<compile_context>
chip_gen: v6e
topology: v6e:2x2x1
jax: 0.10.0
libtpu: 0.0.40
codegen_flags: <defaults>
</compile_context>

<pallas_src>
import jax
import jax.numpy as jnp
from jax import lax
from jax.experimental import pallas as pl
from jax.experimental.pallas import tpu as pltpu


# ----------------------------- Pallas kernels ------------------------------

def _make_conv_kernel(bt):
    """conv1 (5x5, 1->10) + ReLU + maxpool2x2 + conv2 (3x3, 10->20) + ReLU."""
    R = bt * 144  # pooled rows per tile: (b_local, i*12 + j)

    def kernel(ph_ref, w1_ref, b1_ref, w2_ref, b2_ref, o_ref):
        # ph_ref: (bt*576, 25) im2col rows ordered (phase, b_local, pos)
        # w1_ref: (25, 10)  b1_ref: (1, 10)  w2_ref: (90, 20)  b2_ref: (1, 20)
        # o_ref : (bt*144, 20)
        z = jnp.dot(ph_ref[...], w1_ref[...],
                    preferred_element_type=jnp.float32)          # (4R, 10), one MXU dot
        # 2x2 max-pool = max over the 4 stride-2 phases (static row slices).
        pooled = jnp.maximum(jnp.maximum(z[0:R], z[R:2 * R]),
                             jnp.maximum(z[2 * R:3 * R], z[3 * R:4 * R]))
        # bias + ReLU hoisted after the max (bias identical across phases).
        pooled = jnp.maximum(pooled + b1_ref[...], 0.0)           # (R, 10)

        # conv2 im2col in VMEM: tap (p, q) needs row  r + p*12 + q.  Rows are
        # (b_local, i*12+j); for every *valid* output position (i, j < 10) the
        # shifted row stays inside the same sample, and the out-of-range /
        # wrapped rows land on positions that are zeroed inside wf1pad later.
        taps = []
        for p in range(3):
            for q in range(3):
                s = p * 12 + q
                if s == 0:
                    taps.append(pooled)
                else:
                    taps.append(jnp.concatenate([pooled[s:, :], pooled[:s, :]],
                                                axis=0))
        pat2 = jnp.concatenate(taps, axis=1)                      # (R, 90)
        z2 = jnp.dot(pat2, w2_ref[...],
                     preferred_element_type=jnp.float32) + b2_ref[...]
        o_ref[...] = jnp.maximum(z2, 0.0)                         # (R, 20)

    return kernel


def fc_logsoftmax_kernel(x_ref, w1_ref, b1_ref, w2_ref, b2_ref, o_ref):
    # x: (Mt, 2880)  w1: (2880, 500)  b1: (1, 500)  w2: (500, 10)  b2: (1, 10)
    h = jnp.dot(x_ref[...], w1_ref[...], preferred_element_type=jnp.float32)
    h = jnp.maximum(h + b1_ref[...], 0.0)                         # fc1 + ReLU
    logits = jnp.dot(h, w2_ref[...], preferred_element_type=jnp.float32)
    logits = logits + b2_ref[...]                                 # fc2
    m = jnp.max(logits, axis=-1, keepdims=True)                   # log_softmax(dim=1)
    lse = m + jnp.log(jnp.sum(jnp.exp(logits - m), axis=-1, keepdims=True))
    o_ref[...] = logits - lse


# ------------------------------ param prep ----------------------------------

def prepare_params(params):
    """One-time weight re-layout (replaces all per-forward transposes/reshapes)."""
    w1, b1, w2, b2, wf1, bf1, wf2, bf2 = params
    w1m = w1.reshape(10, 25).T                                    # (25, 10), rows (p, q)
    b1m = b1.reshape(1, 10)
    w2m = w2.transpose(2, 3, 1, 0).reshape(90, 20)                # rows ((p*3+q)*10 + ic)
    b2m = b2.reshape(1, 20)
    # fc1 weight: PyTorch flatten order is (c, oi, oj) on the 10x10 conv2 grid.
    # Re-index to the kernel's (pos12, c) order on the padded 12x12 grid, with
    # zero rows at the 44 invalid positions (oi >= 10 or oj >= 10).
    wf1g = wf1.T.reshape(20, 10, 10, 500)                         # (c, oi, oj, n)
    wf1g = jnp.pad(wf1g, ((0, 0), (0, 2), (0, 2), (0, 0)))        # (20, 12, 12, n)
    wf1p = wf1g.transpose(1, 2, 0, 3).reshape(144 * 20, 500)      # row = (oi*12+oj)*20 + c
    bf1m = bf1.reshape(1, 500)
    wf2m = wf2.T                                                  # (500, 10)
    bf2m = bf2.reshape(1, 10)
    return (w1m, b1m, w2m, b2m, wf1p, bf1m, wf2m, bf2m)


# ------------------------------- wrapper ------------------------------------

def convnet_forward(x, prepped):
    """x: (B, 1, 28, 28) float32 (NCHW).  Returns (B, 10) log-probs."""
    w1m, b1m, w2m, b2m, wf1p, bf1m, wf2m, bf2m = prepped
    B = x.shape[0]
    Bt = min(B, 8)                                                # samples per grid step
    Bpad = ((B + Bt - 1) // Bt) * Bt
    nt = Bpad // Bt

    x2 = x[:, 0, :, :]                                            # (B, 28, 28)
    if Bpad != B:
        x2 = jnp.concatenate(
            [x2, jnp.zeros((Bpad - B, 28, 28), x2.dtype)], axis=0)

    # ---- conv1 im2col (XLA glue): 5x5 patches, split into 4 stride-2 phases,
    #      rows ordered (tile, phase, b_local, pos) so the kernel pools with
    #      static row slices and one merged MXU dot.
    patches = jnp.stack([x2[:, p:p + 24, q:q + 24]
                         for p in range(5) for q in range(5)],
                        axis=-1)                                  # (Bpad, 24, 24, 25)
    phases = jnp.stack([patches[:, di::2, dj::2, :]
                        for di in range(2) for dj in range(2)],
                       axis=1)                                    # (Bpad, 4, 12, 12, 25)
    phases = (phases.reshape(nt, Bt, 4, 144, 25)
              .transpose(0, 2, 1, 3, 4)
              .reshape(Bpad * 576, 25))                           # (Bpad*576, 25)

    conv_out = pl.pallas_call(
        _make_conv_kernel(Bt),
        out_shape=jax.ShapeDtypeStruct((Bpad * 144, 20), jnp.float32),
        grid=(nt,),
        in_specs=[pl.BlockSpec((Bt * 576, 25), lambda t: (t, 0)),
                  pl.BlockSpec((25, 10), lambda t: (0, 0)),
                  pl.BlockSpec((1, 10), lambda t: (0, 0)),
                  pl.BlockSpec((90, 20), lambda t: (0, 0)),
                  pl.BlockSpec((1, 20), lambda t: (0, 0))],
        out_specs=pl.BlockSpec((Bt * 144, 20), lambda t: (t, 0)),
        compiler_params=pltpu.CompilerParams(
            dimension_semantics=("parallel",)),
    )(phases, w1m, b1m, w2m, b2m)                                 # (Bpad*144, 20)

    # Row-major reshape only (the NCHW flatten permutation lives in wf1p).
    flat = conv_out.reshape(Bpad, 144 * 20)                       # (Bpad, 2880)

    # ---- fc1 + ReLU + fc2 + log_softmax, batch-tiled, wf1 resident in VMEM.
    if Bpad % 256 == 0:
        Mt = 256
    elif Bpad % 128 == 0:
        Mt = 128
    else:
        Mt = Bt
    K1, N1 = wf1p.shape

    out = pl.pallas_call(
        fc_logsoftmax_kernel,
        out_shape=jax.ShapeDtypeStruct((Bpad, 10), jnp.float32),
        grid=(Bpad // Mt,),
        in_specs=[pl.BlockSpec((Mt, K1), lambda m: (m, 0)),
                  pl.BlockSpec((K1, N1), lambda m: (0, 0)),
                  pl.BlockSpec((1, N1), lambda m: (0, 0)),
                  pl.BlockSpec((N1, 10), lambda m: (0, 0)),
                  pl.BlockSpec((1, 10), lambda m: (0, 0))],
        out_specs=pl.BlockSpec((Mt, 10), lambda m: (m, 0)),
        compiler_params=pltpu.CompilerParams(
            dimension_semantics=("parallel",),
            vmem_limit_bytes=40 * 1024 * 1024),
    )(flat, wf1p, bf1m, wf2m, bf2m)
    return out[:B]


# --------------------------- reference (pure JAX) ---------------------------

def reference_forward(x, params):
    w1, b1, w2, b2, wf1, bf1, wf2, bf2 = params
    dn = ('NCHW', 'OIHW', 'NCHW')
    y = lax.conv_general_dilated(x, w1, (1, 1), 'VALID', dimension_numbers=dn)
    y = jnp.maximum(y + b1[None, :, None, None], 0.0)
    y = lax.reduce_window(y, -jnp.inf, lax.max, (1, 1, 2, 2), (1, 1, 2, 2), 'VALID')
    y = lax.conv_general_dilated(y, w2, (1, 1), 'VALID', dimension_numbers=dn)
    y = jnp.maximum(y + b2[None, :, None, None], 0.0)
    y = y.reshape(x.shape[0], -1)
    y = jnp.maximum(y @ wf1.T + bf1, 0.0)
    y = y @ wf2.T + bf2
    return jax.nn.log_softmax(y, axis=1)


# --------------------------------- main --------------------------------------

def init_params(key):
    ks = jax.random.split(key, 8)
    w1 = 0.10 * jax.random.normal(ks[0], (10, 1, 5, 5), jnp.float32)
    b1 = 0.10 * jax.random.normal(ks[1], (10,), jnp.float32)
    w2 = 0.05 * jax.random.normal(ks[2], (20, 10, 3, 3), jnp.float32)
    b2 = 0.05 * jax.random.normal(ks[3], (20,), jnp.float32)
    wf1 = 0.01 * jax.random.normal(ks[4], (500, 2000), jnp.float32)
    bf1 = 0.01 * jax.random.normal(ks[5], (500,), jnp.float32)
    wf2 = 0.05 * jax.random.normal(ks[6], (10, 500), jnp.float32)
    bf2 = 0.05 * jax.random.normal(ks[7], (10,), jnp.float32)
    return (w1, b1, w2, b2, wf1, bf1, wf2, bf2)


if __name__ == "__main__":
    key = jax.random.PRNGKey(0)
    kx, kp = jax.random.split(key)
    # fc1 (20*10*10 -> 500) pins the input to (B, 1, 28, 28); use a small batch.
    x = jax.random.normal(kx, (2, 1, 28, 28), jnp.float32)
    params = init_params(kp)
    prepped = prepare_params(params)                # one-time weight re-layout

    out = jax.block_until_ready(jax.jit(convnet_forward)(x, prepped))
    ref = jax.block_until_ready(reference_forward(x, params))

    assert out.shape == (2, 10)
    assert bool(jnp.all(jnp.isfinite(out)))
    assert bool(jnp.allclose(out, ref, atol=2e-3, rtol=2e-3)), "mismatch vs reference"
    print("KERNEL_OK")
</pallas_src>

<mosaic_0001>
module attributes {stable_mosaic.version = 11 : i64} {
  func.func @kernel(%arg0: i32, %arg1: memref<1152x25xf32, #tpu.memory_space<vmem>>, %arg2: memref<25x10xf32, #tpu.memory_space<vmem>>, %arg3: memref<1x10xf32, #tpu.memory_space<vmem>>, %arg4: memref<90x20xf32, #tpu.memory_space<vmem>>, %arg5: memref<1x20xf32, #tpu.memory_space<vmem>>, %arg6: memref<288x20xf32, #tpu.memory_space<vmem>>) attributes {dimension_semantics = [#tpu.dimension_semantics<parallel>], iteration_bounds = array<i64: 1>, scalar_prefetch = 0 : i64, scratch_operands = 0 : i64, tpu.core_type = #tpu.core_type<tc>, window_params = [{transform_indices = @transform_0, window_bounds = array<i64: 1152, 25>}, {pipeline_mode = #tpu.pipeline_mode<synchronous>, transform_indices = @transform_1, window_bounds = array<i64: 25, 10>}, {pipeline_mode = #tpu.pipeline_mode<synchronous>, transform_indices = @transform_2, window_bounds = array<i64: 1, 10>}, {pipeline_mode = #tpu.pipeline_mode<synchronous>, transform_indices = @transform_3, window_bounds = array<i64: 90, 20>}, {pipeline_mode = #tpu.pipeline_mode<synchronous>, transform_indices = @transform_4, window_bounds = array<i64: 1, 20>}, {transform_indices = @transform_5, window_bounds = array<i64: 288, 20>}]} {
    %c0 = arith.constant 0 : index
    %c0_0 = arith.constant 0 : index
    %0 = vector.load %arg1[%c0, %c0_0] : memref<1152x25xf32, #tpu.memory_space<vmem>>, vector<1152x25xf32>
    %c0_1 = arith.constant 0 : index
    %c0_2 = arith.constant 0 : index
    %1 = vector.load %arg2[%c0_1, %c0_2] : memref<25x10xf32, #tpu.memory_space<vmem>>, vector<25x10xf32>
    %cst = arith.constant dense<0.000000e+00> : vector<1152x10xf32>
    %2 = tpu.matmul %0, %1, %cst {dimension_numbers = #tpu.dot_dimension_numbers<[1], [0], [0], [1], [0, 0, 1, 1], [], []>} : vector<1152x25xf32>, vector<25x10xf32>, vector<1152x10xf32> -> vector<1152x10xf32>
    %3 = vector.extract_strided_slice %2 {offsets = [0, 0], sizes = [288, 10], strides = [1, 1]} : vector<1152x10xf32> to vector<288x10xf32>
    %4 = vector.extract_strided_slice %2 {offsets = [288, 0], sizes = [288, 10], strides = [1, 1]} : vector<1152x10xf32> to vector<288x10xf32>
    %5 = arith.maximumf %3, %4 : vector<288x10xf32>
    %6 = vector.extract_strided_slice %2 {offsets = [576, 0], sizes = [288, 10], strides = [1, 1]} : vector<1152x10xf32> to vector<288x10xf32>
    %7 = vector.extract_strided_slice %2 {offsets = [864, 0], sizes = [288, 10], strides = [1, 1]} : vector<1152x10xf32> to vector<288x10xf32>
    %8 = arith.maximumf %6, %7 : vector<288x10xf32>
    %9 = arith.maximumf %5, %8 : vector<288x10xf32>
    %c0_3 = arith.constant 0 : index
    %c0_4 = arith.constant 0 : index
    %10 = vector.load %arg3[%c0_3, %c0_4] : memref<1x10xf32, #tpu.memory_space<vmem>>, vector<1x10xf32>
    %11 = vector.broadcast %10 : vector<1x10xf32> to vector<288x10xf32>
    %12 = arith.addf %9, %11 : vector<288x10xf32>
    %cst_5 = arith.constant 0.000000e+00 : f32
    %13 = vector.broadcast %cst_5 : f32 to vector<288x10xf32>
    %14 = arith.maximumf %12, %13 : vector<288x10xf32>
    %15 = vector.extract_strided_slice %14 {offsets = [1, 0], sizes = [287, 10], strides = [1, 1]} : vector<288x10xf32> to vector<287x10xf32>
    %16 = vector.extract_strided_slice %14 {offsets = [0, 0], sizes = [1, 10], strides = [1, 1]} : vector<288x10xf32> to vector<1x10xf32>
    %17 = tpu.concatenate %15, %16 in 0 : vector<287x10xf32>, vector<1x10xf32> -> vector<288x10xf32>
    %18 = vector.extract_strided_slice %14 {offsets = [2, 0], sizes = [286, 10], strides = [1, 1]} : vector<288x10xf32> to vector<286x10xf32>
    %19 = vector.extract_strided_slice %14 {offsets = [0, 0], sizes = [2, 10], strides = [1, 1]} : vector<288x10xf32> to vector<2x10xf32>
    %20 = tpu.concatenate %18, %19 in 0 : vector<286x10xf32>, vector<2x10xf32> -> vector<288x10xf32>
    %21 = vector.extract_strided_slice %14 {offsets = [12, 0], sizes = [276, 10], strides = [1, 1]} : vector<288x10xf32> to vector<276x10xf32>
    %22 = vector.extract_strided_slice %14 {offsets = [0, 0], sizes = [12, 10], strides = [1, 1]} : vector<288x10xf32> to vector<12x10xf32>
    %23 = tpu.concatenate %21, %22 in 0 : vector<276x10xf32>, vector<12x10xf32> -> vector<288x10xf32>
    %24 = vector.extract_strided_slice %14 {offsets = [13, 0], sizes = [275, 10], strides = [1, 1]} : vector<288x10xf32> to vector<275x10xf32>
    %25 = vector.extract_strided_slice %14 {offsets = [0, 0], sizes = [13, 10], strides = [1, 1]} : vector<288x10xf32> to vector<13x10xf32>
    %26 = tpu.concatenate %24, %25 in 0 : vector<275x10xf32>, vector<13x10xf32> -> vector<288x10xf32>
    %27 = vector.extract_strided_slice %14 {offsets = [14, 0], sizes = [274, 10], strides = [1, 1]} : vector<288x10xf32> to vector<274x10xf32>
    %28 = vector.extract_strided_slice %14 {offsets = [0, 0], sizes = [14, 10], strides = [1, 1]} : vector<288x10xf32> to vector<14x10xf32>
    %29 = tpu.concatenate %27, %28 in 0 : vector<274x10xf32>, vector<14x10xf32> -> vector<288x10xf32>
    %30 = vector.extract_strided_slice %14 {offsets = [24, 0], sizes = [264, 10], strides = [1, 1]} : vector<288x10xf32> to vector<264x10xf32>
    %31 = vector.extract_strided_slice %14 {offsets = [0, 0], sizes = [24, 10], strides = [1, 1]} : vector<288x10xf32> to vector<24x10xf32>
    %32 = tpu.concatenate %30, %31 in 0 : vector<264x10xf32>, vector<24x10xf32> -> vector<288x10xf32>
    %33 = vector.extract_strided_slice %14 {offsets = [25, 0], sizes = [263, 10], strides = [1, 1]} : vector<288x10xf32> to vector<263x10xf32>
    %34 = vector.extract_strided_slice %14 {offsets = [0, 0], sizes = [25, 10], strides = [1, 1]} : vector<288x10xf32> to vector<25x10xf32>
    %35 = tpu.concatenate %33, %34 in 0 : vector<263x10xf32>, vector<25x10xf32> -> vector<288x10xf32>
    %36 = vector.extract_strided_slice %14 {offsets = [26, 0], sizes = [262, 10], strides = [1, 1]} : vector<288x10xf32> to vector<262x10xf32>
    %37 = vector.extract_strided_slice %14 {offsets = [0, 0], sizes = [26, 10], strides = [1, 1]} : vector<288x10xf32> to vector<26x10xf32>
    %38 = tpu.concatenate %36, %37 in 0 : vector<262x10xf32>, vector<26x10xf32> -> vector<288x10xf32>
    %39 = tpu.concatenate %14, %17, %20, %23, %26, %29, %32, %35, %38 in 1 : vector<288x10xf32>, vector<288x10xf32>, vector<288x10xf32>, vector<288x10xf32>, vector<288x10xf32>, vector<288x10xf32>, vector<288x10xf32>, vector<288x10xf32>, vector<288x10xf32> -> vector<288x90xf32>
    %c0_6 = arith.constant 0 : index
    %c0_7 = arith.constant 0 : index
    %40 = vector.load %arg4[%c0_6, %c0_7] : memref<90x20xf32, #tpu.memory_space<vmem>>, vector<90x20xf32>
    %cst_8 = arith.constant dense<0.000000e+00> : vector<288x20xf32>
    %41 = tpu.matmul %39, %40, %cst_8 {dimension_numbers = #tpu.dot_dimension_numbers<[1], [0], [0], [1], [0, 0, 1, 1], [], []>} : vector<288x90xf32>, vector<90x20xf32>, vector<288x20xf32> -> vector<288x20xf32>
    %c0_9 = arith.constant 0 : index
    %c0_10 = arith.constant 0 : index
    %42 = vector.load %arg5[%c0_9, %c0_10] : memref<1x20xf32, #tpu.memory_space<vmem>>, vector<1x20xf32>
    %43 = vector.broadcast %42 : vector<1x20xf32> to vector<288x20xf32>
    %44 = arith.addf %41, %43 : vector<288x20xf32>
    %cst_11 = arith.constant 0.000000e+00 : f32
    %45 = vector.broadcast %cst_11 : f32 to vector<288x20xf32>
    %46 = arith.maximumf %44, %45 : vector<288x20xf32>
    %c0_12 = arith.constant 0 : index
    %c0_13 = arith.constant 0 : index
    %47 = vector.load %arg6[%c0_12, %c0_13] : memref<288x20xf32, #tpu.memory_space<vmem>>, vector<288x20xf32>
    tpu.vector_store %arg6[%c0_12, %c0_13], %46 {strides = array<i32>} : memref<288x20xf32, #tpu.memory_space<vmem>>, vector<288x20xf32>,
    return
  }
  func.func @transform_0(%arg0: i32) -> (i32, i32) {
    %c0_i32 = arith.constant 0 : i32
    %c0_i32_0 = arith.constant 0 : i32
    return %arg0, %c0_i32 : i32, i32
  }
  func.func @transform_1(%arg0: i32) -> (i32, i32) {
    %c0_i32 = arith.constant 0 : i32
    %c0_i32_0 = arith.constant 0 : i32
    %c0_i32_1 = arith.constant 0 : i32
    return %c0_i32, %c0_i32_0 : i32, i32
  }
  func.func @transform_2(%arg0: i32) -> (i32, i32) {
    %c0_i32 = arith.constant 0 : i32
    %c0_i32_0 = arith.constant 0 : i32
    %c0_i32_1 = arith.constant 0 : i32
    return %c0_i32, %c0_i32_0 : i32, i32
  }
  func.func @transform_3(%arg0: i32) -> (i32, i32) {
    %c0_i32 = arith.constant 0 : i32
    %c0_i32_0 = arith.constant 0 : i32
    %c0_i32_1 = arith.constant 0 : i32
    return %c0_i32, %c0_i32_0 : i32, i32
  }
  func.func @transform_4(%arg0: i32) -> (i32, i32) {
    %c0_i32 = arith.constant 0 : i32
    %c0_i32_0 = arith.constant 0 : i32
    %c0_i32_1 = arith.constant 0 : i32
    return %c0_i32, %c0_i32_0 : i32, i32
  }
  func.func @transform_5(%arg0: i32) -> (i32, i32) {
    %c0_i32 = arith.constant 0 : i32
    %c0_i32_0 = arith.constant 0 : i32
    return %arg0, %c0_i32 : i32, i32
  }
}

module attributes {stable_mosaic.version = 11 : i64} {
  func.func @fc_logsoftmax_kernel(%arg0: i32, %arg1: memref<2x2880xf32, #tpu.memory_space<vmem>>, %arg2: memref<2880x500xf32, #tpu.memory_space<vmem>>, %arg3: memref<1x500xf32, #tpu.memory_space<vmem>>, %arg4: memref<500x10xf32, #tpu.memory_space<vmem>>, %arg5: memref<1x10xf32, #tpu.memory_space<vmem>>, %arg6: memref<2x10xf32, #tpu.memory_space<vmem>>) attributes {dimension_semantics = [#tpu.dimension_semantics<parallel>], iteration_bounds = array<i64: 1>, scalar_prefetch = 0 : i64, scratch_operands = 0 : i64, tpu.core_type = #tpu.core_type<tc>, window_params = [{transform_indices = @transform_0, window_bounds = array<i64: 2, 2880>}, {pipeline_mode = #tpu.pipeline_mode<synchronous>, transform_indices = @transform_1, window_bounds = array<i64: 2880, 500>}, {pipeline_mode = #tpu.pipeline_mode<synchronous>, transform_indices = @transform_2, window_bounds = array<i64: 1, 500>}, {pipeline_mode = #tpu.pipeline_mode<synchronous>, transform_indices = @transform_3, window_bounds = array<i64: 500, 10>}, {pipeline_mode = #tpu.pipeline_mode<synchronous>, transform_indices = @transform_4, window_bounds = array<i64: 1, 10>}, {transform_indices = @transform_5, window_bounds = array<i64: 2, 10>}]} {
    %c0 = arith.constant 0 : index
    %c0_0 = arith.constant 0 : index
    %0 = vector.load %arg1[%c0, %c0_0] : memref<2x2880xf32, #tpu.memory_space<vmem>>, vector<2x2880xf32>
    %c0_1 = arith.constant 0 : index
    %c0_2 = arith.constant 0 : index
    %1 = vector.load %arg2[%c0_1, %c0_2] : memref<2880x500xf32, #tpu.memory_space<vmem>>, vector<2880x500xf32>
    %cst = arith.constant dense<0.000000e+00> : vector<2x500xf32>
    %2 = tpu.matmul %0, %1, %cst {dimension_numbers = #tpu.dot_dimension_numbers<[1], [0], [0], [1], [0, 0, 1, 1], [], []>} : vector<2x2880xf32>, vector<2880x500xf32>, vector<2x500xf32> -> vector<2x500xf32>
    %c0_3 = arith.constant 0 : index
    %c0_4 = arith.constant 0 : index
    %3 = vector.load %arg3[%c0_3, %c0_4] : memref<1x500xf32, #tpu.memory_space<vmem>>, vector<1x500xf32>
    %4 = vector.broadcast %3 : vector<1x500xf32> to vector<2x500xf32>
    %5 = arith.addf %2, %4 : vector<2x500xf32>
    %cst_5 = arith.constant 0.000000e+00 : f32
    %6 = vector.broadcast %cst_5 : f32 to vector<2x500xf32>
    %7 = arith.maximumf %5, %6 : vector<2x500xf32>
    %c0_6 = arith.constant 0 : index
    %c0_7 = arith.constant 0 : index
    %8 = vector.load %arg4[%c0_6, %c0_7] : memref<500x10xf32, #tpu.memory_space<vmem>>, vector<500x10xf32>
    %cst_8 = arith.constant dense<0.000000e+00> : vector<2x10xf32>
    %9 = tpu.matmul %7, %8, %cst_8 {dimension_numbers = #tpu.dot_dimension_numbers<[1], [0], [0], [1], [0, 0, 1, 1], [], []>} : vector<2x500xf32>, vector<500x10xf32>, vector<2x10xf32> -> vector<2x10xf32>
    %c0_9 = arith.constant 0 : index
    %c0_10 = arith.constant 0 : index
    %10 = vector.load %arg5[%c0_9, %c0_10] : memref<1x10xf32, #tpu.memory_space<vmem>>, vector<1x10xf32>
    %11 = vector.broadcast %10 : vector<1x10xf32> to vector<2x10xf32>
    %12 = arith.addf %9, %11 : vector<2x10xf32>
    %cst_11 = arith.constant dense<0xFF800000> : vector<2xf32>
    %13 = vector.multi_reduction <maximumf>, %12, %cst_11 [1] : vector<2x10xf32> to vector<2xf32>
    %14 = vector.shape_cast %13 : vector<2xf32> to vector<2x1xf32>
    %15 = vector.broadcast %14 : vector<2x1xf32> to vector<2x10xf32>
    %16 = arith.subf %12, %15 : vector<2x10xf32>
    %17 = math.exp %16 : vector<2x10xf32>
    %cst_12 = arith.constant dense<0.000000e+00> : vector<2xf32>
    %18 = vector.multi_reduction <add>, %17, %cst_12 [1] : vector<2x10xf32> to vector<2xf32>
    %19 = vector.shape_cast %18 : vector<2xf32> to vector<2x1xf32>
    %20 = math.log %19 : vector<2x1xf32>
    %21 = arith.addf %14, %20 : vector<2x1xf32>
    %22 = vector.broadcast %21 : vector<2x1xf32> to vector<2x10xf32>
    %23 = arith.subf %12, %22 : vector<2x10xf32>
    %c0_13 = arith.constant 0 : index
    %c0_14 = arith.constant 0 : index
    %24 = vector.load %arg6[%c0_13, %c0_14] : memref<2x10xf32, #tpu.memory_space<vmem>>, vector<2x10xf32>
    tpu.vector_store %arg6[%c0_13, %c0_14], %23 {strides = array<i32>} : memref<2x10xf32, #tpu.memory_space<vmem>>, vector<2x10xf32>,
    return
  }
  func.func @transform_0(%arg0: i32) -> (i32, i32) {
    %c0_i32 = arith.constant 0 : i32
    %c0_i32_0 = arith.constant 0 : i32
    return %arg0, %c0_i32 : i32, i32
  }
  func.func @transform_1(%arg0: i32) -> (i32, i32) {
    %c0_i32 = arith.constant 0 : i32
    %c0_i32_0 = arith.constant 0 : i32
    %c0_i32_1 = arith.constant 0 : i32
    return %c0_i32, %c0_i32_0 : i32, i32
  }
  func.func @transform_2(%arg0: i32) -> (i32, i32) {
    %c0_i32 = arith.constant 0 : i32
    %c0_i32_0 = arith.constant 0 : i32
    %c0_i32_1 = arith.constant 0 : i32
    return %c0_i32, %c0_i32_0 : i32, i32
  }
  func.func @transform_3(%arg0: i32) -> (i32, i32) {
    %c0_i32 = arith.constant 0 : i32
    %c0_i32_0 = arith.constant 0 : i32
    %c0_i32_1 = arith.constant 0 : i32
    return %c0_i32, %c0_i32_0 : i32, i32
  }
  func.func @transform_4(%arg0: i32) -> (i32, i32) {
    %c0_i32 = arith.constant 0 : i32
    %c0_i32_0 = arith.constant 0 : i32
    %c0_i32_1 = arith.constant 0 : i32
    return %c0_i32, %c0_i32_0 : i32, i32
  }
  func.func @transform_5(%arg0: i32) -> (i32, i32) {
    %c0_i32 = arith.constant 0 : i32
    %c0_i32_0 = arith.constant 0 : i32
    return %arg0, %c0_i32 : i32, i32
  }
}

</mosaic_0001>

<bundles_post_ra>
// kernel: convnet_forward.2
= control target key start
LH: loop header
LB: loop body
LE: loop exit
PB: predicated region body
PF: predicated region fallthrough
CT: control target
= control target key end

     0   :  { %vm601_vm0 = vcmask 1040384   ;;  %vm168_vm1 = vcmask 203776   ;;  %s4305_s29 = smov 60   ;;  %vm1613_vm2 = vcmask 1046528   ;;  %vm1763_vm3 = vcmask 1043456   ;;  %s4306_s30 = smov 10   ;;  %s7384_s1 = inlined_call_operand.vmem [shape: f32[25,10], index: 1, kind: input, shape index: {}]   ;;  %s7385_s0 = inlined_call_operand.vmem [shape: f32[1152,25], index: 0, kind: input, shape index: {}]   ;;  %s7386_s2 = inlined_call_operand.vmem [shape: f32[1,10], index: 2, kind: input, shape index: {}]   ;;  %s7387_s3 = inlined_call_operand.vmem [shape: f32[90,20], index: 3, kind: input, shape index: {}]   ;;  %s7388_s4 = inlined_call_operand.vmem [shape: f32[1,20], index: 4, kind: input, shape index: {}]   ;;  %s7389_s5 = inlined_call_operand.vmem [shape: f32[288,20], index: 5, kind: output, shape index: {}]  }
   0x1   :  { %v167_v0 = vld [vmem:[%s7384_s1 + $0x18] sm:$0x1]  ;;  %v166_v1 = vld [vmem:[%s7384_s1 + $0x10] sm:$0xff]  ;;  %v165_v2 = vld [vmem:[%s7384_s1 + $0x8] sm:$0xff]  ;;  %s4307_s6 = smov 30   ;;  %vm1688_vm4 = vcmask 1045504  }
   0x2   :  { %3985 = vmatprep.subr.msk.mxu0 %vm601_vm0, %v167_v0  ;;  %4287 = vmatprep.subr.msk.mxu1 %vm601_vm0, %v167_v0  ;;  %v164_v3 = vld [vmem:[%s7384_s1] sm:$0xff]  ;;  %v110_v5 = vld [vmem:[%s7385_s0 + $0x2d0] sm:$0xff]  ;;  %v21_v6 = vld [vmem:[%s7385_s0 + $0x8] sm:$0xff]  ;;  %vm1913_vm5 = vcmask 1041408   ;;  %s4308_s1 = smov 20   ;;  %s4309_s7 = smov 50  }
   0x3   :  { %3986 = vmatpush3.msk.msra.mxu0 %vm601_vm0, %v167_v0  ;;  %4291 = vmatpush3.msk.msra.mxu1 %vm601_vm0, %v167_v0  ;;  %v20_v4 = vld [vmem:[%s7385_s0] sm:$0xff]  ;;  %v111_v7 = vld [vmem:[%s7385_s0 + $0x2d8] sm:$0xff]  ;;  %v22_v8 = vld [vmem:[%s7385_s0 + $0x10] sm:$0xff]  ;;  %s4310_s8 = smov 70   ;;  %vm1838_vm6 = vcmask 1042432   ;;  %s4311_s9 = smov 40  }
   0x4   :  { %3987 = vmatprep.subr.mxu0 %v166_v1  ;;  %4288 = vmatprep.subr.mxu1 %v166_v1  ;;  %v112_v9 = vld [vmem:[%s7385_s0 + $0x2e0] sm:$0xff]  ;;  %v23_v10 = vld [vmem:[%s7385_s0 + $0x18] sm:$0xff]  ;;  %v113_v11 = vld [vmem:[%s7385_s0 + $0x2e8] sm:$0xff]  ;;  %s4312_s10 = smov 80   ;;  %vm2857_vm7 = vcmask 80896   ;;  %vm2894_vm8 = vcmask 162816  }
   0x5   :  { %3988 = vmatpush3.msra.mxu0 %v166_v1  ;;  %4292 = vmatpush3.msra.mxu1 %v166_v1  ;;  %v24_v12 = vld [vmem:[%s7385_s0 + $0x20] sm:$0xff]  ;;  %v114_v13 = vld [vmem:[%s7385_s0 + $0x2f0] sm:$0xff]  ;;  %v25_v14 = vld [vmem:[%s7385_s0 + $0x28] sm:$0xff]  ;;  %vm2931_vm9 = vcmask 244736   ;;  %vm3005_vm10 = vcmask 408576   ;;  %vm2968_vm11 = vcmask 326656  }
   0x6   :  { %3989 = vmatprep.subr.mxu0 %v165_v2  ;;  %4289 = vmatprep.subr.mxu1 %v165_v2  ;;  %v115_v15 = vld [vmem:[%s7385_s0 + $0x2f8] sm:$0xff]  ;;  %v26_v16 = vld [vmem:[%s7385_s0 + $0x30] sm:$0xff]  ;;  %v116_v17 = vld [vmem:[%s7385_s0 + $0x300] sm:$0xff]  ;;  %vm3042_vm12 = vcmask 490496   ;;  %vm3079_vm13 = vcmask 572416   ;;  %vm3116_vm14 = vcmask 654336  }
   0x7   :  { %3990 = vmatpush3.msra.mxu0 %v165_v2  ;;  %4293 = vmatpush3.msra.mxu1 %v165_v2  ;;  %v27_v18 = vld [vmem:[%s7385_s0 + $0x38] sm:$0xff]  ;;  %v117_v19 = vld [vmem:[%s7385_s0 + $0x308] sm:$0xff]  ;;  %v28_v20 = vld [vmem:[%s7385_s0 + $0x40] sm:$0xff]  ;;  %vm3172_vm15 = vcmask 736256  }
   0x8   :  { %3991 = vmatprep.subr.mxu0 %v164_v3  ;;  %4290 = vmatprep.subr.mxu1 %v164_v3  ;;  %v118_v21 = vld [vmem:[%s7385_s0 + $0x310] sm:$0xff]  ;;  %v29_v22 = vld [vmem:[%s7385_s0 + $0x48] sm:$0xff]  ;;  %v119_v23 = vld [vmem:[%s7385_s0 + $0x318] sm:$0xff] }
   0x9   :  { %3992 = vmatpush3.msra.mxu0 %v164_v3  ;;  %4294 = vmatpush3.msra.mxu1 %v164_v3  ;;  %v30_v24 = vld [vmem:[%s7385_s0 + $0x50] sm:$0xff]  ;;  %v120_v25 = vld [vmem:[%s7385_s0 + $0x320] sm:$0xff]  ;;  %v31_v26 = vld [vmem:[%s7385_s0 + $0x58] sm:$0xff] }
   0xa   :  { %3993 = vmatprep.mubr.msk.f32.mxu0 %vm168_vm1, %v20_v4  ;;  %4128 = vmatprep.mubr.msk.f32.mxu1 %vm168_vm1, %v110_v5  ;;  %v121_v27 = vld [vmem:[%s7385_s0 + $0x328] sm:$0xff]  ;;  %v32_v28 = vld [vmem:[%s7385_s0 + $0x60] sm:$0xff]  ;;  %v122_v29 = vld [vmem:[%s7385_s0 + $0x330] sm:$0xff] }
   0xb   :  { %3994 = vmatmul.mubr.msk.f32.vlgmr.msra.gmra.mxu0 %vm168_vm1, %v21_v6  ;;  %4129 = vmatmul.mubr.msk.f32.vlgmr.msra.gmra.mxu1 %vm168_vm1, %v111_v7  ;;  %v33_v30 = vld [vmem:[%s7385_s0 + $0x68] sm:$0xff]  ;;  %v123_v31 = vld [vmem:[%s7385_s0 + $0x338] sm:$0xff]  ;;  %v34_v32 = vld [vmem:[%s7385_s0 + $0x70] sm:$0xff] }
   0xc   :  { %3996 = vmatprep.mubr.msk.f32.mxu0 %vm168_vm1, %v22_v8  ;;  %4131 = vmatprep.mubr.msk.f32.mxu1 %vm168_vm1, %v112_v9  ;;  %v124_v33 = vld [vmem:[%s7385_s0 + $0x340] sm:$0xff]  ;;  %v35_v34 = vld [vmem:[%s7385_s0 + $0x78] sm:$0xff]  ;;  %v125_v35 = vld [vmem:[%s7385_s0 + $0x348] sm:$0xff] }
   0xd   :  { %v36_v36 = vld [vmem:[%s7385_s0 + $0x80] sm:$0xff]  ;;  %v126_v37 = vld [vmem:[%s7385_s0 + $0x350] sm:$0xff]  ;;  %v37_v38 = vld [vmem:[%s7385_s0 + $0x88] sm:$0xff] }
   0xe   :  { %v127_v39 = vld [vmem:[%s7385_s0 + $0x358] sm:$0xff]  ;;  %v38_v40 = vld [vmem:[%s7385_s0 + $0x90] sm:$0xff]  ;;  %v128_v41 = vld [vmem:[%s7385_s0 + $0x360] sm:$0xff] }
   0xf   :  { %3997 = vmatmul.mubr.msk.f32.gmra.mxu0 %vm168_vm1, %v23_v10  ;;  %4132 = vmatmul.mubr.msk.f32.gmra.mxu1 %vm168_vm1, %v113_v11  ;;  %v39_v42 = vld [vmem:[%s7385_s0 + $0x98] sm:$0xff]  ;;  %v129_v43 = vld [vmem:[%s7385_s0 + $0x368] sm:$0xff]  ;;  %v40_v44 = vld [vmem:[%s7385_s0 + $0xa0] sm:$0xff] }
  0x10   :  { %3999 = vmatprep.mubr.msk.f32.mxu0 %vm168_vm1, %v24_v12  ;;  %4134 = vmatprep.mubr.msk.f32.mxu1 %vm168_vm1, %v114_v13  ;;  %v130_v45 = vld [vmem:[%s7385_s0 + $0x370] sm:$0xff]  ;;  %v41_v46 = vld [vmem:[%s7385_s0 + $0xa8] sm:$0xff]  ;;  %v131_v47 = vld [vmem:[%s7385_s0 + $0x378] sm:$0xff] }
  0x11   :  { %v42_v48 = vld [vmem:[%s7385_s0 + $0xb0] sm:$0xff]  ;;  %v132_v49 = vld [vmem:[%s7385_s0 + $0x380] sm:$0xff]  ;;  %v43_v50 = vld [vmem:[%s7385_s0 + $0xb8] sm:$0xff] }
  0x12   :  { %v133_v51 = vld [vmem:[%s7385_s0 + $0x388] sm:$0xff]  ;;  %v44_v52 = vld [vmem:[%s7385_s0 + $0xc0] sm:$0xff]  ;;  %v134_v53 = vld [vmem:[%s7385_s0 + $0x390] sm:$0xff] }
  0x13   :  { %4000 = vmatmul.mubr.msk.f32.gmra.mxu0 %vm168_vm1, %v25_v14  ;;  %4135 = vmatmul.mubr.msk.f32.gmra.mxu1 %vm168_vm1, %v115_v15  ;;  %v45_v54 = vld [vmem:[%s7385_s0 + $0xc8] sm:$0xff]  ;;  %v135_v55 = vld [vmem:[%s7385_s0 + $0x398] sm:$0xff]  ;;  %v46_v56 = vld [vmem:[%s7385_s0 + $0xd0] sm:$0xff] }
  0x14   :  { %4002 = vmatprep.mubr.msk.f32.mxu0 %vm168_vm1, %v26_v16  ;;  %4137 = vmatprep.mubr.msk.f32.mxu1 %vm168_vm1, %v116_v17  ;;  %v136_v57 = vld [vmem:[%s7385_s0 + $0x3a0] sm:$0xff]  ;;  %v47_v58 = vld [vmem:[%s7385_s0 + $0xd8] sm:$0xff]  ;;  %v137_v59 = vld [vmem:[%s7385_s0 + $0x3a8] sm:$0xff] }
  0x15   :  { %v48_v60 = vld [vmem:[%s7385_s0 + $0xe0] sm:$0xff]  ;;  %v138_v61 = vld [vmem:[%s7385_s0 + $0x3b0] sm:$0xff]  ;;  %v49_v62 = vld [vmem:[%s7385_s0 + $0xe8] sm:$0xff] }
  0x16   :  { %v139_v63 = vld [vmem:[%s7385_s0 + $0x3b8] sm:$0xff]  ;;  %v50_v0 = vld [vmem:[%s7385_s0 + $0xf0] sm:$0xff]  ;;  %v140_v1 = vld [vmem:[%s7385_s0 + $0x3c0] sm:$0xff] }
  0x17   :  { %4003 = vmatmul.mubr.msk.f32.gmra.mxu0 %vm168_vm1, %v27_v18  ;;  %4138 = vmatmul.mubr.msk.f32.gmra.mxu1 %vm168_vm1, %v117_v19  ;;  %v51_v2 = vld [vmem:[%s7385_s0 + $0xf8] sm:$0xff]  ;;  %v141_v3 = vld [vmem:[%s7385_s0 + $0x3c8] sm:$0xff]  ;;  %v52_v4 = vld [vmem:[%s7385_s0 + $0x100] sm:$0xff] }
  0x18   :  { %4005 = vmatprep.mubr.msk.f32.mxu0 %vm168_vm1, %v28_v20  ;;  %4140 = vmatprep.mubr.msk.f32.mxu1 %vm168_vm1, %v118_v21  ;;  %v142_v5 = vld [vmem:[%s7385_s0 + $0x3d0] sm:$0xff]  ;;  %v53_v6 = vld [vmem:[%s7385_s0 + $0x108] sm:$0xff]  ;;  %v143_v7 = vld [vmem:[%s7385_s0 + $0x3d8] sm:$0xff] }
  0x19   :  { %v54_v8 = vld [vmem:[%s7385_s0 + $0x110] sm:$0xff]  ;;  %v144_v9 = vld [vmem:[%s7385_s0 + $0x3e0] sm:$0xff]  ;;  %v55_v10 = vld [vmem:[%s7385_s0 + $0x118] sm:$0xff] }
  0x1a   :  { %v145_v11 = vld [vmem:[%s7385_s0 + $0x3e8] sm:$0xff]  ;;  %v56_v12 = vld [vmem:[%s7385_s0 + $0x120] sm:$0xff]  ;;  %v146_v13 = vld [vmem:[%s7385_s0 + $0x3f0] sm:$0xff] }
  0x1b   :  { %4006 = vmatmul.mubr.msk.f32.gmra.mxu0 %vm168_vm1, %v29_v22  ;;  %4141 = vmatmul.mubr.msk.f32.gmra.mxu1 %vm168_vm1, %v119_v23  ;;  %v57_v14 = vld [vmem:[%s7385_s0 + $0x128] sm:$0xff]  ;;  %v147_v15 = vld [vmem:[%s7385_s0 + $0x3f8] sm:$0xff]  ;;  %v58_v16 = vld [vmem:[%s7385_s0 + $0x130] sm:$0xff] }
  0x1c   :  { %4008 = vmatprep.mubr.msk.f32.mxu0 %vm168_vm1, %v30_v24  ;;  %4143 = vmatprep.mubr.msk.f32.mxu1 %vm168_vm1, %v120_v25  ;;  %v148_v17 = vld [vmem:[%s7385_s0 + $0x400] sm:$0xff]  ;;  %v59_v18 = vld [vmem:[%s7385_s0 + $0x138] sm:$0xff]  ;;  %v149_v19 = vld [vmem:[%s7385_s0 + $0x408] sm:$0xff] }
  0x1d   :  { %v60_v20 = vld [vmem:[%s7385_s0 + $0x140] sm:$0xff]  ;;  %v150_v21 = vld [vmem:[%s7385_s0 + $0x410] sm:$0xff]  ;;  %v61_v22 = vld [vmem:[%s7385_s0 + $0x148] sm:$0xff] }
  0x1e   :  { %v151_v23 = vld [vmem:[%s7385_s0 + $0x418] sm:$0xff]  ;;  %v62_v24 = vld [vmem:[%s7385_s0 + $0x150] sm:$0xff]  ;;  %v152_v25 = vld [vmem:[%s7385_s0 + $0x420] sm:$0xff] }
  0x1f   :  { %4009 = vmatmul.mubr.msk.f32.gmra.mxu0 %vm168_vm1, %v31_v26  ;;  %4144 = vmatmul.mubr.msk.f32.gmra.mxu1 %vm168_vm1, %v121_v27  ;;  %v63_v26 = vld [vmem:[%s7385_s0 + $0x158] sm:$0xff]  ;;  %v153_v27 = vld [vmem:[%s7385_s0 + $0x428] sm:$0xff] }
  0x20   :  { %4011 = vmatprep.mubr.msk.f32.mxu0 %vm168_vm1, %v32_v28  ;;  %4146 = vmatprep.mubr.msk.f32.mxu1 %vm168_vm1, %v122_v29  ;;  %v64_v28 = vld [vmem:[%s7385_s0 + $0x160] sm:$0xff]  ;;  %v154_v29 = vld [vmem:[%s7385_s0 + $0x430] sm:$0xff] }
  0x23   :  { %4012 = vmatmul.mubr.msk.f32.gmra.mxu0 %vm168_vm1, %v33_v30  ;;  %4147 = vmatmul.mubr.msk.f32.gmra.mxu1 %vm168_vm1, %v123_v31  ;;  %v65_v30 = vld [vmem:[%s7385_s0 + $0x168] sm:$0xff]  ;;  %v155_v31 = vld [vmem:[%s7385_s0 + $0x438] sm:$0xff] }
  0x24   :  { %4014 = vmatprep.mubr.msk.f32.mxu0 %vm168_vm1, %v34_v32  ;;  %4149 = vmatprep.mubr.msk.f32.mxu1 %vm168_vm1, %v124_v33  ;;  %v66_v32 = vld [vmem:[%s7385_s0 + $0x170] sm:$0xff]  ;;  %v156_v33 = vld [vmem:[%s7385_s0 + $0x440] sm:$0xff] }
  0x27   :  { %4015 = vmatmul.mubr.msk.f32.gmra.mxu0 %vm168_vm1, %v35_v34  ;;  %4150 = vmatmul.mubr.msk.f32.gmra.mxu1 %vm168_vm1, %v125_v35  ;;  %v67_v34 = vld [vmem:[%s7385_s0 + $0x178] sm:$0xff]  ;;  %v157_v35 = vld [vmem:[%s7385_s0 + $0x448] sm:$0xff] }
  0x28   :  { %4017 = vmatprep.mubr.msk.f32.mxu0 %vm168_vm1, %v36_v36  ;;  %4152 = vmatprep.mubr.msk.f32.mxu1 %vm168_vm1, %v126_v37  ;;  %v68_v36 = vld [vmem:[%s7385_s0 + $0x180] sm:$0xff]  ;;  %v158_v37 = vld [vmem:[%s7385_s0 + $0x450] sm:$0xff] }
  0x2b   :  { %4018 = vmatmul.mubr.msk.f32.gmra.mxu0 %vm168_vm1, %v37_v38  ;;  %4153 = vmatmul.mubr.msk.f32.gmra.mxu1 %vm168_vm1, %v127_v39  ;;  %v69_v38 = vld [vmem:[%s7385_s0 + $0x188] sm:$0xff]  ;;  %v159_v39 = vld [vmem:[%s7385_s0 + $0x458] sm:$0xff] }
  0x2c   :  { %4020 = vmatprep.mubr.msk.f32.mxu0 %vm168_vm1, %v38_v40  ;;  %4155 = vmatprep.mubr.msk.f32.mxu1 %vm168_vm1, %v128_v41  ;;  %v70_v40 = vld [vmem:[%s7385_s0 + $0x190] sm:$0xff]  ;;  %v160_v41 = vld [vmem:[%s7385_s0 + $0x460] sm:$0xff] }
  0x2f   :  { %4021 = vmatmul.mubr.msk.f32.gmra.mxu0 %vm168_vm1, %v39_v42  ;;  %4156 = vmatmul.mubr.msk.f32.gmra.mxu1 %vm168_vm1, %v129_v43  ;;  %v71_v42 = vld [vmem:[%s7385_s0 + $0x198] sm:$0xff]  ;;  %v161_v43 = vld [vmem:[%s7385_s0 + $0x468] sm:$0xff] }
  0x30   :  { %4023 = vmatprep.mubr.msk.f32.mxu0 %vm168_vm1, %v40_v44  ;;  %4158 = vmatprep.mubr.msk.f32.mxu1 %vm168_vm1, %v130_v45  ;;  %v72_v44 = vld [vmem:[%s7385_s0 + $0x1a0] sm:$0xff]  ;;  %v162_v45 = vld [vmem:[%s7385_s0 + $0x470] sm:$0xff] }
  0x33   :  { %4024 = vmatmul.mubr.msk.f32.gmra.mxu0 %vm168_vm1, %v41_v46  ;;  %4159 = vmatmul.mubr.msk.f32.gmra.mxu1 %vm168_vm1, %v131_v47  ;;  %v73_v46 = vld [vmem:[%s7385_s0 + $0x1a8] sm:$0xff]  ;;  %v163_v47 = vld [vmem:[%s7385_s0 + $0x478] sm:$0xff] }
  0x34   :  { %4026 = vmatprep.mubr.msk.f32.mxu0 %vm168_vm1, %v42_v48  ;;  %4161 = vmatprep.mubr.msk.f32.mxu1 %vm168_vm1, %v132_v49  ;;  %v74_v48 = vld [vmem:[%s7385_s0 + $0x1b0] sm:$0xff]  ;;  %v75_v49 = vld [vmem:[%s7385_s0 + $0x1b8] sm:$0xff] }
  0x37   :  { %4027 = vmatmul.mubr.msk.f32.gmra.mxu0 %vm168_vm1, %v43_v50  ;;  %4162 = vmatmul.mubr.msk.f32.gmra.mxu1 %vm168_vm1, %v133_v51  ;;  %v76_v50 = vld [vmem:[%s7385_s0 + $0x1c0] sm:$0xff]  ;;  %v77_v51 = vld [vmem:[%s7385_s0 + $0x1c8] sm:$0xff] }
  0x38   :  { %4029 = vmatprep.mubr.msk.f32.mxu0 %vm168_vm1, %v44_v52  ;;  %4164 = vmatprep.mubr.msk.f32.mxu1 %vm168_vm1, %v134_v53  ;;  %v78_v52 = vld [vmem:[%s7385_s0 + $0x1d0] sm:$0xff]  ;;  %v79_v53 = vld [vmem:[%s7385_s0 + $0x1d8] sm:$0xff] }
  0x3b   :  { %4030 = vmatmul.mubr.msk.f32.gmra.mxu0 %vm168_vm1, %v45_v54  ;;  %4165 = vmatmul.mubr.msk.f32.gmra.mxu1 %vm168_vm1, %v135_v55  ;;  %v80_v54 = vld [vmem:[%s7385_s0 + $0x1e0] sm:$0xff]  ;;  %v81_v55 = vld [vmem:[%s7385_s0 + $0x1e8] sm:$0xff] }
  0x3c   :  { %4032 = vmatprep.mubr.msk.f32.mxu0 %vm168_vm1, %v46_v56  ;;  %4167 = vmatprep.mubr.msk.f32.mxu1 %vm168_vm1, %v136_v57  ;;  %v82_v56 = vld [vmem:[%s7385_s0 + $0x1f0] sm:$0xff]  ;;  %v83_v57 = vld [vmem:[%s7385_s0 + $0x1f8] sm:$0xff] }
  0x3f   :  { %4033 = vmatmul.mubr.msk.f32.gmra.mxu0 %vm168_vm1, %v47_v58  ;;  %4168 = vmatmul.mubr.msk.f32.gmra.mxu1 %vm168_vm1, %v137_v59  ;;  %v84_v58 = vld [vmem:[%s7385_s0 + $0x200] sm:$0xff]  ;;  %v85_v59 = vld [vmem:[%s7385_s0 + $0x208] sm:$0xff] }
  0x40   :  { %4035 = vmatprep.mubr.msk.f32.mxu0 %vm168_vm1, %v48_v60  ;;  %4170 = vmatprep.mubr.msk.f32.mxu1 %vm168_vm1, %v138_v61  ;;  %v86_v60 = vld [vmem:[%s7385_s0 + $0x210] sm:$0xff]  ;;  %v87_v61 = vld [vmem:[%s7385_s0 + $0x218] sm:$0xff] }
  0x43   :  { %4036 = vmatmul.mubr.msk.f32.gmra.mxu0 %vm168_vm1, %v49_v62  ;;  %4171 = vmatmul.mubr.msk.f32.gmra.mxu1 %vm168_vm1, %v139_v63  ;;  %v88_v62 = vld [vmem:[%s7385_s0 + $0x220] sm:$0xff]  ;;  %v89_v63 = vld [vmem:[%s7385_s0 + $0x228] sm:$0xff] }
  0x44   :  { %4038 = vmatprep.mubr.msk.f32.mxu0 %vm168_vm1, %v50_v0  ;;  %4173 = vmatprep.mubr.msk.f32.mxu1 %vm168_vm1, %v140_v1  ;;  %v90_v0 = vld [vmem:[%s7385_s0 + $0x230] sm:$0xff]  ;;  %v91_v1 = vld [vmem:[%s7385_s0 + $0x238] sm:$0xff] }
  0x47   :  { %4039 = vmatmul.mubr.msk.f32.gmra.mxu0 %vm168_vm1, %v51_v2  ;;  %4174 = vmatmul.mubr.msk.f32.gmra.mxu1 %vm168_vm1, %v141_v3  ;;  %v92_v2 = vld [vmem:[%s7385_s0 + $0x240] sm:$0xff]  ;;  %v93_v3 = vld [vmem:[%s7385_s0 + $0x248] sm:$0xff] }
  0x48   :  { %4041 = vmatprep.mubr.msk.f32.mxu0 %vm168_vm1, %v52_v4  ;;  %4176 = vmatprep.mubr.msk.f32.mxu1 %vm168_vm1, %v142_v5  ;;  %v94_v4 = vld [vmem:[%s7385_s0 + $0x250] sm:$0xff]  ;;  %v95_v5 = vld [vmem:[%s7385_s0 + $0x258] sm:$0xff] }
  0x4b   :  { %4042 = vmatmul.mubr.msk.f32.gmra.mxu0 %vm168_vm1, %v53_v6  ;;  %4177 = vmatmul.mubr.msk.f32.gmra.mxu1 %vm168_vm1, %v143_v7  ;;  %v96_v6 = vld [vmem:[%s7385_s0 + $0x260] sm:$0xff]  ;;  %v97_v7 = vld [vmem:[%s7385_s0 + $0x268] sm:$0xff] }
  0x4c   :  { %4044 = vmatprep.mubr.msk.f32.mxu0 %vm168_vm1, %v54_v8  ;;  %4179 = vmatprep.mubr.msk.f32.mxu1 %vm168_vm1, %v144_v9  ;;  %v98_v8 = vld [vmem:[%s7385_s0 + $0x270] sm:$0xff]  ;;  %v99_v9 = vld [vmem:[%s7385_s0 + $0x278] sm:$0xff] }
  0x4f   :  { %4045 = vmatmul.mubr.msk.f32.gmra.mxu0 %vm168_vm1, %v55_v10  ;;  %4180 = vmatmul.mubr.msk.f32.gmra.mxu1 %vm168_vm1, %v145_v11  ;;  %v100_v10 = vld [vmem:[%s7385_s0 + $0x280] sm:$0xff]  ;;  %v101_v11 = vld [vmem:[%s7385_s0 + $0x288] sm:$0xff] }
  0x50   :  { %4047 = vmatprep.mubr.msk.f32.mxu0 %vm168_vm1, %v56_v12  ;;  %4182 = vmatprep.mubr.msk.f32.mxu1 %vm168_vm1, %v146_v13  ;;  %v102_v12 = vld [vmem:[%s7385_s0 + $0x290] sm:$0xff]  ;;  %v103_v13 = vld [vmem:[%s7385_s0 + $0x298] sm:$0xff] }
  0x53   :  { %4048 = vmatmul.mubr.msk.f32.gmra.mxu0 %vm168_vm1, %v57_v14  ;;  %4183 = vmatmul.mubr.msk.f32.gmra.mxu1 %vm168_vm1, %v147_v15  ;;  %v104_v14 = vld [vmem:[%s7385_s0 + $0x2a0] sm:$0xff]  ;;  %v105_v15 = vld [vmem:[%s7385_s0 + $0x2a8] sm:$0xff] }
  0x54   :  { %4050 = vmatprep.mubr.msk.f32.mxu0 %vm168_vm1, %v58_v16  ;;  %4185 = vmatprep.mubr.msk.f32.mxu1 %vm168_vm1, %v148_v17  ;;  %v106_v16 = vld [vmem:[%s7385_s0 + $0x2b0] sm:$0xff]  ;;  %v107_v17 = vld [vmem:[%s7385_s0 + $0x2b8] sm:$0xff] }
  0x57   :  { %4051 = vmatmul.mubr.msk.f32.gmra.mxu0 %vm168_vm1, %v59_v18  ;;  %4186 = vmatmul.mubr.msk.f32.gmra.mxu1 %vm168_vm1, %v149_v19  ;;  %v108_v18 = vld [vmem:[%s7385_s0 + $0x2c0] sm:$0xff]  ;;  %v109_v19 = vld [vmem:[%s7385_s0 + $0x2c8] sm:$0xff] }
  0x58   :  { %4053 = vmatprep.mubr.msk.f32.mxu0 %vm168_vm1, %v60_v20  ;;  %4188 = vmatprep.mubr.msk.f32.mxu1 %vm168_vm1, %v150_v21 }
  0x5b   :  { %4054 = vmatmul.mubr.msk.f32.gmra.mxu0 %vm168_vm1, %v61_v22  ;;  %4189 = vmatmul.mubr.msk.f32.gmra.mxu1 %vm168_vm1, %v151_v23 }
  0x5c   :  { %4056 = vmatprep.mubr.msk.f32.mxu0 %vm168_vm1, %v62_v24  ;;  %4191 = vmatprep.mubr.msk.f32.mxu1 %vm168_vm1, %v152_v25 }
  0x5f   :  { %4057 = vmatmul.mubr.msk.f32.gmra.mxu0 %vm168_vm1, %v63_v26  ;;  %4192 = vmatmul.mubr.msk.f32.gmra.mxu1 %vm168_vm1, %v153_v27 }
  0x60   :  { %4059 = vmatprep.mubr.msk.f32.mxu0 %vm168_vm1, %v64_v28  ;;  %4194 = vmatprep.mubr.msk.f32.mxu1 %vm168_vm1, %v154_v29 }
  0x63   :  { %4060 = vmatmul.mubr.msk.f32.gmra.mxu0 %vm168_vm1, %v65_v30  ;;  %4195 = vmatmul.mubr.msk.f32.gmra.mxu1 %vm168_vm1, %v155_v31 }
  0x64   :  { %4062 = vmatprep.mubr.msk.f32.mxu0 %vm168_vm1, %v66_v32  ;;  %4197 = vmatprep.mubr.msk.f32.mxu1 %vm168_vm1, %v156_v33 }
  0x67   :  { %4063 = vmatmul.mubr.msk.f32.gmra.mxu0 %vm168_vm1, %v67_v34  ;;  %4198 = vmatmul.mubr.msk.f32.gmra.mxu1 %vm168_vm1, %v157_v35 }
  0x68   :  { %4065 = vmatprep.mubr.msk.f32.mxu0 %vm168_vm1, %v68_v36  ;;  %4200 = vmatprep.mubr.msk.f32.mxu1 %vm168_vm1, %v158_v37 }
  0x6b   :  { %4066 = vmatmul.mubr.msk.f32.gmra.mxu0 %vm168_vm1, %v69_v38  ;;  %4201 = vmatmul.mubr.msk.f32.gmra.mxu1 %vm168_vm1, %v159_v39 }
  0x6c   :  { %4068 = vmatprep.mubr.msk.f32.mxu0 %vm168_vm1, %v70_v40  ;;  %4203 = vmatprep.mubr.msk.f32.mxu1 %vm168_vm1, %v160_v41 }
  0x6f   :  { %4069 = vmatmul.mubr.msk.f32.gmra.mxu0 %vm168_vm1, %v71_v42  ;;  %4204 = vmatmul.mubr.msk.f32.gmra.mxu1 %vm168_vm1, %v161_v43 }
  0x70   :  { %4071 = vmatprep.mubr.msk.f32.mxu0 %vm168_vm1, %v72_v44  ;;  %4206 = vmatprep.mubr.msk.f32.mxu1 %vm168_vm1, %v162_v45 }
  0x73   :  { %4072 = vmatmul.mubr.msk.f32.gmra.mxu0 %vm168_vm1, %v73_v46  ;;  %4207 = vmatmul.mubr.msk.f32.gmra.mxu1 %vm168_vm1, %v163_v47 }
  0x74   :  { %4074 = vmatprep.mubr.msk.f32.mxu0 %vm168_vm1, %v74_v48 }
  0x77   :  { %4075 = vmatmul.mubr.msk.f32.gmra.mxu0 %vm168_vm1, %v75_v49 }
  0x78   :  { %4077 = vmatprep.mubr.msk.f32.mxu0 %vm168_vm1, %v76_v50 }
  0x7b   :  { %4078 = vmatmul.mubr.msk.f32.gmra.mxu0 %vm168_vm1, %v77_v51 }
  0x7c   :  { %4080 = vmatprep.mubr.msk.f32.mxu0 %vm168_vm1, %v78_v52 }
  0x7f   :  { %4081 = vmatmul.mubr.msk.f32.gmra.mxu0 %vm168_vm1, %v79_v53 }
  0x80   :  { %4083 = vmatprep.mubr.msk.f32.mxu0 %vm168_vm1, %v80_v54 }
  0x83   :  { %4084 = vmatmul.mubr.msk.f32.gmra.mxu0 %vm168_vm1, %v81_v55 }
  0x84   :  { %4086 = vmatprep.mubr.msk.f32.mxu0 %vm168_vm1, %v82_v56 }
  0x87   :  { %4087 = vmatmul.mubr.msk.f32.gmra.mxu0 %vm168_vm1, %v83_v57 }
  0x88   :  { %4089 = vmatprep.mubr.msk.f32.mxu0 %vm168_vm1, %v84_v58 }
  0x8b   :  { %4090 = vmatmul.mubr.msk.f32.gmra.mxu0 %vm168_vm1, %v85_v59 }
  0x8c   :  { %4092 = vmatprep.mubr.msk.f32.mxu0 %vm168_vm1, %v86_v60 }
  0x8f   :  { %4093 = vmatmul.mubr.msk.f32.gmra.mxu0 %vm168_vm1, %v87_v61 }
  0x90   :  { %4095 = vmatprep.mubr.msk.f32.mxu0 %vm168_vm1, %v88_v62 }
  0x93   :  { %4096 = vmatmul.mubr.msk.f32.gmra.mxu0 %vm168_vm1, %v89_v63 }
  0x94   :  { %4098 = vmatprep.mubr.msk.f32.mxu0 %vm168_vm1, %v90_v0 }
  0x97   :  { %4099 = vmatmul.mubr.msk.f32.gmra.mxu0 %vm168_vm1, %v91_v1 }
  0x98   :  { %4101 = vmatprep.mubr.msk.f32.mxu0 %vm168_vm1, %v92_v2 }
  0x9b   :  { %4102 = vmatmul.mubr.msk.f32.gmra.mxu0 %vm168_vm1, %v93_v3 }
  0x9c   :  { %4104 = vmatprep.mubr.msk.f32.mxu0 %vm168_vm1, %v94_v4 }
  0x9f   :  { %4105 = vmatmul.mubr.msk.f32.gmra.mxu0 %vm168_vm1, %v95_v5 }
  0xa0   :  { %4107 = vmatprep.mubr.msk.f32.mxu0 %vm168_vm1, %v96_v6 }
  0xa3   :  { %4108 = vmatmul.mubr.msk.f32.gmra.mxu0 %vm168_vm1, %v97_v7 }
  0xa4   :  { %4110 = vmatprep.mubr.msk.f32.mxu0 %vm168_vm1, %v98_v8 }
  0xa7   :  { %4111 = vmatmul.mubr.msk.f32.gmra.mxu0 %vm168_vm1, %v99_v9 }
  0xa8   :  { %4113 = vmatprep.mubr.msk.f32.mxu0 %vm168_vm1, %v100_v10 }
  0xab   :  { %4114 = vmatmul.mubr.msk.f32.gmra.mxu0 %vm168_vm1, %v101_v11 }
  0xac   :  { %4116 = vmatprep.mubr.msk.f32.mxu0 %vm168_vm1, %v102_v12 }
  0xaf   :  { %4117 = vmatmul.mubr.msk.f32.gmra.mxu0 %vm168_vm1, %v103_v13 }
  0xb0   :  { %4119 = vmatprep.mubr.msk.f32.mxu0 %vm168_vm1, %v104_v14 }
  0xb3   :  { %4120 = vmatmul.mubr.msk.f32.gmra.mxu0 %vm168_vm1, %v105_v15 }
  0xb4   :  { %4122 = vmatprep.mubr.msk.f32.mxu0 %vm168_vm1, %v106_v16 }
  0xb7   :  { %4123 = vmatmul.mubr.msk.f32.gmra.mxu0 %vm168_vm1, %v107_v17 }
  0xb8   :  { %4125 = vmatprep.mubr.msk.f32.mxu0 %vm168_vm1, %v108_v18 }
  0xbb   :  { %4126 = vmatmul.mubr.msk.f32.gmra.mxu0 %vm168_vm1, %v109_v19 }
  0xcb   :  { %v4931_v20 = vpop.f32.mrf.mxu0  ;;  %v4933_v21 = vpop.f32.mrf.mxu1 }
  0xcd   :  { %v4935_v22 = vpop.f32.mrf.mxu0  ;;  %v4937_v23 = vpop.f32.mrf.mxu1 }
  0xcf   :  { %v4939_v24 = vpop.f32.mrf.mxu0  ;;  %v4941_v25 = vpop.f32.mrf.mxu1 }
  0xd1   :  { %v4943_v26 = vpop.f32.mrf.mxu0  ;;  %v4945_v27 = vpop.f32.mrf.mxu1 }
  0xd2   :  { %7493 = vst [vmem:[#allocation2_spill] sm:$0xff] %v4943_v26 }
  0xd3   :  { %v4947_v28 = vpop.f32.mrf.mxu0  ;;  %v4949_v29 = vpop.f32.mrf.mxu1 }
  0xd4   :  { %7494 = vst [vmem:[#allocation3_spill] sm:$0xff] %v4947_v28 }
  0xd5   :  { %v4951_v30 = vpop.f32.mrf.mxu0  ;;  %v4953_v31 = vpop.f32.mrf.mxu1 }
  0xd6   :  { %7495 = vst [vmem:[#allocation4_spill] sm:$0xff] %v4951_v30 }
  0xd7   :  { %v4955_v32 = vpop.f32.mrf.mxu0  ;;  %v4957_v33 = vpop.f32.mrf.mxu1 }
  0xd8   :  { %7496 = vst [vmem:[#allocation5_spill] sm:$0xff] %v4955_v32 }
  0xd9   :  { %v4959_v34 = vpop.f32.mrf.mxu0  ;;  %v4961_v35 = vpop.f32.mrf.mxu1 }
  0xda   :  { %7497 = vst [vmem:[#allocation6_spill] sm:$0xff] %v4959_v34 }
  0xdb   :  { %v4963_v36 = vpop.f32.mrf.mxu0  ;;  %v4965_v37 = vpop.f32.mrf.mxu1 }
  0xdc   :  { %7498 = vst [vmem:[#allocation7_spill] sm:$0xff] %v4963_v36 }
  0xdd   :  { %v4967_v38 = vpop.f32.mrf.mxu0  ;;  %v4969_v39 = vpop.f32.mrf.mxu1 }
  0xde   :  { %7499 = vst [vmem:[#allocation8_spill] sm:$0xff] %v4967_v38 }
  0xdf   :  { %v4971_v40 = vpop.f32.mrf.mxu0  ;;  %v4973_v41 = vpop.f32.mrf.mxu1 }
  0xe0   :  { %7500 = vst [vmem:[#allocation9_spill] sm:$0xff] %v4971_v40 }
  0xe1   :  { %v4975_v42 = vpop.f32.mrf.mxu0  ;;  %v4977_v43 = vpop.f32.mrf.mxu1 }
  0xe2   :  { %7501 = vst [vmem:[#allocation10_spill] sm:$0xff] %v4975_v42 }
  0xe3   :  { %v4979_v44 = vpop.f32.mrf.mxu0  ;;  %v4981_v45 = vpop.f32.mrf.mxu1 }
  0xe4   :  { %7502 = vst [vmem:[#allocation11_spill] sm:$0xff] %v4979_v44 }
  0xe5   :  { %v4983_v46 = vpop.f32.mrf.mxu0  ;;  %v4985_v47 = vpop.f32.mrf.mxu1 }
  0xe6   :  { %7503 = vst [vmem:[#allocation12_spill] sm:$0xff] %v4983_v46 }
  0xe7   :  { %v4987_v48 = vpop.f32.mrf.mxu0  ;;  %v4989_v49 = vpop.f32.mrf.mxu1 }
  0xe8   :  { %7504 = vst [vmem:[#allocation13_spill] sm:$0xff] %v4987_v48 }
  0xe9   :  { %v4991_v50 = vpop.f32.mrf.mxu0  ;;  %v4993_v51 = vpop.f32.mrf.mxu1 }
  0xea   :  { %7505 = vst [vmem:[#allocation14_spill] sm:$0xff] %v4991_v50 }
  0xeb   :  { %v4995_v52 = vpop.f32.mrf.mxu0  ;;  %v4997_v53 = vpop.f32.mrf.mxu1 }
  0xec   :  { %7506 = vst [vmem:[#allocation15_spill] sm:$0xff] %v4995_v52 }
  0xed   :  { %v4999_v54 = vpop.f32.mrf.mxu0  ;;  %v5001_v55 = vpop.f32.mrf.mxu1 }
  0xee   :  { %7507 = vst [vmem:[#allocation16_spill] sm:$0xff] %v4999_v54 }
  0xef   :  { %v5003_v56 = vpop.f32.mrf.mxu0  ;;  %v5005_v57 = vpop.f32.mrf.mxu1 }
  0xf1   :  { %v5007_v58 = vpop.f32.mrf.mxu0  ;;  %v5009_v59 = vpop.f32.mrf.mxu1 }
  0xf3   :  { %v5011_v60 = vpop.f32.mrf.mxu0  ;;  %v5013_v61 = vpop.f32.mrf.mxu1 }
  0xf5   :  { %v5015_v62 = vpop.f32.mrf.mxu0  ;;  %v5017_v63 = vpop.f32.mrf.mxu1 }
  0xf7   :  { %v5019_v0 = vpop.f32.mrf.mxu0  ;;  %v5021_v1 = vpop.f32.mrf.mxu1 }
  0xf8   :  { %7508 = vst [vmem:[#allocation17_spill] sm:$0xff] %v5021_v1 }
  0xf9   :  { %v5023_v2 = vpop.f32.mrf.mxu0  ;;  %v5025_v3 = vpop.f32.mrf.mxu1 }
  0xfa   :  { %7509 = vst [vmem:[#allocation18_spill] sm:$0xff] %v5025_v3 }
  0xfb   :  { %v5027_v4 = vpop.f32.mrf.mxu0  ;;  %v5031_v6 = vpop.f32.mrf.mxu1 }
  0xfc   :  { %7510 = vst [vmem:[#allocation19_spill] sm:$0xff] %v5031_v6 }
  0xfd   :  { %v5029_v5 = vpop.f32.mrf.mxu0  ;;  %v5037_v9 = vpop.f32.mrf.mxu1 }
  0xfe   :  { %7511 = vst [vmem:[#allocation20_spill] sm:$0xff] %v5037_v9 }
  0xff   :  { %v5033_v7 = vpop.f32.mrf.mxu0  ;;  %v5043_v12 = vpop.f32.mrf.mxu1 }
 0x100   :  { %7512 = vst [vmem:[#allocation21_spill] sm:$0xff] %v5043_v12 }
 0x101   :  { %v5035_v8 = vpop.f32.mrf.mxu0  ;;  %v5049_v15 = vpop.f32.mrf.mxu1 }
 0x102   :  { %7513 = vst [vmem:[#allocation22_spill] sm:$0xff] %v5049_v15 }
 0x103   :  { %v5039_v10 = vpop.f32.mrf.mxu0  ;;  %v5055_v18 = vpop.f32.mrf.mxu1 }
 0x104   :  { %7514 = vst [vmem:[#allocation23_spill] sm:$0xff] %v5055_v18 }
 0x105   :  { %v5041_v11 = vpop.f32.mrf.mxu0  ;;  %v5061_v52 = vpop.f32.mrf.mxu1 }
 0x106   :  { %7515 = vst [vmem:[#allocation24_spill] sm:$0xff] %v5061_v52 }
 0x107   :  { %v5045_v13 = vpop.f32.mrf.mxu0  ;;  %v5067_v46 = vpop.f32.mrf.mxu1 }
 0x108   :  { %7516 = vst [vmem:[#allocation25_spill] sm:$0xff] %v5067_v46 }
 0x109   :  { %v5047_v14 = vpop.f32.mrf.mxu0  ;;  %v5073_v40 = vpop.f32.mrf.mxu1 }
 0x10a   :  { %7517 = vst [vmem:[#allocation26_spill] sm:$0xff] %v5073_v40 }
 0x10b   :  { %v5051_v16 = vpop.f32.mrf.mxu0  ;;  %v5079_v15 = vpop.f32.mrf.mxu1 }
 0x10c   :  { %7520 = vst [vmem:[#allocation29_spill] sm:$0xff] %v5079_v15 }
 0x10d   :  { %v5053_v17 = vpop.f32.mrf.mxu0  ;;  %v5085_v12 = vpop.f32.mrf.mxu1 }
 0x10e   :  { %7523 = vst [vmem:[#allocation32_spill] sm:$0xff] %v5085_v12 }
 0x10f   :  { %v5057_v19 = vpop.f32.mrf.mxu0  ;;  %v5091_v9 = vpop.f32.mrf.mxu1 }
 0x110   :  { %7526 = vst [vmem:[#allocation35_spill] sm:$0xff] %v5091_v9 }
 0x111   :  { %v5059_v54 = vpop.f32.mrf.mxu0  ;;  %v5097_v6 = vpop.f32.mrf.mxu1 }
 0x112   :  { %7529 = vst [vmem:[#allocation38_spill] sm:$0xff] %v5097_v6 }
 0x113   :  { %v5063_v50 = vpop.f32.mrf.mxu0 }
 0x115   :  { %v5065_v48 = vpop.f32.mrf.mxu0 }
 0x117   :  { %v5069_v44 = vpop.f32.mrf.mxu0 }
 0x119   :  { %v5071_v42 = vpop.f32.mrf.mxu0 }
 0x11b   :  { %v5075_v38 = vpop.f32.mrf.mxu0 }
 0x11c   :  { %7518 = vst [vmem:[#allocation27_spill] sm:$0xff] %v5075_v38 }
 0x11d   :  { %v5077_v18 = vpop.f32.mrf.mxu0 }
 0x11e   :  { %7519 = vst [vmem:[#allocation28_spill] sm:$0xff] %v5077_v18 }
 0x11f   :  { %v5081_v36 = vpop.f32.mrf.mxu0 }
 0x120   :  { %7521 = vst [vmem:[#allocation30_spill] sm:$0xff] %v5081_v36  ;;  %v4184_v36 = vpop.f32.mrf.mxu1 }
 0x121   :  { %v5083_v52 = vpop.f32.mrf.mxu0 }
 0x122   :  { %7522 = vst [vmem:[#allocation31_spill] sm:$0xff] %v5083_v52 }
 0x123   :  { %v5087_v34 = vpop.f32.mrf.mxu0 }
 0x124   :  { %7524 = vst [vmem:[#allocation33_spill] sm:$0xff] %v5087_v34  ;;  %v1301_v34 = vpop.f32.mrf.mxu1 }
 0x125   :  { %v5089_v46 = vpop.f32.mrf.mxu0 }
 0x126   :  { %7525 = vst [vmem:[#allocation34_spill] sm:$0xff] %v5089_v46  ;;  %v4187_v9 = vpop.f32.mrf.mxu1 }
 0x127   :  { %v5093_v32 = vpop.f32.mrf.mxu0 }
 0x128   :  { %7527 = vst [vmem:[#allocation36_spill] sm:$0xff] %v5093_v32 }
 0x129   :  { %v5095_v40 = vpop.f32.mrf.mxu0 }
 0x12a   :  { %7528 = vst [vmem:[#allocation37_spill] sm:$0xff] %v5095_v40  ;;  %v1445_v40 = vmax.f32 %v4933_v21, %v4184_v36 }
 0x12b   :  { %v5099_v30 = vpop.f32.mrf.mxu0 }
 0x12c   :  { %7530 = vst [vmem:[#allocation39_spill] sm:$0xff] %v5099_v30 }
 0x12d   :  { %v5101_v15 = vpop.f32.mrf.mxu0 }
 0x12e   :  { %7531 = vst [vmem:[#allocation40_spill] sm:$0xff] %v5101_v15  ;;  %v5116_v15 = vld [vmem:[%s7386_s2] ss:$0 sm:$0xff] }
 0x12f   :  { %v5103_v52 = vpop.f32.mrf.mxu0 }
 0x130   :  { %7532 = vst [vmem:[#allocation41_spill] sm:$0xff] %v5103_v52  ;;  %v1444_v52 = vmax.f32 %v4937_v23, %v1301_v34 }
 0x131   :  { %v5105_v12 = vpop.f32.mrf.mxu0 }
 0x132   :  { %7533 = vst [vmem:[#allocation42_spill] sm:$0xff] %v5105_v12 }
 0x133   :  { %v5107_v18 = vpop.f32.mrf.mxu0 }
 0x134   :  { %7534 = vst [vmem:[#allocation43_spill] sm:$0xff] %v5107_v18  ;;  %v1311_v18 = vpop.f32.mrf.mxu1 }
 0x135   :  { %v5109_v46 = vpop.f32.mrf.mxu0  ;;  %v1446_v21 = vmax.f32 %v4945_v27, %v1311_v18 }
 0x136   :  { %7535 = vst [vmem:[#allocation44_spill] sm:$0xff] %v5109_v46 }
 0x137   :  { %v4076_v32 = vpop.f32.mrf.mxu0 }
 0x138   :  { %v1409_v6 = vmax.f32 %v5003_v56, %v4076_v32 }
 0x139   :  { %v941_v30 = vpop.f32.mrf.mxu0 }
 0x13a   :  { %v1481_v12 = vmax.f32 %v1409_v6, %v1445_v40  ;;  %v1408_v3 = vmax.f32 %v5007_v58, %v941_v30 }
 0x13b   :  { %v4079_v28 = vpop.f32.mrf.mxu0 }
 0x13c   :  { %v1524_v46 = vadd.f32 %v5116_v15, %v1481_v12  ;;  %v1480_v38 = vmax.f32 %v1408_v3, %v1444_v52  ;;  %v1447_v12 = vmax.f32 %v4941_v25, %v4187_v9 }
 0x13d   :  { %v951_v1 = vpop.f32.mrf.mxu0 }
 0x13e   :  { %v5122_v32 = vmax.f32 %v1524_v46, 0.0  ;;  %v1523_v36 = vadd.f32 %v5116_v15, %v1480_v38  ;;  %v1410_v56 = vmax.f32 %v5015_v62, %v951_v1  ;;  %v1411_v1 = vmax.f32 %v5011_v60, %v4079_v28  ;;  %v4190_v28 = vpop.f32.mrf.mxu1 }
 0x140   :  { %v5126_v26 = vmax.f32 %v1523_v36, 0.0  ;;  %v1482_v23 = vmax.f32 %v1410_v56, %v1446_v21  ;;  %2565 = vrot.lane.b32.xlu0 %v5122_v32, %s4305_s29  ;;  %v1651_v30 = vrot.slane %v5122_v32, 1  ;;  %v7396_v38 = vrot.slane %v5122_v32, 4  ;;  %v4082_v56 = vpop.f32.mrf.mxu0 }
 0x141   :  { %v1726_v3 = vrot.slane %v5122_v32, 2  ;;  %v7390_v6 = vrot.slane %v5122_v32, 6  ;;  %v1483_v25 = vmax.f32 %v1411_v1, %v1447_v12 }
 0x142   :  { %7536 = vst [vmem:[#allocation45_spill] sm:$0xff] %v5126_v26  ;;  %2563 = vrot.lane.b32.xlu1 %v5126_v26, %s4305_s29  ;;  %v7395_v27 = vrot.slane %v5126_v26, 1  ;;  %v7392_v34 = vrot.slane %v5126_v26, 4  ;;  %v1525_v40 = vadd.f32 %v5116_v15, %v1482_v23  ;;  %v7393_v58 = vrot.slane %v5126_v26, 2  ;;  %v961_v23 = vpop.f32.mrf.mxu0 }
 0x143   :  { %v7391_v62 = vrot.slane %v5126_v26, 6  ;;  %v7394_v60 = vrot.slane %v5126_v26, 5  ;;  %v1412_v1 = vmax.f32 %v5023_v2, %v961_v23 }
 0x144   :  { %v1652_v46 = vsel %vm1613_vm2, %v7395_v27, %v1651_v30  ;;  %v1800_v52 = vsel %vm1763_vm3, %v7392_v34, %v7396_v38  ;;  %v5153_v18 = vmax.f32 %v1525_v40, 0.0  ;;  %v1727_v21 = vsel %vm1688_vm4, %v7393_v58, %v1726_v3  ;;  %v4085_v58 = vpop.f32.mrf.mxu0 }
 0x145   :  { %2025 = vrot.lane.b32.xlu0 %v1652_v46, %s4306_s30  ;;  %v1950_v36 = vsel %vm1913_vm5, %v7391_v62, %v7390_v6  ;;  %v1526_v40 = vadd.f32 %v5116_v15, %v1483_v25  ;;  %v1321_v6 = vpop.f32.mrf.mxu1  ;;  %v1449_v27 = vmax.f32 %v4949_v29, %v4190_v28  ;;  %v7537_v28 = vrot.slane %v5122_v32, 4 }
 0x146   :  { %2241 = vrot.lane.b32.xlu1 %v1800_v52, %s4307_s6  ;;  %v1653_v9 = vrot.slane %v5153_v18, 1  ;;  %v1874_v52 = vrot.slane %v5122_v32, 5  ;;  %v1728_v62 = vrot.slane %v5153_v18, 2  ;;  %v1801_v23 = vrot.slane %v5153_v18, 4 }
 0x147   :  { %v5181_v25 = vmax.f32 %v1526_v40, 0.0  ;;  %v7400_v40 = vrot.slane %v5153_v18, 5 }
 0x148   :  { %v1875_v12 = vsel %vm1838_vm6, %v7394_v60, %v1874_v52  ;;  %v1729_v2 = vsel %vm1688_vm4, %v1726_v3, %v1728_v62  ;;  %v4193_v60 = vpop.f32.mrf.mxu1 }
 0x149   :  { %2134 = vrot.lane.b32.xlu0 %v1727_v21, %s4308_s1  ;;  %v1877_v26 = vsel %vm1838_vm6, %v1874_v52, %v7400_v40 }
 0x14a   :  { %2459 = vrot.lane.b32.xlu1 %v1950_v36, %s4309_s7  ;;  %v1654_v36 = vsel %vm1613_vm2, %v1651_v30, %v1653_v9  ;;  %v1655_v30 = vrot.slane %v5181_v25, 1 }
 0x14d   :  { %2671 = vrot.lane.b32.xlu0 %v1652_v46, %s4310_s8  ;;  %v1448_v46 = vmax.f32 %v4953_v31, %v1321_v6  ;;  %v1656_v6 = vsel %vm1613_vm2, %v1653_v9, %v1655_v30 }
 0x14e   :  { %2567 = vrot.lane.b32.xlu1 %v5153_v18, %s4305_s29 }
 0x14f   :  { %v1484_v34 = vmax.f32 %v1412_v1, %v1448_v46  ;;  %v971_v1 = vpop.f32.mrf.mxu0  ;;  %v1730_v46 = vrot.slane %v5181_v25, 2 }
 0x150   :  { %v1414_v9 = vmax.f32 %v5029_v5, %v971_v1  ;;  %v1802_v5 = vsel %vm1763_vm3, %v7537_v28, %v1801_v23 }
 0x151   :  { %2350 = vrot.lane.b32.xlu0 %v1875_v12, %s4311_s9  ;;  %v7397_v12 = vrot.slane %v5181_v25, 4  ;;  %v1527_v31 = vadd.f32 %v5116_v15, %v1484_v34  ;;  %v1331_v34 = vpop.f32.mrf.mxu1 }
 0x152   :  { %2027 = vrot.lane.b32.xlu1 %v1654_v36, %s4306_s30 }
 0x153   :  { %v1804_v3 = vsel %vm1763_vm3, %v1801_v23, %v7397_v12  ;;  %v5200_v38 = vmax.f32 %v1527_v31, 0.0  ;;  %v5204_v12 = vsel %vm1688_vm4, %v1728_v62, %v1730_v46  ;;  %v4088_v31 = vpop.f32.mrf.mxu0 }
 0x155   :  { %2779 = vrot.lane.b32.xlu0 %v1727_v21, %s4312_s10  ;;  %v1413_v21 = vmax.f32 %v5019_v0, %v4082_v56  ;;  %v1450_v0 = vmax.f32 %v4961_v35, %v1331_v34  ;;  %v1657_v62 = vrot.slane %v5200_v38, 1  ;;  %v981_v1 = vpop.f32.mrf.mxu0 }
 0x156   :  { %2136 = vrot.lane.b32.xlu1 %v1729_v2, %s4308_s1 }
 0x157   :  { %v1485_v29 = vmax.f32 %v1413_v21, %v1449_v27  ;;  %v1486_v56 = vmax.f32 %v1414_v9, %v1450_v0  ;;  %v5222_v35 = vsel %vm1613_vm2, %v1655_v30, %v1657_v62  ;;  %v1732_v27 = vrot.slane %v5200_v38, 2 }
 0x158   :  { %v1451_v21 = vmax.f32 %v4957_v33, %v4193_v60  ;;  %v1416_v30 = vmax.f32 %v5035_v8, %v981_v1 }
 0x159   :  { %2029 = vrot.lane.b32.xlu0 %v1656_v6, %s4306_s30  ;;  %v1528_v52 = vadd.f32 %v5116_v15, %v1485_v29  ;;  %v5236_v0 = vsel %vm1688_vm4, %v1730_v46, %v1732_v27  ;;  %v1805_v29 = vrot.slane %v5200_v38, 4 }
 0x15a   :  { %2245 = vrot.lane.b32.xlu1 %v1804_v3, %s4307_s6  ;;  %v4196_v3 = vpop.f32.mrf.mxu1 }
 0x15b   :  { %v5228_v23 = vmax.f32 %v1528_v52, 0.0 }
 0x15c   :  { %v1341_v34 = vpop.f32.mrf.mxu1 }
 0x15d   :  { %2138 = vrot.lane.b32.xlu0 %v5204_v12, %s4308_s1  ;;  %v1659_v33 = vrot.slane %v5228_v23, 1 }
 0x15e   :  { %2352 = vrot.lane.b32.xlu1 %v1877_v26, %s4311_s9  ;;  %v1529_v26 = vadd.f32 %v5116_v15, %v1486_v56  ;;  %v4091_v56 = vpop.f32.mrf.mxu0 }
 0x15f   :  { %v5246_v8 = vsel %vm1613_vm2, %v1657_v62, %v1659_v33 }
 0x160   :  { %v5232_v9 = vmax.f32 %v1529_v26, 0.0  ;;  %v991_v26 = vpop.f32.mrf.mxu0 }
 0x161   :  { %2243 = vrot.lane.b32.xlu0 %v1802_v5, %s4307_s6  ;;  %v4199_v5 = vpop.f32.mrf.mxu1 }
 0x162   :  { %2781 = vrot.lane.b32.xlu1 %v1729_v2, %s4312_s10  ;;  %v1415_v2 = vmax.f32 %v5027_v4, %v4085_v58  ;;  %v1807_v58 = vrot.slane %v5228_v23, 4  ;;  %v1661_v28 = vrot.slane %v5232_v9, 1  ;;  %v1809_v40 = vrot.slane %v5232_v9, 4 }
 0x164   :  { %v1487_v4 = vmax.f32 %v1415_v2, %v1451_v21  ;;  %v1808_v46 = vsel %vm1763_vm3, %v1805_v29, %v1807_v58  ;;  %v5260_v1 = vsel %vm1613_vm2, %v1659_v33, %v1661_v28  ;;  %v1736_v2 = vrot.slane %v5232_v9, 2 }
 0x165   :  { %2673 = vrot.lane.b32.xlu0 %v1654_v36, %s4310_s8  ;;  %v1452_v36 = vmax.f32 %v4969_v39, %v1341_v34  ;;  %v1417_v34 = vmax.f32 %v5033_v7, %v4088_v31  ;;  %v7540_v33 = vrot.slane %v5181_v25, 4 }
 0x166   :  { %2031 = vrot.lane.b32.xlu1 %v5222_v35, %s4306_s30  ;;  %v1530_v39 = vadd.f32 %v5116_v15, %v1487_v4 }
 0x167   :  { %v1488_v60 = vmax.f32 %v1416_v30, %v1452_v36  ;;  %v1453_v30 = vmax.f32 %v4965_v37, %v4196_v3  ;;  %v1351_v36 = vpop.f32.mrf.mxu1 }
 0x168   :  { %v5267_v21 = vmax.f32 %v1530_v39, 0.0  ;;  %v1454_v37 = vmax.f32 %v4977_v43, %v1351_v36  ;;  %v4094_v39 = vpop.f32.mrf.mxu0 }
 0x169   :  { %2675 = vrot.lane.b32.xlu0 %v1656_v6, %s4310_s8  ;;  %v1734_v6 = vrot.slane %v5228_v23, 2  ;;  %v1531_v52 = vadd.f32 %v5116_v15, %v1488_v60  ;;  %v1806_v60 = vsel %vm1763_vm3, %v7540_v33, %v1805_v29  ;;  %v1489_v7 = vmax.f32 %v1417_v34, %v1453_v30  ;;  %v4202_v34 = vpop.f32.mrf.mxu1 }
 0x16a   :  { %2140 = vrot.lane.b32.xlu1 %v5236_v0, %s4308_s1  ;;  %7538 = vst [vmem:[#allocation46_spill] sm:$0xff] %v5267_v21  ;;  %v1811_v31 = vrot.slane %v5267_v21, 4  ;;  %v1001_v36 = vpop.f32.mrf.mxu0 }
 0x16b   :  { %v5257_v62 = vsel %vm1688_vm4, %v1732_v27, %v1734_v6  ;;  %v1418_v27 = vmax.f32 %v5041_v11, %v991_v26  ;;  %v5272_v4 = vmax.f32 %v1531_v52, 0.0  ;;  %v1663_v11 = vrot.slane %v5267_v21, 1 }
 0x16c   :  { %v1532_v43 = vadd.f32 %v5116_v15, %v1489_v7  ;;  %v1738_v26 = vrot.slane %v5267_v21, 2  ;;  %v1455_v7 = vmax.f32 %v4973_v41, %v4199_v5 }
 0x16d   :  { %2033 = vrot.lane.b32.xlu0 %v5246_v8, %s4306_s30  ;;  %7539 = vst [vmem:[#allocation47_spill] sm:$0xff] %v5272_v4  ;;  %v1490_v3 = vmax.f32 %v1418_v27, %v1454_v37  ;;  %v5288_v29 = vsel %vm1613_vm2, %v1661_v28, %v1663_v11  ;;  %v1665_v52 = vrot.slane %v5272_v4, 1  ;;  %v1740_v33 = vrot.slane %v5272_v4, 2 }
 0x16e   :  { %2249 = vrot.lane.b32.xlu1 %v1808_v46, %s4307_s6  ;;  %v5278_v46 = vsel %vm1688_vm4, %v1734_v6, %v1736_v2  ;;  %v1812_v6 = vsel %vm1763_vm3, %v1809_v40, %v1811_v31  ;;  %v5299_v28 = vsel %vm1688_vm4, %v1736_v2, %v1738_v26  ;;  %v1419_v37 = vmax.f32 %v5039_v10, %v4091_v56 }
 0x16f   :  { %7541 = vst [vmem:[#allocation48_spill] sm:$0xff] %v5278_v46  ;;  %v1533_v30 = vadd.f32 %v5116_v15, %v1490_v3  ;;  %7542 = vst [vmem:[#allocation49_spill] sm:$0xff] %v5299_v28  ;;  %v5302_v27 = vsel %vm1613_vm2, %v1663_v11, %v1665_v52  ;;  %v1361_v3 = vpop.f32.mrf.mxu1  ;;  %v1420_v2 = vmax.f32 %v5047_v14, %v1001_v36 }
 0x170   :  { %7543 = vst [vmem:[#allocation50_spill] sm:$0xff] %v5302_v27  ;;  %v1810_v11 = vsel %vm1763_vm3, %v1807_v58, %v1809_v40  ;;  %v5318_v21 = vsel %vm1688_vm4, %v1738_v26, %v1740_v33  ;;  %v1456_v10 = vmax.f32 %v4985_v47, %v1361_v3  ;;  %v1491_v41 = vmax.f32 %v1419_v37, %v1455_v7 }
 0x171   :  { %2142 = vrot.lane.b32.xlu0 %v5257_v62, %s4308_s1  ;;  %7546 = vst [vmem:[#allocation53_spill] sm:$0xff] %v5318_v21  ;;  %v4205_v36 = vpop.f32.mrf.mxu1 }
 0x172   :  { %2035 = vrot.lane.b32.xlu1 %v5260_v1, %s4306_s30  ;;  %v1492_v5 = vmax.f32 %v1420_v2, %v1456_v10  ;;  %v1534_v47 = vadd.f32 %v5116_v15, %v1491_v41  ;;  %v1421_v10 = vmax.f32 %v5045_v13, %v4094_v39  ;;  %v1457_v41 = vmax.f32 %v4981_v45, %v4202_v34 }
 0x174   :  { %v1535_v37 = vadd.f32 %v5116_v15, %v1492_v5  ;;  %v1371_v5 = vpop.f32.mrf.mxu1  ;;  %v1493_v45 = vmax.f32 %v1421_v10, %v1457_v41 }
 0x175   :  { %2247 = vrot.lane.b32.xlu0 %v1806_v60, %s4307_s6  ;;  %v5309_v60 = vmax.f32 %v1532_v43, 0.0  ;;  %v4097_v43 = vpop.f32.mrf.mxu0  ;;  %v1458_v13 = vmax.f32 %v4993_v51, %v1371_v5 }
 0x176   :  { %2144 = vrot.lane.b32.xlu1 %v5278_v46, %s4308_s1  ;;  %v1536_v51 = vadd.f32 %v5116_v15, %v1493_v45  ;;  %v1459_v45 = vmax.f32 %v4989_v49, %v4205_v36 }
 0x177   :  { %7544 = vst [vmem:[#allocation51_spill] sm:$0xff] %v5309_v60  ;;  %v1667_v56 = vrot.slane %v5309_v60, 1  ;;  %v1815_v14 = vrot.slane %v5309_v60, 4  ;;  %v1011_v7 = vpop.f32.mrf.mxu0 }
 0x179   :  { %2037 = vrot.lane.b32.xlu0 %v5288_v29, %s4306_s30  ;;  %v5328_v40 = vsel %vm1613_vm2, %v1665_v52, %v1667_v56 }
 0x17a   :  { %2253 = vrot.lane.b32.xlu1 %v1812_v6, %s4307_s6  ;;  %v5314_v6 = vmax.f32 %v1533_v30, 0.0  ;;  %7547 = vst [vmem:[#allocation54_spill] sm:$0xff] %v5328_v40  ;;  %v1742_v30 = vrot.slane %v5309_v60, 2 }
 0x17c   :  { %7545 = vst [vmem:[#allocation52_spill] sm:$0xff] %v5314_v6  ;;  %v1669_v26 = vrot.slane %v5314_v6, 1  ;;  %v5339_v52 = vsel %vm1688_vm4, %v1740_v33, %v1742_v30  ;;  %v1744_v2 = vrot.slane %v5314_v6, 2  ;;  %v1422_v33 = vmax.f32 %v5053_v17, %v1011_v7  ;;  %v4208_v7 = vpop.f32.mrf.mxu1 }
 0x17d   :  { %2146 = vrot.lane.b32.xlu0 %v5299_v28, %s4308_s1  ;;  %v1813_v28 = vrot.slane %v5272_v4, 4  ;;  %7548 = vst [vmem:[#allocation55_spill] sm:$0xff] %v5339_v52  ;;  %v7700_v4 = vld [vmem:[#allocation13_spill] sm:$0xff] }
 0x17e   :  { %2039 = vrot.lane.b32.xlu1 %v5302_v27, %s4306_s30  ;;  %v5342_v3 = vsel %vm1613_vm2, %v1667_v56, %v1669_v26  ;;  %v5358_v60 = vsel %vm1688_vm4, %v1742_v30, %v1744_v2  ;;  %v1494_v34 = vmax.f32 %v1422_v33, %v1458_v13  ;;  %v1423_v13 = vmax.f32 %v5051_v16, %v4097_v43  ;;  %v7699_v27 = vld [vmem:[#allocation41_spill] sm:$0xff] }
 0x17f   :  { %v1816_v58 = vsel %vm1763_vm3, %v1813_v28, %v1815_v14  ;;  %7549 = vst [vmem:[#allocation56_spill] sm:$0xff] %v5342_v3  ;;  %v1814_v56 = vsel %vm1763_vm3, %v1811_v31, %v1813_v28  ;;  %7552 = vst [vmem:[#allocation59_spill] sm:$0xff] %v5358_v60  ;;  %v1405_v46 = vmax.f32 %v7700_v4, %v7699_v27 }
 0x180   :  { %v1537_v10 = vadd.f32 %v5116_v15, %v1494_v34  ;;  %v1381_v34 = vpop.f32.mrf.mxu1  ;;  %v1495_v49 = vmax.f32 %v1423_v13, %v1459_v45 }
 0x181   :  { %2251 = vrot.lane.b32.xlu0 %v1810_v11, %s4307_s6  ;;  %v5349_v11 = vmax.f32 %v1534_v47, 0.0  ;;  %v4100_v47 = vpop.f32.mrf.mxu0  ;;  %v1460_v16 = vmax.f32 %v5001_v55, %v1381_v34 }
 0x182   :  { %2148 = vrot.lane.b32.xlu1 %v5318_v21, %s4308_s1  ;;  %v1538_v55 = vadd.f32 %v5116_v15, %v1495_v49 }
 0x183   :  { %7550 = vst [vmem:[#allocation57_spill] sm:$0xff] %v5349_v11  ;;  %v1671_v39 = vrot.slane %v5349_v11, 1  ;;  %v1819_v17 = vrot.slane %v5349_v11, 4  ;;  %v1021_v41 = vpop.f32.mrf.mxu0 }
 0x184   :  { %v5429_v34 = vmax.f32 %v1538_v55, 0.0 }
 0x185   :  { %2041 = vrot.lane.b32.xlu0 %v5328_v40, %s4306_s30  ;;  %v5368_v31 = vsel %vm1613_vm2, %v1669_v26, %v1671_v39 }
 0x186   :  { %2257 = vrot.lane.b32.xlu1 %v1816_v58, %s4307_s6  ;;  %v5354_v58 = vmax.f32 %v1535_v37, 0.0  ;;  %7553 = vst [vmem:[#allocation60_spill] sm:$0xff] %v5368_v31  ;;  %v1746_v37 = vrot.slane %v5349_v11, 2  ;;  %7562 = vst [vmem:[#allocation69_spill] sm:$0xff] %v5429_v34 }
 0x188   :  { %7551 = vst [vmem:[#allocation58_spill] sm:$0xff] %v5354_v58  ;;  %v1673_v30 = vrot.slane %v5354_v58, 1  ;;  %v5379_v26 = vsel %vm1688_vm4, %v1744_v2, %v1746_v37  ;;  %v1748_v33 = vrot.slane %v5354_v58, 2  ;;  %v1424_v2 = vmax.f32 %v5059_v54, %v1021_v41  ;;  %v4103_v41 = vpop.f32.mrf.mxu0 }
 0x189   :  { %2150 = vrot.lane.b32.xlu0 %v5339_v52, %s4308_s1  ;;  %v1817_v52 = vrot.slane %v5314_v6, 4  ;;  %7554 = vst [vmem:[#allocation61_spill] sm:$0xff] %v5379_v26  ;;  %v7698_v6 = vld [vmem:[#allocation29_spill] sm:$0xff] }
 0x18a   :  { %2043 = vrot.lane.b32.xlu1 %v5342_v3, %s4306_s30  ;;  %v5382_v5 = vsel %vm1613_vm2, %v1671_v39, %v1673_v30  ;;  %v5398_v11 = vsel %vm1688_vm4, %v1746_v37, %v1748_v33  ;;  %v1496_v36 = vmax.f32 %v1424_v2, %v1460_v16  ;;  %v1425_v2 = vmax.f32 %v5057_v19, %v4100_v47 }
 0x18b   :  { %v1820_v28 = vsel %vm1763_vm3, %v1817_v52, %v1819_v17  ;;  %7555 = vst [vmem:[#allocation62_spill] sm:$0xff] %v5382_v5  ;;  %v1818_v39 = vsel %vm1763_vm3, %v1815_v14, %v1817_v52  ;;  %7558 = vst [vmem:[#allocation65_spill] sm:$0xff] %v5398_v11  ;;  %v1679_v19 = vrot.slane %v5429_v34, 1 }
 0x18d   :  { %2255 = vrot.lane.b32.xlu0 %v1814_v56, %s4307_s6  ;;  %v5389_v56 = vmax.f32 %v1536_v51, 0.0 }
 0x18e   :  { %2152 = vrot.lane.b32.xlu1 %v5358_v60, %s4308_s1 }
 0x18f   :  { %7556 = vst [vmem:[#allocation63_spill] sm:$0xff] %v5389_v56  ;;  %v1675_v43 = vrot.slane %v5389_v56, 1  ;;  %v1823_v54 = vrot.slane %v5389_v56, 4  ;;  %v1750_v37 = vrot.slane %v5389_v56, 2 }
 0x191   :  { %2045 = vrot.lane.b32.xlu0 %v5368_v31, %s4306_s30  ;;  %v5408_v14 = vsel %vm1613_vm2, %v1673_v30, %v1675_v43  ;;  %v5419_v13 = vsel %vm1688_vm4, %v1748_v33, %v1750_v37  ;;  %v1031_v33 = vpop.f32.mrf.mxu0 }
 0x192   :  { %2261 = vrot.lane.b32.xlu1 %v1820_v28, %s4307_s6  ;;  %v5394_v28 = vmax.f32 %v1537_v10, 0.0  ;;  %7559 = vst [vmem:[#allocation66_spill] sm:$0xff] %v5408_v14  ;;  %v1539_v10 = vadd.f32 %v5116_v15, %v1496_v36  ;;  %7560 = vst [vmem:[#allocation67_spill] sm:$0xff] %v5419_v13  ;;  %v1426_v47 = vmax.f32 %v1031_v33, %v5009_v59  ;;  %v1754_v59 = vrot.slane %v5429_v34, 2 }
 0x194   :  { %7557 = vst [vmem:[#allocation64_spill] sm:$0xff] %v5394_v28  ;;  %v1677_v51 = vrot.slane %v5394_v28, 1  ;;  %v1752_v45 = vrot.slane %v5394_v28, 2  ;;  %v5433_v16 = vmax.f32 %v1539_v10, 0.0  ;;  %v1825_v36 = vrot.slane %v5394_v28, 4  ;;  %v7688_v28 = vld [vmem:[#allocation11_spill] sm:$0xff] }
 0x195   :  { %2154 = vrot.lane.b32.xlu0 %v5379_v26, %s4308_s1  ;;  %v1821_v26 = vrot.slane %v5354_v58, 4  ;;  %v7694_v58 = vld [vmem:[#allocation26_spill] sm:$0xff] }
 0x196   :  { %2047 = vrot.lane.b32.xlu1 %v5382_v5, %s4306_s30  ;;  %v5422_v30 = vsel %vm1613_vm2, %v1675_v43, %v1677_v51  ;;  %7563 = vst [vmem:[#allocation70_spill] sm:$0xff] %v5433_v16  ;;  %v5437_v43 = vsel %vm1688_vm4, %v1750_v37, %v1752_v45  ;;  %v1681_v55 = vrot.slane %v5433_v16, 1  ;;  %v1390_v37 = vmax.f32 %v4935_v22, %v5065_v48 }
 0x197   :  { %v1824_v52 = vsel %vm1763_vm3, %v1821_v26, %v1823_v54  ;;  %7561 = vst [vmem:[#allocation68_spill] sm:$0xff] %v5422_v30  ;;  %v1822_v49 = vsel %vm1763_vm3, %v1819_v17, %v1821_v26  ;;  %7564 = vst [vmem:[#allocation71_spill] sm:$0xff] %v5437_v43  ;;  %v5447_v17 = vsel %vm1613_vm2, %v1677_v51, %v1679_v19 }
 0x198   :  { %7565 = vst [vmem:[#allocation72_spill] sm:$0xff] %v5447_v17  ;;  %v1462_v51 = vmax.f32 %v1390_v37, %v1426_v47  ;;  %v5463_v33 = vsel %vm1613_vm2, %v1679_v19, %v1681_v55  ;;  %v1427_v48 = vmax.f32 %v4103_v41, %v5005_v57  ;;  %v1826_v19 = vsel %vm1763_vm3, %v1823_v54, %v1825_v36 }
 0x199   :  { %2259 = vrot.lane.b32.xlu0 %v1818_v39, %s4307_s6  ;;  %v1461_v39 = vmax.f32 %v4997_v53, %v4208_v7  ;;  %v1827_v53 = vrot.slane %v5429_v34, 4  ;;  %v4106_v7 = vpop.f32.mrf.mxu0  ;;  %7567 = vst [vmem:[#allocation74_spill] sm:$0xff] %v5463_v33  ;;  %v7610_v34 = vld [vmem:[#allocation5_spill] sm:$0xff] }
 0x19a   :  { %2156 = vrot.lane.b32.xlu1 %v5398_v11, %s4308_s1 }
 0x19b   :  { %v1828_v26 = vsel %vm1763_vm3, %v1825_v36, %v1827_v53 }
 0x19d   :  { %2049 = vrot.lane.b32.xlu0 %v5408_v14, %s4306_s30 }
 0x19e   :  { %2265 = vrot.lane.b32.xlu1 %v1824_v52, %s4307_s6  ;;  %v1497_v52 = vmax.f32 %v1425_v2, %v1461_v39  ;;  %v1429_v2 = vmax.f32 %v4106_v7, %v5013_v61  ;;  %v5460_v39 = vsel %vm1688_vm4, %v1752_v45, %v1754_v59  ;;  %v1391_v61 = vmax.f32 %v4931_v20, %v5063_v50  ;;  %v1041_v7 = vpop.f32.mrf.mxu0 }
 0x19f   :  { %7566 = vst [vmem:[#allocation73_spill] sm:$0xff] %v5460_v39 }
 0x1a0   :  { %v1540_v10 = vadd.f32 %v5116_v15, %v1497_v52  ;;  %v1505_v52 = vadd.f32 %v5116_v15, %v1462_v51  ;;  %v1463_v57 = vmax.f32 %v1391_v61, %v1427_v48  ;;  %v4109_v61 = vpop.f32.mrf.mxu0 }
 0x1a1   :  { %2158 = vrot.lane.b32.xlu0 %v5419_v13, %s4308_s1 }
 0x1a2   :  { %2051 = vrot.lane.b32.xlu1 %v5422_v30, %s4306_s30  ;;  %v5472_v22 = vmax.f32 %v1540_v10, 0.0  ;;  %v5493_v36 = vmax.f32 %v1505_v52, 0.0 }
 0x1a4   :  { %7568 = vst [vmem:[#allocation75_spill] sm:$0xff] %v5472_v22  ;;  %v1683_v20 = vrot.slane %v5472_v22, 1  ;;  %v1831_v50 = vrot.slane %v5472_v22, 4  ;;  %7572 = vst [vmem:[#allocation79_spill] sm:$0xff] %v5493_v36  ;;  %v1614_v52 = vrot.slane %v5493_v36, 1 }
 0x1a5   :  { %2263 = vrot.lane.b32.xlu0 %v1822_v49, %s4307_s6  ;;  %v1756_v49 = vrot.slane %v5433_v16, 2 }
 0x1a6   :  { %2160 = vrot.lane.b32.xlu1 %v5437_v43, %s4308_s1  ;;  %v5496_v37 = vsel %vm1613_vm2, %v1681_v55, %v1683_v20  ;;  %v1428_v55 = vmax.f32 %v1041_v7, %v5017_v63 }
 0x1a7   :  { %7573 = vst [vmem:[#allocation80_spill] sm:$0xff] %v5496_v37 }
 0x1a9   :  { %2053 = vrot.lane.b32.xlu0 %v5447_v17, %s4306_s30 }
 0x1aa   :  { %2269 = vrot.lane.b32.xlu1 %v1828_v26, %s4307_s6  ;;  %v1393_v26 = vmax.f32 %v4939_v24, %v5069_v44  ;;  %v5480_v24 = vsel %vm1688_vm4, %v1754_v59, %v1756_v49  ;;  %v1829_v44 = vrot.slane %v5433_v16, 4  ;;  %v1506_v59 = vadd.f32 %v5116_v15, %v1463_v57  ;;  %v7584_v16 = vld [vmem:[#allocation3_spill] sm:$0xff] }
 0x1ab   :  { %7569 = vst [vmem:[#allocation76_spill] sm:$0xff] %v5480_v24 }
 0x1ac   :  { %v1465_v45 = vmax.f32 %v1393_v26, %v1429_v2  ;;  %v1832_v10 = vsel %vm1763_vm3, %v1829_v44, %v1831_v50  ;;  %v1758_v2 = vrot.slane %v5472_v22, 2 }
 0x1ad   :  { %2162 = vrot.lane.b32.xlu0 %v5460_v39, %s4308_s1 }
 0x1ae   :  { %2055 = vrot.lane.b32.xlu1 %v5463_v33, %s4306_s30  ;;  %v1508_v41 = vadd.f32 %v5116_v15, %v1465_v45  ;;  %v5512_v45 = vsel %vm1688_vm4, %v1756_v49, %v1758_v2  ;;  %v7583_v33 = vld [vmem:[#allocation27_spill] sm:$0xff] }
 0x1af   :  { %7576 = vst [vmem:[#allocation83_spill] sm:$0xff] %v5512_v45  ;;  %v1395_v39 = vmax.f32 %v7584_v16, %v7583_v33  ;;  %v1834_v16 = vrot.slane %v5493_v36, 4 }
 0x1b0   :  { %v5504_v51 = vmax.f32 %v1508_v41, 0.0  ;;  %v5521_v41 = vmax.f32 %v1506_v59, 0.0 }
 0x1b1   :  { %2267 = vrot.lane.b32.xlu0 %v1826_v19, %s4307_s6  ;;  %v7577_v19 = vld [vmem:[#allocation2_spill] sm:$0xff] }
 0x1b2   :  { %v5484_v47 = vpop.permute.xlu0 %2565  ;;  %2164 = vrot.lane.b32.xlu1 %v5480_v24, %s4308_s1  ;;  %v1392_v57 = vmax.f32 %v7577_v19, %v5071_v42  ;;  %7578 = vst [vmem:[#allocation2_spill] sm:$0xff] %v5521_v41  ;;  %v1830_v24 = vsel %vm1763_vm3, %v1827_v53, %v1829_v44  ;;  %v1615_v42 = vrot.slane %v5521_v41, 1  ;;  %v1764_v33 = vrot.slane %v5521_v41, 4 }
 0x1b3   :  { %7570 = vst [vmem:[#allocation77_spill] sm:$0xff] %v5484_v47 }
 0x1b4   :  { %v5491_v54 = vpop.permute.xlu1 %2563  ;;  %v1464_v49 = vmax.f32 %v1392_v57, %v1428_v55  ;;  %v5545_v44 = vsel %vm1613_vm2, %v1614_v52, %v1615_v42  ;;  %v1835_v57 = vsel %vm1763_vm3, %v1834_v16, %v1764_v33 }
 0x1b5   :  { %7571 = vst [vmem:[#allocation78_spill] sm:$0xff] %v5491_v54  ;;  %2057 = vrot.lane.b32.xlu0 %v5496_v37, %s4306_s30  ;;  %v5530_v37 = vsel %vm1613_vm2, %v1683_v20, %v1614_v52  ;;  %7587 = vst [vmem:[#allocation86_spill] sm:$0xff] %v5545_v44  ;;  %v7662_v54 = vld [vmem:[#allocation36_spill] sm:$0xff] }
 0x1b6   :  { %2273 = vrot.lane.b32.xlu1 %v1832_v10, %s4307_s6  ;;  %v7579_v10 = vld [vmem:[#allocation17_spill] sm:$0xff]  ;;  %7582 = vst [vmem:[#allocation85_spill] sm:$0xff] %v5530_v37  ;;  %v1507_v53 = vadd.f32 %v5116_v15, %v1464_v49 }
 0x1b7   :  { %v5506_v26 = vpop.permute.xlu0 %2025  ;;  %v1431_v22 = vmax.f32 %v4109_v61, %v7579_v10 }
 0x1b8   :  { %7574 = vst [vmem:[#allocation81_spill] sm:$0xff] %v5506_v26  ;;  %v5508_v48 = vpop.permute.xlu1 %2241  ;;  %v7609_v26 = vld [vmem:[#allocation30_spill] sm:$0xff] }
 0x1b9   :  { %7575 = vst [vmem:[#allocation82_spill] sm:$0xff] %v5508_v48  ;;  %2166 = vrot.lane.b32.xlu0 %v5512_v45, %s4308_s1  ;;  %v1689_v45 = vrot.slane %v5493_v36, 2  ;;  %v1467_v59 = vmax.f32 %v1395_v39, %v1431_v22  ;;  %v1690_v39 = vrot.slane %v5521_v41, 2 }
 0x1ba   :  { %2533 = vrot.lane.b32.xlu1 %v5504_v51, %s4305_s29 }
 0x1bb   :  { %v5524_v63 = vpop.permute.xlu0 %2134  ;;  %v5548_v20 = vsel %vm1688_vm4, %v1758_v2, %v1689_v45  ;;  %v1510_v22 = vadd.f32 %v5116_v15, %v1467_v59  ;;  %v5562_v2 = vmax.f32 %v1507_v53, 0.0  ;;  %v5565_v19 = vsel %vm1688_vm4, %v1689_v45, %v1690_v39 }
 0x1bc   :  { %7580 = vst [vmem:[#allocation17_spill] sm:$0xff] %v5524_v63  ;;  %v5526_v7 = vpop.permute.xlu1 %2459  ;;  %7588 = vst [vmem:[#allocation87_spill] sm:$0xff] %v5548_v20  ;;  %v7423_v45 = vrot.slane %v5504_v51, 1 }
 0x1bd   :  { %7581 = vst [vmem:[#allocation84_spill] sm:$0xff] %v5526_v7  ;;  %2271 = vrot.lane.b32.xlu0 %v1830_v24, %s4307_s6  ;;  %7591 = vst [vmem:[#allocation90_spill] sm:$0xff] %v5562_v2  ;;  %v5571_v10 = vmax.f32 %v1510_v22, 0.0  ;;  %v1617_v53 = vrot.slane %v5562_v2, 1  ;;  %v1051_v22 = vpop.f32.mrf.mxu0  ;;  %v7663_v7 = vld [vmem:[#allocation9_spill] sm:$0xff] }
 0x1be   :  { %2059 = vrot.lane.b32.xlu1 %v5530_v37, %s4306_s30  ;;  %7592 = vst [vmem:[#allocation91_spill] sm:$0xff] %v5565_v19  ;;  %v1401_v30 = vmax.f32 %v7663_v7, %v7662_v54 }
 0x1bf   :  { %v5539_v61 = vpop.permute.xlu0 %2671 }
 0x1c0   :  { %7585 = vst [vmem:[#allocation27_spill] sm:$0xff] %v5539_v61  ;;  %v5541_v55 = vpop.permute.xlu1 %2567  ;;  %v7636_v61 = vld [vmem:[#allocation7_spill] sm:$0xff] }
 0x1c1   :  { %7586 = vst [vmem:[#allocation3_spill] sm:$0xff] %v5541_v55  ;;  %1989 = vrot.lane.b32.xlu0 %v5545_v44, %s4306_s30  ;;  %v5588_v44 = vsel %vm1613_vm2, %v1615_v42, %v1617_v53  ;;  %v7601_v42 = vld [vmem:[#allocation18_spill] sm:$0xff]  ;;  %v3155_v55 = vld [vmem:[%s7387_s3 + $0x10] sm:$0xff] }
 0x1c2   :  { %2168 = vrot.lane.b32.xlu1 %v5548_v20, %s4308_s1  ;;  %v1837_v20 = vsel %vm1763_vm3, %v1831_v50, %v1834_v16  ;;  %7597 = vst [vmem:[#allocation96_spill] sm:$0xff] %v5588_v44  ;;  %v5593_v50 = vsel %vm1613_vm2, %v1617_v53, %v7423_v45  ;;  %v7426_v16 = vrot.slane %v5504_v51, 2 }
 0x1c3   :  { %v5558_v24 = vpop.permute.xlu0 %2350  ;;  %7598 = vst [vmem:[#allocation97_spill] sm:$0xff] %v5593_v50 }
 0x1c4   :  { %7589 = vst [vmem:[#allocation88_spill] sm:$0xff] %v5558_v24  ;;  %v5560_v52 = vpop.permute.xlu1 %2027  ;;  %v7687_v24 = vld [vmem:[#allocation39_spill] sm:$0xff] }
 0x1c5   :  { %7590 = vst [vmem:[#allocation89_spill] sm:$0xff] %v5560_v52  ;;  %2098 = vrot.lane.b32.xlu0 %v5565_v19, %s4308_s1  ;;  %v7606_v52 = vld [vmem:[#allocation19_spill] sm:$0xff]  ;;  %v1403_v48 = vmax.f32 %v7688_v28, %v7687_v24 }
 0x1c6   :  { %2277 = vrot.lane.b32.xlu1 %v1835_v57, %s4307_s6 }
 0x1c7   :  { %v5573_v49 = vpop.permute.xlu0 %2779 }
 0x1c8   :  { %7593 = vst [vmem:[#allocation92_spill] sm:$0xff] %v5573_v49  ;;  %v5575_v59 = vpop.permute.xlu1 %2136 }
 0x1c9   :  { %7594 = vst [vmem:[#allocation93_spill] sm:$0xff] %v5575_v59  ;;  %2275 = vrot.lane.b32.xlu0 %v1837_v20, %s4307_s6  ;;  %v1692_v20 = vrot.slane %v5562_v2, 2  ;;  %v4112_v59 = vpop.f32.mrf.mxu0 }
 0x1ca   :  { %2537 = vrot.lane.b32.xlu1 %v5571_v10, %s4305_s29 }
 0x1cb   :  { %v5583_v19 = vpop.permute.xlu0 %2029  ;;  %v5609_v53 = vsel %vm1688_vm4, %v1692_v20, %v7426_v16  ;;  %v5612_v45 = vsel %vm1688_vm4, %v1690_v39, %v1692_v20 }
 0x1cc   :  { %7595 = vst [vmem:[#allocation94_spill] sm:$0xff] %v5583_v19  ;;  %v5585_v57 = vpop.permute.xlu1 %2245  ;;  %7602 = vst [vmem:[#allocation18_spill] sm:$0xff] %v5609_v53 }
 0x1cd   :  { %7596 = vst [vmem:[#allocation95_spill] sm:$0xff] %v5585_v57  ;;  %1991 = vrot.lane.b32.xlu0 %v5588_v44, %s4306_s30  ;;  %v1430_v57 = vmax.f32 %v1051_v22, %v7601_v42  ;;  %7603 = vst [vmem:[#allocation100_spill] sm:$0xff] %v5612_v45  ;;  %v1765_v44 = vrot.slane %v5562_v2, 4  ;;  %v7435_v42 = vrot.slane %v5504_v51, 4 }
 0x1ce   :  { %1993 = vrot.lane.b32.xlu1 %v5593_v50, %s4306_s30  ;;  %v7604_v50 = vld [vmem:[#allocation28_spill] sm:$0xff] }
 0x1cf   :  { %v5601_v37 = vpop.permute.xlu0 %2138  ;;  %v1766_v20 = vsel %vm1763_vm3, %v1764_v33, %v1765_v44 }
 0x1d0   :  { %7599 = vst [vmem:[#allocation98_spill] sm:$0xff] %v5601_v37  ;;  %v5603_v19 = vpop.permute.xlu1 %2352  ;;  %v7605_v37 = vld [vmem:[#allocation4_spill] sm:$0xff] }
 0x1d1   :  { %7600 = vst [vmem:[#allocation99_spill] sm:$0xff] %v5603_v19  ;;  %2102 = vrot.lane.b32.xlu0 %v5609_v53, %s4308_s1  ;;  %v1394_v22 = vmax.f32 %v7605_v37, %v7604_v50  ;;  %v1433_v19 = vmax.f32 %v4112_v59, %v7606_v52  ;;  %v1768_v53 = vsel %vm1763_vm3, %v1765_v44, %v7435_v42  ;;  %v7431_v52 = vrot.slane %v5521_v41, 5 }
 0x1d2   :  { %2100 = vrot.lane.b32.xlu1 %v5612_v45, %s4308_s1  ;;  %v1840_v45 = vrot.slane %v5562_v2, 5  ;;  %v1397_v37 = vmax.f32 %v7610_v34, %v7609_v26  ;;  %v7433_v59 = vrot.slane %v5504_v51, 5  ;;  %v1915_v26 = vrot.slane %v5562_v2, 6 }
 0x1d3   :  { %v5623_v16 = vpop.permute.xlu0 %2243  ;;  %v1466_v39 = vmax.f32 %v1394_v22, %v1430_v57 }
 0x1d4   :  { %7607 = vst [vmem:[#allocation28_spill] sm:$0xff] %v5623_v16  ;;  %v5625_v63 = vpop.permute.xlu1 %2781  ;;  %v1469_v57 = vmax.f32 %v1397_v37, %v1433_v19  ;;  %v1841_v22 = vsel %vm1838_vm6, %v7431_v52, %v1840_v45  ;;  %v1843_v34 = vsel %vm1838_vm6, %v1840_v45, %v7433_v59  ;;  %v7432_v19 = vrot.slane %v5504_v51, 6  ;;  %v3158_v16 = vld [vmem:[%s7387_s3 + $0x28] sm:$0xff] }
 0x1d5   :  { %7608 = vst [vmem:[#allocation4_spill] sm:$0xff] %v5625_v63  ;;  %2207 = vrot.lane.b32.xlu0 %v1766_v20, %s4307_s6  ;;  %v1509_v44 = vadd.f32 %v5116_v15, %v1466_v39  ;;  %v3164_v39 = vld [vmem:[%s7387_s3 + $0x58] sm:$0x3] }
 0x1d6   :  { %2209 = vrot.lane.b32.xlu1 %v1768_v53, %s4307_s6  ;;  %v7434_v53 = vrot.slane %v5521_v41, 6  ;;  %v1512_v20 = vadd.f32 %v5116_v15, %v1469_v57  ;;  %4209 = vmatprep.subr.msk.mxu1 %vm1913_vm5, %v3164_v39  ;;  %v3163_v57 = vld [vmem:[%s7387_s3 + $0x50] sm:$0xff] }
 0x1d7   :  { %v5638_v50 = vpop.permute.xlu0 %2673  ;;  %v5663_v45 = vmax.f32 %v1509_v44, 0.0  ;;  %4210 = vmatpush3.msk.msra.mxu1 %vm1913_vm5, %v3164_v39  ;;  %v3162_v44 = vld [vmem:[%s7387_s3 + $0x48] sm:$0xff] }
 0x1d8   :  { %7611 = vst [vmem:[#allocation19_spill] sm:$0xff] %v5638_v50  ;;  %v5640_v33 = vpop.permute.xlu1 %2031  ;;  %4211 = vmatprep.subr.mxu1 %v3163_v57 }
 0x1d9   :  { %7612 = vst [vmem:[#allocation30_spill] sm:$0xff] %v5640_v33  ;;  %2316 = vrot.lane.b32.xlu0 %v1841_v22, %s4311_s9  ;;  %v1918_v22 = vsel %vm1913_vm5, %v1915_v26, %v7432_v19  ;;  %v5680_v19 = vmax.f32 %v1512_v20, 0.0  ;;  %4212 = vmatpush3.msra.mxu1 %v3163_v57  ;;  %v1621_v39 = vrot.slane %v5663_v45, 1  ;;  %v7436_v20 = vrot.slane %v5571_v10, 1  ;;  %v3160_v57 = vld [vmem:[%s7387_s3 + $0x38] sm:$0xff] }
 0x1da   :  { %2318 = vrot.lane.b32.xlu1 %v1843_v34, %s4311_s9  ;;  %v1916_v34 = vsel %vm1913_vm5, %v7434_v53, %v1915_v26  ;;  %4213 = vmatprep.subr.mxu1 %v3162_v44  ;;  %v1769_v33 = vrot.slane %v5663_v45, 4 }
 0x1db   :  { %v5658_v37 = vpop.permute.xlu0 %2675  ;;  %4214 = vmatpush3.msra.mxu1 %v3162_v44  ;;  %v1624_v42 = vsel %vm1613_vm2, %v1621_v39, %v7436_v20  ;;  %v3159_v44 = vld [vmem:[%s7387_s3 + $0x30] sm:$0xff]  ;;  %v1925_v54 = vrot.slane %v5680_v19, 6 }
 0x1dc   :  { %7613 = vst [vmem:[#allocation5_spill] sm:$0xff] %v5658_v37  ;;  %v5660_v52 = vpop.permute.xlu1 %2140 }
 0x1dd   :  { %7614 = vst [vmem:[#allocation101_spill] sm:$0xff] %v5660_v52  ;;  %2427 = vrot.lane.b32.xlu0 %v1918_v22, %s4309_s7  ;;  %v3161_v22 = vld [vmem:[%s7387_s3 + $0x40] sm:$0xff]  ;;  %v1696_v52 = vrot.slane %v5663_v45, 2 }
 0x1de   :  { %2425 = vrot.lane.b32.xlu1 %v1916_v34, %s4309_s7  ;;  %4215 = vmatprep.subr.mxu1 %v3161_v22 }
 0x1df   :  { %v5682_v59 = vpop.permute.xlu0 %2033  ;;  %4216 = vmatpush3.msra.mxu1 %v3161_v22 }
 0x1e0   :  { %7615 = vst [vmem:[#allocation102_spill] sm:$0xff] %v5682_v59  ;;  %v5684_v26 = vpop.permute.xlu1 %2249  ;;  %v7619_v59 = vrot.slane %v5504_v51, 1  ;;  %4217 = vmatprep.subr.mxu1 %v3160_v57 }
 0x1e1   :  { %7616 = vst [vmem:[#allocation103_spill] sm:$0xff] %v5684_v26  ;;  %2535 = vrot.lane.b32.xlu0 %v5663_v45, %s4305_s29  ;;  %4218 = vmatpush3.msra.mxu1 %v3160_v57  ;;  %v7439_v57 = vrot.slane %v5571_v10, 4 }
 0x1e2   :  { %2541 = vrot.lane.b32.xlu1 %v5680_v19, %s4305_s29  ;;  %v1622_v26 = vsel %vm1613_vm2, %v7619_v59, %v1621_v39  ;;  %v7622_v39 = vrot.slane %v5504_v51, 2  ;;  %4219 = vmatprep.subr.mxu1 %v3159_v44 }
 0x1e3   :  { %v5695_v34 = vpop.permute.xlu0 %2142  ;;  %4220 = vmatpush3.msra.mxu1 %v3159_v44  ;;  %v1772_v43 = vsel %vm1763_vm3, %v1769_v33, %v7439_v57  ;;  %v1844_v44 = vrot.slane %v5663_v45, 5 }
 0x1e4   :  { %7617 = vst [vmem:[#allocation104_spill] sm:$0xff] %v5695_v34  ;;  %v5697_v53 = vpop.permute.xlu1 %2035  ;;  %v1697_v22 = vsel %vm1688_vm4, %v7622_v39, %v1696_v52  ;;  %4221 = vmatprep.subr.mxu1 %v3158_v16  ;;  %v1061_v39 = vpop.f32.mrf.mxu0 }
 0x1e5   :  { %7618 = vst [vmem:[#allocation105_spill] sm:$0xff] %v5697_v53  ;;  %1997 = vrot.lane.b32.xlu0 %v1624_v42, %s4306_s30  ;;  %v7437_v53 = vrot.slane %v5571_v10, 2  ;;  %4222 = vmatpush3.msra.mxu1 %v3158_v16  ;;  %v7629_v16 = vrot.slane %v5504_v51, 5 }
 0x1e6   :  { %1995 = vrot.lane.b32.xlu1 %v1622_v26, %s4306_s30  ;;  %v4115_v17 = vpop.f32.mrf.mxu0 }
 0x1e7   :  { %v5715_v34 = vpop.permute.xlu0 %2247  ;;  %v5722_v59 = vsel %vm1688_vm4, %v1696_v52, %v7437_v53  ;;  %v3157_v52 = vld [vmem:[%s7387_s3 + $0x20] sm:$0xff] }
 0x1e8   :  { %7620 = vst [vmem:[#allocation106_spill] sm:$0xff] %v5715_v34  ;;  %v5717_v20 = vpop.permute.xlu1 %2144  ;;  %v7625_v34 = vrot.slane %v5504_v51, 4  ;;  %4223 = vmatprep.subr.mxu1 %v3157_v52 }
 0x1e9   :  { %7621 = vst [vmem:[#allocation107_spill] sm:$0xff] %v5717_v20  ;;  %2106 = vrot.lane.b32.xlu0 %v5722_v59, %s4308_s1  ;;  %4224 = vmatpush3.msra.mxu1 %v3157_v52  ;;  %v7630_v52 = vld [vmem:[#allocation31_spill] sm:$0xff] }
 0x1ea   :  { %2104 = vrot.lane.b32.xlu1 %v1697_v22, %s4308_s1  ;;  %v1770_v37 = vsel %vm1763_vm3, %v7625_v34, %v1769_v33  ;;  %v7628_v33 = vld [vmem:[#allocation20_spill] sm:$0xff] }
 0x1eb   :  { %v5735_v53 = vpop.permute.xlu0 %2037  ;;  %v1432_v57 = vmax.f32 %v1061_v39, %v7628_v33  ;;  %v7631_v39 = vld [vmem:[#allocation6_spill] sm:$0xff] }
 0x1ec   :  { %7623 = vst [vmem:[#allocation108_spill] sm:$0xff] %v5735_v53  ;;  %v5737_v20 = vpop.permute.xlu1 %2253  ;;  %v3156_v53 = vld [vmem:[%s7387_s3 + $0x18] sm:$0xff]  ;;  %v1396_v33 = vmax.f32 %v7631_v39, %v7630_v52 }
 0x1ed   :  { %7624 = vst [vmem:[#allocation109_spill] sm:$0xff] %v5737_v20  ;;  %2211 = vrot.lane.b32.xlu0 %v1770_v37, %s4307_s6  ;;  %v7441_v20 = vrot.slane %v5571_v10, 5  ;;  %v1845_v37 = vsel %vm1838_vm6, %v7629_v16, %v1844_v44  ;;  %4225 = vmatprep.subr.mxu1 %v3156_v53 }
 0x1ee   :  { %2213 = vrot.lane.b32.xlu1 %v1772_v43, %s4307_s6  ;;  %4226 = vmatpush3.msra.mxu1 %v3156_v53 }
 0x1ef   :  { %v5755_v63 = vpop.permute.xlu0 %2146  ;;  %v1847_v43 = vsel %vm1838_vm6, %v1844_v44, %v7441_v20  ;;  %4227 = vmatprep.subr.mxu1 %v3155_v55  ;;  %v3154_v44 = vld [vmem:[%s7387_s3 + $0x8] sm:$0xff]  ;;  %v1468_v20 = vmax.f32 %v1396_v33, %v1432_v57  ;;  %v7639_v57 = vrot.slane %v5504_v51, 6 }
 0x1f0   :  { %7626 = vst [vmem:[#allocation110_spill] sm:$0xff] %v5755_v63  ;;  %v5757_v34 = vpop.permute.xlu1 %2039  ;;  %4228 = vmatpush3.msra.mxu1 %v3155_v55 }
 0x1f1   :  { %7627 = vst [vmem:[#allocation111_spill] sm:$0xff] %v5757_v34  ;;  %2320 = vrot.lane.b32.xlu0 %v1845_v37, %s4311_s9  ;;  %v7632_v34 = vld [vmem:[#allocation21_spill] sm:$0xff]  ;;  %v1919_v37 = vrot.slane %v5663_v45, 6  ;;  %4229 = vmatprep.subr.mxu1 %v3154_v44  ;;  %v1511_v55 = vadd.f32 %v5116_v15, %v1468_v20 }
 0x1f2   :  { %2322 = vrot.lane.b32.xlu1 %v1847_v43, %s4311_s9  ;;  %v1435_v63 = vmax.f32 %v4115_v17, %v7632_v34  ;;  %v7635_v43 = vld [vmem:[#allocation33_spill] sm:$0xff]  ;;  %v3153_v17 = vld [vmem:[%s7387_s3] sm:$0xff]  ;;  %4230 = vmatpush3.msra.mxu1 %v3154_v44 }
 0x1f3   :  { %v5774_v16 = vpop.permute.xlu0 %2251  ;;  %v1399_v50 = vmax.f32 %v7636_v61, %v7635_v43  ;;  %v1920_v61 = vsel %vm1913_vm5, %v7639_v57, %v1919_v37  ;;  %4231 = vmatprep.subr.mxu1 %v3153_v17  ;;  %v5810_v20 = vmax.f32 %v1511_v55, 0.0  ;;  %v7646_v55 = vrot.slane %v5571_v10, 1 }
 0x1f4   :  { %7633 = vst [vmem:[#allocation20_spill] sm:$0xff] %v5774_v16  ;;  %v5776_v49 = vpop.permute.xlu1 %2148  ;;  %4232 = vmatpush3.msra.mxu1 %v3153_v17 }
 0x1f5   :  { %7634 = vst [vmem:[#allocation31_spill] sm:$0xff] %v5776_v49  ;;  %2643 = vrot.lane.b32.xlu0 %v1624_v42, %s4310_s8  ;;  %v1471_v53 = vmax.f32 %v1399_v50, %v1435_v63  ;;  %v7442_v42 = vrot.slane %v5571_v10, 6  ;;  %v5803_v63 = vld [vmem:[%s7386_s2] ss:$0 sm:$0xff]  ;;  %v1625_v43 = vrot.slane %v5810_v20, 1 }
 0x1f6   :  { %2641 = vrot.lane.b32.xlu1 %v1622_v26, %s4310_s8 }
 0x1f7   :  { %v5789_v34 = vpop.permute.xlu0 %2041  ;;  %v1514_v50 = vadd.f32 %v5803_v63, %v1471_v53  ;;  %v1626_v57 = vsel %vm1613_vm2, %v7646_v55, %v1625_v43  ;;  %v1773_v55 = vrot.slane %v5810_v20, 4 }
 0x1f8   :  { %7637 = vst [vmem:[#allocation6_spill] sm:$0xff] %v5789_v34  ;;  %v5791_v52 = vpop.permute.xlu1 %2257  ;;  %v7655_v34 = vld [vmem:[#allocation22_spill] sm:$0xff] }
 0x1f9   :  { %7638 = vst [vmem:[#allocation21_spill] sm:$0xff] %v5791_v52  ;;  %2429 = vrot.lane.b32.xlu0 %v1920_v61, %s4309_s7  ;;  %v5818_v39 = vmax.f32 %v1514_v50, 0.0  ;;  %v1700_v61 = vrot.slane %v5810_v20, 2  ;;  %v7444_v50 = vrot.slane %v5680_v19, 2 }
 0x1fa   :  { %2749 = vrot.lane.b32.xlu1 %v1697_v22, %s4312_s10  ;;  %v1922_v22 = vsel %vm1913_vm5, %v1919_v37, %v7442_v42  ;;  %v7443_v37 = vrot.slane %v5680_v19, 1 }
 0x1fb   :  { %v5806_v15 = vpop.permute.xlu0 %2150  ;;  %v7693_v56 = vrot.slane %v5818_v39, 4 }
 0x1fc   :  { %7640 = vst [vmem:[#allocation33_spill] sm:$0xff] %v5806_v15  ;;  %v5808_v26 = vpop.permute.xlu1 %2043  ;;  %v7447_v15 = vrot.slane %v5680_v19, 5 }
 0x1fd   :  { %7641 = vst [vmem:[#allocation7_spill] sm:$0xff] %v5808_v26  ;;  %2431 = vrot.lane.b32.xlu0 %v1922_v22, %s4309_s7  ;;  %v7652_v26 = vrot.slane %v5571_v10, 4 }
 0x1fe   :  { %2751 = vrot.lane.b32.xlu1 %v5722_v59, %s4312_s10  ;;  %v1628_v59 = vsel %vm1613_vm2, %v1625_v43, %v7443_v37  ;;  %v1703_v37 = vsel %vm1688_vm4, %v1700_v61, %v7444_v50 }
 0x1ff   :  { %v5820_v33 = vpop.permute.xlu0 %2255  ;;  %v1774_v50 = vsel %vm1763_vm3, %v7652_v26, %v1773_v55  ;;  %v7656_v26 = vrot.slane %v5571_v10, 5 }
 0x200   :  { %7642 = vst [vmem:[#allocation112_spill] sm:$0xff] %v5820_v33  ;;  %v5822_v44 = vpop.permute.xlu1 %2152 }
 0x201   :  { %7643 = vst [vmem:[#allocation113_spill] sm:$0xff] %v5822_v44  ;;  %2539 = vrot.lane.b32.xlu0 %v5810_v20, %s4305_s29 }
 0x202   :  { %2545 = vrot.lane.b32.xlu1 %v5818_v39, %s4305_s29 }
 0x203   :  { %v5830_v17 = vpop.permute.xlu0 %2045 }
 0x204   :  { %7644 = vst [vmem:[#allocation114_spill] sm:$0xff] %v5830_v17  ;;  %v5832_v53 = vpop.permute.xlu1 %2261  ;;  %v7649_v17 = vrot.slane %v5571_v10, 2 }
 0x205   :  { %7645 = vst [vmem:[#allocation115_spill] sm:$0xff] %v5832_v53  ;;  %2001 = vrot.lane.b32.xlu0 %v1628_v59, %s4306_s30  ;;  %v7445_v53 = vrot.slane %v5680_v19, 4 }
 0x206   :  { %1999 = vrot.lane.b32.xlu1 %v1626_v57, %s4306_s30  ;;  %v1701_v43 = vsel %vm1688_vm4, %v7649_v17, %v1700_v61  ;;  %v1848_v61 = vrot.slane %v5810_v20, 5 }
 0x207   :  { %v5844_v22 = vpop.permute.xlu0 %2154  ;;  %v1776_v17 = vsel %vm1763_vm3, %v1773_v55, %v7445_v53 }
 0x208   :  { %7647 = vst [vmem:[#allocation116_spill] sm:$0xff] %v5844_v22  ;;  %v5846_v42 = vpop.permute.xlu1 %2047  ;;  %v1849_v33 = vsel %vm1838_vm6, %v7656_v26, %v1848_v61  ;;  %v1851_v55 = vsel %vm1838_vm6, %v1848_v61, %v7447_v15  ;;  %v1923_v26 = vrot.slane %v5810_v20, 6 }
 0x209   :  { %7648 = vst [vmem:[#allocation117_spill] sm:$0xff] %v5846_v42  ;;  %2110 = vrot.lane.b32.xlu0 %v1703_v37, %s4308_s1  ;;  %v1071_v42 = vpop.f32.mrf.mxu0 }
 0x20a   :  { %2108 = vrot.lane.b32.xlu1 %v1701_v43, %s4308_s1  ;;  %v1434_v52 = vmax.f32 %v1071_v42, %v7655_v34 }
 0x20b   :  { %v5858_v44 = vpop.permute.xlu0 %2259  ;;  %v4118_v49 = vpop.f32.mrf.mxu0 }
 0x20c   :  { %7650 = vst [vmem:[#allocation118_spill] sm:$0xff] %v5858_v44  ;;  %v5860_v22 = vpop.permute.xlu1 %2156 }
 0x20d   :  { %7651 = vst [vmem:[#allocation119_spill] sm:$0xff] %v5860_v22  ;;  %2215 = vrot.lane.b32.xlu0 %v1774_v50, %s4307_s6  ;;  %v7657_v50 = vld [vmem:[#allocation34_spill] sm:$0xff] }
 0x20e   :  { %2217 = vrot.lane.b32.xlu1 %v1776_v17, %s4307_s6  ;;  %v7658_v17 = vld [vmem:[#allocation8_spill] sm:$0xff] }
 0x20f   :  { %v5872_v44 = vpop.permute.xlu0 %2049  ;;  %v1398_v53 = vmax.f32 %v7658_v17, %v7657_v50 }
 0x210   :  { %7653 = vst [vmem:[#allocation120_spill] sm:$0xff] %v5872_v44  ;;  %v5874_v22 = vpop.permute.xlu1 %2265  ;;  %v7659_v44 = vld [vmem:[#allocation23_spill] sm:$0xff] }
 0x211   :  { %7654 = vst [vmem:[#allocation121_spill] sm:$0xff] %v5874_v22  ;;  %2324 = vrot.lane.b32.xlu0 %v1849_v33, %s4311_s9  ;;  %v1437_v22 = vmax.f32 %v4118_v49, %v7659_v44  ;;  %v1470_v42 = vmax.f32 %v1398_v53, %v1434_v52  ;;  %v7666_v44 = vrot.slane %v5571_v10, 6 }
 0x212   :  { %2326 = vrot.lane.b32.xlu1 %v1851_v55, %s4311_s9 }
 0x213   :  { %v5888_v16 = vpop.permute.xlu0 %2158  ;;  %v1473_v33 = vmax.f32 %v1401_v30, %v1437_v22  ;;  %v1513_v49 = vadd.f32 %v5803_v63, %v1470_v42  ;;  %v1924_v52 = vsel %vm1913_vm5, %v7666_v44, %v1923_v26  ;;  %v7448_v42 = vrot.slane %v5818_v39, 1 }
 0x214   :  { %7660 = vst [vmem:[#allocation22_spill] sm:$0xff] %v5888_v16  ;;  %v5890_v34 = vpop.permute.xlu1 %2051 }
 0x215   :  { %7661 = vst [vmem:[#allocation34_spill] sm:$0xff] %v5890_v34  ;;  %2647 = vrot.lane.b32.xlu0 %v1628_v59, %s4310_s8  ;;  %v1516_v7 = vadd.f32 %v5803_v63, %v1473_v33  ;;  %v5913_v59 = vmax.f32 %v1513_v49, 0.0  ;;  %v7673_v49 = vrot.slane %v5680_v19, 1  ;;  %v7681_v34 = vld [vmem:[#allocation24_spill] sm:$0xff] }
 0x216   :  { %2645 = vrot.lane.b32.xlu1 %v1626_v57, %s4310_s8  ;;  %v1926_v57 = vsel %vm1913_vm5, %v1923_v26, %v1925_v54 }
 0x217   :  { %v5897_v61 = vpop.permute.xlu0 %2263  ;;  %v5918_v22 = vmax.f32 %v1516_v7, 0.0  ;;  %v1629_v17 = vrot.slane %v5913_v59, 1  ;;  %v7449_v7 = vrot.slane %v5818_v39, 2 }
 0x218   :  { %7664 = vst [vmem:[#allocation8_spill] sm:$0xff] %v5897_v61  ;;  %v5899_v55 = vpop.permute.xlu1 %2160 }
 0x219   :  { %7665 = vst [vmem:[#allocation23_spill] sm:$0xff] %v5899_v55  ;;  %2433 = vrot.lane.b32.xlu0 %v1924_v52, %s4309_s7  ;;  %v1630_v44 = vsel %vm1613_vm2, %v7673_v49, %v1629_v17  ;;  %v1704_v52 = vrot.slane %v5913_v59, 2  ;;  %v1777_v49 = vrot.slane %v5913_v59, 4  ;;  %v7479_v11 = vrot.slane %v5918_v22, 5 }
 0x21a   :  { %2753 = vrot.lane.b32.xlu1 %v1701_v43, %s4312_s10 }
 0x21b   :  { %v5909_v53 = vpop.permute.xlu0 %2053 }
 0x21c   :  { %7667 = vst [vmem:[#allocation36_spill] sm:$0xff] %v5909_v53  ;;  %v5911_v30 = vpop.permute.xlu1 %2269  ;;  %v7678_v53 = vrot.slane %v5680_v19, 4 }
 0x21d   :  { %7668 = vst [vmem:[#allocation9_spill] sm:$0xff] %v5911_v30  ;;  %2435 = vrot.lane.b32.xlu0 %v1926_v57, %s4309_s7  ;;  %v7454_v30 = vrot.slane %v5818_v39, 5 }
 0x21e   :  { %2755 = vrot.lane.b32.xlu1 %v1703_v37, %s4312_s10  ;;  %v1632_v37 = vsel %vm1613_vm2, %v1629_v17, %v7448_v42  ;;  %v1707_v42 = vsel %vm1688_vm4, %v1704_v52, %v7449_v7  ;;  %v1778_v7 = vsel %vm1763_vm3, %v7678_v53, %v1777_v49  ;;  %v7682_v53 = vrot.slane %v5680_v19, 5 }
 0x21f   :  { %v5920_v50 = vpop.permute.xlu0 %2162 }
 0x220   :  { %7669 = vst [vmem:[#allocation122_spill] sm:$0xff] %v5920_v50  ;;  %v5922_v43 = vpop.permute.xlu1 %2055 }
 0x221   :  { %7670 = vst [vmem:[#allocation123_spill] sm:$0xff] %v5922_v43  ;;  %2543 = vrot.lane.b32.xlu0 %v5913_v59, %s4305_s29  ;;  %v7450_v43 = vrot.slane %v5818_v39, 4 }
 0x222   :  { %2549 = vrot.lane.b32.xlu1 %v5918_v22, %s4305_s29 }
 0x223   :  { %v5930_v26 = vpop.permute.xlu0 %2267 }
 0x224   :  { %7671 = vst [vmem:[#allocation124_spill] sm:$0xff] %v5930_v26  ;;  %v5932_v33 = vpop.permute.xlu1 %2164 }
 0x225   :  { %7672 = vst [vmem:[#allocation125_spill] sm:$0xff] %v5932_v33  ;;  %2005 = vrot.lane.b32.xlu0 %v1632_v37, %s4306_s30  ;;  %v7676_v33 = vrot.slane %v5680_v19, 2 }
 0x226   :  { %2003 = vrot.lane.b32.xlu1 %v1630_v44, %s4306_s30 }
 0x227   :  { %v5944_v57 = vpop.permute.xlu0 %2057  ;;  %v1705_v17 = vsel %vm1688_vm4, %v7676_v33, %v1704_v52  ;;  %v1780_v33 = vsel %vm1763_vm3, %v1777_v49, %v7450_v43  ;;  %v1852_v52 = vrot.slane %v5913_v59, 5 }
 0x228   :  { %7674 = vst [vmem:[#allocation126_spill] sm:$0xff] %v5944_v57  ;;  %v5946_v15 = vpop.permute.xlu1 %2273 }
 0x229   :  { %7675 = vst [vmem:[#allocation127_spill] sm:$0xff] %v5946_v15  ;;  %2114 = vrot.lane.b32.xlu0 %v1707_v42, %s4308_s1  ;;  %v1081_v15 = vpop.f32.mrf.mxu0  ;;  %v1853_v61 = vsel %vm1838_vm6, %v7682_v53, %v1852_v52  ;;  %v1855_v49 = vsel %vm1838_vm6, %v1852_v52, %v7454_v30  ;;  %v1927_v53 = vrot.slane %v5913_v59, 6  ;;  %v7692_v30 = vrot.slane %v5818_v39, 2 }
 0x22a   :  { %2112 = vrot.lane.b32.xlu1 %v1705_v17, %s4308_s1  ;;  %v1436_v26 = vmax.f32 %v1081_v15, %v7681_v34 }
 0x22b   :  { %v5958_v50 = vpop.permute.xlu0 %2166  ;;  %v4121_v16 = vpop.f32.mrf.mxu0 }
 0x22c   :  { %7677 = vst [vmem:[#allocation128_spill] sm:$0xff] %v5958_v50  ;;  %v5960_v57 = vpop.permute.xlu1 %2533 }
 0x22d   :  { %2219 = vrot.lane.b32.xlu0 %v1778_v7, %s4307_s6  ;;  %v7683_v7 = vld [vmem:[#allocation37_spill] sm:$0xff]  ;;  %v1091_v13 = vpop.f32.mrf.mxu0 }
 0x22e   :  { %2221 = vrot.lane.b32.xlu1 %v1780_v33, %s4307_s6  ;;  %v7684_v33 = vld [vmem:[#allocation10_spill] sm:$0xff]  ;;  %v1438_v60 = vmax.f32 %v1091_v13, %v7694_v58 }
 0x22f   :  { %v5972_v50 = vpop.permute.xlu0 %2271  ;;  %v1400_v43 = vmax.f32 %v7684_v33, %v7683_v7  ;;  %v7453_v7 = vrot.slane %v5918_v22, 1  ;;  %v4124_v31 = vpop.f32.mrf.mxu0 }
 0x230   :  { %7679 = vst [vmem:[#allocation129_spill] sm:$0xff] %v5972_v50  ;;  %v5974_v55 = vpop.permute.xlu1 %2059  ;;  %v7685_v50 = vld [vmem:[#allocation25_spill] sm:$0xff]  ;;  %v1441_v21 = vmax.f32 %v4124_v31, %v7698_v6 }
 0x231   :  { %7680 = vst [vmem:[#allocation130_spill] sm:$0xff] %v5974_v55  ;;  %2328 = vrot.lane.b32.xlu0 %v1853_v61, %s4311_s9  ;;  %v1439_v55 = vmax.f32 %v4121_v16, %v7685_v50  ;;  %v1472_v34 = vmax.f32 %v1400_v43, %v1436_v26  ;;  %v1928_v50 = vsel %vm1913_vm5, %v1925_v54, %v1927_v53  ;;  %v1929_v43 = vrot.slane %v5818_v39, 6 }
 0x232   :  { %2330 = vrot.lane.b32.xlu1 %v1855_v49, %s4311_s9 }
 0x233   :  { %v5988_v47 = vpop.permute.xlu0 %1989  ;;  %v1475_v61 = vmax.f32 %v1403_v48, %v1439_v55  ;;  %v1515_v16 = vadd.f32 %v5803_v63, %v1472_v34  ;;  %v1930_v55 = vsel %vm1913_vm5, %v1927_v53, %v1929_v43  ;;  %v7691_v53 = vrot.slane %v5818_v39, 1 }
 0x234   :  { %v5990_v15 = vpop.permute.xlu1 %2168 }
 0x235   :  { %7686 = vst [vmem:[#allocation24_spill] sm:$0xff] %v5990_v15  ;;  %2651 = vrot.lane.b32.xlu0 %v1632_v37, %s4310_s8  ;;  %v1518_v28 = vadd.f32 %v5803_v63, %v1475_v61  ;;  %v6011_v48 = vmax.f32 %v1515_v16, 0.0 }
 0x236   :  { %2649 = vrot.lane.b32.xlu1 %v1630_v44, %s4310_s8 }
 0x237   :  { %v5997_v52 = vpop.permute.xlu0 %2098  ;;  %v6016_v54 = vmax.f32 %v1518_v28, 0.0  ;;  %v1708_v16 = vrot.slane %v6011_v48, 2 }
 0x238   :  { %v5999_v49 = vpop.permute.xlu1 %2277 }
 0x239   :  { %7689 = vst [vmem:[#allocation37_spill] sm:$0xff] %v5999_v49  ;;  %2437 = vrot.lane.b32.xlu0 %v1928_v50, %s4309_s7  ;;  %v7458_v50 = vrot.slane %v5918_v22, 2  ;;  %v7467_v49 = vrot.slane %v5918_v22, 4 }
 0x23a   :  { %2757 = vrot.lane.b32.xlu1 %v1705_v17, %s4312_s10  ;;  %v1633_v17 = vrot.slane %v6011_v48, 1 }
 0x23b   :  { %v6007_v24 = vpop.permute.xlu0 %2275 }
 0x23c   :  { %7690 = vst [vmem:[#allocation10_spill] sm:$0xff] %v6007_v24  ;;  %v6009_v26 = vpop.permute.xlu1 %2537  ;;  %v1634_v61 = vsel %vm1613_vm2, %v7691_v53, %v1633_v17  ;;  %v1781_v53 = vrot.slane %v6011_v48, 4 }
 0x23d   :  { %2439 = vrot.lane.b32.xlu0 %v1930_v55, %s4309_s7 }
 0x23e   :  { %2759 = vrot.lane.b32.xlu1 %v1707_v42, %s4312_s10  ;;  %v1636_v42 = vsel %vm1613_vm2, %v1633_v17, %v7453_v7  ;;  %v1711_v7 = vsel %vm1688_vm4, %v1708_v16, %v7458_v50  ;;  %v1709_v17 = vsel %vm1688_vm4, %v7692_v30, %v1708_v16  ;;  %v1782_v50 = vsel %vm1763_vm3, %v7693_v56, %v1781_v53 }
 0x23f   :  { %v6018_v37 = vpop.permute.xlu0 %1991  ;;  %v1784_v30 = vsel %vm1763_vm3, %v1781_v53, %v7467_v49  ;;  %v1856_v16 = vrot.slane %v6011_v48, 5  ;;  %v7695_v56 = vrot.slane %v5818_v39, 5 }
 0x240   :  { %v6020_v44 = vpop.permute.xlu1 %1993 }
 0x241   :  { %2547 = vrot.lane.b32.xlu0 %v6011_v48, %s4305_s29  ;;  %v1857_v3 = vsel %vm1838_vm6, %v7695_v56, %v1856_v16  ;;  %v1859_v53 = vsel %vm1838_vm6, %v1856_v16, %v7479_v11  ;;  %v1931_v56 = vrot.slane %v6011_v48, 6  ;;  %v7486_v11 = vrot.slane %v6016_v54, 4 }
 0x242   :  { %2553 = vrot.lane.b32.xlu1 %v6016_v54, %s4305_s29 }
 0x243   :  { %v6028_v33 = vpop.permute.xlu0 %2102  ;;  %v1932_v31 = vsel %vm1913_vm5, %v1929_v43, %v1931_v56 }
 0x244   :  { %v6030_v34 = vpop.permute.xlu1 %2100 }
 0x245   :  { %2009 = vrot.lane.b32.xlu0 %v1636_v42, %s4306_s30 }
 0x246   :  { %2007 = vrot.lane.b32.xlu1 %v1634_v61, %s4306_s30 }
 0x247   :  { %v6042_v28 = vpop.permute.xlu0 %2207 }
 0x248   :  { %v6044_v55 = vpop.permute.xlu1 %2209 }
 0x249   :  { %2118 = vrot.lane.b32.xlu0 %v1711_v7, %s4308_s1 }
 0x24a   :  { %2116 = vrot.lane.b32.xlu1 %v1709_v17, %s4308_s1 }
 0x24b   :  { %v6056_v24 = vpop.permute.xlu0 %2316 }
 0x24c   :  { %v6058_v15 = vpop.permute.xlu1 %2318 }
 0x24d   :  { %2223 = vrot.lane.b32.xlu0 %v1782_v50, %s4307_s6  ;;  %v7696_v50 = vld [vmem:[#allocation40_spill] sm:$0xff] }
 0x24e   :  { %2225 = vrot.lane.b32.xlu1 %v1784_v30, %s4307_s6  ;;  %v7697_v30 = vld [vmem:[#allocation12_spill] sm:$0xff] }
 0x24f   :  { %v6070_v14 = vpop.permute.xlu0 %2427  ;;  %v1402_v49 = vmax.f32 %v7697_v30, %v7696_v50  ;;  %v7476_v50 = vrot.slane %v6016_v54, 1 }
 0x250   :  { %v2426_v5 = vpop.permute.xlu1 %2425 }
 0x251   :  { %2332 = vrot.lane.b32.xlu0 %v1857_v3, %s4311_s9  ;;  %v1474_v13 = vmax.f32 %v1402_v49, %v1438_v60  ;;  %v1477_v3 = vmax.f32 %v1405_v46, %v1441_v21  ;;  %v7477_v60 = vrot.slane %v5918_v22, 6 }
 0x252   :  { %2334 = vrot.lane.b32.xlu1 %v1859_v53, %s4311_s9 }
 0x253   :  { %v6084_v40 = vpop.permute.xlu0 %2535  ;;  %v1517_v6 = vadd.f32 %v5803_v63, %v1474_v13  ;;  %v1520_v4 = vadd.f32 %v5803_v63, %v1477_v3  ;;  %v1934_v46 = vsel %vm1913_vm5, %v1931_v56, %v7477_v60 }
 0x254   :  { %v6086_v58 = vpop.permute.xlu1 %2541 }
 0x255   :  { %2655 = vrot.lane.b32.xlu0 %v1636_v42, %s4310_s8  ;;  %v6107_v21 = vmax.f32 %v1517_v6, 0.0  ;;  %v6114_v43 = vmax.f32 %v1520_v4, 0.0 }
 0x256   :  { %2653 = vrot.lane.b32.xlu1 %v1634_v61, %s4310_s8 }
 0x257   :  { %v6093_v16 = vpop.permute.xlu0 %1997  ;;  %v1712_v56 = vrot.slane %v6107_v21, 2 }
 0x258   :  { %v6095_v53 = vpop.permute.xlu1 %1995 }
 0x259   :  { %2441 = vrot.lane.b32.xlu0 %v1932_v31, %s4309_s7  ;;  %v7701_v31 = vrot.slane %v5918_v22, 1 }
 0x25a   :  { %2761 = vrot.lane.b32.xlu1 %v1709_v17, %s4312_s10  ;;  %v1637_v17 = vrot.slane %v6107_v21, 1 }
 0x25b   :  { %v6103_v27 = vpop.permute.xlu0 %2106 }
 0x25c   :  { %v6105_v49 = vpop.permute.xlu1 %2104  ;;  %v1640_v6 = vsel %vm1613_vm2, %v1637_v17, %v7476_v50  ;;  %v1638_v4 = vsel %vm1613_vm2, %v7701_v31, %v1637_v17  ;;  %v7702_v17 = vrot.slane %v5918_v22, 2  ;;  %v1785_v31 = vrot.slane %v6107_v21, 4 }
 0x25d   :  { %2443 = vrot.lane.b32.xlu0 %v1934_v46, %s4309_s7  ;;  %v7478_v46 = vrot.slane %v6016_v54, 2 }
 0x25e   :  { %2763 = vrot.lane.b32.xlu1 %v1711_v7, %s4312_s10  ;;  %v2858_v7 = vsel %vm2857_vm7, %v5493_v36, %v5988_v47 }
 0x25f   :  { %v6116_v42 = vpop.permute.xlu0 %2211  ;;  %v2895_v3 = vsel %vm2894_vm8, %v2858_v7, %v5997_v52 }
 0x260   :  { %v6118_v61 = vpop.permute.xlu1 %2213  ;;  %v2932_v47 = vsel %vm2931_vm9, %v2895_v3, %v6042_v28  ;;  %v1715_v28 = vsel %vm1688_vm4, %v1712_v56, %v7478_v46  ;;  %v1713_v3 = vsel %vm1688_vm4, %v7702_v17, %v1712_v56 }
 0x261   :  { %2551 = vrot.lane.b32.xlu0 %v6107_v21, %s4305_s29  ;;  %v2969_v52 = vsel %vm2968_vm11, %v2932_v47, %v6056_v24  ;;  %v2859_v24 = vsel %vm2857_vm7, %v5521_v41, %v6018_v37 }
 0x262   :  { %2557 = vrot.lane.b32.xlu1 %v6114_v43, %s4305_s29  ;;  %v3006_v7 = vsel %vm3005_vm10, %v2969_v52, %v2426_v5  ;;  %v1101_v5 = vpop.f32.mrf.mxu0  ;;  %v2896_v47 = vsel %vm2894_vm8, %v2859_v24, %v6030_v34  ;;  %v7703_v34 = vrot.slane %v5918_v22, 4  ;;  %v7704_v24 = vld [vmem:[#allocation32_spill] sm:$0xff] }
 0x263   :  { %v6129_v30 = vpop.permute.xlu0 %2320  ;;  %v3043_v52 = vsel %vm3042_vm12, %v3006_v7, %v5960_v57  ;;  %v2933_v56 = vsel %vm2931_vm9, %v2896_v47, %v6044_v55  ;;  %v1860_v7 = vrot.slane %v6107_v21, 5  ;;  %v1440_v55 = vmax.f32 %v1101_v5, %v7704_v24 }
 0x264   :  { %v6131_v13 = vpop.permute.xlu1 %2322  ;;  %v2970_v41 = vsel %vm2968_vm11, %v2933_v56, %v6058_v15  ;;  %v1786_v57 = vsel %vm1763_vm3, %v7703_v34, %v1785_v31  ;;  %v1788_v15 = vsel %vm1763_vm3, %v1785_v31, %v7486_v11  ;;  %v7706_v56 = vld [vmem:[#allocation14_spill] sm:$0xff]  ;;  %v7707_v34 = vrot.slane %v5918_v22, 5 }
 0x265   :  { %2013 = vrot.lane.b32.xlu0 %v1640_v6, %s4306_s30  ;;  %v2861_v11 = vsel %vm2857_vm7, %v5504_v51, %v6095_v53 }
 0x266   :  { %2011 = vrot.lane.b32.xlu1 %v1638_v4, %s4306_s30  ;;  %v1861_v31 = vsel %vm1838_vm6, %v7707_v34, %v1860_v7 }
 0x267   :  { %v2644_v50 = vpop.permute.xlu0 %2643 }
 0x268   :  { %v2642_v60 = vpop.permute.xlu1 %2641 }
 0x269   :  { %2122 = vrot.lane.b32.xlu0 %v1715_v28, %s4308_s1  ;;  %v3080_v17 = vsel %vm3079_vm13, %v3043_v52, %v2642_v60  ;;  %v3007_v60 = vsel %vm3005_vm10, %v2970_v41, %v6070_v14  ;;  %v7705_v52 = vld [vmem:[#allocation42_spill] sm:$0xff]  ;;  %v7485_v41 = vrot.slane %v6016_v54, 5 }
 0x26a   :  { %2120 = vrot.lane.b32.xlu1 %v1713_v3, %s4308_s1  ;;  %v3044_v47 = vsel %vm3042_vm12, %v3007_v60, %v6084_v40  ;;  %v4127_v60 = vpop.f32.mrf.mxu0 }
 0x26b   :  { %v6169_v46 = vpop.permute.xlu0 %2429  ;;  %v3081_v5 = vsel %vm3079_vm13, %v3044_v47, %v2644_v50  ;;  %v1863_v40 = vsel %vm1838_vm6, %v1860_v7, %v7485_v41  ;;  %v7487_v41 = vrot.slane %v6114_v43, 1 }
 0x26c   :  { %v2750_v37 = vpop.permute.xlu1 %2749 }
 0x26d   :  { %v3117_v36 = vsel %vm3116_vm14, %v3080_v17, %v2750_v37  ;;  %2227 = vrot.lane.b32.xlu0 %v1786_v57, %s4307_s6  ;;  %v1404_v17 = vmax.f32 %v7706_v56, %v7705_v52 }
 0x26e   :  { %4233 = vmatprep.mubr.msk.f32.mxu1 %vm3172_vm15, %v3117_v36  ;;  %2229 = vrot.lane.b32.xlu1 %v1788_v15, %s4307_s6  ;;  %v1935_v15 = vrot.slane %v6107_v21, 6 }
 0x26f   :  { %v6193_v37 = vpop.permute.xlu0 %2431  ;;  %v1476_v57 = vmax.f32 %v1404_v17, %v1440_v55  ;;  %v7708_v55 = vld [vmem:[#allocation35_spill] sm:$0xff]  ;;  %v7709_v17 = vrot.slane %v5918_v22, 6 }
 0x270   :  { %v2752_v14 = vpop.permute.xlu1 %2751  ;;  %v1443_v52 = vmax.f32 %v4127_v60, %v7708_v55 }
 0x271   :  { %v3118_v36 = vsel %vm3116_vm14, %v3081_v5, %v2752_v14  ;;  %2336 = vrot.lane.b32.xlu0 %v1861_v31, %s4311_s9  ;;  %v1519_v47 = vadd.f32 %v5803_v63, %v1476_v57  ;;  %v1936_v5 = vsel %vm1913_vm5, %v7709_v17, %v1935_v15  ;;  %v7710_v14 = vld [vmem:[#allocation43_spill] sm:$0xff] }
 0x272   :  { %4234 = vmatmul.mubr.msk.f32.vlgmr.msra.gmra.mxu1 %vm3172_vm15, %v3118_v36  ;;  %2338 = vrot.lane.b32.xlu1 %v1863_v40, %s4311_s9  ;;  %v7711_v36 = vld [vmem:[#allocation15_spill] sm:$0xff] }
 0x273   :  { %v6206_v50 = vpop.permute.xlu0 %2539  ;;  %v1407_v34 = vmax.f32 %v7711_v36, %v7710_v14  ;;  %v6224_v31 = vmax.f32 %v1519_v47, 0.0 }
 0x274   :  { %v6208_v24 = vpop.permute.xlu1 %2545 }
 0x275   :  { %2659 = vrot.lane.b32.xlu0 %v1640_v6, %s4310_s8  ;;  %v7484_v6 = vrot.slane %v6016_v54, 6  ;;  %v1641_v47 = vrot.slane %v6224_v31, 1 }
 0x276   :  { %2657 = vrot.lane.b32.xlu1 %v1638_v4, %s4310_s8  ;;  %v1479_v4 = vmax.f32 %v1407_v34, %v1443_v52  ;;  %v7712_v52 = vrot.slane %v6016_v54, 1 }
 0x277   :  { %v6215_v56 = vpop.permute.xlu0 %2001  ;;  %v1938_v60 = vsel %vm1913_vm5, %v1935_v15, %v7484_v6  ;;  %v1716_v15 = vrot.slane %v6224_v31, 2  ;;  %v1789_v6 = vrot.slane %v6224_v31, 4 }
 0x278   :  { %v6217_v7 = vpop.permute.xlu1 %1999  ;;  %v1522_v55 = vadd.f32 %v5803_v63, %v1479_v4 }
 0x279   :  { %2445 = vrot.lane.b32.xlu0 %v1936_v5, %s4309_s7  ;;  %v1642_v5 = vsel %vm1613_vm2, %v7712_v52, %v1641_v47 }
 0x27a   :  { %2765 = vrot.lane.b32.xlu1 %v1713_v3, %s4312_s10  ;;  %v6251_v14 = vmax.f32 %v1522_v55, 0.0  ;;  %v7713_v55 = vrot.slane %v6016_v54, 2 }
 0x27b   :  { %v6229_v57 = vpop.permute.xlu0 %2110 }
 0x27c   :  { %v6231_v40 = vpop.permute.xlu1 %2108  ;;  %v1717_v52 = vsel %vm1688_vm4, %v7713_v55, %v1716_v15  ;;  %v1644_v55 = vsel %vm1613_vm2, %v1641_v47, %v7487_v41  ;;  %v7492_v47 = vrot.slane %v6114_v43, 2 }
 0x27d   :  { %2447 = vrot.lane.b32.xlu0 %v1938_v60, %s4309_s7 }
 0x27e   :  { %2767 = vrot.lane.b32.xlu1 %v1715_v28, %s4312_s10  ;;  %v2860_v28 = vsel %vm2857_vm7, %v5562_v2, %v6020_v44  ;;  %v7490_v2 = vrot.slane %v6114_v43, 5 }
 0x27f   :  { %v6240_v3 = vpop.permute.xlu0 %2215  ;;  %v2897_v4 = vsel %vm2894_vm8, %v2860_v28, %v6028_v33 }
 0x280   :  { %v6242_v17 = vpop.permute.xlu1 %2217  ;;  %v2934_v60 = vsel %vm2931_vm9, %v2897_v4, %v6116_v42  ;;  %v7488_v4 = vrot.slane %v6114_v43, 4 }
 0x281   :  { %2555 = vrot.lane.b32.xlu0 %v6224_v31, %s4305_s29  ;;  %v2971_v44 = vsel %vm2968_vm11, %v2934_v60, %v6129_v30  ;;  %v2898_v60 = vsel %vm2894_vm8, %v2861_v11, %v6105_v49 }
 0x282   :  { %2015 = vrot.lane.b32.xlu1 %v1642_v5, %s4306_s30  ;;  %v3008_v33 = vsel %vm3005_vm10, %v2971_v44, %v6169_v46  ;;  %v1792_v30 = vsel %vm1763_vm3, %v1789_v6, %v7488_v4  ;;  %v1864_v46 = vrot.slane %v6224_v31, 5  ;;  %v2935_v51 = vsel %vm2931_vm9, %v2898_v60, %v6118_v61 }
 0x283   :  { %v6256_v36 = vpop.permute.xlu0 %2324  ;;  %v3045_v44 = vsel %vm3042_vm12, %v3008_v33, %v6009_v26  ;;  %v2972_v11 = vsel %vm2968_vm11, %v2935_v51, %v6131_v13  ;;  %v1719_v26 = vsel %vm1688_vm4, %v1716_v15, %v7492_v47  ;;  %v7715_v51 = vrot.slane %v6016_v54, 5 }
 0x284   :  { %v6258_v34 = vpop.permute.xlu1 %2326  ;;  %v3009_v33 = vsel %vm3005_vm10, %v2972_v11, %v6193_v37  ;;  %v1867_v61 = vsel %vm1838_vm6, %v1864_v46, %v7490_v2  ;;  %v2863_v47 = vsel %vm2857_vm7, %v5571_v10, %v6217_v7 }
 0x285   :  { %2561 = vrot.lane.b32.xlu0 %v6251_v14, %s4305_s29  ;;  %v3046_v13 = vsel %vm3042_vm12, %v3009_v33, %v6206_v50 }
 0x286   :  { %2124 = vrot.lane.b32.xlu1 %v1717_v52, %s4308_s1 }
 0x287   :  { %v2648_v42 = vpop.permute.xlu0 %2647 }
 0x288   :  { %v2646_v28 = vpop.permute.xlu1 %2645 }
 0x289   :  { %2017 = vrot.lane.b32.xlu0 %v1644_v55, %s4306_s30  ;;  %v3082_v53 = vsel %vm3079_vm13, %v3045_v44, %v2646_v28  ;;  %v3083_v28 = vsel %vm3079_vm13, %v3046_v13, %v2648_v42  ;;  %v1111_v42 = vpop.f32.mrf.mxu0  ;;  %v7718_v13 = vld [vmem:[#allocation16_spill] sm:$0xff] }
 0x28a   :  { %2233 = vrot.lane.b32.xlu1 %v1792_v30, %s4307_s6  ;;  %v7714_v30 = vrot.slane %v6016_v54, 4 }
 0x28b   :  { %v6297_v41 = vpop.permute.xlu0 %2433 }
 0x28c   :  { %v2754_v4 = vpop.permute.xlu1 %2753  ;;  %v1790_v60 = vsel %vm1763_vm3, %v7714_v30, %v1789_v6  ;;  %v7716_v6 = vld [vmem:[#allocation38_spill] sm:$0xff]  ;;  %v7719_v30 = vrot.slane %v6016_v54, 6 }
 0x28d   :  { %v3119_v49 = vsel %vm3116_vm14, %v3082_v53, %v2754_v4  ;;  %2126 = vrot.lane.b32.xlu0 %v1719_v26, %s4308_s1  ;;  %v1865_v53 = vsel %vm1838_vm6, %v7715_v51, %v1864_v46  ;;  %v1442_v11 = vmax.f32 %v1111_v42, %v7716_v6  ;;  %v7720_v42 = vld [vmem:[#allocation45_spill] sm:$0xff] }
 0x28e   :  { %4236 = vmatprep.mubr.msk.f32.mxu1 %vm3172_vm15, %v3119_v49  ;;  %2342 = vrot.lane.b32.xlu1 %v1867_v61, %s4311_s9  ;;  %v7717_v61 = vld [vmem:[#allocation44_spill] sm:$0xff]  ;;  %v7721_v51 = vrot.slane %v7720_v42, 1 }
 0x28f   :  { %v6317_v4 = vpop.permute.xlu0 %2435 }
 0x290   :  { %v2756_v15 = vpop.permute.xlu1 %2755 }
 0x291   :  { %v3120_v37 = vsel %vm3116_vm14, %v3083_v28, %v2756_v15  ;;  %2231 = vrot.lane.b32.xlu0 %v1790_v60, %s4307_s6  ;;  %v1406_v28 = vmax.f32 %v7718_v13, %v7717_v61  ;;  %v1647_v15 = vrot.slane %v6251_v14, 1 }
 0x292   :  { %4237 = vmatmul.mubr.msk.f32.gmra.mxu1 %vm3172_vm15, %v3120_v37  ;;  %2661 = vrot.lane.b32.xlu1 %v1642_v5, %s4310_s8  ;;  %v1939_v5 = vrot.slane %v6224_v31, 6 }
 0x293   :  { %v6326_v50 = vpop.permute.xlu0 %2543  ;;  %v1478_v46 = vmax.f32 %v1406_v28, %v1442_v11  ;;  %v7722_v28 = vrot.slane %v7720_v42, 2 }
 0x294   :  { %v6328_v44 = vpop.permute.xlu1 %2549  ;;  %v1940_v60 = vsel %vm1913_vm5, %v7719_v30, %v1939_v5 }
 0x295   :  { %2340 = vrot.lane.b32.xlu0 %v1865_v53, %s4311_s9  ;;  %v1650_v53 = vsel %vm1613_vm2, %v1647_v15, %v7721_v51  ;;  %v1521_v6 = vadd.f32 %v5803_v63, %v1478_v46  ;;  %v2862_v63 = vsel %vm2857_vm7, %v5663_v45, %v6093_v16 }
 0x296   :  { %2769 = vrot.lane.b32.xlu1 %v1717_v52, %s4312_s10 }
 0x297   :  { %v6336_v49 = vpop.permute.xlu0 %2005  ;;  %v6374_v51 = vmax.f32 %v1521_v6, 0.0  ;;  %v7723_v6 = vrot.slane %v7720_v42, 5 }
 0x298   :  { %v6338_v33 = vpop.permute.xlu1 %2003 }
 0x299   :  { %2663 = vrot.lane.b32.xlu0 %v1644_v55, %s4310_s8  ;;  %v1722_v55 = vrot.slane %v6251_v14, 2 }
 0x29a   :  { %2771 = vrot.lane.b32.xlu1 %v1719_v26, %s4312_s10  ;;  %v7491_v26 = vrot.slane %v6114_v43, 6 }
 0x29b   :  { %v6346_v37 = vpop.permute.xlu0 %2114  ;;  %v1725_v30 = vsel %vm1688_vm4, %v1722_v55, %v7722_v28 }
 0x29c   :  { %v6348_v52 = vpop.permute.xlu1 %2112  ;;  %v1942_v13 = vsel %vm1913_vm5, %v1939_v5, %v7491_v26  ;;  %v2899_v5 = vsel %vm2894_vm8, %v2862_v63, %v6103_v27 }
 0x29d   :  { %2449 = vrot.lane.b32.xlu0 %v1940_v60, %s4309_s7  ;;  %v1870_v60 = vrot.slane %v6251_v14, 5  ;;  %v2936_v28 = vsel %vm2931_vm9, %v2899_v5, %v6240_v3  ;;  %v7724_v3 = vrot.slane %v7720_v42, 4 }
 0x29e   :  { %2023 = vrot.lane.b32.xlu1 %v1650_v53, %s4306_s30  ;;  %v2973_v16 = vsel %vm2968_vm11, %v2936_v28, %v6256_v36  ;;  %v2900_v36 = vsel %vm2894_vm8, %v2863_v47, %v6231_v40 }
 0x29f   :  { %v6361_v11 = vpop.permute.xlu0 %2219  ;;  %v1873_v45 = vsel %vm1838_vm6, %v1870_v60, %v7723_v6  ;;  %v3010_v27 = vsel %vm3005_vm10, %v2973_v16, %v6297_v41  ;;  %v1945_v6 = vrot.slane %v6251_v14, 6  ;;  %v2937_v28 = vsel %vm2931_vm9, %v2900_v36, %v6242_v17 }
 0x2a0   :  { %v6363_v61 = vpop.permute.xlu1 %2221  ;;  %v3047_v41 = vsel %vm3042_vm12, %v3010_v27, %v6086_v58  ;;  %v2974_v10 = vsel %vm2968_vm11, %v2937_v28, %v6258_v34  ;;  %v7725_v58 = vrot.slane %v7720_v42, 6  ;;  %v1720_v27 = vrot.slane %v6374_v51, 2 }
 0x2a1   :  { %2451 = vrot.lane.b32.xlu0 %v1942_v13, %s4309_s7  ;;  %v1795_v13 = vrot.slane %v6251_v14, 4  ;;  %v3011_v40 = vsel %vm3005_vm10, %v2974_v10, %v6317_v4  ;;  %v7726_v36 = vrot.slane %v6114_v43, 1 }
 0x2a2   :  { %2132 = vrot.lane.b32.xlu1 %v1725_v30, %s4308_s1  ;;  %v1948_v17 = vsel %vm1913_vm5, %v1945_v6, %v7725_v58  ;;  %v3048_v34 = vsel %vm3042_vm12, %v3011_v40, %v6326_v50  ;;  %v1723_v28 = vsel %vm1688_vm4, %v1720_v27, %v1722_v55  ;;  %v1868_v55 = vrot.slane %v6374_v51, 5 }
 0x2a3   :  { %v6379_v46 = vpop.permute.xlu0 %2328  ;;  %v1798_v5 = vsel %vm1763_vm3, %v1795_v13, %v7724_v3 }
 0x2a4   :  { %v6381_v2 = vpop.permute.xlu1 %2330 }
 0x2a5   :  { %2559 = vrot.lane.b32.xlu0 %v6374_v51, %s4305_s29 }
 0x2a6   :  { %2348 = vrot.lane.b32.xlu1 %v1873_v45, %s4311_s9 }
 0x2a7   :  { %v2652_v63 = vpop.permute.xlu0 %2651 }
 0x2a8   :  { %v2650_v26 = vpop.permute.xlu1 %2649  ;;  %v3085_v47 = vsel %vm3079_vm13, %v3048_v34, %v2652_v63 }
 0x2a9   :  { %2239 = vrot.lane.b32.xlu0 %v1798_v5, %s4307_s6  ;;  %v3084_v45 = vsel %vm3079_vm13, %v3047_v41, %v2650_v26  ;;  %v1645_v5 = vrot.slane %v6374_v51, 1 }
 0x2aa   :  { %2777 = vrot.lane.b32.xlu1 %v1725_v30, %s4312_s10 }
 0x2ab   :  { %v2438_v16 = vpop.permute.xlu0 %2437  ;;  %v1646_v50 = vsel %vm1613_vm2, %v7726_v36, %v1645_v5  ;;  %v2864_v36 = vsel %vm2857_vm7, %v5810_v20, %v6215_v56 }
 0x2ac   :  { %v2758_v3 = vpop.permute.xlu1 %2757 }
 0x2ad   :  { %v3121_v7 = vsel %vm3116_vm14, %v3084_v45, %v2758_v3  ;;  %2669 = vrot.lane.b32.xlu0 %v1650_v53, %s4310_s8  ;;  %v1648_v53 = vsel %vm1613_vm2, %v1645_v5, %v1647_v15  ;;  %v1793_v45 = vrot.slane %v6374_v51, 4  ;;  %v7727_v15 = vrot.slane %v6114_v43, 2 }
 0x2ae   :  { %4239 = vmatprep.mubr.msk.f32.mxu1 %vm3172_vm15, %v3121_v7  ;;  %2457 = vrot.lane.b32.xlu1 %v1948_v17, %s4309_s7  ;;  %v7728_v5 = vrot.slane %v6114_v43, 4 }
 0x2af   :  { %v2440_v26 = vpop.permute.xlu0 %2439  ;;  %v1721_v3 = vsel %vm1688_vm4, %v7727_v15, %v1720_v27  ;;  %v1796_v58 = vsel %vm1763_vm3, %v1793_v45, %v1795_v13  ;;  %v1943_v13 = vrot.slane %v6374_v51, 6 }
 0x2b0   :  { %v2760_v30 = vpop.permute.xlu1 %2759  ;;  %v1794_v40 = vsel %vm1763_vm3, %v7728_v5, %v1793_v45  ;;  %v1871_v5 = vsel %vm1838_vm6, %v1868_v55, %v1870_v60  ;;  %v2865_v60 = vsel %vm2857_vm7, %v5680_v19, %v6338_v33 }
 0x2b1   :  { %v3122_v4 = vsel %vm3116_vm14, %v3085_v47, %v2760_v30  ;;  %2021 = vrot.lane.b32.xlu0 %v1648_v53, %s4306_s30  ;;  %v7729_v47 = vrot.slane %v6114_v43, 5 }
 0x2b2   :  { %4240 = vmatmul.mubr.msk.f32.gmra.mxu1 %vm3172_vm15, %v3122_v4  ;;  %2019 = vrot.lane.b32.xlu1 %v1646_v50, %s4306_s30 }
 0x2b3   :  { %v2548_v41 = vpop.permute.xlu0 %2547  ;;  %v1869_v30 = vsel %vm1838_vm6, %v7729_v47, %v1868_v55  ;;  %v1951_v55 = vrot.slane %v5153_v18, 6  ;;  %v1878_v47 = vrot.slane %v5181_v25, 5 }
 0x2b4   :  { %v6442_v63 = vpop.permute.xlu1 %2553 }
 0x2b5   :  { %2130 = vrot.lane.b32.xlu0 %v1723_v28, %s4308_s1 }
 0x2b6   :  { %2128 = vrot.lane.b32.xlu1 %v1721_v3, %s4308_s1 }
 0x2b7   :  { %v6451_v10 = vpop.permute.xlu0 %2009 }
 0x2b8   :  { %v6453_v7 = vpop.permute.xlu1 %2007 }
 0x2b9   :  { %2235 = vrot.lane.b32.xlu0 %v1794_v40, %s4307_s6 }
 0x2ba   :  { %2237 = vrot.lane.b32.xlu1 %v1796_v58, %s4307_s6 }
 0x2bb   :  { %v6462_v17 = vpop.permute.xlu0 %2118 }
 0x2bc   :  { %v6464_v34 = vpop.permute.xlu1 %2116 }
 0x2bd   :  { %2344 = vrot.lane.b32.xlu0 %v1869_v30, %s4311_s9 }
 0x2be   :  { %2665 = vrot.lane.b32.xlu1 %v1646_v50, %s4310_s8  ;;  %v2901_v50 = vsel %vm2894_vm8, %v2864_v36, %v6229_v57 }
 0x2bf   :  { %v6471_v4 = vpop.permute.xlu0 %2223 }
 0x2c0   :  { %v6473_v27 = vpop.permute.xlu1 %2225 }
 0x2c1   :  { %2667 = vrot.lane.b32.xlu0 %v1648_v53, %s4310_s8  ;;  %v2938_v53 = vsel %vm2931_vm9, %v2901_v50, %v6361_v11  ;;  %v1946_v11 = vsel %vm1913_vm5, %v1943_v13, %v1945_v6 }
 0x2c2   :  { %2773 = vrot.lane.b32.xlu1 %v1721_v3, %s4312_s10  ;;  %v7730_v3 = vrot.slane %v6114_v43, 6  ;;  %v2975_v56 = vsel %vm2968_vm11, %v2938_v53, %v6379_v46  ;;  %v2902_v46 = vsel %vm2894_vm8, %v2865_v60, %v6348_v52  ;;  %v7731_v52 = vrot.slane %v5153_v18, 5 }
 0x2c3   :  { %v6481_v45 = vpop.permute.xlu0 %2332  ;;  %v3012_v57 = vsel %vm3005_vm10, %v2975_v56, %v2438_v16  ;;  %v2939_v19 = vsel %vm2931_vm9, %v2902_v46, %v6363_v61  ;;  %v7732_v61 = vrot.slane %v5122_v32, 6  ;;  %v1955_v46 = vrot.slane %v5200_v38, 6 }
 0x2c4   :  { %v6483_v15 = vpop.permute.xlu1 %2334  ;;  %v1944_v20 = vsel %vm1913_vm5, %v7730_v3, %v1943_v13  ;;  %v3049_v16 = vsel %vm3042_vm12, %v3012_v57, %v6208_v24  ;;  %v2976_v6 = vsel %vm2968_vm11, %v2939_v19, %v6381_v2  ;;  %v1879_v24 = vsel %vm1838_vm6, %v7731_v52, %v1878_v47 }
 0x2c5   :  { %2346 = vrot.lane.b32.xlu0 %v1871_v5, %s4311_s9  ;;  %v3013_v36 = vsel %vm3005_vm10, %v2976_v6, %v2440_v26  ;;  %v1952_v50 = vsel %vm1913_vm5, %v7732_v61, %v1951_v55 }
 0x2c6   :  { %2453 = vrot.lane.b32.xlu1 %v1944_v20, %s4309_s7  ;;  %v3050_v5 = vsel %vm3042_vm12, %v3013_v36, %v2548_v41  ;;  %v1953_v20 = vrot.slane %v5181_v25, 6 }
 0x2c7   :  { %v2656_v40 = vpop.permute.xlu0 %2655 }
 0x2c8   :  { %v2654_v58 = vpop.permute.xlu1 %2653  ;;  %v3087_v2 = vsel %vm3079_vm13, %v3050_v5, %v2656_v40  ;;  %v1954_v56 = vsel %vm1913_vm5, %v1951_v55, %v1953_v20  ;;  %v1880_v40 = vrot.slane %v5200_v38, 5 }
 0x2c9   :  { %2775 = vrot.lane.b32.xlu0 %v1723_v28, %s4312_s10  ;;  %v3086_v33 = vsel %vm3079_vm13, %v3049_v16, %v2654_v58  ;;  %v1882_v16 = vrot.slane %v5228_v23, 5 }
 0x2ca   :  { %2455 = vrot.lane.b32.xlu1 %v1946_v11, %s4309_s7  ;;  %v1881_v60 = vsel %vm1838_vm6, %v1878_v47, %v1880_v40 }
 0x2cb   :  { %v2442_v28 = vpop.permute.xlu0 %2441  ;;  %v1883_v47 = vsel %vm1838_vm6, %v1880_v40, %v1882_v16 }
 0x2cc   :  { %v2762_v30 = vpop.permute.xlu1 %2761 }
 0x2cd   :  { %v3123_v13 = vsel %vm3116_vm14, %v3086_v33, %v2762_v30  ;;  %2354 = vrot.lane.b32.xlu0 %v1879_v24, %s4311_s9  ;;  %v1956_v33 = vsel %vm1913_vm5, %v1953_v20, %v1955_v46  ;;  %v1957_v30 = vrot.slane %v5228_v23, 6 }
 0x2ce   :  { %4242 = vmatprep.mubr.msk.f32.mxu1 %vm3172_vm15, %v3123_v13  ;;  %2461 = vrot.lane.b32.xlu1 %v1952_v50, %s4309_s7 }
 0x2cf   :  { %v2444_v53 = vpop.permute.xlu0 %2443  ;;  %v1958_v52 = vsel %vm1913_vm5, %v1955_v46, %v1957_v30 }
 0x2d0   :  { %v2764_v3 = vpop.permute.xlu1 %2763 }
 0x2d1   :  { %v3124_v26 = vsel %vm3116_vm14, %v3087_v2, %v2764_v3  ;;  %2783 = vrot.lane.b32.xlu0 %v5204_v12, %s4312_s10 }
 0x2d2   :  { %4243 = vmatmul.mubr.msk.f32.gmra.mxu1 %vm3172_vm15, %v3124_v26  ;;  %2463 = vrot.lane.b32.xlu1 %v1954_v56, %s4309_s7  ;;  %v7734_v56 = vld [vmem:[#allocation46_spill] sm:$0xff] }
 0x2d3   :  { %v2552_v41 = vpop.permute.xlu0 %2551  ;;  %v1886_v40 = vrot.slane %v7734_v56, 5 }
 0x2d4   :  { %v6539_v57 = vpop.permute.xlu1 %2557 }
 0x2d5   :  { %2569 = vrot.lane.b32.xlu0 %v5181_v25, %s4305_s29 }
 0x2d6   :  { %2571 = vrot.lane.b32.xlu1 %v5200_v38, %s4305_s29 }
 0x2d7   :  { %v6546_v58 = vpop.permute.xlu0 %2013 }
 0x2d8   :  { %v6548_v12 = vpop.permute.xlu1 %2011 }
 0x2d9   :  { %2677 = vrot.lane.b32.xlu0 %v5222_v35, %s4310_s8 }
 0x2da   :  { %2356 = vrot.lane.b32.xlu1 %v1881_v60, %s4311_s9 }
 0x2db   :  { %v6554_v11 = vpop.permute.xlu0 %2122 }
 0x2dc   :  { %v6556_v55 = vpop.permute.xlu1 %2120 }
 0x2dd   :  { %2679 = vrot.lane.b32.xlu0 %v5246_v8, %s4310_s8 }
 0x2de   :  { %2785 = vrot.lane.b32.xlu1 %v5236_v0, %s4312_s10  ;;  %v2866_v0 = vsel %vm2857_vm7, %v5913_v59, %v6336_v49 }
 0x2df   :  { %v6564_v19 = vpop.permute.xlu0 %2227  ;;  %v2903_v13 = vsel %vm2894_vm8, %v2866_v0, %v6346_v37  ;;  %v1884_v37 = vrot.slane %v5232_v9, 5  ;;  %v7735_v0 = vld [vmem:[#allocation49_spill] sm:$0xff] }
 0x2e0   :  { %v6566_v35 = vpop.permute.xlu1 %2229  ;;  %v2940_v24 = vsel %vm2931_vm9, %v2903_v13, %v6471_v4 }
 0x2e1   :  { %2358 = vrot.lane.b32.xlu0 %v1883_v47, %s4311_s9  ;;  %v2977_v36 = vsel %vm2968_vm11, %v2940_v24, %v6481_v45  ;;  %v1887_v46 = vsel %vm1838_vm6, %v1884_v37, %v1886_v40  ;;  %v1961_v47 = vrot.slane %v7734_v56, 6 }
 0x2e2   :  { %2465 = vrot.lane.b32.xlu1 %v1956_v33, %s4309_s7  ;;  %v3014_v59 = vsel %vm3005_vm10, %v2977_v36, %v2442_v28 }
 0x2e3   :  { %v6572_v8 = vpop.permute.xlu0 %2336  ;;  %v3051_v45 = vsel %vm3042_vm12, %v3014_v59, %v6328_v44  ;;  %v2868_v59 = vsel %vm2857_vm7, %v6011_v48, %v6451_v10 }
 0x2e4   :  { %v6578_v6 = vpop.permute.xlu1 %2338 }
 0x2e5   :  { %2787 = vrot.lane.b32.xlu0 %v5257_v62, %s4312_s10  ;;  %v2867_v62 = vsel %vm2857_vm7, %v5818_v39, %v6453_v7  ;;  %v1885_v7 = vsel %vm1838_vm6, %v1882_v16, %v1884_v37  ;;  %v2905_v37 = vsel %vm2894_vm8, %v2868_v59, %v6462_v17  ;;  %v7738_v17 = vld [vmem:[#allocation54_spill] sm:$0xff] }
 0x2e6   :  { %2467 = vrot.lane.b32.xlu1 %v1958_v52, %s4309_s7  ;;  %v2904_v4 = vsel %vm2894_vm8, %v2867_v62, %v6464_v34  ;;  %v7737_v62 = vld [vmem:[#allocation50_spill] sm:$0xff] }
 0x2e7   :  { %v2660_v61 = vpop.permute.xlu0 %2659  ;;  %v2941_v50 = vsel %vm2931_vm9, %v2904_v4, %v6473_v27 }
 0x2e8   :  { %v2658_v49 = vpop.permute.xlu1 %2657  ;;  %v2978_v3 = vsel %vm2968_vm11, %v2941_v50, %v6483_v15 }
 0x2e9   :  { %2573 = vrot.lane.b32.xlu0 %v5228_v23, %s4305_s29  ;;  %v3088_v5 = vsel %vm3079_vm13, %v3051_v45, %v2658_v49  ;;  %v3015_v34 = vsel %vm3005_vm10, %v2978_v3, %v2444_v53  ;;  %v7733_v53 = vld [vmem:[#allocation48_spill] sm:$0xff]  ;;  %v2942_v45 = vsel %vm2931_vm9, %v2905_v37, %v6564_v19  ;;  %v2869_v3 = vsel %vm2857_vm7, %v5918_v22, %v6548_v12  ;;  %v7739_v19 = vld [vmem:[#allocation53_spill] sm:$0xff] }
 0x2ea   :  { %2575 = vrot.lane.b32.xlu1 %v5232_v9, %s4305_s29  ;;  %v3052_v44 = vsel %vm3042_vm12, %v3015_v34, %v2552_v41  ;;  %v2979_v50 = vsel %vm2968_vm11, %v2942_v45, %v6572_v8  ;;  %v2906_v8 = vsel %vm2894_vm8, %v2869_v3, %v6556_v55  ;;  %v7743_v37 = vld [vmem:[#allocation56_spill] sm:$0xff] }
 0x2eb   :  { %v2446_v28 = vpop.permute.xlu0 %2445  ;;  %v3089_v20 = vsel %vm3079_vm13, %v3052_v44, %v2660_v61  ;;  %v2943_v44 = vsel %vm2931_vm9, %v2906_v8, %v6566_v35 }
 0x2ec   :  { %v2766_v2 = vpop.permute.xlu1 %2765  ;;  %v3016_v48 = vsel %vm3005_vm10, %v2979_v50, %v2446_v28  ;;  %v2980_v12 = vsel %vm2968_vm11, %v2943_v44, %v6578_v6  ;;  %v7744_v50 = vld [vmem:[#allocation60_spill] sm:$0xff] }
 0x2ed   :  { %v3125_v39 = vsel %vm3116_vm14, %v3088_v5, %v2766_v2  ;;  %2681 = vrot.lane.b32.xlu0 %v5260_v1, %s4310_s8  ;;  %v1959_v1 = vrot.slane %v5232_v9, 6  ;;  %v3053_v28 = vsel %vm3042_vm12, %v3016_v48, %v6442_v63 }
 0x2ee   :  { %4245 = vmatprep.mubr.msk.f32.mxu1 %vm3172_vm15, %v3125_v39  ;;  %2360 = vrot.lane.b32.xlu1 %v1885_v7, %s4311_s9  ;;  %v7740_v39 = vld [vmem:[#allocation51_spill] sm:$0xff] }
 0x2ef   :  { %v2448_v27 = vpop.permute.xlu0 %2447  ;;  %v1960_v16 = vsel %vm1913_vm5, %v1957_v30, %v1959_v1  ;;  %v1962_v13 = vsel %vm1913_vm5, %v1959_v1, %v1961_v47  ;;  %v7736_v30 = vld [vmem:[#allocation47_spill] sm:$0xff]  ;;  %v1890_v7 = vrot.slane %v7740_v39, 5 }
 0x2f0   :  { %v2768_v26 = vpop.permute.xlu1 %2767  ;;  %v1888_v36 = vrot.slane %v7736_v30, 5  ;;  %v1963_v2 = vrot.slane %v7736_v30, 6  ;;  %v3017_v63 = vsel %vm3005_vm10, %v2980_v12, %v2448_v27 }
 0x2f1   :  { %v3126_v15 = vsel %vm3116_vm14, %v3089_v20, %v2768_v26  ;;  %2683 = vrot.lane.b32.xlu0 %v5288_v29, %s4310_s8 }
 0x2f2   :  { %4246 = vmatmul.mubr.msk.f32.gmra.mxu1 %vm3172_vm15, %v3126_v15  ;;  %2789 = vrot.lane.b32.xlu1 %v7733_v53, %s4312_s10  ;;  %v1889_v4 = vsel %vm1838_vm6, %v1886_v40, %v1888_v36  ;;  %v1891_v22 = vsel %vm1838_vm6, %v1888_v36, %v1890_v7  ;;  %v1964_v55 = vsel %vm1913_vm5, %v1961_v47, %v1963_v2  ;;  %v1965_v53 = vrot.slane %v7740_v39, 6 }
 0x2f3   :  { %v2556_v60 = vpop.permute.xlu0 %2555 }
 0x2f4   :  { %v6625_v41 = vpop.permute.xlu1 %2015  ;;  %v3054_v35 = vsel %vm3042_vm12, %v3017_v63, %v2556_v60  ;;  %v1966_v47 = vsel %vm1913_vm5, %v1963_v2, %v1965_v53  ;;  %v7742_v60 = vld [vmem:[#allocation52_spill] sm:$0xff] }
 0x2f5   :  { %2362 = vrot.lane.b32.xlu0 %v1887_v46, %s4311_s9  ;;  %v1967_v48 = vrot.slane %v7742_v60, 6 }
 0x2f6   :  { %2469 = vrot.lane.b32.xlu1 %v1960_v16, %s4309_s7  ;;  %v7741_v16 = vld [vmem:[#allocation55_spill] sm:$0xff] }
 0x2f7   :  { %v6631_v29 = vpop.permute.xlu0 %2561  ;;  %v1968_v8 = vsel %vm1913_vm5, %v1965_v53, %v1967_v48  ;;  %v7749_v53 = vld [vmem:[#allocation62_spill] sm:$0xff] }
 0x2f8   :  { %v6634_v33 = vpop.permute.xlu1 %2124 }
 0x2f9   :  { %2791 = vrot.lane.b32.xlu0 %v7735_v0, %s4312_s10 }
 0x2fa   :  { %2471 = vrot.lane.b32.xlu1 %v1962_v13, %s4309_s7  ;;  %v1892_v13 = vrot.slane %v7742_v60, 5 }
 0x2fb   :  { %v6640_v52 = vpop.permute.xlu0 %2017 }
 0x2fc   :  { %v6642_v24 = vpop.permute.xlu1 %2233 }
 0x2fd   :  { %2577 = vrot.lane.b32.xlu0 %v7734_v56, %s4305_s29 }
 0x2fe   :  { %2579 = vrot.lane.b32.xlu1 %v7736_v30, %s4305_s29 }
 0x2ff   :  { %v6649_v61 = vpop.permute.xlu0 %2126 }
 0x300   :  { %v6654_v49 = vpop.permute.xlu1 %2342 }
 0x301   :  { %2685 = vrot.lane.b32.xlu0 %v7737_v62, %s4310_s8  ;;  %v1893_v62 = vsel %vm1838_vm6, %v1890_v7, %v1892_v13 }
 0x302   :  { %2364 = vrot.lane.b32.xlu1 %v1889_v4, %s4311_s9 }
 0x303   :  { %v6666_v5 = vpop.permute.xlu0 %2231 }
 0x304   :  { %v2662_v10 = vpop.permute.xlu1 %2661 }
 0x305   :  { %2687 = vrot.lane.b32.xlu0 %v7738_v17, %s4310_s8  ;;  %v3090_v20 = vsel %vm3079_vm13, %v3053_v28, %v2662_v10  ;;  %v7745_v10 = vld [vmem:[#allocation59_spill] sm:$0xff]  ;;  %v7746_v17 = vld [vmem:[#allocation57_spill] sm:$0xff] }
 0x306   :  { %2793 = vrot.lane.b32.xlu1 %v7739_v19, %s4312_s10  ;;  %v1894_v2 = vrot.slane %v7746_v17, 5  ;;  %v1969_v44 = vrot.slane %v7746_v17, 6 }
 0x307   :  { %v6682_v34 = vpop.permute.xlu0 %2340 }
 0x308   :  { %v2770_v26 = vpop.permute.xlu1 %2769  ;;  %v1895_v7 = vsel %vm1838_vm6, %v1892_v13, %v1894_v2  ;;  %v7750_v13 = vld [vmem:[#allocation66_spill] sm:$0xff] }
 0x309   :  { %v3127_v15 = vsel %vm3116_vm14, %v3090_v20, %v2770_v26  ;;  %2366 = vrot.lane.b32.xlu0 %v1891_v22, %s4311_s9  ;;  %v7747_v26 = vld [vmem:[#allocation61_spill] sm:$0xff]  ;;  %v1970_v22 = vsel %vm1913_vm5, %v1967_v48, %v1969_v44 }
 0x30a   :  { %4248 = vmatprep.mubr.msk.f32.mxu1 %vm3172_vm15, %v3127_v15  ;;  %2473 = vrot.lane.b32.xlu1 %v1964_v55, %s4309_s7  ;;  %v7748_v55 = vld [vmem:[#allocation58_spill] sm:$0xff]  ;;  %v7751_v48 = vld [vmem:[#allocation65_spill] sm:$0xff] }
 0x30b   :  { %v2664_v1 = vpop.permute.xlu0 %2663  ;;  %v1896_v63 = vrot.slane %v7748_v55, 5 }
 0x30c   :  { %v3091_v40 = vsel %vm3079_vm13, %v3054_v35, %v2664_v1  ;;  %v2772_v6 = vpop.permute.xlu1 %2771 }
 0x30d   :  { %v3128_v46 = vsel %vm3116_vm14, %v3091_v40, %v2772_v6  ;;  %2795 = vrot.lane.b32.xlu0 %v7741_v16, %s4312_s10  ;;  %v1897_v40 = vsel %vm1838_vm6, %v1894_v2, %v1896_v63 }
 0x30e   :  { %4249 = vmatmul.mubr.msk.f32.gmra.mxu1 %vm3172_vm15, %v3128_v46  ;;  %2475 = vrot.lane.b32.xlu1 %v1966_v47, %s4309_s7  ;;  %v2870_v46 = vsel %vm2857_vm7, %v6107_v21, %v6546_v58  ;;  %v7752_v21 = vld [vmem:[#allocation63_spill] sm:$0xff] }
 0x30f   :  { %v2450_v27 = vpop.permute.xlu0 %2449  ;;  %v2907_v47 = vsel %vm2894_vm8, %v2870_v46, %v6554_v11  ;;  %v1898_v58 = vrot.slane %v7752_v21, 5 }
 0x310   :  { %v6705_v0 = vpop.permute.xlu1 %2023 }
 0x311   :  { %2581 = vrot.lane.b32.xlu0 %v7740_v39, %s4305_s29 }
 0x312   :  { %2583 = vrot.lane.b32.xlu1 %v7742_v60, %s4305_s29 }
 0x313   :  { %v6712_v36 = vpop.permute.xlu0 %2451 }
 0x314   :  { %v6714_v59 = vpop.permute.xlu1 %2132 }
 0x315   :  { %2689 = vrot.lane.b32.xlu0 %v7743_v37, %s4310_s8  ;;  %v1971_v37 = vrot.slane %v7748_v55, 6 }
 0x316   :  { %2368 = vrot.lane.b32.xlu1 %v1893_v62, %s4311_s9  ;;  %v2944_v62 = vsel %vm2931_vm9, %v2907_v47, %v6666_v5 }
 0x317   :  { %v6720_v4 = vpop.permute.xlu0 %2559 }
 0x318   :  { %v6722_v45 = vpop.permute.xlu1 %2348 }
 0x319   :  { %2691 = vrot.lane.b32.xlu0 %v7744_v50, %s4310_s8 }
 0x31a   :  { %2797 = vrot.lane.b32.xlu1 %v7745_v10, %s4312_s10  ;;  %v2981_v10 = vsel %vm2968_vm11, %v2944_v62, %v6682_v34  ;;  %v1972_v34 = vsel %vm1913_vm5, %v1969_v44, %v1971_v37 }
 0x31b   :  { %v2240_v3 = vpop.permute.xlu0 %2239  ;;  %v3018_v5 = vsel %vm3005_vm10, %v2981_v10, %v2450_v27  ;;  %v2875_v27 = vsel %vm2857_vm7, %v6251_v14, %v6705_v0  ;;  %v2871_v14 = vsel %vm2857_vm7, %v6016_v54, %v6625_v41  ;;  %v7754_v41 = vld [vmem:[#allocation82_spill] sm:$0xff] }
 0x31c   :  { %v6730_v19 = vpop.permute.xlu1 %2777 }
 0x31d   :  { %2370 = vrot.lane.b32.xlu0 %v1895_v7, %s4311_s9  ;;  %v6781_v7 = vld [vmem:[%s7388_s4] ss:$0 sm:$0xff] }
 0x31e   :  { %2477 = vrot.lane.b32.xlu1 %v1968_v8, %s4309_s7 }
 0x31f   :  { %v6736_v28 = vpop.permute.xlu0 %2669 }
 0x320   :  { %v6739_v20 = vpop.permute.xlu1 %2457 }
 0x321   :  { %2799 = vrot.lane.b32.xlu0 %v7747_v26, %s4312_s10 }
 0x322   :  { %2479 = vrot.lane.b32.xlu1 %v1970_v22, %s4309_s7  ;;  %v1973_v22 = vrot.slane %v7752_v21, 6 }
 0x323   :  { %v2022_v12 = vpop.permute.xlu0 %2021 }
 0x324   :  { %v6745_v15 = vpop.permute.xlu1 %2019  ;;  %v2874_v50 = vsel %vm2857_vm7, %v6374_v51, %v2022_v12  ;;  %v1899_v51 = vsel %vm1838_vm6, %v1896_v63, %v1898_v58  ;;  %v3055_v63 = vsel %vm3042_vm12, %v3018_v5, %v6539_v57  ;;  %v1974_v44 = vsel %vm1913_vm5, %v1971_v37, %v1973_v22 }
 0x325   :  { %2585 = vrot.lane.b32.xlu0 %v7746_v17, %s4305_s29  ;;  %v2872_v57 = vsel %vm2857_vm7, %v6224_v31, %v6640_v52 }
 0x326   :  { %2587 = vrot.lane.b32.xlu1 %v7748_v55, %s4305_s29 }
 0x327   :  { %v2131_v35 = vpop.permute.xlu0 %2130 }
 0x328   :  { %v6752_v1 = vpop.permute.xlu1 %2128  ;;  %v2911_v11 = vsel %vm2894_vm8, %v2874_v50, %v2131_v35  ;;  %v2908_v50 = vsel %vm2894_vm8, %v2871_v14, %v6634_v33  ;;  %v7762_v14 = vld [vmem:[#allocation27_spill] sm:$0xff] }
 0x329   :  { %2693 = vrot.lane.b32.xlu0 %v7749_v53, %s4310_s8  ;;  %v2948_v12 = vsel %vm2931_vm9, %v2911_v11, %v2240_v3  ;;  %v2912_v3 = vsel %vm2894_vm8, %v2875_v27, %v6714_v59  ;;  %v7753_v59 = vld [vmem:[#allocation67_spill] sm:$0xff]  ;;  %v2945_v31 = vsel %vm2931_vm9, %v2908_v50, %v6642_v24  ;;  %v7757_v27 = vld [vmem:[#allocation77_spill] sm:$0xff] }
 0x32a   :  { %2372 = vrot.lane.b32.xlu1 %v1897_v40, %s4311_s9  ;;  %v2985_v0 = vsel %vm2968_vm11, %v2948_v12, %v6722_v45  ;;  %v2949_v52 = vsel %vm2931_vm9, %v2912_v3, %v7754_v41 }
 0x32b   :  { %v2236_v6 = vpop.permute.xlu0 %2235  ;;  %v3022_v10 = vsel %vm3005_vm10, %v2985_v0, %v6739_v20  ;;  %v7755_v20 = vld [vmem:[#allocation64_spill] sm:$0xff] }
 0x32c   :  { %v6761_v16 = vpop.permute.xlu1 %2237  ;;  %v1975_v41 = vrot.slane %v7755_v20, 6 }
 0x32d   :  { %2695 = vrot.lane.b32.xlu0 %v7750_v13, %s4310_s8 }
 0x32e   :  { %2801 = vrot.lane.b32.xlu1 %v7751_v48, %s4312_s10  ;;  %v2909_v48 = vsel %vm2894_vm8, %v2872_v57, %v6649_v61  ;;  %v2982_v61 = vsel %vm2968_vm11, %v2945_v31, %v6654_v49 }
 0x32f   :  { %v2345_v2 = vpop.permute.xlu0 %2344  ;;  %v2946_v33 = vsel %vm2931_vm9, %v2909_v48, %v2236_v6  ;;  %v3019_v5 = vsel %vm3005_vm10, %v2982_v61, %v6712_v36  ;;  %v2873_v6 = vsel %vm2857_vm7, %v6114_v43, %v6745_v15  ;;  %v7765_v48 = vld [vmem:[#allocation72_spill] sm:$0xff]  ;;  %v7769_v61 = vld [vmem:[#allocation5_spill] sm:$0xff] }
 0x330   :  { %v2666_v8 = vpop.permute.xlu1 %2665  ;;  %v2983_v11 = vsel %vm2968_vm11, %v2946_v33, %v2345_v2  ;;  %v1900_v2 = vrot.slane %v7755_v20, 5  ;;  %v2910_v36 = vsel %vm2894_vm8, %v2873_v6, %v6752_v1  ;;  %v7768_v33 = vld [vmem:[#allocation69_spill] sm:$0xff] }
 0x331   :  { %2374 = vrot.lane.b32.xlu0 %v1899_v51, %s4311_s9  ;;  %v3092_v46 = vsel %vm3079_vm13, %v3055_v63, %v2666_v8  ;;  %v7756_v8 = vld [vmem:[#allocation88_spill] sm:$0xff]  ;;  %v2947_v43 = vsel %vm2931_vm9, %v2910_v36, %v6761_v16 }
 0x332   :  { %v4235_v26 = vpop.f32.mrf.mxu1  ;;  %2481 = vrot.lane.b32.xlu1 %v1972_v34, %s4309_s7  ;;  %v2986_v51 = vsel %vm2968_vm11, %v2949_v52, %v7756_v8  ;;  %v7758_v16 = vld [vmem:[#allocation68_spill] sm:$0xff]  ;;  %v7767_v52 = vld [vmem:[#allocation71_spill] sm:$0xff] }
 0x333   :  { %v3356_v35 = vadd.f32 %v4235_v26, %v6781_v7  ;;  %v2668_v53 = vpop.permute.xlu0 %2667  ;;  %v3056_v26 = vsel %vm3042_vm12, %v3019_v5, %v6720_v4  ;;  %v3059_v4 = vsel %vm3042_vm12, %v3022_v10, %v7757_v27 }
 0x334   :  { %v3350_v40 = vpop.f32.mrf.mxu1  ;;  %v2774_v62 = vpop.permute.xlu1 %2773  ;;  %v3093_v15 = vsel %vm3079_vm13, %v3056_v26, %v2668_v53  ;;  %v7759_v53 = vld [vmem:[#allocation84_spill] sm:$0xff]  ;;  %v7770_v26 = vld [vmem:[#allocation81_spill] sm:$0xff] }
 0x335   :  { %v3530_v47 = vmax.f32 %v3356_v35, 0.0  ;;  %v3351_v13 = vadd.f32 %v6781_v7, %v3350_v40  ;;  %v3129_v37 = vsel %vm3116_vm14, %v3092_v46, %v2774_v62  ;;  %2803 = vrot.lane.b32.xlu0 %v7753_v59, %s4312_s10  ;;  %v3023_v3 = vsel %vm3005_vm10, %v2986_v51, %v7759_v53  ;;  %v7760_v46 = vld [vmem:[#allocation78_spill] sm:$0xff]  ;;  %v7764_v59 = vld [vmem:[#allocation3_spill] sm:$0xff] }
 0x336   :  { %2483 = vrot.lane.b32.xlu1 %v1974_v44, %s4309_s7  ;;  %4251 = vmatprep.mubr.msk.f32.mxu1 %vm3172_vm15, %v3129_v37  ;;  %v7763_v37 = vld [vmem:[#allocation92_spill] sm:$0xff]  ;;  %v3060_v50 = vsel %vm3042_vm12, %v3023_v3, %v7764_v59  ;;  %v1977_v51 = vrot.slane %v7768_v33, 6  ;;  %v2876_v36 = vsel %vm2857_vm7, %v7720_v42, %v7770_v26  ;;  %v7775_v42 = vld [vmem:[#allocation70_spill] sm:$0xff]  ;;  %v7776_v3 = vld [vmem:[#allocation89_spill] sm:$0xff] }
 0x337   :  { %3566 = vst.msk [vmem:[%s7389_s5 + $0x8] sm:$0xff] %vm2894_vm8, %v3530_v47  ;;  %v3529_v54 = vmax.f32 %v3351_v13, 0.0  ;;  %v2347_v45 = vpop.permute.xlu0 %2346  ;;  %v3097_v10 = vsel %vm3079_vm13, %v3060_v50, %v7769_v61  ;;  %v1979_v61 = vrot.slane %v7775_v42, 6 }
 0x338   :  { %v2454_v24 = vpop.permute.xlu1 %2453  ;;  %v2984_v1 = vsel %vm2968_vm11, %v2947_v43, %v2347_v45  ;;  %v1902_v45 = vrot.slane %v7768_v33, 5  ;;  %v7771_v43 = vld [vmem:[#allocation17_spill] sm:$0xff] }
 0x339   :  { %3565 = vst.msk [vmem:[%s7389_s5] sm:$0xff] %vm2894_vm8, %v3529_v54  ;;  %v3020_v49 = vsel %vm3005_vm10, %v2983_v11, %v2454_v24  ;;  %2589 = vrot.lane.b32.xlu0 %v7752_v21, %s4305_s29  ;;  %v7766_v54 = vld [vmem:[#allocation4_spill] sm:$0xff] }
 0x33a   :  { %v3057_v34 = vsel %vm3042_vm12, %v3020_v49, %v6631_v29  ;;  %2591 = vrot.lane.b32.xlu1 %v7755_v20, %s4305_s29  ;;  %v1903_v6 = vsel %vm1838_vm6, %v1900_v2, %v1902_v45  ;;  %v1976_v49 = vsel %vm1913_vm5, %v1973_v22, %v1975_v41 }
 0x33b   :  { %v2776_v12 = vpop.permute.xlu0 %2775  ;;  %v3094_v35 = vsel %vm3079_vm13, %v3057_v34, %v6736_v28  ;;  %v1901_v28 = vsel %vm1838_vm6, %v1898_v58, %v1900_v2  ;;  %v2913_v2 = vsel %vm2894_vm8, %v2876_v36, %v7771_v43 }
 0x33c   :  { %v3130_v63 = vsel %vm3116_vm14, %v3093_v15, %v2776_v12  ;;  %v2456_v29 = vpop.permute.xlu1 %2455  ;;  %v3131_v40 = vsel %vm3116_vm14, %v3094_v35, %v6730_v19  ;;  %v7761_v19 = vld [vmem:[#allocation19_spill] sm:$0xff]  ;;  %v7772_v15 = vld [vmem:[#allocation73_spill] sm:$0xff]  ;;  %v1978_v12 = vsel %vm1913_vm5, %v1975_v41, %v1977_v51  ;;  %v7773_v35 = vld [vmem:[#allocation28_spill] sm:$0xff] }
 0x33d   :  { %v3021_v44 = vsel %vm3005_vm10, %v2984_v1, %v2456_v29  ;;  %2697 = vrot.lane.b32.xlu0 %v7758_v16, %s4310_s8  ;;  %4252 = vmatmul.mubr.msk.f32.gmra.mxu1 %vm3172_vm15, %v3130_v63  ;;  %v3096_v13 = vsel %vm3079_vm13, %v3059_v4, %v7761_v19  ;;  %v2950_v22 = vsel %vm2931_vm9, %v2913_v2, %v7773_v35  ;;  %v7774_v1 = vld [vmem:[#allocation99_spill] sm:$0xff]  ;;  %v1904_v29 = vrot.slane %v7775_v42, 5  ;;  %v7777_v19 = vld [vmem:[#allocation74_spill] sm:$0xff] }
 0x33e   :  { %v3058_v47 = vsel %vm3042_vm12, %v3021_v44, %v7760_v46  ;;  %2376 = vrot.lane.b32.xlu1 %v1901_v28, %s4311_s9  ;;  %4254 = vmatprep.mubr.msk.f32.mxu1 %vm3172_vm15, %v3131_v40  ;;  %v3133_v31 = vsel %vm3116_vm14, %v3096_v13, %v7766_v54  ;;  %v2987_v63 = vsel %vm2968_vm11, %v2950_v22, %v7774_v1  ;;  %v7784_v22 = vld [vmem:[#allocation94_spill] sm:$0xff] }
 0x33f   :  { %v2355_v62 = vpop.permute.xlu0 %2354  ;;  %v3095_v57 = vsel %vm3079_vm13, %v3058_v47, %v7762_v14  ;;  %v2877_v46 = vsel %vm2857_vm7, %v5122_v32, %v7776_v3  ;;  %v1905_v14 = vsel %vm1838_vm6, %v1902_v45, %v1904_v29  ;;  %v7780_v45 = vld [vmem:[#allocation80_spill] sm:$0xff]  ;;  %v7785_v1 = vld [vmem:[#allocation98_spill] sm:$0xff] }
 0x340   :  { %v2462_v0 = vpop.permute.xlu1 %2461  ;;  %v3132_v58 = vsel %vm3116_vm14, %v3095_v57, %v7763_v37  ;;  %v7778_v57 = vld [vmem:[#allocation93_spill] sm:$0xff] }
 0x341   :  { %2699 = vrot.lane.b32.xlu0 %v7765_v48, %s4310_s8  ;;  %4255 = vmatmul.mubr.msk.f32.gmra.mxu1 %vm3172_vm15, %v3132_v58  ;;  %v3024_v40 = vsel %vm3005_vm10, %v2987_v63, %v2462_v0  ;;  %v2914_v0 = vsel %vm2894_vm8, %v2877_v46, %v7778_v57  ;;  %v7779_v58 = vld [vmem:[#allocation95_spill] sm:$0xff]  ;;  %v7789_v57 = vld [vmem:[#allocation85_spill] sm:$0xff] }
 0x342   :  { %2805 = vrot.lane.b32.xlu1 %v7767_v52, %s4312_s10  ;;  %4257 = vmatprep.mubr.msk.f32.mxu1 %vm3172_vm15, %v3133_v31  ;;  %v2951_v32 = vsel %vm2931_vm9, %v2914_v0, %v7779_v58 }
 0x343   :  { %v2784_v11 = vpop.permute.xlu0 %2783  ;;  %v2988_v48 = vsel %vm2968_vm11, %v2951_v32, %v2355_v62  ;;  %v7781_v62 = vld [vmem:[#allocation76_spill] sm:$0xff]  ;;  %v7791_v32 = vld [vmem:[#allocation103_spill] sm:$0xff] }
 0x344   :  { %v3134_v24 = vsel %vm3116_vm14, %v3097_v10, %v2784_v11  ;;  %v2464_v5 = vpop.permute.xlu1 %2463 }
 0x345   :  { %2378 = vrot.lane.b32.xlu0 %v1903_v6, %s4311_s9  ;;  %4258 = vmatmul.mubr.msk.f32.gmra.mxu1 %vm3172_vm15, %v3134_v24  ;;  %v3025_v52 = vsel %vm3005_vm10, %v2988_v48, %v2464_v5  ;;  %v7782_v24 = vld [vmem:[#allocation75_spill] sm:$0xff] }
 0x346   :  { %2485 = vrot.lane.b32.xlu1 %v1976_v49, %s4309_s7  ;;  %v1906_v6 = vrot.slane %v7782_v24, 5  ;;  %v1981_v2 = vrot.slane %v7782_v24, 6 }
 0x347   :  { %v2570_v8 = vpop.permute.xlu0 %2569 }
 0x348   :  { %v2572_v34 = vpop.permute.xlu1 %2571  ;;  %v3061_v44 = vsel %vm3042_vm12, %v3024_v40, %v2570_v8  ;;  %v1907_v36 = vsel %vm1838_vm6, %v1904_v29, %v1906_v6  ;;  %v1982_v35 = vsel %vm1913_vm5, %v1979_v61, %v1981_v2  ;;  %v7786_v29 = vld [vmem:[#allocation106_spill] sm:$0xff] }
 0x349   :  { %2807 = vrot.lane.b32.xlu0 %v7772_v15, %s4312_s10  ;;  %v3062_v10 = vsel %vm3042_vm12, %v3025_v52, %v2572_v34  ;;  %v1980_v34 = vsel %vm1913_vm5, %v1977_v51, %v1979_v61  ;;  %v7793_v61 = vld [vmem:[#allocation87_spill] sm:$0xff] }
 0x34a   :  { %2487 = vrot.lane.b32.xlu1 %v1978_v12, %s4309_s7  ;;  %v7783_v12 = vld [vmem:[#allocation83_spill] sm:$0xff] }
 0x34b   :  { %v2678_v27 = vpop.permute.xlu0 %2677 }
 0x34c   :  { %v2357_v4 = vpop.permute.xlu1 %2356  ;;  %v3098_v28 = vsel %vm3079_vm13, %v3061_v44, %v2678_v27  ;;  %v2878_v27 = vsel %vm2857_vm7, %v5153_v18, %v7784_v22 }
 0x34d   :  { %2593 = vrot.lane.b32.xlu0 %v7768_v33, %s4305_s29  ;;  %v2915_v51 = vsel %vm2894_vm8, %v2878_v27, %v7785_v1 }
 0x34e   :  { %2595 = vrot.lane.b32.xlu1 %v7775_v42, %s4305_s29  ;;  %v2952_v40 = vsel %vm2931_vm9, %v2915_v51, %v7786_v29  ;;  %v7800_v29 = vld [vmem:[#allocation20_spill] sm:$0xff] }
 0x34f   :  { %v2680_v16 = vpop.permute.xlu0 %2679 }
 0x350   :  { %v2786_v53 = vpop.permute.xlu1 %2785  ;;  %v3099_v5 = vsel %vm3079_vm13, %v3062_v10, %v2680_v16  ;;  %v2989_v16 = vsel %vm2968_vm11, %v2952_v40, %v2357_v4 }
 0x351   :  { %v3135_v47 = vsel %vm3116_vm14, %v3098_v28, %v2786_v53  ;;  %2701 = vrot.lane.b32.xlu0 %v7777_v19, %s4310_s8  ;;  %v7787_v28 = vld [vmem:[#allocation79_spill] sm:$0xff] }
 0x352   :  { %v4238_v13 = vpop.f32.mrf.mxu1  ;;  %2380 = vrot.lane.b32.xlu1 %v1905_v14, %s4311_s9  ;;  %4260 = vmatprep.mubr.msk.f32.mxu1 %vm3172_vm15, %v3135_v47  ;;  %v1909_v53 = vrot.slane %v7787_v28, 5  ;;  %v1984_v52 = vrot.slane %v7787_v28, 6 }
 0x353   :  { %v3366_v37 = vadd.f32 %v4238_v13, %v6781_v7  ;;  %v2359_v59 = vpop.permute.xlu0 %2358  ;;  %v7788_v13 = vld [vmem:[#allocation30_spill] sm:$0xff] }
 0x354   :  { %v3360_v50 = vpop.f32.mrf.mxu1  ;;  %v2466_v41 = vpop.permute.xlu1 %2465  ;;  %v2879_v4 = vsel %vm2857_vm7, %v5181_v25, %v7788_v13  ;;  %v1912_v0 = vsel %vm1838_vm6, %v1906_v6, %v1909_v53 }
 0x355   :  { %v3532_v54 = vmax.f32 %v3366_v37, 0.0  ;;  %v3361_v31 = vadd.f32 %v6781_v7, %v3360_v50  ;;  %2703 = vrot.lane.b32.xlu0 %v7780_v45, %s4310_s8  ;;  %v3026_v3 = vsel %vm3005_vm10, %v2989_v16, %v2466_v41  ;;  %v7790_v37 = vld [vmem:[#allocation101_spill] sm:$0xff]  ;;  %v7792_v41 = vld [vmem:[#allocation86_spill] sm:$0xff] }
 0x356   :  { %2809 = vrot.lane.b32.xlu1 %v7781_v62, %s4312_s10  ;;  %v2916_v58 = vsel %vm2894_vm8, %v2879_v4, %v7790_v37  ;;  %v7802_v4 = vld [vmem:[#allocation105_spill] sm:$0xff]  ;;  %v7804_v37 = vld [vmem:[#allocation107_spill] sm:$0xff] }
 0x357   :  { %3568 = vst.msk [vmem:[%s7389_s5 + $0x18] sm:$0xff] %vm2894_vm8, %v3532_v54  ;;  %v3531_v11 = vmax.f32 %v3361_v31, 0.0  ;;  %v2788_v49 = vpop.permute.xlu0 %2787  ;;  %v2953_v50 = vsel %vm2931_vm9, %v2916_v58, %v7791_v32  ;;  %v7805_v32 = vld [vmem:[#allocation97_spill] sm:$0xff] }
 0x358   :  { %v3136_v8 = vsel %vm3116_vm14, %v3099_v5, %v2788_v49  ;;  %v2468_v26 = vpop.permute.xlu1 %2467  ;;  %v2990_v25 = vsel %vm2968_vm11, %v2953_v50, %v2359_v59  ;;  %v7794_v59 = vld [vmem:[#allocation2_spill] sm:$0xff]  ;;  %v7806_v50 = vld [vmem:[#allocation109_spill] sm:$0xff] }
 0x359   :  { %3567 = vst.msk [vmem:[%s7389_s5 + $0x10] sm:$0xff] %vm2894_vm8, %v3531_v11  ;;  %2382 = vrot.lane.b32.xlu0 %v1907_v36, %s4311_s9  ;;  %4261 = vmatmul.mubr.msk.f32.gmra.mxu1 %vm3172_vm15, %v3136_v8  ;;  %v3027_v31 = vsel %vm3005_vm10, %v2990_v25, %v2468_v26  ;;  %v7795_v5 = vrot.slane %v7794_v59, 5  ;;  %v1987_v8 = vsel %vm1913_vm5, %v1981_v2, %v1984_v52  ;;  %v7799_v2 = vld [vmem:[#allocation104_spill] sm:$0xff] }
 0x35a   :  { %2489 = vrot.lane.b32.xlu1 %v1980_v34, %s4309_s7  ;;  %v7796_v34 = vld [vmem:[#allocation91_spill] sm:$0xff] }
 0x35b   :  { %v2574_v43 = vpop.permute.xlu0 %2573  ;;  %v1910_v49 = vsel %vm1838_vm6, %v1909_v53, %v7795_v5 }
 0x35c   :  { %v2576_v15 = vpop.permute.xlu1 %2575  ;;  %v3063_v18 = vsel %vm3042_vm12, %v3026_v3, %v2574_v43 }
 0x35d   :  { %2811 = vrot.lane.b32.xlu0 %v7783_v12, %s4312_s10  ;;  %v3064_v45 = vsel %vm3042_vm12, %v3027_v31, %v2576_v15  ;;  %v7797_v15 = vrot.slane %v7794_v59, 6 }
 0x35e   :  { %2491 = vrot.lane.b32.xlu1 %v1982_v35, %s4309_s7  ;;  %v7798_v35 = vld [vmem:[#allocation102_spill] sm:$0xff] }
 0x35f   :  { %v2682_v63 = vpop.permute.xlu0 %2681  ;;  %v1985_v12 = vsel %vm1913_vm5, %v1984_v52, %v7797_v15  ;;  %v2880_v22 = vsel %vm2857_vm7, %v5200_v38, %v7798_v35  ;;  %v7807_v52 = vld [vmem:[#allocation100_spill] sm:$0xff] }
 0x360   :  { %v2361_v44 = vpop.permute.xlu1 %2360  ;;  %v3100_v47 = vsel %vm3079_vm13, %v3063_v18, %v2682_v63  ;;  %v2917_v1 = vsel %vm2894_vm8, %v2880_v22, %v7799_v2 }
 0x361   :  { %2597 = vrot.lane.b32.xlu0 %v7782_v24, %s4305_s29  ;;  %v2954_v40 = vsel %vm2931_vm9, %v2917_v1, %v7800_v29  ;;  %v7813_v29 = vld [vmem:[#allocation31_spill] sm:$0xff] }
 0x362   :  { %2599 = vrot.lane.b32.xlu1 %v7787_v28, %s4305_s29  ;;  %v2991_v3 = vsel %vm2968_vm11, %v2954_v40, %v2361_v44 }
 0x363   :  { %v2684_v46 = vpop.permute.xlu0 %2683 }
 0x364   :  { %v2790_v19 = vpop.permute.xlu1 %2789  ;;  %v3101_v10 = vsel %vm3079_vm13, %v3064_v45, %v2684_v46  ;;  %v7801_v46 = vld [vmem:[#allocation90_spill] sm:$0xff] }
 0x365   :  { %v3137_v14 = vsel %vm3116_vm14, %v3100_v47, %v2790_v19  ;;  %2705 = vrot.lane.b32.xlu0 %v7789_v57, %s4310_s8 }
 0x366   :  { %2384 = vrot.lane.b32.xlu1 %v1912_v0, %s4311_s9  ;;  %4263 = vmatprep.mubr.msk.f32.mxu1 %vm3172_vm15, %v3137_v14  ;;  %v2881_v14 = vsel %vm2857_vm7, %v5228_v23, %v7802_v4  ;;  %v7803_v0 = vld [vmem:[#allocation96_spill] sm:$0xff] }
 0x367   :  { %v2363_v48 = vpop.permute.xlu0 %2362  ;;  %v2918_v58 = vsel %vm2894_vm8, %v2881_v14, %v7804_v37 }
 0x368   :  { %v2470_v54 = vpop.permute.xlu1 %2469  ;;  %v2955_v25 = vsel %vm2931_vm9, %v2918_v58, %v7806_v50  ;;  %v7815_v50 = vld [vmem:[#allocation6_spill] sm:$0xff] }
 0x369   :  { %2707 = vrot.lane.b32.xlu0 %v7792_v41, %s4310_s8  ;;  %v3028_v38 = vsel %vm3005_vm10, %v2991_v3, %v2470_v54  ;;  %v2992_v31 = vsel %vm2968_vm11, %v2955_v25, %v2363_v48  ;;  %v2884_v25 = vsel %vm2857_vm7, %v7736_v30, %v7815_v50  ;;  %v7826_v50 = vld [vmem:[#allocation121_spill] sm:$0xff] }
 0x36a   :  { %2813 = vrot.lane.b32.xlu1 %v7793_v61, %s4312_s10  ;;  %v7808_v61 = vld [vmem:[#allocation18_spill] sm:$0xff] }
 0x36b   :  { %v2792_v11 = vpop.permute.xlu0 %2791 }
 0x36c   :  { %v3138_v62 = vsel %vm3116_vm14, %v3101_v10, %v2792_v11  ;;  %v2472_v6 = vpop.permute.xlu1 %2471 }
 0x36d   :  { %2386 = vrot.lane.b32.xlu0 %v1910_v49, %s4311_s9  ;;  %4264 = vmatmul.mubr.msk.f32.gmra.mxu1 %vm3172_vm15, %v3138_v62  ;;  %v3029_v41 = vsel %vm3005_vm10, %v2992_v31, %v2472_v6  ;;  %v7809_v49 = vld [vmem:[#allocation108_spill] sm:$0xff] }
 0x36e   :  { %2493 = vrot.lane.b32.xlu1 %v1987_v8, %s4309_s7  ;;  %v2882_v6 = vsel %vm2857_vm7, %v5232_v9, %v7809_v49  ;;  %v7810_v8 = vld [vmem:[#allocation110_spill] sm:$0xff] }
 0x36f   :  { %v2578_v26 = vpop.permute.xlu0 %2577 }
 0x370   :  { %v2580_v36 = vpop.permute.xlu1 %2579  ;;  %v3065_v47 = vsel %vm3042_vm12, %v3028_v38, %v2578_v26  ;;  %v2919_v26 = vsel %vm2894_vm8, %v2882_v6, %v7810_v8  ;;  %v7819_v6 = vld [vmem:[#allocation113_spill] sm:$0xff] }
 0x371   :  { %2815 = vrot.lane.b32.xlu0 %v7796_v34, %s4312_s10  ;;  %v3066_v45 = vsel %vm3042_vm12, %v3029_v41, %v2580_v36  ;;  %v7811_v34 = vld [vmem:[#allocation112_spill] sm:$0xff]  ;;  %v7817_v41 = vld [vmem:[#allocation118_spill] sm:$0xff] }
 0x372   :  { %v4241_v43 = vpop.f32.mrf.mxu1  ;;  %2495 = vrot.lane.b32.xlu1 %v1985_v12, %s4309_s7 }
 0x373   :  { %v3376_v27 = vadd.f32 %v4241_v43, %v6781_v7  ;;  %v2686_v51 = vpop.permute.xlu0 %2685  ;;  %v2956_v43 = vsel %vm2931_vm9, %v2919_v26, %v7811_v34  ;;  %v7820_v26 = vld [vmem:[#allocation115_spill] sm:$0xff] }
 0x374   :  { %v3370_v63 = vpop.f32.mrf.mxu1  ;;  %v2365_v53 = vpop.permute.xlu1 %2364  ;;  %v3102_v13 = vsel %vm3079_vm13, %v3065_v47, %v2686_v51  ;;  %v7812_v51 = vld [vmem:[#allocation111_spill] sm:$0xff] }
 0x375   :  { %v3534_v16 = vmax.f32 %v3376_v27, 0.0  ;;  %v3371_v28 = vadd.f32 %v6781_v7, %v3370_v63  ;;  %2601 = vrot.lane.b32.xlu0 %v7794_v59, %s4305_s29  ;;  %v2993_v12 = vsel %vm2968_vm11, %v2956_v43, %v2365_v53  ;;  %v2883_v9 = vsel %vm2857_vm7, %v7734_v56, %v7812_v51 }
 0x376   :  { %2603 = vrot.lane.b32.xlu1 %v7801_v46, %s4305_s29  ;;  %v2920_v40 = vsel %vm2894_vm8, %v2883_v9, %v7813_v29  ;;  %v7821_v9 = vld [vmem:[#allocation114_spill] sm:$0xff]  ;;  %v7822_v29 = vld [vmem:[#allocation116_spill] sm:$0xff] }
 0x377   :  { %3570 = vst.msk [vmem:[%s7389_s5 + $0x28] sm:$0xff] %vm2894_vm8, %v3534_v16  ;;  %v3533_v18 = vmax.f32 %v3371_v28, 0.0  ;;  %v2688_v19 = vpop.permute.xlu0 %2687  ;;  %v7814_v16 = vld [vmem:[#allocation21_spill] sm:$0xff] }
 0x378   :  { %v2794_v44 = vpop.permute.xlu1 %2793  ;;  %v3103_v10 = vsel %vm3079_vm13, %v3066_v45, %v2688_v19  ;;  %v2957_v28 = vsel %vm2931_vm9, %v2920_v40, %v7814_v16 }
 0x379   :  { %3569 = vst.msk [vmem:[%s7389_s5 + $0x20] sm:$0xff] %vm2894_vm8, %v3533_v18  ;;  %v3139_v57 = vsel %vm3116_vm14, %v3102_v13, %v2794_v44  ;;  %2709 = vrot.lane.b32.xlu0 %v7803_v0, %s4310_s8 }
 0x37a   :  { %2711 = vrot.lane.b32.xlu1 %v7805_v32, %s4310_s8  ;;  %4266 = vmatprep.mubr.msk.f32.mxu1 %vm3172_vm15, %v3139_v57 }
 0x37b   :  { %v2367_v54 = vpop.permute.xlu0 %2366 }
 0x37c   :  { %v2474_v23 = vpop.permute.xlu1 %2473  ;;  %v2994_v3 = vsel %vm2968_vm11, %v2957_v28, %v2367_v54  ;;  %v7816_v54 = vld [vmem:[#allocation33_spill] sm:$0xff]  ;;  %v7823_v28 = vld [vmem:[#allocation8_spill] sm:$0xff] }
 0x37d   :  { %2817 = vrot.lane.b32.xlu0 %v7807_v52, %s4312_s10  ;;  %v3030_v35 = vsel %vm3005_vm10, %v2993_v12, %v2474_v23  ;;  %v2921_v31 = vsel %vm2894_vm8, %v2884_v25, %v7816_v54 }
 0x37e   :  { %2819 = vrot.lane.b32.xlu1 %v7808_v61, %s4312_s10  ;;  %v2958_v52 = vsel %vm2931_vm9, %v2921_v31, %v7817_v41 }
 0x37f   :  { %v2796_v11 = vpop.permute.xlu0 %2795 }
 0x380   :  { %v3140_v62 = vsel %vm3116_vm14, %v3103_v10, %v2796_v11  ;;  %v2476_v59 = vpop.permute.xlu1 %2475 }
 0x381   :  { %4267 = vmatmul.mubr.msk.f32.gmra.mxu1 %vm3172_vm15, %v3140_v62  ;;  %v3031_v18 = vsel %vm3005_vm10, %v2994_v3, %v2476_v59 }
 0x383   :  { %v2582_v48 = vpop.permute.xlu0 %2581 }
 0x384   :  { %v2584_v5 = vpop.permute.xlu1 %2583  ;;  %v3067_v22 = vsel %vm3042_vm12, %v3030_v35, %v2582_v48 }
 0x385   :  { %v3068_v47 = vsel %vm3042_vm12, %v3031_v18, %v2584_v5  ;;  %v7818_v5 = vld [vmem:[#allocation7_spill] sm:$0xff] }
 0x386   :  { %v2885_v30 = vsel %vm2857_vm7, %v7740_v39, %v7818_v5 }
 0x387   :  { %v2690_v36 = vpop.permute.xlu0 %2689  ;;  %v2922_v8 = vsel %vm2894_vm8, %v2885_v30, %v7819_v6  ;;  %v7828_v30 = vld [vmem:[#allocation22_spill] sm:$0xff] }
 0x388   :  { %v2369_v15 = vpop.permute.xlu1 %2368  ;;  %v3104_v2 = vsel %vm3079_vm13, %v3067_v22, %v2690_v36  ;;  %v2959_v36 = vsel %vm2931_vm9, %v2922_v8, %v7820_v26  ;;  %v7829_v8 = vld [vmem:[#allocation124_spill] sm:$0xff] }
 0x389   :  { %v2995_v61 = vsel %vm2968_vm11, %v2958_v52, %v2369_v15 }
 0x38b   :  { %v2692_v27 = vpop.permute.xlu0 %2691 }
 0x38c   :  { %v2798_v1 = vpop.permute.xlu1 %2797  ;;  %v3105_v19 = vsel %vm3079_vm13, %v3068_v47, %v2692_v27 }
 0x38d   :  { %v3141_v63 = vsel %vm3116_vm14, %v3104_v2, %v2798_v1 }
 0x38e   :  { %4269 = vmatprep.mubr.msk.f32.mxu1 %vm3172_vm15, %v3141_v63  ;;  %v2886_v63 = vsel %vm2857_vm7, %v7742_v60, %v7821_v9 }
 0x38f   :  { %v2371_v53 = vpop.permute.xlu0 %2370  ;;  %v2923_v40 = vsel %vm2894_vm8, %v2886_v63, %v7822_v29 }
 0x390   :  { %v2478_v38 = vpop.permute.xlu1 %2477  ;;  %v2996_v43 = vsel %vm2968_vm11, %v2959_v36, %v2371_v53  ;;  %v2960_v53 = vsel %vm2931_vm9, %v2923_v40, %v7823_v28 }
 0x391   :  { %v3032_v10 = vsel %vm3005_vm10, %v2995_v61, %v2478_v38 }
 0x392   :  { %v4244_v46 = vpop.f32.mrf.mxu1 }
 0x393   :  { %v3386_v56 = vadd.f32 %v4244_v46, %v6781_v7  ;;  %v2800_v13 = vpop.permute.xlu0 %2799 }
 0x394   :  { %v3380_v44 = vpop.f32.mrf.mxu1  ;;  %v3142_v14 = vsel %vm3116_vm14, %v3105_v19, %v2800_v13  ;;  %v2480_v0 = vpop.permute.xlu1 %2479 }
 0x395   :  { %v3536_v4 = vmax.f32 %v3386_v56, 0.0  ;;  %v3381_v57 = vadd.f32 %v6781_v7, %v3380_v44  ;;  %4270 = vmatmul.mubr.msk.f32.gmra.mxu1 %vm3172_vm15, %v3142_v14  ;;  %v3033_v12 = vsel %vm3005_vm10, %v2996_v43, %v2480_v0 }
 0x397   :  { %3572 = vst.msk [vmem:[%s7389_s5 + $0x38] sm:$0xff] %vm2894_vm8, %v3536_v4  ;;  %v3535_v37 = vmax.f32 %v3381_v57, 0.0  ;;  %v2586_v58 = vpop.permute.xlu0 %2585  ;;  %v7824_v4 = vld [vmem:[#allocation117_spill] sm:$0xff] }
 0x398   :  { %v2588_v32 = vpop.permute.xlu1 %2587  ;;  %v3069_v11 = vsel %vm3042_vm12, %v3032_v10, %v2586_v58  ;;  %v2887_v14 = vsel %vm2857_vm7, %v7746_v17, %v7824_v4  ;;  %v7825_v58 = vld [vmem:[#allocation119_spill] sm:$0xff]  ;;  %v7833_v4 = vld [vmem:[#allocation36_spill] sm:$0xff] }
 0x399   :  { %3571 = vst.msk [vmem:[%s7389_s5 + $0x30] sm:$0xff] %vm2894_vm8, %v3535_v37  ;;  %v3070_v35 = vsel %vm3042_vm12, %v3033_v12, %v2588_v32  ;;  %v2924_v32 = vsel %vm2894_vm8, %v2887_v14, %v7825_v58  ;;  %v2890_v14 = vsel %vm2857_vm7, %v7755_v20, %v7833_v4  ;;  %v7835_v58 = vld [vmem:[#allocation129_spill] sm:$0xff] }
 0x39a   :  { %v2961_v25 = vsel %vm2931_vm9, %v2924_v32, %v7826_v50 }
 0x39b   :  { %v2694_v23 = vpop.permute.xlu0 %2693 }
 0x39c   :  { %v2373_v45 = vpop.permute.xlu1 %2372  ;;  %v3106_v59 = vsel %vm3079_vm13, %v3069_v11, %v2694_v23 }
 0x39d   :  { %v2997_v38 = vsel %vm2968_vm11, %v2960_v53, %v2373_v45 }
 0x39f   :  { %v2696_v62 = vpop.permute.xlu0 %2695 }
 0x3a0   :  { %v2802_v48 = vpop.permute.xlu1 %2801  ;;  %v3107_v39 = vsel %vm3079_vm13, %v3070_v35, %v2696_v62 }
 0x3a1   :  { %v3143_v49 = vsel %vm3116_vm14, %v3106_v59, %v2802_v48  ;;  %v7827_v48 = vld [vmem:[#allocation120_spill] sm:$0xff] }
 0x3a2   :  { %4272 = vmatprep.mubr.msk.f32.mxu1 %vm3172_vm15, %v3143_v49  ;;  %v2888_v5 = vsel %vm2857_vm7, %v7748_v55, %v7827_v48 }
 0x3a3   :  { %v2375_v34 = vpop.permute.xlu0 %2374  ;;  %v2925_v49 = vsel %vm2894_vm8, %v2888_v5, %v7828_v30 }
 0x3a4   :  { %v2482_v15 = vpop.permute.xlu1 %2481  ;;  %v2998_v31 = vsel %vm2968_vm11, %v2961_v25, %v2375_v34  ;;  %v2962_v26 = vsel %vm2931_vm9, %v2925_v49, %v7829_v8 }
 0x3a5   :  { %v3034_v18 = vsel %vm3005_vm10, %v2997_v38, %v2482_v15 }
 0x3a7   :  { %v2804_v22 = vpop.permute.xlu0 %2803 }
 0x3a8   :  { %v3144_v27 = vsel %vm3116_vm14, %v3107_v39, %v2804_v22  ;;  %v2484_v2 = vpop.permute.xlu1 %2483  ;;  %v7830_v22 = vld [vmem:[#allocation34_spill] sm:$0xff] }
 0x3a9   :  { %4273 = vmatmul.mubr.msk.f32.gmra.mxu1 %vm3172_vm15, %v3144_v27  ;;  %v3035_v41 = vsel %vm3005_vm10, %v2998_v31, %v2484_v2  ;;  %v2889_v55 = vsel %vm2857_vm7, %v7752_v21, %v7830_v22  ;;  %v7831_v2 = vld [vmem:[#allocation23_spill] sm:$0xff] }
 0x3ab   :  { %v2590_v1 = vpop.permute.xlu0 %2589 }
 0x3ac   :  { %v2592_v51 = vpop.permute.xlu1 %2591  ;;  %v3071_v47 = vsel %vm3042_vm12, %v3034_v18, %v2590_v1  ;;  %v2926_v1 = vsel %vm2894_vm8, %v2889_v55, %v7831_v2  ;;  %v7842_v55 = vld [vmem:[#allocation24_spill] sm:$0xff]  ;;  %v7843_v2 = vld [vmem:[#allocation10_spill] sm:$0xff] }
 0x3ad   :  { %v3072_v52 = vsel %vm3042_vm12, %v3035_v41, %v2592_v51  ;;  %v7832_v51 = vld [vmem:[#allocation9_spill] sm:$0xff] }
 0x3ae   :  { %v2963_v9 = vsel %vm2931_vm9, %v2926_v1, %v7832_v51 }
 0x3af   :  { %v2698_v16 = vpop.permute.xlu0 %2697 }
 0x3b0   :  { %v2377_v3 = vpop.permute.xlu1 %2376  ;;  %v3108_v60 = vsel %vm3079_vm13, %v3071_v47, %v2698_v16 }
 0x3b1   :  { %v2999_v34 = vsel %vm2968_vm11, %v2962_v26, %v2377_v3 }
 0x3b2   :  { %v4247_v46 = vpop.f32.mrf.mxu1 }
 0x3b3   :  { %v3396_v56 = vadd.f32 %v4247_v46, %v6781_v7  ;;  %v2700_v19 = vpop.permute.xlu0 %2699 }
 0x3b4   :  { %v3390_v13 = vpop.f32.mrf.mxu1  ;;  %v2806_v44 = vpop.permute.xlu1 %2805  ;;  %v3109_v45 = vsel %vm3079_vm13, %v3072_v52, %v2700_v19  ;;  %v7836_v52 = vld [vmem:[#allocation123_spill] sm:$0xff] }
 0x3b5   :  { %v3538_v57 = vmax.f32 %v3396_v56, 0.0  ;;  %v3391_v0 = vadd.f32 %v6781_v7, %v3390_v13  ;;  %v3145_v37 = vsel %vm3116_vm14, %v3108_v60, %v2806_v44  ;;  %v2891_v20 = vsel %vm2857_vm7, %v7768_v33, %v7836_v52 }
 0x3b6   :  { %4275 = vmatprep.mubr.msk.f32.mxu1 %vm3172_vm15, %v3145_v37 }
 0x3b7   :  { %3574 = vst.msk [vmem:[%s7389_s5 + $0x48] sm:$0xff] %vm2894_vm8, %v3538_v57  ;;  %v3537_v54 = vmax.f32 %v3391_v0, 0.0  ;;  %v2379_v17 = vpop.permute.xlu0 %2378  ;;  %v7834_v57 = vld [vmem:[#allocation122_spill] sm:$0xff] }
 0x3b8   :  { %v2486_v23 = vpop.permute.xlu1 %2485  ;;  %v3000_v29 = vsel %vm2968_vm11, %v2963_v9, %v2379_v17  ;;  %v2927_v0 = vsel %vm2894_vm8, %v2890_v14, %v7834_v57  ;;  %v7844_v9 = vld [vmem:[#allocation37_spill] sm:$0xff] }
 0x3b9   :  { %3573 = vst.msk [vmem:[%s7389_s5 + $0x40] sm:$0xff] %vm2894_vm8, %v3537_v54  ;;  %v3036_v43 = vsel %vm3005_vm10, %v2999_v34, %v2486_v23  ;;  %v2964_v32 = vsel %vm2931_vm9, %v2927_v0, %v7835_v58 }
 0x3bb   :  { %v2808_v61 = vpop.permute.xlu0 %2807 }
 0x3bc   :  { %v3146_v10 = vsel %vm3116_vm14, %v3109_v45, %v2808_v61  ;;  %v2488_v11 = vpop.permute.xlu1 %2487  ;;  %v7837_v61 = vld [vmem:[#allocation125_spill] sm:$0xff] }
 0x3bd   :  { %4276 = vmatmul.mubr.msk.f32.gmra.mxu1 %vm3172_vm15, %v3146_v10  ;;  %v3037_v16 = vsel %vm3005_vm10, %v3000_v29, %v2488_v11  ;;  %v2928_v10 = vsel %vm2894_vm8, %v2891_v20, %v7837_v61  ;;  %v7838_v11 = vld [vmem:[#allocation127_spill] sm:$0xff] }
 0x3bf   :  { %v2594_v62 = vpop.permute.xlu0 %2593 }
 0x3c0   :  { %v2596_v59 = vpop.permute.xlu1 %2595  ;;  %v3073_v15 = vsel %vm3042_vm12, %v3036_v43, %v2594_v62  ;;  %v2965_v62 = vsel %vm2931_vm9, %v2928_v10, %v7838_v11  ;;  %v7839_v43 = vld [vmem:[#allocation126_spill] sm:$0xff] }
 0x3c1   :  { %v3074_v28 = vsel %vm3042_vm12, %v3037_v16, %v2596_v59 }
 0x3c3   :  { %v2702_v6 = vpop.permute.xlu0 %2701 }
 0x3c4   :  { %v2381_v36 = vpop.permute.xlu1 %2380  ;;  %v3110_v35 = vsel %vm3079_vm13, %v3073_v15, %v2702_v6  ;;  %v2892_v15 = vsel %vm2857_vm7, %v7775_v42, %v7839_v43 }
 0x3c5   :  { %v3001_v25 = vsel %vm2968_vm11, %v2964_v32, %v2381_v36 }
 0x3c7   :  { %v2704_v12 = vpop.permute.xlu0 %2703 }
 0x3c8   :  { %v2810_v39 = vpop.permute.xlu1 %2809  ;;  %v3111_v21 = vsel %vm3079_vm13, %v3074_v28, %v2704_v12  ;;  %v7840_v12 = vld [vmem:[#allocation128_spill] sm:$0xff] }
 0x3c9   :  { %v3147_v27 = vsel %vm3116_vm14, %v3110_v35, %v2810_v39  ;;  %v2929_v35 = vsel %vm2894_vm8, %v2892_v15, %v7840_v12  ;;  %v7841_v39 = vld [vmem:[#allocation130_spill] sm:$0xff] }
 0x3ca   :  { %4278 = vmatprep.mubr.msk.f32.mxu1 %vm3172_vm15, %v3147_v27  ;;  %v2893_v22 = vsel %vm2857_vm7, %v7782_v24, %v7841_v39  ;;  %v2966_v1 = vsel %vm2931_vm9, %v2929_v35, %v7843_v2 }
 0x3cb   :  { %v2383_v63 = vpop.permute.xlu0 %2382  ;;  %v2930_v27 = vsel %vm2894_vm8, %v2893_v22, %v7842_v55 }
 0x3cc   :  { %v2490_v40 = vpop.permute.xlu1 %2489  ;;  %v3002_v48 = vsel %vm2968_vm11, %v2965_v62, %v2383_v63  ;;  %v2967_v63 = vsel %vm2931_vm9, %v2930_v27, %v7844_v9 }
 0x3cd   :  { %v3038_v54 = vsel %vm3005_vm10, %v3001_v25, %v2490_v40 }
 0x3ce   :  { %v4250_v53 = vpop.f32.mrf.mxu1 }
 0x3cf   :  { %v3406_v3 = vadd.f32 %v4250_v53, %v6781_v7  ;;  %v2812_v38 = vpop.permute.xlu0 %2811 }
 0x3d0   :  { %v3148_v18 = vsel %vm3116_vm14, %v3111_v21, %v2812_v38  ;;  %v3400_v46 = vpop.f32.mrf.mxu1  ;;  %v2492_v47 = vpop.permute.xlu1 %2491 }
 0x3d1   :  { %v3540_v56 = vmax.f32 %v3406_v3, 0.0  ;;  %v3401_v19 = vadd.f32 %v6781_v7, %v3400_v46  ;;  %4279 = vmatmul.mubr.msk.f32.gmra.mxu1 %vm3172_vm15, %v3148_v18  ;;  %v3039_v30 = vsel %vm3005_vm10, %v3002_v48, %v2492_v47 }
 0x3d3   :  { %3576 = vst.msk [vmem:[%s7389_s5 + $0x58] sm:$0xff] %vm2894_vm8, %v3540_v56  ;;  %v3539_v60 = vmax.f32 %v3401_v19, 0.0  ;;  %v2598_v13 = vpop.permute.xlu0 %2597 }
 0x3d4   :  { %v2600_v44 = vpop.permute.xlu1 %2599  ;;  %v3075_v17 = vsel %vm3042_vm12, %v3038_v54, %v2598_v13 }
 0x3d5   :  { %3575 = vst.msk [vmem:[%s7389_s5 + $0x50] sm:$0xff] %vm2894_vm8, %v3539_v60  ;;  %v3076_v49 = vsel %vm3042_vm12, %v3039_v30, %v2600_v44 }
 0x3d7   :  { %v2706_v37 = vpop.permute.xlu0 %2705 }
 0x3d8   :  { %v2385_v50 = vpop.permute.xlu1 %2384  ;;  %v3112_v23 = vsel %vm3079_vm13, %v3075_v17, %v2706_v37 }
 0x3d9   :  { %v3003_v29 = vsel %vm2968_vm11, %v2966_v1, %v2385_v50 }
 0x3db   :  { %v2708_v31 = vpop.permute.xlu0 %2707 }
 0x3dc   :  { %v2814_v41 = vpop.permute.xlu1 %2813  ;;  %v3113_v33 = vsel %vm3079_vm13, %v3076_v49, %v2708_v31 }
 0x3dd   :  { %v3149_v45 = vsel %vm3116_vm14, %v3112_v23, %v2814_v41 }
 0x3de   :  { %4281 = vmatprep.mubr.msk.f32.mxu1 %vm3172_vm15, %v3149_v45 }
 0x3df   :  { %v2387_v59 = vpop.permute.xlu0 %2386 }
 0x3e0   :  { %v2494_v5 = vpop.permute.xlu1 %2493  ;;  %v3004_v40 = vsel %vm2968_vm11, %v2967_v63, %v2387_v59 }
 0x3e1   :  { %v3040_v16 = vsel %vm3005_vm10, %v3003_v29, %v2494_v5 }
 0x3e3   :  { %v2816_v6 = vpop.permute.xlu0 %2815 }
 0x3e4   :  { %v3150_v8 = vsel %vm3116_vm14, %v3113_v33, %v2816_v6  ;;  %v2496_v26 = vpop.permute.xlu1 %2495 }
 0x3e5   :  { %4282 = vmatmul.mubr.msk.f32.gmra.mxu1 %vm3172_vm15, %v3150_v8  ;;  %v3041_v28 = vsel %vm3005_vm10, %v3004_v40, %v2496_v26 }
 0x3e7   :  { %v2602_v36 = vpop.permute.xlu0 %2601 }
 0x3e8   :  { %v2604_v34 = vpop.permute.xlu1 %2603  ;;  %v3077_v24 = vsel %vm3042_vm12, %v3040_v16, %v2602_v36 }
 0x3e9   :  { %v3078_v53 = vsel %vm3042_vm12, %v3041_v28, %v2604_v34 }
 0x3eb   :  { %v2710_v51 = vpop.permute.xlu0 %2709 }
 0x3ec   :  { %v2712_v42 = vpop.permute.xlu1 %2711  ;;  %v3114_v21 = vsel %vm3079_vm13, %v3077_v24, %v2710_v51 }
 0x3ed   :  { %v3115_v38 = vsel %vm3079_vm13, %v3078_v53, %v2712_v42 }
 0x3ef   :  { %v2818_v3 = vpop.permute.xlu0 %2817 }
 0x3f0   :  { %v3151_v18 = vsel %vm3116_vm14, %v3114_v21, %v2818_v3  ;;  %v2820_v46 = vpop.permute.xlu1 %2819 }
 0x3f1   :  { %v3152_v47 = vsel %vm3116_vm14, %v3115_v38, %v2820_v46  ;;  %4284 = vmatprep.mubr.msk.f32.mxu1 %vm3172_vm15, %v3151_v18 }
 0x3f2   :  { %4285 = vmatmul.mubr.msk.f32.gmra.mxu1 %vm3172_vm15, %v3152_v47 }
 0x3fd   :  { %v4253_v56 = vpop.f32.mrf.mxu1 }
 0x3fe   :  { %v3416_v19 = vadd.f32 %v4253_v56, %v6781_v7 }
 0x3ff   :  { %v3410_v60 = vpop.f32.mrf.mxu1 }
 0x400   :  { %v3542_v13 = vmax.f32 %v3416_v19, 0.0  ;;  %v3411_v44 = vadd.f32 %v6781_v7, %v3410_v60 }
 0x401   :  { %v4256_v4 = vpop.f32.mrf.mxu1 }
 0x402   :  { %3578 = vst.msk [vmem:[%s7389_s5 + $0x68] sm:$0xff] %vm2894_vm8, %v3542_v13  ;;  %v3541_v14 = vmax.f32 %v3411_v44, 0.0  ;;  %v3426_v57 = vadd.f32 %v4256_v4, %v6781_v7  ;;  %v4304_v44 = vld [vmem:[%s7388_s4] ss:$0 sm:$0xff] }
 0x403   :  { %v3420_v0 = vpop.f32.mrf.mxu1 }
 0x404   :  { %3577 = vst.msk [vmem:[%s7389_s5 + $0x60] sm:$0xff] %vm2894_vm8, %v3541_v14  ;;  %v3544_v37 = vmax.f32 %v3426_v57, 0.0  ;;  %v3421_v58 = vadd.f32 %v6781_v7, %v3420_v0 }
 0x405   :  { %v4259_v32 = vpop.f32.mrf.mxu1 }
 0x406   :  { %3580 = vst.msk [vmem:[%s7389_s5 + $0x78] sm:$0xff] %vm2894_vm8, %v3544_v37  ;;  %v3543_v50 = vmax.f32 %v3421_v58, 0.0  ;;  %v3436_v25 = vadd.f32 %v4259_v32, %v6781_v7 }
 0x407   :  { %v3430_v54 = vpop.f32.mrf.mxu1 }
 0x408   :  { %3579 = vst.msk [vmem:[%s7389_s5 + $0x70] sm:$0xff] %vm2894_vm8, %v3543_v50  ;;  %v3546_v17 = vmax.f32 %v3436_v25, 0.0  ;;  %v3431_v31 = vadd.f32 %v6781_v7, %v3430_v54 }
 0x40a   :  { %3582 = vst.msk [vmem:[%s7389_s5 + $0x88] sm:$0xff] %vm2894_vm8, %v3546_v17  ;;  %v3545_v23 = vmax.f32 %v3431_v31, 0.0 }
 0x40c   :  { %3581 = vst.msk [vmem:[%s7389_s5 + $0x80] sm:$0xff] %vm2894_vm8, %v3545_v23 }
 0x419   :  { %v4262_v41 = vpop.f32.mrf.mxu1 }
 0x41a   :  { %v3446_v52 = vadd.f32 %v4262_v41, %v6781_v7 }
 0x41b   :  { %v3440_v20 = vpop.f32.mrf.mxu1 }
 0x41c   :  { %v3548_v45 = vmax.f32 %v3446_v52, 0.0  ;;  %v3441_v61 = vadd.f32 %v6781_v7, %v3440_v20 }
 0x41e   :  { %3584 = vst.msk [vmem:[%s7389_s5 + $0x98] sm:$0xff] %vm2894_vm8, %v3548_v45  ;;  %v3547_v10 = vmax.f32 %v3441_v61, 0.0 }
 0x420   :  { %3583 = vst.msk [vmem:[%s7389_s5 + $0x90] sm:$0xff] %vm2894_vm8, %v3547_v10 }
 0x42d   :  { %v4265_v11 = vpop.f32.mrf.mxu1 }
 0x42e   :  { %v3456_v62 = vadd.f32 %v4265_v11, %v6781_v7 }
 0x42f   :  { %v3450_v59 = vpop.f32.mrf.mxu1 }
 0x430   :  { %v3550_v48 = vmax.f32 %v3456_v62, 0.0  ;;  %v3451_v5 = vadd.f32 %v6781_v7, %v3450_v59 }
 0x432   :  { %3586 = vst.msk [vmem:[%s7389_s5 + $0xa8] sm:$0xff] %vm2894_vm8, %v3550_v48  ;;  %v3549_v30 = vmax.f32 %v3451_v5, 0.0 }
 0x434   :  { %3585 = vst.msk [vmem:[%s7389_s5 + $0xa0] sm:$0xff] %vm2894_vm8, %v3549_v30 }
 0x441   :  { %v4268_v49 = vpop.f32.mrf.mxu1 }
 0x442   :  { %v3466_v33 = vadd.f32 %v4268_v49, %v6781_v7 }
 0x443   :  { %v3460_v6 = vpop.f32.mrf.mxu1 }
 0x444   :  { %v3552_v8 = vmax.f32 %v3466_v33, 0.0  ;;  %v3461_v26 = vadd.f32 %v6781_v7, %v3460_v6 }
 0x446   :  { %3588 = vst.msk [vmem:[%s7389_s5 + $0xb8] sm:$0xff] %vm2894_vm8, %v3552_v8  ;;  %v3551_v36 = vmax.f32 %v3461_v26, 0.0 }
 0x448   :  { %3587 = vst.msk [vmem:[%s7389_s5 + $0xb0] sm:$0xff] %vm2894_vm8, %v3551_v36 }
 0x455   :  { %v4271_v34 = vpop.f32.mrf.mxu1 }
 0x456   :  { %v3476_v43 = vadd.f32 %v4271_v34, %v6781_v7 }
 0x457   :  { %v3470_v15 = vpop.f32.mrf.mxu1 }
 0x458   :  { %v3554_v12 = vmax.f32 %v3476_v43, 0.0  ;;  %v3471_v35 = vadd.f32 %v6781_v7, %v3470_v15 }
 0x45a   :  { %3590 = vst.msk [vmem:[%s7389_s5 + $0xc8] sm:$0xff] %vm2894_vm8, %v3554_v12  ;;  %v3553_v39 = vmax.f32 %v3471_v35, 0.0 }
 0x45c   :  { %3589 = vst.msk [vmem:[%s7389_s5 + $0xc0] sm:$0xff] %vm2894_vm8, %v3553_v39 }
 0x469   :  { %v4274_v22 = vpop.f32.mrf.mxu1 }
 0x46a   :  { %v3486_v55 = vadd.f32 %v4274_v22, %v6781_v7 }
 0x46b   :  { %v3480_v27 = vpop.f32.mrf.mxu1 }
 0x46c   :  { %v3556_v2 = vmax.f32 %v3486_v55, 0.0  ;;  %v3481_v1 = vadd.f32 %v6781_v7, %v3480_v27 }
 0x46e   :  { %3592 = vst.msk [vmem:[%s7389_s5 + $0xd8] sm:$0xff] %vm2894_vm8, %v3556_v2  ;;  %v3555_v51 = vmax.f32 %v3481_v1, 0.0 }
 0x470   :  { %3591 = vst.msk [vmem:[%s7389_s5 + $0xd0] sm:$0xff] %vm2894_vm8, %v3555_v51 }
 0x47d   :  { %v4277_v9 = vpop.f32.mrf.mxu1 }
 0x47e   :  { %v3496_v63 = vadd.f32 %v4277_v9, %v6781_v7 }
 0x47f   :  { %v3490_v29 = vpop.f32.mrf.mxu1 }
 0x480   :  { %v3558_v42 = vmax.f32 %v3496_v63, 0.0  ;;  %v3491_v40 = vadd.f32 %v6781_v7, %v3490_v29 }
 0x482   :  { %3594 = vst.msk [vmem:[%s7389_s5 + $0xe8] sm:$0xff] %vm2894_vm8, %v3558_v42  ;;  %v3557_v16 = vmax.f32 %v3491_v40, 0.0 }
 0x484   :  { %3593 = vst.msk [vmem:[%s7389_s5 + $0xe0] sm:$0xff] %vm2894_vm8, %v3557_v16 }
 0x491   :  { %v4280_v28 = vpop.f32.mrf.mxu1 }
 0x492   :  { %v3506_v24 = vadd.f32 %v4280_v28, %v6781_v7 }
 0x493   :  { %v3500_v53 = vpop.f32.mrf.mxu1 }
 0x494   :  { %v3560_v21 = vmax.f32 %v3506_v24, 0.0  ;;  %v3501_v3 = vadd.f32 %v6781_v7, %v3500_v53 }
 0x496   :  { %3596 = vst.msk [vmem:[%s7389_s5 + $0xf8] sm:$0xff] %vm2894_vm8, %v3560_v21  ;;  %v3559_v38 = vmax.f32 %v3501_v3, 0.0 }
 0x498   :  { %3595 = vst.msk [vmem:[%s7389_s5 + $0xf0] sm:$0xff] %vm2894_vm8, %v3559_v38 }
 0x4a5   :  { %v4283_v18 = vpop.f32.mrf.mxu1 }
 0x4a6   :  { %v3516_v46 = vadd.f32 %v4283_v18, %v6781_v7 }
 0x4a7   :  { %v3510_v47 = vpop.f32.mrf.mxu1 }
 0x4a8   :  { %v3562_v56 = vmax.f32 %v3516_v46, 0.0  ;;  %v3511_v19 = vadd.f32 %v6781_v7, %v3510_v47 }
 0x4aa   :  { %3598 = vst.msk [vmem:[%s7389_s5 + $0x108] sm:$0xff] %vm2894_vm8, %v3562_v56  ;;  %v3561_v60 = vmax.f32 %v3511_v19, 0.0 }
 0x4ac   :  { %3597 = vst.msk [vmem:[%s7389_s5 + $0x100] sm:$0xff] %vm2894_vm8, %v3561_v60 }
 0x4b2   :  { %v4286_v13 = vpop.f32.mrf.mxu1 }
 0x4b3   :  { %v3526_v4 = vadd.f32 %v4304_v44, %v4286_v13 }
 0x4b4   :  { %v3520_v14 = vpop.f32.mrf.mxu1 }
 0x4b5   :  { %v3564_v57 = vmax.f32 %v3526_v4, 0.0  ;;  %v3521_v7 = vadd.f32 %v4304_v44, %v3520_v14 }
 0x4b7   :  { %3600 = vst.msk [vmem:[%s7389_s5 + $0x118] sm:$0xff] %vm2894_vm8, %v3564_v57  ;;  %v3563_v0 = vmax.f32 %v3521_v7, 0.0 }
 0x4b9   :  { %3599 = vst.msk [vmem:[%s7389_s5 + $0x110] sm:$0xff] %vm2894_vm8, %v3563_v0 }

// kernel: convnet_forward.3
= control target key start
LH: loop header
LB: loop body
LE: loop exit
PB: predicated region body
PF: predicated region fallthrough
CT: control target
= control target key end

     0   :  { %s8440_s0 = inlined_call_operand.vmem [shape: f32[2,2880], index: 0, kind: input, shape index: {}]   ;;  %s8441_s1 = inlined_call_operand.vmem [shape: f32[2880,500], index: 1, kind: input, shape index: {}]   ;;  %s8442_s2 = inlined_call_operand.vmem [shape: f32[1,500], index: 2, kind: input, shape index: {}]   ;;  %s8443_s3 = inlined_call_operand.vmem [shape: f32[500,10], index: 3, kind: input, shape index: {}]   ;;  %s8444_s4 = inlined_call_operand.vmem [shape: f32[1,10], index: 4, kind: input, shape index: {}]   ;;  %s8445_s5 = inlined_call_operand.hbm [shape: f32[2,10], index: 5, kind: output, shape index: {}]  }
   0x1   :  { %v88_v0 = vld [vmem:[%s8441_s1 + $0x1e8] sm:$0xff]  ;;  %v87_v1 = vld [vmem:[%s8441_s1 + $0x1e0] sm:$0xff] }
   0x2   :  { %v84_v2 = vld [vmem:[%s8441_s1 + $0x1c8] sm:$0xff]  ;;  %1621 = vmatprep.subr.mxu0 %v88_v0  ;;  %v83_v4 = vld [vmem:[%s8441_s1 + $0x1c0] sm:$0xff] }
   0x3   :  { %v216_v3 = vld [vmem:[%s8441_s1 + $0x5e8] sm:$0xff]  ;;  %v215_v5 = vld [vmem:[%s8441_s1 + $0x5e0] sm:$0xff]  ;;  %1622 = vmatpush1.msra.mxu0 %v87_v1 }
   0x4   :  { %1692 = vmatprep.subr.mxu1 %v216_v3  ;;  %v80_v6 = vld [vmem:[%s8441_s1 + $0x1a8] sm:$0xff]  ;;  %1623 = vmatprep.subr.mxu0 %v84_v2  ;;  %v79_v8 = vld [vmem:[%s8441_s1 + $0x1a0] sm:$0xff] }
   0x5   :  { %v212_v7 = vld [vmem:[%s8441_s1 + $0x5c8] sm:$0xff]  ;;  %1693 = vmatpush1.msra.mxu1 %v215_v5  ;;  %v211_v9 = vld [vmem:[%s8441_s1 + $0x5c0] sm:$0xff]  ;;  %1624 = vmatpush1.msra.mxu0 %v83_v4 }
   0x6   :  { %v208_v10 = vld [vmem:[%s8441_s1 + $0x5a8] sm:$0xff]  ;;  %1694 = vmatprep.subr.mxu1 %v212_v7  ;;  %v207_v12 = vld [vmem:[%s8441_s1 + $0x5a0] sm:$0xff]  ;;  %1625 = vmatprep.subr.mxu0 %v80_v6 }
   0x7   :  { %v76_v11 = vld [vmem:[%s8441_s1 + $0x188] sm:$0xff]  ;;  %1695 = vmatpush1.msra.mxu1 %v211_v9  ;;  %v75_v13 = vld [vmem:[%s8441_s1 + $0x180] sm:$0xff]  ;;  %1626 = vmatpush1.msra.mxu0 %v79_v8 }
   0x8   :  { %v204_v14 = vld [vmem:[%s8441_s1 + $0x588] sm:$0xff]  ;;  %1696 = vmatprep.subr.mxu1 %v208_v10  ;;  %v203_v16 = vld [vmem:[%s8441_s1 + $0x580] sm:$0xff]  ;;  %1627 = vmatprep.subr.mxu0 %v76_v11 }
   0x9   :  { %v72_v15 = vld [vmem:[%s8441_s1 + $0x168] sm:$0xff]  ;;  %1697 = vmatpush1.msra.mxu1 %v207_v12  ;;  %v71_v17 = vld [vmem:[%s8441_s1 + $0x160] sm:$0xff]  ;;  %1628 = vmatpush1.msra.mxu0 %v75_v13 }
   0xa   :  { %v200_v18 = vld [vmem:[%s8441_s1 + $0x568] sm:$0xff]  ;;  %1698 = vmatprep.subr.mxu1 %v204_v14  ;;  %v199_v20 = vld [vmem:[%s8441_s1 + $0x560] sm:$0xff]  ;;  %1629 = vmatprep.subr.mxu0 %v72_v15 }
   0xb   :  { %v68_v19 = vld [vmem:[%s8441_s1 + $0x148] sm:$0xff]  ;;  %1699 = vmatpush1.msra.mxu1 %v203_v16  ;;  %v67_v21 = vld [vmem:[%s8441_s1 + $0x140] sm:$0xff]  ;;  %1630 = vmatpush1.msra.mxu0 %v71_v17 }
   0xc   :  { %v196_v22 = vld [vmem:[%s8441_s1 + $0x548] sm:$0xff]  ;;  %1700 = vmatprep.subr.mxu1 %v200_v18  ;;  %v195_v24 = vld [vmem:[%s8441_s1 + $0x540] sm:$0xff]  ;;  %1631 = vmatprep.subr.mxu0 %v68_v19 }
   0xd   :  { %v64_v23 = vld [vmem:[%s8441_s1 + $0x128] sm:$0xff]  ;;  %1701 = vmatpush1.msra.mxu1 %v199_v20  ;;  %v63_v25 = vld [vmem:[%s8441_s1 + $0x120] sm:$0xff]  ;;  %1632 = vmatpush1.msra.mxu0 %v67_v21 }
   0xe   :  { %v192_v26 = vld [vmem:[%s8441_s1 + $0x528] sm:$0xff]  ;;  %1702 = vmatprep.subr.mxu1 %v196_v22  ;;  %v191_v28 = vld [vmem:[%s8441_s1 + $0x520] sm:$0xff]  ;;  %1633 = vmatprep.subr.mxu0 %v64_v23 }
   0xf   :  { %v60_v27 = vld [vmem:[%s8441_s1 + $0x108] sm:$0xff]  ;;  %1703 = vmatpush1.msra.mxu1 %v195_v24  ;;  %v59_v29 = vld [vmem:[%s8441_s1 + $0x100] sm:$0xff]  ;;  %1634 = vmatpush1.msra.mxu0 %v63_v25 }
  0x10   :  { %v188_v30 = vld [vmem:[%s8441_s1 + $0x508] sm:$0xff]  ;;  %1704 = vmatprep.subr.mxu1 %v192_v26  ;;  %v187_v32 = vld [vmem:[%s8441_s1 + $0x500] sm:$0xff]  ;;  %1635 = vmatprep.subr.mxu0 %v60_v27  ;;  %v1469_v27 = vlaneseq }
  0x11   :  { %v56_v31 = vld [vmem:[%s8441_s1 + $0xe8] sm:$0xff]  ;;  %1705 = vmatpush1.msra.mxu1 %v191_v28  ;;  %v55_v33 = vld [vmem:[%s8441_s1 + $0xe0] sm:$0xff]  ;;  %1636 = vmatpush1.msra.mxu0 %v59_v29  ;;  %v3651_v28 = vmov 1983009808  }
  0x12   :  { %v184_v34 = vld [vmem:[%s8441_s1 + $0x4e8] sm:$0xff]  ;;  %1706 = vmatprep.subr.mxu1 %v188_v30  ;;  %v183_v36 = vld [vmem:[%s8441_s1 + $0x4e0] sm:$0xff]  ;;  %1637 = vmatprep.subr.mxu0 %v56_v31  ;;  %v1497_v29 = vunpack.c.l.s4 %v3651_v28 }
  0x13   :  { %v52_v35 = vld [vmem:[%s8441_s1 + $0xc8] sm:$0xff]  ;;  %1707 = vmatpush1.msra.mxu1 %v187_v32  ;;  %v51_v37 = vld [vmem:[%s8441_s1 + $0xc0] sm:$0xff]  ;;  %1638 = vmatpush1.msra.mxu0 %v55_v33 }
  0x14   :  { %v180_v38 = vld [vmem:[%s8441_s1 + $0x4c8] sm:$0xff]  ;;  %1708 = vmatprep.subr.mxu1 %v184_v34  ;;  %v179_v40 = vld [vmem:[%s8441_s1 + $0x4c0] sm:$0xff]  ;;  %1639 = vmatprep.subr.mxu0 %v52_v35 }
  0x15   :  { %v48_v39 = vld [vmem:[%s8441_s1 + $0xa8] sm:$0xff]  ;;  %1709 = vmatpush1.msra.mxu1 %v183_v36  ;;  %v47_v41 = vld [vmem:[%s8441_s1 + $0xa0] sm:$0xff]  ;;  %1640 = vmatpush1.msra.mxu0 %v51_v37 }
  0x16   :  { %v176_v42 = vld [vmem:[%s8441_s1 + $0x4a8] sm:$0xff]  ;;  %1710 = vmatprep.subr.mxu1 %v180_v38  ;;  %v175_v44 = vld [vmem:[%s8441_s1 + $0x4a0] sm:$0xff]  ;;  %1641 = vmatprep.subr.mxu0 %v48_v39  ;;  %v3981_v38 = vshrl.u32 %v1469_v27, 7  ;;  %v1498_v39 = vunpack.c.0.s8 %v1497_v29 }
  0x17   :  { %v44_v43 = vld [vmem:[%s8441_s1 + $0x88] sm:$0xff]  ;;  %1711 = vmatpush1.msra.mxu1 %v179_v40  ;;  %v43_v45 = vld [vmem:[%s8441_s1 + $0x80] sm:$0xff]  ;;  %1642 = vmatpush1.msra.mxu0 %v47_v41 }
  0x18   :  { %v172_v46 = vld [vmem:[%s8441_s1 + $0x488] sm:$0xff]  ;;  %1712 = vmatprep.subr.mxu1 %v176_v42  ;;  %v171_v48 = vld [vmem:[%s8441_s1 + $0x480] sm:$0xff]  ;;  %1643 = vmatprep.subr.mxu0 %v44_v43 }
  0x19   :  { %v40_v47 = vld [vmem:[%s8441_s1 + $0x68] sm:$0xff]  ;;  %1713 = vmatpush1.msra.mxu1 %v175_v44  ;;  %v39_v49 = vld [vmem:[%s8441_s1 + $0x60] sm:$0xff]  ;;  %1644 = vmatpush1.msra.mxu0 %v43_v45 }
  0x1a   :  { %v168_v50 = vld [vmem:[%s8441_s1 + $0x468] sm:$0xff]  ;;  %1714 = vmatprep.subr.mxu1 %v172_v46  ;;  %v167_v52 = vld [vmem:[%s8441_s1 + $0x460] sm:$0xff]  ;;  %1645 = vmatprep.subr.mxu0 %v40_v47 }
  0x1b   :  { %v36_v51 = vld [vmem:[%s8441_s1 + $0x48] sm:$0xff]  ;;  %1715 = vmatpush1.msra.mxu1 %v171_v48  ;;  %v35_v53 = vld [vmem:[%s8441_s1 + $0x40] sm:$0xff]  ;;  %1646 = vmatpush1.msra.mxu0 %v39_v49  ;;  %v4008_v48 = vsub.s32 %v1498_v39, %v3981_v38 }
  0x1c   :  { %v164_v54 = vld [vmem:[%s8441_s1 + $0x448] sm:$0xff]  ;;  %1716 = vmatprep.subr.mxu1 %v168_v50  ;;  %v163_v56 = vld [vmem:[%s8441_s1 + $0x440] sm:$0xff]  ;;  %1647 = vmatprep.subr.mxu0 %v36_v51 }
  0x1d   :  { %v32_v55 = vld [vmem:[%s8441_s1 + $0x28] sm:$0xff]  ;;  %1717 = vmatpush1.msra.mxu1 %v167_v52  ;;  %v31_v57 = vld [vmem:[%s8441_s1 + $0x20] sm:$0xff]  ;;  %1648 = vmatpush1.msra.mxu0 %v35_v53 }
  0x1e   :  { %v160_v58 = vld [vmem:[%s8441_s1 + $0x428] sm:$0xff]  ;;  %1718 = vmatprep.subr.mxu1 %v164_v54  ;;  %v159_v60 = vld [vmem:[%s8441_s1 + $0x420] sm:$0xff]  ;;  %1649 = vmatprep.subr.mxu0 %v32_v55 }
  0x1f   :  { %v28_v59 = vld [vmem:[%s8441_s1 + $0x8] sm:$0xff]  ;;  %1719 = vmatpush1.msra.mxu1 %v163_v56  ;;  %v27_v61 = vld [vmem:[%s8441_s1] sm:$0xff]  ;;  %1650 = vmatpush1.msra.mxu0 %v31_v57 }
  0x20   :  { %v156_v62 = vld [vmem:[%s8441_s1 + $0x408] sm:$0xff]  ;;  %1720 = vmatprep.subr.mxu1 %v160_v58  ;;  %v155_v0 = vld [vmem:[%s8441_s1 + $0x400] sm:$0xff]  ;;  %1651 = vmatprep.subr.mxu0 %v28_v59 }
  0x21   :  { %v152_v63 = vld [vmem:[%s8441_s1 + $0x3e8] sm:$0xff]  ;;  %1721 = vmatpush1.msra.mxu1 %v159_v60  ;;  %v151_v1 = vld [vmem:[%s8441_s1 + $0x3e0] sm:$0xff]  ;;  %1652 = vmatpush1.msra.mxu0 %v27_v61 }
  0x22   :  { %v280_v2 = vld [vmem:[%s8441_s1 + $0x7e8] sm:$0xff]  ;;  %1722 = vmatprep.subr.mxu1 %v156_v62  ;;  %v279_v4 = vld [vmem:[%s8441_s1 + $0x7e0] sm:$0xff]  ;;  %1653 = vmatprep.subr.mxu0 %v152_v63 }
  0x23   :  { %v148_v3 = vld [vmem:[%s8441_s1 + $0x3c8] sm:$0xff]  ;;  %1723 = vmatpush1.msra.mxu1 %v155_v0  ;;  %v147_v5 = vld [vmem:[%s8441_s1 + $0x3c0] sm:$0xff]  ;;  %1654 = vmatpush2.msra.mxu0 %v151_v1 }
  0x24   :  { %v276_v6 = vld [vmem:[%s8441_s1 + $0x7c8] sm:$0xff]  ;;  %1724 = vmatprep.subr.mxu1 %v280_v2  ;;  %v275_v8 = vld [vmem:[%s8441_s1 + $0x7c0] sm:$0xff]  ;;  %1655 = vmatprep.subr.mxu0 %v148_v3 }
  0x25   :  { %v144_v7 = vld [vmem:[%s8441_s1 + $0x3a8] sm:$0xff]  ;;  %1725 = vmatpush2.msra.mxu1 %v279_v4  ;;  %v143_v9 = vld [vmem:[%s8441_s1 + $0x3a0] sm:$0xff]  ;;  %1656 = vmatpush2.msra.mxu0 %v147_v5 }
  0x26   :  { %v272_v10 = vld [vmem:[%s8441_s1 + $0x7a8] sm:$0xff]  ;;  %1726 = vmatprep.subr.mxu1 %v276_v6  ;;  %v271_v12 = vld [vmem:[%s8441_s1 + $0x7a0] sm:$0xff]  ;;  %1657 = vmatprep.subr.mxu0 %v144_v7 }
  0x27   :  { %v140_v11 = vld [vmem:[%s8441_s1 + $0x388] sm:$0xff]  ;;  %1727 = vmatpush2.msra.mxu1 %v275_v8  ;;  %v139_v13 = vld [vmem:[%s8441_s1 + $0x380] sm:$0xff]  ;;  %1658 = vmatpush2.msra.mxu0 %v143_v9 }
  0x28   :  { %v268_v14 = vld [vmem:[%s8441_s1 + $0x788] sm:$0xff]  ;;  %1728 = vmatprep.subr.mxu1 %v272_v10  ;;  %v267_v16 = vld [vmem:[%s8441_s1 + $0x780] sm:$0xff]  ;;  %1659 = vmatprep.subr.mxu0 %v140_v11 }
  0x29   :  { %v136_v15 = vld [vmem:[%s8441_s1 + $0x368] sm:$0xff]  ;;  %1729 = vmatpush2.msra.mxu1 %v271_v12  ;;  %v135_v17 = vld [vmem:[%s8441_s1 + $0x360] sm:$0xff]  ;;  %1660 = vmatpush2.msra.mxu0 %v139_v13 }
  0x2a   :  { %v264_v18 = vld [vmem:[%s8441_s1 + $0x768] sm:$0xff]  ;;  %1730 = vmatprep.subr.mxu1 %v268_v14  ;;  %v263_v20 = vld [vmem:[%s8441_s1 + $0x760] sm:$0xff]  ;;  %1661 = vmatprep.subr.mxu0 %v136_v15 }
  0x2b   :  { %v132_v19 = vld [vmem:[%s8441_s1 + $0x348] sm:$0xff]  ;;  %1731 = vmatpush2.msra.mxu1 %v267_v16  ;;  %v131_v21 = vld [vmem:[%s8441_s1 + $0x340] sm:$0xff]  ;;  %1662 = vmatpush2.msra.mxu0 %v135_v17 }
  0x2c   :  { %v260_v22 = vld [vmem:[%s8441_s1 + $0x748] sm:$0xff]  ;;  %1732 = vmatprep.subr.mxu1 %v264_v18  ;;  %v259_v24 = vld [vmem:[%s8441_s1 + $0x740] sm:$0xff]  ;;  %1663 = vmatprep.subr.mxu0 %v132_v19 }
  0x2d   :  { %v128_v23 = vld [vmem:[%s8441_s1 + $0x328] sm:$0xff]  ;;  %1733 = vmatpush2.msra.mxu1 %v263_v20  ;;  %v127_v25 = vld [vmem:[%s8441_s1 + $0x320] sm:$0xff]  ;;  %1664 = vmatpush2.msra.mxu0 %v131_v21 }
  0x2e   :  { %v256_v26 = vld [vmem:[%s8441_s1 + $0x728] sm:$0xff]  ;;  %1734 = vmatprep.subr.mxu1 %v260_v22  ;;  %v255_v31 = vld [vmem:[%s8441_s1 + $0x720] sm:$0xff]  ;;  %1665 = vmatprep.subr.mxu0 %v128_v23 }
  0x2f   :  { %v124_v30 = vld [vmem:[%s8441_s1 + $0x308] sm:$0xff]  ;;  %1735 = vmatpush2.msra.mxu1 %v259_v24  ;;  %v123_v32 = vld [vmem:[%s8441_s1 + $0x300] sm:$0xff]  ;;  %1666 = vmatpush2.msra.mxu0 %v127_v25 }
  0x30   :  { %v252_v33 = vld [vmem:[%s8441_s1 + $0x708] sm:$0xff]  ;;  %1736 = vmatprep.subr.mxu1 %v256_v26  ;;  %v251_v35 = vld [vmem:[%s8441_s1 + $0x700] sm:$0xff]  ;;  %1667 = vmatprep.subr.mxu0 %v124_v30 }
  0x31   :  { %v120_v34 = vld [vmem:[%s8441_s1 + $0x2e8] sm:$0xff]  ;;  %1737 = vmatpush2.msra.mxu1 %v255_v31  ;;  %v119_v36 = vld [vmem:[%s8441_s1 + $0x2e0] sm:$0xff]  ;;  %1668 = vmatpush2.msra.mxu0 %v123_v32 }
  0x32   :  { %v248_v37 = vld [vmem:[%s8441_s1 + $0x6e8] sm:$0xff]  ;;  %1738 = vmatprep.subr.mxu1 %v252_v33  ;;  %v247_v41 = vld [vmem:[%s8441_s1 + $0x6e0] sm:$0xff]  ;;  %1669 = vmatprep.subr.mxu0 %v120_v34 }
  0x33   :  { %v116_v40 = vld [vmem:[%s8441_s1 + $0x2c8] sm:$0xff]  ;;  %1739 = vmatpush2.msra.mxu1 %v251_v35  ;;  %v115_v42 = vld [vmem:[%s8441_s1 + $0x2c0] sm:$0xff]  ;;  %1670 = vmatpush2.msra.mxu0 %v119_v36 }
  0x34   :  { %v244_v43 = vld [vmem:[%s8441_s1 + $0x6c8] sm:$0xff]  ;;  %1740 = vmatprep.subr.mxu1 %v248_v37  ;;  %v243_v45 = vld [vmem:[%s8441_s1 + $0x6c0] sm:$0xff]  ;;  %1671 = vmatprep.subr.mxu0 %v116_v40 }
  0x35   :  { %v112_v44 = vld [vmem:[%s8441_s1 + $0x2a8] sm:$0xff]  ;;  %1741 = vmatpush2.msra.mxu1 %v247_v41  ;;  %v111_v46 = vld [vmem:[%s8441_s1 + $0x2a0] sm:$0xff]  ;;  %1672 = vmatpush2.msra.mxu0 %v115_v42 }
  0x36   :  { %v240_v47 = vld [vmem:[%s8441_s1 + $0x6a8] sm:$0xff]  ;;  %1742 = vmatprep.subr.mxu1 %v244_v43  ;;  %v239_v50 = vld [vmem:[%s8441_s1 + $0x6a0] sm:$0xff]  ;;  %1673 = vmatprep.subr.mxu0 %v112_v44 }
  0x37   :  { %v108_v49 = vld [vmem:[%s8441_s1 + $0x288] sm:$0xff]  ;;  %v21_v51 = vld [vmem:[%s8440_s0] sm:$0xff]  ;;  %1743 = vmatpush2.msra.mxu1 %v243_v45  ;;  %1674 = vmatpush2.msra.mxu0 %v111_v46 }
  0x38   :  { %v107_v52 = vld [vmem:[%s8441_s1 + $0x280] sm:$0xff]  ;;  %v236_v53 = vld [vmem:[%s8441_s1 + $0x688] sm:$0xff]  ;;  %1744 = vmatprep.subr.mxu1 %v240_v47  ;;  %1675 = vmatprep.subr.mxu0 %v108_v49  ;;  %v4038_v58 = vrot.slane %v21_v51, %v4008_v48  ;;  %v1495_v59 = vcombine.high %v21_v51, %v21_v51 }
  0x39   :  { %v104_v54 = vld [vmem:[%s8441_s1 + $0x268] sm:$0xff]  ;;  %v235_v55 = vld [vmem:[%s8441_s1 + $0x680] sm:$0xff]  ;;  %1745 = vmatpush2.msra.mxu1 %v239_v50  ;;  %1676 = vmatpush2.msra.mxu0 %v107_v52 }
  0x3a   :  { %v103_v56 = vld [vmem:[%s8441_s1 + $0x260] sm:$0xff]  ;;  %v232_v57 = vld [vmem:[%s8441_s1 + $0x668] sm:$0xff]  ;;  %1746 = vmatprep.subr.mxu1 %v236_v53  ;;  %1677 = vmatprep.subr.mxu0 %v104_v54  ;;  %v4066_v4 = vcombine.high %v4038_v58, %v4038_v58  ;;  %v4069_v5 = vrot.slane %v1495_v59, %v4008_v48 }
  0x3b   :  { %v100_v60 = vld [vmem:[%s8441_s1 + $0x248] sm:$0xff]  ;;  %v231_v61 = vld [vmem:[%s8441_s1 + $0x660] sm:$0xff]  ;;  %1747 = vmatpush2.msra.mxu1 %v235_v55  ;;  %1678 = vmatpush2.msra.mxu0 %v103_v56 }
  0x3c   :  { %v99_v62 = vld [vmem:[%s8441_s1 + $0x240] sm:$0xff]  ;;  %v228_v63 = vld [vmem:[%s8441_s1 + $0x648] sm:$0xff]  ;;  %1748 = vmatprep.subr.mxu1 %v232_v57  ;;  %1679 = vmatprep.subr.mxu0 %v100_v60  ;;  %v4092_v12 = vcombine.high %v4069_v5, %v4069_v5 }
  0x3d   :  { %v96_v0 = vld [vmem:[%s8441_s1 + $0x228] sm:$0xff]  ;;  %v227_v1 = vld [vmem:[%s8441_s1 + $0x640] sm:$0xff]  ;;  %1749 = vmatpush2.msra.mxu1 %v231_v61  ;;  %1680 = vmatpush2.msra.mxu0 %v99_v62 }
  0x3e   :  { %v95_v2 = vld [vmem:[%s8441_s1 + $0x220] sm:$0xff]  ;;  %v224_v3 = vld [vmem:[%s8441_s1 + $0x628] sm:$0xff]  ;;  %1750 = vmatprep.subr.mxu1 %v228_v63  ;;  %1681 = vmatprep.subr.mxu0 %v96_v0 }
  0x3f   :  { %v92_v6 = vld [vmem:[%s8441_s1 + $0x208] sm:$0xff]  ;;  %1751 = vmatpush2.msra.mxu1 %v227_v1  ;;  %v91_v7 = vld [vmem:[%s8441_s1 + $0x200] sm:$0xff]  ;;  %1682 = vmatpush2.msra.mxu0 %v95_v2 }
  0x40   :  { %v223_v8 = vld [vmem:[%s8441_s1 + $0x620] sm:$0xff]  ;;  %1752 = vmatprep.subr.mxu1 %v224_v3  ;;  %v220_v9 = vld [vmem:[%s8441_s1 + $0x608] sm:$0xff]  ;;  %1683 = vmatprep.subr.mxu0 %v92_v6 }
  0x41   :  { %1685 = vmatprep.mubr.f32.mxu0 %v4066_v4  ;;  %v344_v10 = vld [vmem:[%s8441_s1 + $0x9e8] sm:$0xff]  ;;  %v219_v11 = vld [vmem:[%s8441_s1 + $0x600] sm:$0xff]  ;;  %1684 = vmatpush2.msra.mxu0 %v91_v7 }
  0x42   :  { %1753 = vmatpush2.msra.mxu1 %v223_v8  ;;  %v343_v13 = vld [vmem:[%s8441_s1 + $0x9e0] sm:$0xff]  ;;  %1686 = vmatmul.mubr.f32.vlgmr.msra.gmra.mxu0 %v4038_v58  ;;  %v340_v14 = vld [vmem:[%s8441_s1 + $0x9c8] sm:$0xff] }
  0x43   :  { %1754 = vmatprep.subr.mxu1 %v220_v9  ;;  %1763 = vmatprep.subr.mxu0 %v344_v10  ;;  %v472_v15 = vld [vmem:[%s8441_s1 + $0xde8] sm:$0xff]  ;;  %v339_v16 = vld [vmem:[%s8441_s1 + $0x9c0] sm:$0xff] }
  0x44   :  { %1755 = vmatpush2.msra.mxu1 %v219_v11  ;;  %1756 = vmatprep.mubr.f32.mxu1 %v4092_v12  ;;  %v471_v17 = vld [vmem:[%s8441_s1 + $0xde0] sm:$0xff]  ;;  %v336_v18 = vld [vmem:[%s8441_s1 + $0x9a8] sm:$0xff] }
  0x45   :  { %1764 = vmatpush1.msra.mxu0 %v343_v13  ;;  %1757 = vmatmul.mubr.f32.vlgmr.msra.gmra.mxu1 %v4069_v5  ;;  %v468_v19 = vld [vmem:[%s8441_s1 + $0xdc8] sm:$0xff]  ;;  %v335_v20 = vld [vmem:[%s8441_s1 + $0x9a0] sm:$0xff] }
  0x46   :  { %1765 = vmatprep.subr.mxu0 %v340_v14  ;;  %1834 = vmatprep.subr.mxu1 %v472_v15  ;;  %v467_v21 = vld [vmem:[%s8441_s1 + $0xdc0] sm:$0xff]  ;;  %v332_v22 = vld [vmem:[%s8441_s1 + $0x988] sm:$0xff] }
  0x47   :  { %1766 = vmatpush1.msra.mxu0 %v339_v16  ;;  %1835 = vmatpush1.msra.mxu1 %v471_v17  ;;  %v464_v23 = vld [vmem:[%s8441_s1 + $0xda8] sm:$0xff]  ;;  %v331_v24 = vld [vmem:[%s8441_s1 + $0x980] sm:$0xff] }
  0x48   :  { %1767 = vmatprep.subr.mxu0 %v336_v18  ;;  %1836 = vmatprep.subr.mxu1 %v468_v19  ;;  %v463_v25 = vld [vmem:[%s8441_s1 + $0xda0] sm:$0xff]  ;;  %v328_v26 = vld [vmem:[%s8441_s1 + $0x968] sm:$0xff] }
  0x49   :  { %1768 = vmatpush1.msra.mxu0 %v335_v20  ;;  %1837 = vmatpush1.msra.mxu1 %v467_v21  ;;  %v460_v27 = vld [vmem:[%s8441_s1 + $0xd88] sm:$0xff]  ;;  %v327_v28 = vld [vmem:[%s8441_s1 + $0x960] sm:$0xff] }
  0x4a   :  { %1769 = vmatprep.subr.mxu0 %v332_v22  ;;  %1838 = vmatprep.subr.mxu1 %v464_v23  ;;  %v459_v29 = vld [vmem:[%s8441_s1 + $0xd80] sm:$0xff]  ;;  %v324_v30 = vld [vmem:[%s8441_s1 + $0x948] sm:$0xff] }
  0x4b   :  { %1770 = vmatpush1.msra.mxu0 %v331_v24  ;;  %1839 = vmatpush1.msra.mxu1 %v463_v25  ;;  %v456_v31 = vld [vmem:[%s8441_s1 + $0xd68] sm:$0xff]  ;;  %v323_v32 = vld [vmem:[%s8441_s1 + $0x940] sm:$0xff] }
  0x4c   :  { %1771 = vmatprep.subr.mxu0 %v328_v26  ;;  %1840 = vmatprep.subr.mxu1 %v460_v27  ;;  %v455_v33 = vld [vmem:[%s8441_s1 + $0xd60] sm:$0xff]  ;;  %v320_v34 = vld [vmem:[%s8441_s1 + $0x928] sm:$0xff] }
  0x4d   :  { %1772 = vmatpush1.msra.mxu0 %v327_v28  ;;  %1841 = vmatpush1.msra.mxu1 %v459_v29  ;;  %v452_v35 = vld [vmem:[%s8441_s1 + $0xd48] sm:$0xff]  ;;  %v319_v36 = vld [vmem:[%s8441_s1 + $0x920] sm:$0xff] }
  0x4e   :  { %1773 = vmatprep.subr.mxu0 %v324_v30  ;;  %1842 = vmatprep.subr.mxu1 %v456_v31  ;;  %v451_v37 = vld [vmem:[%s8441_s1 + $0xd40] sm:$0xff]  ;;  %v316_v39 = vld [vmem:[%s8441_s1 + $0x908] sm:$0xff] }
  0x4f   :  { %1774 = vmatpush1.msra.mxu0 %v323_v32  ;;  %1843 = vmatpush1.msra.mxu1 %v455_v33  ;;  %v448_v40 = vld [vmem:[%s8441_s1 + $0xd28] sm:$0xff]  ;;  %v315_v41 = vld [vmem:[%s8441_s1 + $0x900] sm:$0xff] }
  0x50   :  { %1775 = vmatprep.subr.mxu0 %v320_v34  ;;  %1844 = vmatprep.subr.mxu1 %v452_v35  ;;  %v447_v42 = vld [vmem:[%s8441_s1 + $0xd20] sm:$0xff]  ;;  %v312_v43 = vld [vmem:[%s8441_s1 + $0x8e8] sm:$0xff] }
  0x51   :  { %1776 = vmatpush1.msra.mxu0 %v319_v36  ;;  %1845 = vmatpush1.msra.mxu1 %v451_v37  ;;  %v444_v44 = vld [vmem:[%s8441_s1 + $0xd08] sm:$0xff]  ;;  %v311_v45 = vld [vmem:[%s8441_s1 + $0x8e0] sm:$0xff] }
  0x52   :  { %1777 = vmatprep.subr.mxu0 %v316_v39  ;;  %1846 = vmatprep.subr.mxu1 %v448_v40  ;;  %v443_v46 = vld [vmem:[%s8441_s1 + $0xd00] sm:$0xff]  ;;  %v308_v47 = vld [vmem:[%s8441_s1 + $0x8c8] sm:$0xff] }
  0x53   :  { %1778 = vmatpush1.msra.mxu0 %v315_v41  ;;  %1847 = vmatpush1.msra.mxu1 %v447_v42  ;;  %v440_v49 = vld [vmem:[%s8441_s1 + $0xce8] sm:$0xff]  ;;  %v307_v50 = vld [vmem:[%s8441_s1 + $0x8c0] sm:$0xff] }
  0x54   :  { %1779 = vmatprep.subr.mxu0 %v312_v43  ;;  %1848 = vmatprep.subr.mxu1 %v444_v44  ;;  %v439_v51 = vld [vmem:[%s8441_s1 + $0xce0] sm:$0xff]  ;;  %v304_v52 = vld [vmem:[%s8441_s1 + $0x8a8] sm:$0xff] }
  0x55   :  { %1780 = vmatpush1.msra.mxu0 %v311_v45  ;;  %1849 = vmatpush1.msra.mxu1 %v443_v46  ;;  %v436_v53 = vld [vmem:[%s8441_s1 + $0xcc8] sm:$0xff]  ;;  %v303_v54 = vld [vmem:[%s8441_s1 + $0x8a0] sm:$0xff] }
  0x56   :  { %1781 = vmatprep.subr.mxu0 %v308_v47  ;;  %1850 = vmatprep.subr.mxu1 %v440_v49  ;;  %v435_v55 = vld [vmem:[%s8441_s1 + $0xcc0] sm:$0xff]  ;;  %v300_v56 = vld [vmem:[%s8441_s1 + $0x888] sm:$0xff] }
  0x57   :  { %1782 = vmatpush1.msra.mxu0 %v307_v50  ;;  %1851 = vmatpush1.msra.mxu1 %v439_v51  ;;  %v432_v57 = vld [vmem:[%s8441_s1 + $0xca8] sm:$0xff]  ;;  %v299_v59 = vld [vmem:[%s8441_s1 + $0x880] sm:$0xff] }
  0x58   :  { %1783 = vmatprep.subr.mxu0 %v304_v52  ;;  %1852 = vmatprep.subr.mxu1 %v436_v53  ;;  %v431_v60 = vld [vmem:[%s8441_s1 + $0xca0] sm:$0xff]  ;;  %v296_v61 = vld [vmem:[%s8441_s1 + $0x868] sm:$0xff] }
  0x59   :  { %1784 = vmatpush1.msra.mxu0 %v303_v54  ;;  %1853 = vmatpush1.msra.mxu1 %v435_v55  ;;  %v428_v62 = vld [vmem:[%s8441_s1 + $0xc88] sm:$0xff]  ;;  %v295_v63 = vld [vmem:[%s8441_s1 + $0x860] sm:$0xff] }
  0x5a   :  { %1785 = vmatprep.subr.mxu0 %v300_v56  ;;  %1854 = vmatprep.subr.mxu1 %v432_v57  ;;  %v427_v0 = vld [vmem:[%s8441_s1 + $0xc80] sm:$0xff]  ;;  %v292_v1 = vld [vmem:[%s8441_s1 + $0x848] sm:$0xff] }
  0x5b   :  { %1786 = vmatpush1.msra.mxu0 %v299_v59  ;;  %1855 = vmatpush1.msra.mxu1 %v431_v60  ;;  %v424_v2 = vld [vmem:[%s8441_s1 + $0xc68] sm:$0xff]  ;;  %v291_v3 = vld [vmem:[%s8441_s1 + $0x840] sm:$0xff] }
  0x5c   :  { %1787 = vmatprep.subr.mxu0 %v296_v61  ;;  %1856 = vmatprep.subr.mxu1 %v428_v62  ;;  %v423_v6 = vld [vmem:[%s8441_s1 + $0xc60] sm:$0xff]  ;;  %v288_v7 = vld [vmem:[%s8441_s1 + $0x828] sm:$0xff] }
  0x5d   :  { %1788 = vmatpush1.msra.mxu0 %v295_v63  ;;  %1857 = vmatpush1.msra.mxu1 %v427_v0  ;;  %v420_v8 = vld [vmem:[%s8441_s1 + $0xc48] sm:$0xff]  ;;  %v287_v9 = vld [vmem:[%s8441_s1 + $0x820] sm:$0xff] }
  0x5e   :  { %1789 = vmatprep.subr.mxu0 %v292_v1  ;;  %1858 = vmatprep.subr.mxu1 %v424_v2  ;;  %v419_v10 = vld [vmem:[%s8441_s1 + $0xc40] sm:$0xff]  ;;  %v284_v11 = vld [vmem:[%s8441_s1 + $0x808] sm:$0xff] }
  0x5f   :  { %1790 = vmatpush1.msra.mxu0 %v291_v3  ;;  %1859 = vmatpush1.msra.mxu1 %v423_v6  ;;  %v416_v13 = vld [vmem:[%s8441_s1 + $0xc28] sm:$0xff]  ;;  %v283_v14 = vld [vmem:[%s8441_s1 + $0x800] sm:$0xff] }
  0x60   :  { %1791 = vmatprep.subr.mxu0 %v288_v7  ;;  %1860 = vmatprep.subr.mxu1 %v420_v8  ;;  %v415_v15 = vld [vmem:[%s8441_s1 + $0xc20] sm:$0xff]  ;;  %v408_v16 = vld [vmem:[%s8441_s1 + $0xbe8] sm:$0xff] }
  0x61   :  { %1792 = vmatpush1.msra.mxu0 %v287_v9  ;;  %1861 = vmatpush1.msra.mxu1 %v419_v10  ;;  %v412_v17 = vld [vmem:[%s8441_s1 + $0xc08] sm:$0xff]  ;;  %v407_v18 = vld [vmem:[%s8441_s1 + $0xbe0] sm:$0xff] }
  0x62   :  { %1793 = vmatprep.subr.mxu0 %v284_v11  ;;  %1862 = vmatprep.subr.mxu1 %v416_v13  ;;  %v411_v19 = vld [vmem:[%s8441_s1 + $0xc00] sm:$0xff]  ;;  %v404_v20 = vld [vmem:[%s8441_s1 + $0xbc8] sm:$0xff] }
  0x63   :  { %1794 = vmatpush1.msra.mxu0 %v283_v14  ;;  %1863 = vmatpush1.msra.mxu1 %v415_v15  ;;  %v536_v21 = vld [vmem:[%s8441_s1 + $0xfe8] sm:$0xff]  ;;  %v403_v22 = vld [vmem:[%s8441_s1 + $0xbc0] sm:$0xff] }
  0x64   :  { %1795 = vmatprep.subr.mxu0 %v408_v16  ;;  %1864 = vmatprep.subr.mxu1 %v412_v17  ;;  %v535_v23 = vld [vmem:[%s8441_s1 + $0xfe0] sm:$0xff]  ;;  %v400_v24 = vld [vmem:[%s8441_s1 + $0xba8] sm:$0xff] }
  0x65   :  { %1796 = vmatpush2.msra.mxu0 %v407_v18  ;;  %1865 = vmatpush1.msra.mxu1 %v411_v19  ;;  %v532_v25 = vld [vmem:[%s8441_s1 + $0xfc8] sm:$0xff]  ;;  %v399_v26 = vld [vmem:[%s8441_s1 + $0xba0] sm:$0xff] }
  0x66   :  { %1797 = vmatprep.subr.mxu0 %v404_v20  ;;  %1866 = vmatprep.subr.mxu1 %v536_v21  ;;  %v531_v27 = vld [vmem:[%s8441_s1 + $0xfc0] sm:$0xff]  ;;  %v396_v28 = vld [vmem:[%s8441_s1 + $0xb88] sm:$0xff] }
  0x67   :  { %1798 = vmatpush2.msra.mxu0 %v403_v22  ;;  %1867 = vmatpush2.msra.mxu1 %v535_v23  ;;  %v528_v29 = vld [vmem:[%s8441_s1 + $0xfa8] sm:$0xff]  ;;  %v395_v30 = vld [vmem:[%s8441_s1 + $0xb80] sm:$0xff] }
  0x68   :  { %1799 = vmatprep.subr.mxu0 %v400_v24  ;;  %1868 = vmatprep.subr.mxu1 %v532_v25  ;;  %v527_v31 = vld [vmem:[%s8441_s1 + $0xfa0] sm:$0xff]  ;;  %v392_v32 = vld [vmem:[%s8441_s1 + $0xb68] sm:$0xff] }
  0x69   :  { %1800 = vmatpush2.msra.mxu0 %v399_v26  ;;  %1869 = vmatpush2.msra.mxu1 %v531_v27  ;;  %v524_v33 = vld [vmem:[%s8441_s1 + $0xf88] sm:$0xff]  ;;  %v391_v34 = vld [vmem:[%s8441_s1 + $0xb60] sm:$0xff] }
  0x6a   :  { %1801 = vmatprep.subr.mxu0 %v396_v28  ;;  %1870 = vmatprep.subr.mxu1 %v528_v29  ;;  %v523_v35 = vld [vmem:[%s8441_s1 + $0xf80] sm:$0xff]  ;;  %v388_v36 = vld [vmem:[%s8441_s1 + $0xb48] sm:$0xff] }
  0x6b   :  { %1802 = vmatpush2.msra.mxu0 %v395_v30  ;;  %1871 = vmatpush2.msra.mxu1 %v527_v31  ;;  %v520_v37 = vld [vmem:[%s8441_s1 + $0xf68] sm:$0xff]  ;;  %v387_v39 = vld [vmem:[%s8441_s1 + $0xb40] sm:$0xff] }
  0x6c   :  { %1803 = vmatprep.subr.mxu0 %v392_v32  ;;  %1872 = vmatprep.subr.mxu1 %v524_v33  ;;  %v519_v40 = vld [vmem:[%s8441_s1 + $0xf60] sm:$0xff]  ;;  %v384_v41 = vld [vmem:[%s8441_s1 + $0xb28] sm:$0xff] }
  0x6d   :  { %1804 = vmatpush2.msra.mxu0 %v391_v34  ;;  %1873 = vmatpush2.msra.mxu1 %v523_v35  ;;  %v516_v42 = vld [vmem:[%s8441_s1 + $0xf48] sm:$0xff]  ;;  %v383_v43 = vld [vmem:[%s8441_s1 + $0xb20] sm:$0xff] }
  0x6e   :  { %1805 = vmatprep.subr.mxu0 %v388_v36  ;;  %1874 = vmatprep.subr.mxu1 %v520_v37  ;;  %v515_v44 = vld [vmem:[%s8441_s1 + $0xf40] sm:$0xff]  ;;  %v380_v45 = vld [vmem:[%s8441_s1 + $0xb08] sm:$0xff] }
  0x6f   :  { %1806 = vmatpush2.msra.mxu0 %v387_v39  ;;  %1875 = vmatpush2.msra.mxu1 %v519_v40  ;;  %v512_v46 = vld [vmem:[%s8441_s1 + $0xf28] sm:$0xff]  ;;  %v379_v47 = vld [vmem:[%s8441_s1 + $0xb00] sm:$0xff] }
  0x70   :  { %1807 = vmatprep.subr.mxu0 %v384_v41  ;;  %1876 = vmatprep.subr.mxu1 %v516_v42  ;;  %v511_v49 = vld [vmem:[%s8441_s1 + $0xf20] sm:$0xff]  ;;  %v376_v50 = vld [vmem:[%s8441_s1 + $0xae8] sm:$0xff] }
  0x71   :  { %1808 = vmatpush2.msra.mxu0 %v383_v43  ;;  %1877 = vmatpush2.msra.mxu1 %v515_v44  ;;  %v508_v51 = vld [vmem:[%s8441_s1 + $0xf08] sm:$0xff]  ;;  %v375_v52 = vld [vmem:[%s8441_s1 + $0xae0] sm:$0xff] }
  0x72   :  { %1809 = vmatprep.subr.mxu0 %v380_v45  ;;  %1878 = vmatprep.subr.mxu1 %v512_v46  ;;  %v507_v53 = vld [vmem:[%s8441_s1 + $0xf00] sm:$0xff]  ;;  %v372_v54 = vld [vmem:[%s8441_s1 + $0xac8] sm:$0xff] }
  0x73   :  { %1810 = vmatpush2.msra.mxu0 %v379_v47  ;;  %1879 = vmatpush2.msra.mxu1 %v511_v49  ;;  %v504_v55 = vld [vmem:[%s8441_s1 + $0xee8] sm:$0xff]  ;;  %v371_v56 = vld [vmem:[%s8441_s1 + $0xac0] sm:$0xff] }
  0x74   :  { %1811 = vmatprep.subr.mxu0 %v376_v50  ;;  %1880 = vmatprep.subr.mxu1 %v508_v51  ;;  %v503_v57 = vld [vmem:[%s8441_s1 + $0xee0] sm:$0xff]  ;;  %v368_v59 = vld [vmem:[%s8441_s1 + $0xaa8] sm:$0xff] }
  0x75   :  { %1812 = vmatpush2.msra.mxu0 %v375_v52  ;;  %1881 = vmatpush2.msra.mxu1 %v507_v53  ;;  %v500_v60 = vld [vmem:[%s8441_s1 + $0xec8] sm:$0xff]  ;;  %v367_v61 = vld [vmem:[%s8441_s1 + $0xaa0] sm:$0xff] }
  0x76   :  { %1813 = vmatprep.subr.mxu0 %v372_v54  ;;  %1882 = vmatprep.subr.mxu1 %v504_v55  ;;  %v499_v62 = vld [vmem:[%s8441_s1 + $0xec0] sm:$0xff]  ;;  %v364_v63 = vld [vmem:[%s8441_s1 + $0xa88] sm:$0xff] }
  0x77   :  { %1814 = vmatpush2.msra.mxu0 %v371_v56  ;;  %1883 = vmatpush2.msra.mxu1 %v503_v57  ;;  %v496_v0 = vld [vmem:[%s8441_s1 + $0xea8] sm:$0xff]  ;;  %v363_v1 = vld [vmem:[%s8441_s1 + $0xa80] sm:$0xff] }
  0x78   :  { %1815 = vmatprep.subr.mxu0 %v368_v59  ;;  %v22_v2 = vld [vmem:[%s8440_s0 + $0x8] sm:$0xff]  ;;  %1884 = vmatprep.subr.mxu1 %v500_v60  ;;  %v495_v3 = vld [vmem:[%s8441_s1 + $0xea0] sm:$0xff] }
  0x79   :  { %1816 = vmatpush2.msra.mxu0 %v367_v61  ;;  %v360_v6 = vld [vmem:[%s8441_s1 + $0xa68] sm:$0xff]  ;;  %1885 = vmatpush2.msra.mxu1 %v499_v62  ;;  %v359_v8 = vld [vmem:[%s8441_s1 + $0xa60] sm:$0xff]  ;;  %v1512_v11 = vcombine.high %v22_v2, %v22_v2  ;;  %v4449_v15 = vrot.slane %v22_v2, %v4008_v48 }
  0x7a   :  { %1817 = vmatprep.subr.mxu0 %v364_v63  ;;  %v492_v7 = vld [vmem:[%s8441_s1 + $0xe88] sm:$0xff]  ;;  %1886 = vmatprep.subr.mxu1 %v496_v0  ;;  %v491_v9 = vld [vmem:[%s8441_s1 + $0xe80] sm:$0xff] }
  0x7b   :  { %1818 = vmatpush2.msra.mxu0 %v363_v1  ;;  %v356_v10 = vld [vmem:[%s8441_s1 + $0xa48] sm:$0xff]  ;;  %1887 = vmatpush2.msra.mxu1 %v495_v3  ;;  %v355_v14 = vld [vmem:[%s8441_s1 + $0xa40] sm:$0xff]  ;;  %v4470_v22 = vrot.slane %v1512_v11, %v4008_v48  ;;  %v4480_v25 = vcombine.high %v4449_v15, %v4449_v15 }
  0x7c   :  { %1819 = vmatprep.subr.mxu0 %v360_v6  ;;  %v488_v13 = vld [vmem:[%s8441_s1 + $0xe68] sm:$0xff]  ;;  %1888 = vmatprep.subr.mxu1 %v492_v7  ;;  %v487_v16 = vld [vmem:[%s8441_s1 + $0xe60] sm:$0xff] }
  0x7d   :  { %1820 = vmatpush2.msra.mxu0 %v359_v8  ;;  %v352_v17 = vld [vmem:[%s8441_s1 + $0xa28] sm:$0xff]  ;;  %1889 = vmatpush2.msra.mxu1 %v491_v9  ;;  %v351_v19 = vld [vmem:[%s8441_s1 + $0xa20] sm:$0xff]  ;;  %v4496_v30 = vcombine.high %v4470_v22, %v4470_v22 }
  0x7e   :  { %1821 = vmatprep.subr.mxu0 %v356_v10  ;;  %v484_v18 = vld [vmem:[%s8441_s1 + $0xe48] sm:$0xff]  ;;  %1890 = vmatprep.subr.mxu1 %v488_v13  ;;  %v483_v20 = vld [vmem:[%s8441_s1 + $0xe40] sm:$0xff] }
  0x7f   :  { %1822 = vmatpush2.msra.mxu0 %v355_v14  ;;  %v348_v21 = vld [vmem:[%s8441_s1 + $0xa08] sm:$0xff]  ;;  %1891 = vmatpush2.msra.mxu1 %v487_v16  ;;  %v347_v24 = vld [vmem:[%s8441_s1 + $0xa00] sm:$0xff] }
  0x80   :  { %1823 = vmatprep.subr.mxu0 %v352_v17  ;;  %v480_v23 = vld [vmem:[%s8441_s1 + $0xe28] sm:$0xff]  ;;  %1892 = vmatprep.subr.mxu1 %v484_v18  ;;  %v479_v26 = vld [vmem:[%s8441_s1 + $0xe20] sm:$0xff] }
  0x81   :  { %1824 = vmatpush2.msra.mxu0 %v351_v19  ;;  %1893 = vmatpush2.msra.mxu1 %v483_v20  ;;  %v476_v27 = vld [vmem:[%s8441_s1 + $0xe08] sm:$0xff]  ;;  %v475_v29 = vld [vmem:[%s8441_s1 + $0xe00] sm:$0xff] }
  0x82   :  { %1825 = vmatprep.subr.mxu0 %v348_v21  ;;  %1894 = vmatprep.subr.mxu1 %v480_v23  ;;  %v600_v28 = vld [vmem:[%s8441_s1 + $0x11e8] sm:$0xff]  ;;  %v599_v31 = vld [vmem:[%s8441_s1 + $0x11e0] sm:$0xff] }
  0x83   :  { %1826 = vmatpush2.msra.mxu0 %v347_v24  ;;  %1827 = vmatprep.mubr.f32.mxu0 %v4480_v25  ;;  %v596_v32 = vld [vmem:[%s8441_s1 + $0x11c8] sm:$0xff]  ;;  %v595_v34 = vld [vmem:[%s8441_s1 + $0x11c0] sm:$0xff] }
  0x84   :  { %1895 = vmatpush2.msra.mxu1 %v479_v26  ;;  %1828 = vmatmul.mubr.f32.vlgmr.msra.gmra.mxu0 %v4449_v15  ;;  %v728_v33 = vld [vmem:[%s8441_s1 + $0x15e8] sm:$0xff]  ;;  %v727_v35 = vld [vmem:[%s8441_s1 + $0x15e0] sm:$0xff] }
  0x85   :  { %1896 = vmatprep.subr.mxu1 %v476_v27  ;;  %1905 = vmatprep.subr.mxu0 %v600_v28  ;;  %v592_v36 = vld [vmem:[%s8441_s1 + $0x11a8] sm:$0xff]  ;;  %v591_v39 = vld [vmem:[%s8441_s1 + $0x11a0] sm:$0xff] }
  0x86   :  { %1897 = vmatpush2.msra.mxu1 %v475_v29  ;;  %1898 = vmatprep.mubr.f32.mxu1 %v4496_v30  ;;  %v724_v37 = vld [vmem:[%s8441_s1 + $0x15c8] sm:$0xff]  ;;  %v723_v40 = vld [vmem:[%s8441_s1 + $0x15c0] sm:$0xff] }
  0x87   :  { %1906 = vmatpush1.msra.mxu0 %v599_v31  ;;  %1899 = vmatmul.mubr.f32.vlgmr.msra.gmra.mxu1 %v4470_v22  ;;  %v588_v41 = vld [vmem:[%s8441_s1 + $0x1188] sm:$0xff]  ;;  %v587_v43 = vld [vmem:[%s8441_s1 + $0x1180] sm:$0xff] }
  0x88   :  { %1907 = vmatprep.subr.mxu0 %v596_v32  ;;  %1976 = vmatprep.subr.mxu1 %v728_v33  ;;  %v720_v42 = vld [vmem:[%s8441_s1 + $0x15a8] sm:$0xff]  ;;  %v719_v44 = vld [vmem:[%s8441_s1 + $0x15a0] sm:$0xff] }
  0x89   :  { %1908 = vmatpush1.msra.mxu0 %v595_v34  ;;  %1977 = vmatpush1.msra.mxu1 %v727_v35  ;;  %v584_v45 = vld [vmem:[%s8441_s1 + $0x1168] sm:$0xff]  ;;  %v583_v47 = vld [vmem:[%s8441_s1 + $0x1160] sm:$0xff] }
  0x8a   :  { %1909 = vmatprep.subr.mxu0 %v592_v36  ;;  %1978 = vmatprep.subr.mxu1 %v724_v37  ;;  %v716_v46 = vld [vmem:[%s8441_s1 + $0x1588] sm:$0xff]  ;;  %v715_v49 = vld [vmem:[%s8441_s1 + $0x1580] sm:$0xff] }
  0x8b   :  { %1910 = vmatpush1.msra.mxu0 %v591_v39  ;;  %1979 = vmatpush1.msra.mxu1 %v723_v40  ;;  %v580_v50 = vld [vmem:[%s8441_s1 + $0x1148] sm:$0xff]  ;;  %v579_v52 = vld [vmem:[%s8441_s1 + $0x1140] sm:$0xff] }
  0x8c   :  { %1911 = vmatprep.subr.mxu0 %v588_v41  ;;  %1980 = vmatprep.subr.mxu1 %v720_v42  ;;  %v712_v51 = vld [vmem:[%s8441_s1 + $0x1568] sm:$0xff]  ;;  %v711_v53 = vld [vmem:[%s8441_s1 + $0x1560] sm:$0xff] }
  0x8d   :  { %1912 = vmatpush1.msra.mxu0 %v587_v43  ;;  %1981 = vmatpush1.msra.mxu1 %v719_v44  ;;  %v576_v54 = vld [vmem:[%s8441_s1 + $0x1128] sm:$0xff]  ;;  %v575_v56 = vld [vmem:[%s8441_s1 + $0x1120] sm:$0xff] }
  0x8e   :  { %1913 = vmatprep.subr.mxu0 %v584_v45  ;;  %1982 = vmatprep.subr.mxu1 %v716_v46  ;;  %v708_v55 = vld [vmem:[%s8441_s1 + $0x1548] sm:$0xff]  ;;  %v707_v57 = vld [vmem:[%s8441_s1 + $0x1540] sm:$0xff] }
  0x8f   :  { %1914 = vmatpush1.msra.mxu0 %v583_v47  ;;  %1983 = vmatpush1.msra.mxu1 %v715_v49  ;;  %v572_v59 = vld [vmem:[%s8441_s1 + $0x1108] sm:$0xff]  ;;  %v571_v61 = vld [vmem:[%s8441_s1 + $0x1100] sm:$0xff] }
  0x90   :  { %1915 = vmatprep.subr.mxu0 %v580_v50  ;;  %1984 = vmatprep.subr.mxu1 %v712_v51  ;;  %v704_v60 = vld [vmem:[%s8441_s1 + $0x1528] sm:$0xff]  ;;  %v703_v62 = vld [vmem:[%s8441_s1 + $0x1520] sm:$0xff] }
  0x91   :  { %1916 = vmatpush1.msra.mxu0 %v579_v52  ;;  %1985 = vmatpush1.msra.mxu1 %v711_v53  ;;  %v568_v63 = vld [vmem:[%s8441_s1 + $0x10e8] sm:$0xff]  ;;  %v567_v1 = vld [vmem:[%s8441_s1 + $0x10e0] sm:$0xff] }
  0x92   :  { %1917 = vmatprep.subr.mxu0 %v576_v54  ;;  %1986 = vmatprep.subr.mxu1 %v708_v55  ;;  %v700_v0 = vld [vmem:[%s8441_s1 + $0x1508] sm:$0xff]  ;;  %v699_v2 = vld [vmem:[%s8441_s1 + $0x1500] sm:$0xff] }
  0x93   :  { %1918 = vmatpush1.msra.mxu0 %v575_v56  ;;  %1987 = vmatpush1.msra.mxu1 %v707_v57  ;;  %v564_v3 = vld [vmem:[%s8441_s1 + $0x10c8] sm:$0xff]  ;;  %v563_v7 = vld [vmem:[%s8441_s1 + $0x10c0] sm:$0xff] }
  0x94   :  { %1919 = vmatprep.subr.mxu0 %v572_v59  ;;  %1988 = vmatprep.subr.mxu1 %v704_v60  ;;  %v696_v6 = vld [vmem:[%s8441_s1 + $0x14e8] sm:$0xff]  ;;  %v695_v8 = vld [vmem:[%s8441_s1 + $0x14e0] sm:$0xff] }
  0x95   :  { %1920 = vmatpush1.msra.mxu0 %v571_v61  ;;  %1989 = vmatpush1.msra.mxu1 %v703_v62  ;;  %v560_v9 = vld [vmem:[%s8441_s1 + $0x10a8] sm:$0xff]  ;;  %v559_v11 = vld [vmem:[%s8441_s1 + $0x10a0] sm:$0xff] }
  0x96   :  { %1921 = vmatprep.subr.mxu0 %v568_v63  ;;  %1990 = vmatprep.subr.mxu1 %v700_v0  ;;  %v692_v10 = vld [vmem:[%s8441_s1 + $0x14c8] sm:$0xff]  ;;  %v691_v13 = vld [vmem:[%s8441_s1 + $0x14c0] sm:$0xff] }
  0x97   :  { %1922 = vmatpush1.msra.mxu0 %v567_v1  ;;  %1991 = vmatpush1.msra.mxu1 %v699_v2  ;;  %v556_v14 = vld [vmem:[%s8441_s1 + $0x1088] sm:$0xff]  ;;  %v555_v17 = vld [vmem:[%s8441_s1 + $0x1080] sm:$0xff] }
  0x98   :  { %1923 = vmatprep.subr.mxu0 %v564_v3  ;;  %1992 = vmatprep.subr.mxu1 %v696_v6  ;;  %v688_v16 = vld [vmem:[%s8441_s1 + $0x14a8] sm:$0xff]  ;;  %v687_v18 = vld [vmem:[%s8441_s1 + $0x14a0] sm:$0xff] }
  0x99   :  { %1924 = vmatpush1.msra.mxu0 %v563_v7  ;;  %1993 = vmatpush1.msra.mxu1 %v695_v8  ;;  %v552_v19 = vld [vmem:[%s8441_s1 + $0x1068] sm:$0xff]  ;;  %v551_v21 = vld [vmem:[%s8441_s1 + $0x1060] sm:$0xff] }
  0x9a   :  { %1925 = vmatprep.subr.mxu0 %v560_v9  ;;  %1994 = vmatprep.subr.mxu1 %v692_v10  ;;  %v684_v20 = vld [vmem:[%s8441_s1 + $0x1488] sm:$0xff]  ;;  %v683_v23 = vld [vmem:[%s8441_s1 + $0x1480] sm:$0xff] }
  0x9b   :  { %1926 = vmatpush1.msra.mxu0 %v559_v11  ;;  %1995 = vmatpush1.msra.mxu1 %v691_v13  ;;  %v548_v24 = vld [vmem:[%s8441_s1 + $0x1048] sm:$0xff]  ;;  %v547_v27 = vld [vmem:[%s8441_s1 + $0x1040] sm:$0xff] }
  0x9c   :  { %1927 = vmatprep.subr.mxu0 %v556_v14  ;;  %1996 = vmatprep.subr.mxu1 %v688_v16  ;;  %v680_v26 = vld [vmem:[%s8441_s1 + $0x1468] sm:$0xff]  ;;  %v679_v28 = vld [vmem:[%s8441_s1 + $0x1460] sm:$0xff] }
  0x9d   :  { %1928 = vmatpush1.msra.mxu0 %v555_v17  ;;  %1997 = vmatpush1.msra.mxu1 %v687_v18  ;;  %v544_v29 = vld [vmem:[%s8441_s1 + $0x1028] sm:$0xff]  ;;  %v543_v32 = vld [vmem:[%s8441_s1 + $0x1020] sm:$0xff] }
  0x9e   :  { %1929 = vmatprep.subr.mxu0 %v552_v19  ;;  %1998 = vmatprep.subr.mxu1 %v684_v20  ;;  %v676_v31 = vld [vmem:[%s8441_s1 + $0x1448] sm:$0xff]  ;;  %v675_v33 = vld [vmem:[%s8441_s1 + $0x1440] sm:$0xff] }
  0x9f   :  { %1930 = vmatpush1.msra.mxu0 %v551_v21  ;;  %1999 = vmatpush1.msra.mxu1 %v683_v23  ;;  %v540_v34 = vld [vmem:[%s8441_s1 + $0x1008] sm:$0xff]  ;;  %v539_v36 = vld [vmem:[%s8441_s1 + $0x1000] sm:$0xff] }
  0xa0   :  { %1931 = vmatprep.subr.mxu0 %v548_v24  ;;  %2000 = vmatprep.subr.mxu1 %v680_v26  ;;  %v672_v35 = vld [vmem:[%s8441_s1 + $0x1428] sm:$0xff]  ;;  %v671_v37 = vld [vmem:[%s8441_s1 + $0x1420] sm:$0xff] }
  0xa1   :  { %1932 = vmatpush1.msra.mxu0 %v547_v27  ;;  %2001 = vmatpush1.msra.mxu1 %v679_v28  ;;  %v664_v39 = vld [vmem:[%s8441_s1 + $0x13e8] sm:$0xff]  ;;  %v663_v41 = vld [vmem:[%s8441_s1 + $0x13e0] sm:$0xff] }
  0xa2   :  { %1933 = vmatprep.subr.mxu0 %v544_v29  ;;  %2002 = vmatprep.subr.mxu1 %v676_v31  ;;  %v668_v40 = vld [vmem:[%s8441_s1 + $0x1408] sm:$0xff]  ;;  %v667_v42 = vld [vmem:[%s8441_s1 + $0x1400] sm:$0xff]  ;;  %v23_v31 = vld [vmem:[%s8440_s0 + $0x10] sm:$0xff] }
  0xa3   :  { %1934 = vmatpush1.msra.mxu0 %v543_v32  ;;  %2003 = vmatpush1.msra.mxu1 %v675_v33  ;;  %v660_v43 = vld [vmem:[%s8441_s1 + $0x13c8] sm:$0xff]  ;;  %v659_v45 = vld [vmem:[%s8441_s1 + $0x13c0] sm:$0xff] }
  0xa4   :  { %1935 = vmatprep.subr.mxu0 %v540_v34  ;;  %2004 = vmatprep.subr.mxu1 %v672_v35  ;;  %v792_v44 = vld [vmem:[%s8441_s1 + $0x17e8] sm:$0xff]  ;;  %v791_v46 = vld [vmem:[%s8441_s1 + $0x17e0] sm:$0xff] }
  0xa5   :  { %1936 = vmatpush1.msra.mxu0 %v539_v36  ;;  %2005 = vmatpush1.msra.mxu1 %v671_v37  ;;  %v656_v47 = vld [vmem:[%s8441_s1 + $0x13a8] sm:$0xff]  ;;  %v655_v50 = vld [vmem:[%s8441_s1 + $0x13a0] sm:$0xff] }
  0xa6   :  { %1937 = vmatprep.subr.mxu0 %v664_v39  ;;  %2006 = vmatprep.subr.mxu1 %v668_v40  ;;  %v788_v49 = vld [vmem:[%s8441_s1 + $0x17c8] sm:$0xff]  ;;  %v787_v51 = vld [vmem:[%s8441_s1 + $0x17c0] sm:$0xff]  ;;  %v1529_v39 = vcombine.high %v23_v31, %v23_v31 }
  0xa7   :  { %1938 = vmatpush2.msra.mxu0 %v663_v41  ;;  %2007 = vmatpush1.msra.mxu1 %v667_v42  ;;  %v652_v52 = vld [vmem:[%s8441_s1 + $0x1388] sm:$0xff]  ;;  %v651_v54 = vld [vmem:[%s8441_s1 + $0x1380] sm:$0xff]  ;;  %v4854_v42 = vrot.slane %v23_v31, %v4008_v48 }
  0xa8   :  { %1939 = vmatprep.subr.mxu0 %v660_v43  ;;  %2008 = vmatprep.subr.mxu1 %v792_v44  ;;  %v784_v53 = vld [vmem:[%s8441_s1 + $0x17a8] sm:$0xff]  ;;  %v783_v55 = vld [vmem:[%s8441_s1 + $0x17a0] sm:$0xff] }
  0xa9   :  { %1940 = vmatpush2.msra.mxu0 %v659_v45  ;;  %2009 = vmatpush2.msra.mxu1 %v791_v46  ;;  %v648_v56 = vld [vmem:[%s8441_s1 + $0x1368] sm:$0xff]  ;;  %v647_v59 = vld [vmem:[%s8441_s1 + $0x1360] sm:$0xff] }
  0xaa   :  { %1941 = vmatprep.subr.mxu0 %v656_v47  ;;  %2010 = vmatprep.subr.mxu1 %v788_v49  ;;  %v780_v57 = vld [vmem:[%s8441_s1 + $0x1788] sm:$0xff]  ;;  %v779_v60 = vld [vmem:[%s8441_s1 + $0x1780] sm:$0xff] }
  0xab   :  { %1942 = vmatpush2.msra.mxu0 %v655_v50  ;;  %2011 = vmatpush2.msra.mxu1 %v787_v51  ;;  %v644_v61 = vld [vmem:[%s8441_s1 + $0x1348] sm:$0xff]  ;;  %v643_v63 = vld [vmem:[%s8441_s1 + $0x1340] sm:$0xff]  ;;  %v4875_v50 = vrot.slane %v1529_v39, %v4008_v48 }
  0xac   :  { %1943 = vmatprep.subr.mxu0 %v652_v52  ;;  %2012 = vmatprep.subr.mxu1 %v784_v53  ;;  %v776_v62 = vld [vmem:[%s8441_s1 + $0x1768] sm:$0xff]  ;;  %v775_v0 = vld [vmem:[%s8441_s1 + $0x1760] sm:$0xff]  ;;  %v4885_v53 = vcombine.high %v4854_v42, %v4854_v42 }
  0xad   :  { %1944 = vmatpush2.msra.mxu0 %v651_v54  ;;  %2013 = vmatpush2.msra.mxu1 %v783_v55  ;;  %v640_v1 = vld [vmem:[%s8441_s1 + $0x1328] sm:$0xff]  ;;  %v639_v3 = vld [vmem:[%s8441_s1 + $0x1320] sm:$0xff] }
  0xae   :  { %1945 = vmatprep.subr.mxu0 %v648_v56  ;;  %2014 = vmatprep.subr.mxu1 %v780_v57  ;;  %v772_v2 = vld [vmem:[%s8441_s1 + $0x1748] sm:$0xff]  ;;  %v771_v6 = vld [vmem:[%s8441_s1 + $0x1740] sm:$0xff] }
  0xaf   :  { %1946 = vmatpush2.msra.mxu0 %v647_v59  ;;  %2015 = vmatpush2.msra.mxu1 %v779_v60  ;;  %v636_v7 = vld [vmem:[%s8441_s1 + $0x1308] sm:$0xff]  ;;  %v635_v9 = vld [vmem:[%s8441_s1 + $0x1300] sm:$0xff]  ;;  %v4901_v59 = vcombine.high %v4875_v50, %v4875_v50 }
  0xb0   :  { %1947 = vmatprep.subr.mxu0 %v644_v61  ;;  %2016 = vmatprep.subr.mxu1 %v776_v62  ;;  %v768_v8 = vld [vmem:[%s8441_s1 + $0x1728] sm:$0xff]  ;;  %v767_v10 = vld [vmem:[%s8441_s1 + $0x1720] sm:$0xff] }
  0xb1   :  { %1948 = vmatpush2.msra.mxu0 %v643_v63  ;;  %2017 = vmatpush2.msra.mxu1 %v775_v0  ;;  %v632_v11 = vld [vmem:[%s8441_s1 + $0x12e8] sm:$0xff]  ;;  %v631_v14 = vld [vmem:[%s8441_s1 + $0x12e0] sm:$0xff] }
  0xb2   :  { %1949 = vmatprep.subr.mxu0 %v640_v1  ;;  %2018 = vmatprep.subr.mxu1 %v772_v2  ;;  %v764_v13 = vld [vmem:[%s8441_s1 + $0x1708] sm:$0xff]  ;;  %v763_v16 = vld [vmem:[%s8441_s1 + $0x1700] sm:$0xff] }
  0xb3   :  { %1950 = vmatpush2.msra.mxu0 %v639_v3  ;;  %2019 = vmatpush2.msra.mxu1 %v771_v6  ;;  %v628_v17 = vld [vmem:[%s8441_s1 + $0x12c8] sm:$0xff]  ;;  %v627_v19 = vld [vmem:[%s8441_s1 + $0x12c0] sm:$0xff] }
  0xb4   :  { %1951 = vmatprep.subr.mxu0 %v636_v7  ;;  %2020 = vmatprep.subr.mxu1 %v768_v8  ;;  %v760_v18 = vld [vmem:[%s8441_s1 + $0x16e8] sm:$0xff]  ;;  %v759_v20 = vld [vmem:[%s8441_s1 + $0x16e0] sm:$0xff] }
  0xb5   :  { %1952 = vmatpush2.msra.mxu0 %v635_v9  ;;  %2021 = vmatpush2.msra.mxu1 %v767_v10  ;;  %v624_v21 = vld [vmem:[%s8441_s1 + $0x12a8] sm:$0xff]  ;;  %v623_v24 = vld [vmem:[%s8441_s1 + $0x12a0] sm:$0xff] }
  0xb6   :  { %1953 = vmatprep.subr.mxu0 %v632_v11  ;;  %2022 = vmatprep.subr.mxu1 %v764_v13  ;;  %v756_v23 = vld [vmem:[%s8441_s1 + $0x16c8] sm:$0xff]  ;;  %v755_v26 = vld [vmem:[%s8441_s1 + $0x16c0] sm:$0xff] }
  0xb7   :  { %1954 = vmatpush2.msra.mxu0 %v631_v14  ;;  %2023 = vmatpush2.msra.mxu1 %v763_v16  ;;  %v620_v27 = vld [vmem:[%s8441_s1 + $0x1288] sm:$0xff]  ;;  %v619_v29 = vld [vmem:[%s8441_s1 + $0x1280] sm:$0xff] }
  0xb8   :  { %1955 = vmatprep.subr.mxu0 %v628_v17  ;;  %2024 = vmatprep.subr.mxu1 %v760_v18  ;;  %v752_v28 = vld [vmem:[%s8441_s1 + $0x16a8] sm:$0xff]  ;;  %v751_v32 = vld [vmem:[%s8441_s1 + $0x16a0] sm:$0xff] }
  0xb9   :  { %1956 = vmatpush2.msra.mxu0 %v627_v19  ;;  %2025 = vmatpush2.msra.mxu1 %v759_v20  ;;  %v616_v33 = vld [vmem:[%s8441_s1 + $0x1268] sm:$0xff]  ;;  %v615_v35 = vld [vmem:[%s8441_s1 + $0x1260] sm:$0xff] }
  0xba   :  { %1957 = vmatprep.subr.mxu0 %v624_v21  ;;  %2026 = vmatprep.subr.mxu1 %v756_v23  ;;  %v748_v34 = vld [vmem:[%s8441_s1 + $0x1688] sm:$0xff]  ;;  %v747_v36 = vld [vmem:[%s8441_s1 + $0x1680] sm:$0xff] }
  0xbb   :  { %1958 = vmatpush2.msra.mxu0 %v623_v24  ;;  %2027 = vmatpush2.msra.mxu1 %v755_v26  ;;  %v612_v37 = vld [vmem:[%s8441_s1 + $0x1248] sm:$0xff]  ;;  %v611_v41 = vld [vmem:[%s8441_s1 + $0x1240] sm:$0xff] }
  0xbc   :  { %1959 = vmatprep.subr.mxu0 %v620_v27  ;;  %2028 = vmatprep.subr.mxu1 %v752_v28  ;;  %v744_v40 = vld [vmem:[%s8441_s1 + $0x1668] sm:$0xff]  ;;  %v743_v43 = vld [vmem:[%s8441_s1 + $0x1660] sm:$0xff] }
  0xbd   :  { %1960 = vmatpush2.msra.mxu0 %v619_v29  ;;  %2029 = vmatpush2.msra.mxu1 %v751_v32  ;;  %v608_v44 = vld [vmem:[%s8441_s1 + $0x1228] sm:$0xff]  ;;  %v607_v46 = vld [vmem:[%s8441_s1 + $0x1220] sm:$0xff] }
  0xbe   :  { %1961 = vmatprep.subr.mxu0 %v616_v33  ;;  %2030 = vmatprep.subr.mxu1 %v748_v34  ;;  %v740_v45 = vld [vmem:[%s8441_s1 + $0x1648] sm:$0xff]  ;;  %v739_v47 = vld [vmem:[%s8441_s1 + $0x1640] sm:$0xff] }
  0xbf   :  { %1962 = vmatpush2.msra.mxu0 %v615_v35  ;;  %2031 = vmatpush2.msra.mxu1 %v747_v36  ;;  %v604_v49 = vld [vmem:[%s8441_s1 + $0x1208] sm:$0xff]  ;;  %v603_v52 = vld [vmem:[%s8441_s1 + $0x1200] sm:$0xff] }
  0xc0   :  { %1963 = vmatprep.subr.mxu0 %v612_v37  ;;  %2032 = vmatprep.subr.mxu1 %v744_v40  ;;  %v736_v51 = vld [vmem:[%s8441_s1 + $0x1628] sm:$0xff]  ;;  %v735_v54 = vld [vmem:[%s8441_s1 + $0x1620] sm:$0xff] }
  0xc1   :  { %1964 = vmatpush2.msra.mxu0 %v611_v41  ;;  %2033 = vmatpush2.msra.mxu1 %v743_v43  ;;  %v732_v55 = vld [vmem:[%s8441_s1 + $0x1608] sm:$0xff]  ;;  %v731_v57 = vld [vmem:[%s8441_s1 + $0x1600] sm:$0xff] }
  0xc2   :  { %1965 = vmatprep.subr.mxu0 %v608_v44  ;;  %2034 = vmatprep.subr.mxu1 %v740_v45  ;;  %v856_v56 = vld [vmem:[%s8441_s1 + $0x19e8] sm:$0xff]  ;;  %v855_v60 = vld [vmem:[%s8441_s1 + $0x19e0] sm:$0xff] }
  0xc3   :  { %1966 = vmatpush2.msra.mxu0 %v607_v46  ;;  %2035 = vmatpush2.msra.mxu1 %v739_v47  ;;  %v852_v61 = vld [vmem:[%s8441_s1 + $0x19c8] sm:$0xff]  ;;  %v851_v63 = vld [vmem:[%s8441_s1 + $0x19c0] sm:$0xff] }
  0xc4   :  { %1967 = vmatprep.subr.mxu0 %v604_v49  ;;  %2036 = vmatprep.subr.mxu1 %v736_v51  ;;  %v984_v62 = vld [vmem:[%s8441_s1 + $0x1de8] sm:$0xff]  ;;  %v983_v0 = vld [vmem:[%s8441_s1 + $0x1de0] sm:$0xff] }
  0xc5   :  { %1968 = vmatpush2.msra.mxu0 %v603_v52  ;;  %1969 = vmatprep.mubr.f32.mxu0 %v4885_v53  ;;  %v848_v1 = vld [vmem:[%s8441_s1 + $0x19a8] sm:$0xff]  ;;  %v847_v3 = vld [vmem:[%s8441_s1 + $0x19a0] sm:$0xff] }
  0xc6   :  { %2037 = vmatpush2.msra.mxu1 %v735_v54  ;;  %1970 = vmatmul.mubr.f32.vlgmr.msra.gmra.mxu0 %v4854_v42  ;;  %v980_v2 = vld [vmem:[%s8441_s1 + $0x1dc8] sm:$0xff]  ;;  %v979_v6 = vld [vmem:[%s8441_s1 + $0x1dc0] sm:$0xff] }
  0xc7   :  { %2038 = vmatprep.subr.mxu1 %v732_v55  ;;  %2047 = vmatprep.subr.mxu0 %v856_v56  ;;  %v844_v7 = vld [vmem:[%s8441_s1 + $0x1988] sm:$0xff]  ;;  %v843_v9 = vld [vmem:[%s8441_s1 + $0x1980] sm:$0xff] }
  0xc8   :  { %2039 = vmatpush2.msra.mxu1 %v731_v57  ;;  %2040 = vmatprep.mubr.f32.mxu1 %v4901_v59  ;;  %v976_v8 = vld [vmem:[%s8441_s1 + $0x1da8] sm:$0xff]  ;;  %v975_v10 = vld [vmem:[%s8441_s1 + $0x1da0] sm:$0xff] }
  0xc9   :  { %2048 = vmatpush1.msra.mxu0 %v855_v60  ;;  %2041 = vmatmul.mubr.f32.vlgmr.msra.gmra.mxu1 %v4875_v50  ;;  %v840_v11 = vld [vmem:[%s8441_s1 + $0x1968] sm:$0xff]  ;;  %v839_v14 = vld [vmem:[%s8441_s1 + $0x1960] sm:$0xff] }
  0xca   :  { %2049 = vmatprep.subr.mxu0 %v852_v61  ;;  %2118 = vmatprep.subr.mxu1 %v984_v62  ;;  %v972_v13 = vld [vmem:[%s8441_s1 + $0x1d88] sm:$0xff]  ;;  %v971_v16 = vld [vmem:[%s8441_s1 + $0x1d80] sm:$0xff] }
  0xcb   :  { %2050 = vmatpush1.msra.mxu0 %v851_v63  ;;  %2119 = vmatpush1.msra.mxu1 %v983_v0  ;;  %v836_v17 = vld [vmem:[%s8441_s1 + $0x1948] sm:$0xff]  ;;  %v835_v19 = vld [vmem:[%s8441_s1 + $0x1940] sm:$0xff] }
  0xcc   :  { %2051 = vmatprep.subr.mxu0 %v848_v1  ;;  %2120 = vmatprep.subr.mxu1 %v980_v2  ;;  %v968_v18 = vld [vmem:[%s8441_s1 + $0x1d68] sm:$0xff]  ;;  %v967_v20 = vld [vmem:[%s8441_s1 + $0x1d60] sm:$0xff] }
  0xcd   :  { %2052 = vmatpush1.msra.mxu0 %v847_v3  ;;  %2121 = vmatpush1.msra.mxu1 %v979_v6  ;;  %v832_v21 = vld [vmem:[%s8441_s1 + $0x1928] sm:$0xff]  ;;  %v831_v24 = vld [vmem:[%s8441_s1 + $0x1920] sm:$0xff] }
  0xce   :  { %2053 = vmatprep.subr.mxu0 %v844_v7  ;;  %2122 = vmatprep.subr.mxu1 %v976_v8  ;;  %v964_v23 = vld [vmem:[%s8441_s1 + $0x1d48] sm:$0xff]  ;;  %v963_v26 = vld [vmem:[%s8441_s1 + $0x1d40] sm:$0xff] }
  0xcf   :  { %2054 = vmatpush1.msra.mxu0 %v843_v9  ;;  %2123 = vmatpush1.msra.mxu1 %v975_v10  ;;  %v828_v27 = vld [vmem:[%s8441_s1 + $0x1908] sm:$0xff]  ;;  %v827_v29 = vld [vmem:[%s8441_s1 + $0x1900] sm:$0xff] }
  0xd0   :  { %2055 = vmatprep.subr.mxu0 %v840_v11  ;;  %2124 = vmatprep.subr.mxu1 %v972_v13  ;;  %v960_v28 = vld [vmem:[%s8441_s1 + $0x1d28] sm:$0xff]  ;;  %v959_v31 = vld [vmem:[%s8441_s1 + $0x1d20] sm:$0xff] }
  0xd1   :  { %2056 = vmatpush1.msra.mxu0 %v839_v14  ;;  %2125 = vmatpush1.msra.mxu1 %v971_v16  ;;  %v824_v32 = vld [vmem:[%s8441_s1 + $0x18e8] sm:$0xff]  ;;  %v823_v34 = vld [vmem:[%s8441_s1 + $0x18e0] sm:$0xff] }
  0xd2   :  { %2057 = vmatprep.subr.mxu0 %v836_v17  ;;  %2126 = vmatprep.subr.mxu1 %v968_v18  ;;  %v956_v33 = vld [vmem:[%s8441_s1 + $0x1d08] sm:$0xff]  ;;  %v955_v35 = vld [vmem:[%s8441_s1 + $0x1d00] sm:$0xff] }
  0xd3   :  { %2058 = vmatpush1.msra.mxu0 %v835_v19  ;;  %2127 = vmatpush1.msra.mxu1 %v967_v20  ;;  %v820_v36 = vld [vmem:[%s8441_s1 + $0x18c8] sm:$0xff]  ;;  %v819_v39 = vld [vmem:[%s8441_s1 + $0x18c0] sm:$0xff] }
  0xd4   :  { %2059 = vmatprep.subr.mxu0 %v832_v21  ;;  %2128 = vmatprep.subr.mxu1 %v964_v23  ;;  %v952_v37 = vld [vmem:[%s8441_s1 + $0x1ce8] sm:$0xff]  ;;  %v951_v40 = vld [vmem:[%s8441_s1 + $0x1ce0] sm:$0xff] }
  0xd5   :  { %2060 = vmatpush1.msra.mxu0 %v831_v24  ;;  %2129 = vmatpush1.msra.mxu1 %v963_v26  ;;  %v816_v41 = vld [vmem:[%s8441_s1 + $0x18a8] sm:$0xff]  ;;  %v815_v44 = vld [vmem:[%s8441_s1 + $0x18a0] sm:$0xff] }
  0xd6   :  { %2061 = vmatprep.subr.mxu0 %v828_v27  ;;  %2130 = vmatprep.subr.mxu1 %v960_v28  ;;  %v948_v43 = vld [vmem:[%s8441_s1 + $0x1cc8] sm:$0xff]  ;;  %v947_v45 = vld [vmem:[%s8441_s1 + $0x1cc0] sm:$0xff] }
  0xd7   :  { %2062 = vmatpush1.msra.mxu0 %v827_v29  ;;  %2131 = vmatpush1.msra.mxu1 %v959_v31  ;;  %v812_v46 = vld [vmem:[%s8441_s1 + $0x1888] sm:$0xff]  ;;  %v811_v49 = vld [vmem:[%s8441_s1 + $0x1880] sm:$0xff] }
  0xd8   :  { %2063 = vmatprep.subr.mxu0 %v824_v32  ;;  %2132 = vmatprep.subr.mxu1 %v956_v33  ;;  %v944_v47 = vld [vmem:[%s8441_s1 + $0x1ca8] sm:$0xff]  ;;  %v943_v51 = vld [vmem:[%s8441_s1 + $0x1ca0] sm:$0xff] }
  0xd9   :  { %2064 = vmatpush1.msra.mxu0 %v823_v34  ;;  %2133 = vmatpush1.msra.mxu1 %v955_v35  ;;  %v808_v52 = vld [vmem:[%s8441_s1 + $0x1868] sm:$0xff]  ;;  %v807_v55 = vld [vmem:[%s8441_s1 + $0x1860] sm:$0xff] }
  0xda   :  { %2065 = vmatprep.subr.mxu0 %v820_v36  ;;  %2134 = vmatprep.subr.mxu1 %v952_v37  ;;  %v940_v54 = vld [vmem:[%s8441_s1 + $0x1c88] sm:$0xff]  ;;  %v939_v56 = vld [vmem:[%s8441_s1 + $0x1c80] sm:$0xff] }
  0xdb   :  { %2066 = vmatpush1.msra.mxu0 %v819_v39  ;;  %2135 = vmatpush1.msra.mxu1 %v951_v40  ;;  %v804_v57 = vld [vmem:[%s8441_s1 + $0x1848] sm:$0xff]  ;;  %v803_v61 = vld [vmem:[%s8441_s1 + $0x1840] sm:$0xff] }
  0xdc   :  { %2067 = vmatprep.subr.mxu0 %v816_v41  ;;  %2136 = vmatprep.subr.mxu1 %v948_v43  ;;  %v936_v60 = vld [vmem:[%s8441_s1 + $0x1c68] sm:$0xff]  ;;  %v935_v62 = vld [vmem:[%s8441_s1 + $0x1c60] sm:$0xff] }
  0xdd   :  { %2068 = vmatpush1.msra.mxu0 %v815_v44  ;;  %2137 = vmatpush1.msra.mxu1 %v947_v45  ;;  %v800_v63 = vld [vmem:[%s8441_s1 + $0x1828] sm:$0xff]  ;;  %v799_v1 = vld [vmem:[%s8441_s1 + $0x1820] sm:$0xff] }
  0xde   :  { %2069 = vmatprep.subr.mxu0 %v812_v46  ;;  %2138 = vmatprep.subr.mxu1 %v944_v47  ;;  %v932_v0 = vld [vmem:[%s8441_s1 + $0x1c48] sm:$0xff]  ;;  %v931_v2 = vld [vmem:[%s8441_s1 + $0x1c40] sm:$0xff] }
  0xdf   :  { %2070 = vmatpush1.msra.mxu0 %v811_v49  ;;  %2139 = vmatpush1.msra.mxu1 %v943_v51  ;;  %v796_v3 = vld [vmem:[%s8441_s1 + $0x1808] sm:$0xff]  ;;  %v795_v7 = vld [vmem:[%s8441_s1 + $0x1800] sm:$0xff] }
  0xe0   :  { %2071 = vmatprep.subr.mxu0 %v808_v52  ;;  %2140 = vmatprep.subr.mxu1 %v940_v54  ;;  %v928_v6 = vld [vmem:[%s8441_s1 + $0x1c28] sm:$0xff] }
  0xe1   :  { %2072 = vmatpush1.msra.mxu0 %v807_v55  ;;  %2141 = vmatpush1.msra.mxu1 %v939_v56 }
  0xe2   :  { %2073 = vmatprep.subr.mxu0 %v804_v57  ;;  %2142 = vmatprep.subr.mxu1 %v936_v60 }
  0xe3   :  { %2074 = vmatpush1.msra.mxu0 %v803_v61  ;;  %2143 = vmatpush1.msra.mxu1 %v935_v62 }
  0xe4   :  { %2075 = vmatprep.subr.mxu0 %v800_v63 }
  0xe5   :  { %10 = vsyncpa [#allocation3], 0  ;;  %2144 = vmatprep.subr.mxu1 %v932_v0  ;;  %2076 = vmatpush1.msra.mxu0 %v799_v1  ;;  %v927_v8 = vld [vmem:[%s8441_s1 + $0x1c20] sm:$0xff]  ;;  %v920_v9 = vld [vmem:[%s8441_s1 + $0x1be8] sm:$0xff]  ;;  %vm1618_vm0 = vcmask 523264   ;;  %vm3403_vm1 = vcmask 1043456  }
  0xe6   :  { %2145 = vmatpush1.msra.mxu1 %v931_v2  ;;  %2077 = vmatprep.subr.mxu0 %v796_v3  ;;  %v924_v10 = vld [vmem:[%s8441_s1 + $0x1c08] sm:$0xff]  ;;  %v919_v11 = vld [vmem:[%s8441_s1 + $0x1be0] sm:$0xff]  ;;  %vm3399_vm2 = vcmask 949248   ;;  %vm3547_vm3 = vcmask 74752  }
  0xe7   :  { %2146 = vmatprep.subr.mxu1 %v928_v6  ;;  %2078 = vmatpush1.msra.mxu0 %v795_v7  ;;  %v923_v13 = vld [vmem:[%s8441_s1 + $0x1c00] sm:$0xff]  ;;  %v916_v14 = vld [vmem:[%s8441_s1 + $0x1bc8] sm:$0xff]  ;;  %v24_v6 = vld [vmem:[%s8440_s0 + $0x18] sm:$0xff] }
  0xe8   :  { %2147 = vmatpush1.msra.mxu1 %v927_v8  ;;  %2079 = vmatprep.subr.mxu0 %v920_v9  ;;  %v1048_v16 = vld [vmem:[%s8441_s1 + $0x1fe8] sm:$0xff]  ;;  %v915_v17 = vld [vmem:[%s8441_s1 + $0x1bc0] sm:$0xff] }
  0xe9   :  { %2148 = vmatprep.subr.mxu1 %v924_v10  ;;  %2080 = vmatpush2.msra.mxu0 %v919_v11  ;;  %v1047_v18 = vld [vmem:[%s8441_s1 + $0x1fe0] sm:$0xff]  ;;  %v912_v19 = vld [vmem:[%s8441_s1 + $0x1ba8] sm:$0xff] }
  0xea   :  { %2149 = vmatpush1.msra.mxu1 %v923_v13  ;;  %2081 = vmatprep.subr.mxu0 %v916_v14  ;;  %v1044_v20 = vld [vmem:[%s8441_s1 + $0x1fc8] sm:$0xff]  ;;  %v911_v21 = vld [vmem:[%s8441_s1 + $0x1ba0] sm:$0xff]  ;;  %v1546_v14 = vcombine.high %v24_v6, %v24_v6 }
  0xeb   :  { %2150 = vmatprep.subr.mxu1 %v1048_v16  ;;  %2082 = vmatpush2.msra.mxu0 %v915_v17  ;;  %v1043_v23 = vld [vmem:[%s8441_s1 + $0x1fc0] sm:$0xff]  ;;  %v908_v24 = vld [vmem:[%s8441_s1 + $0x1b88] sm:$0xff] }
  0xec   :  { %2151 = vmatpush2.msra.mxu1 %v1047_v18  ;;  %2083 = vmatprep.subr.mxu0 %v912_v19  ;;  %v1040_v26 = vld [vmem:[%s8441_s1 + $0x1fa8] sm:$0xff]  ;;  %v907_v27 = vld [vmem:[%s8441_s1 + $0x1b80] sm:$0xff]  ;;  %v5259_v18 = vrot.slane %v24_v6, %v4008_v48 }
  0xed   :  { %2152 = vmatprep.subr.mxu1 %v1044_v20  ;;  %2084 = vmatpush2.msra.mxu0 %v911_v21  ;;  %v1039_v28 = vld [vmem:[%s8441_s1 + $0x1fa0] sm:$0xff]  ;;  %v904_v29 = vld [vmem:[%s8441_s1 + $0x1b68] sm:$0xff] }
  0xee   :  { %2153 = vmatpush2.msra.mxu1 %v1043_v23  ;;  %2085 = vmatprep.subr.mxu0 %v908_v24  ;;  %v1036_v31 = vld [vmem:[%s8441_s1 + $0x1f88] sm:$0xff]  ;;  %v903_v32 = vld [vmem:[%s8441_s1 + $0x1b60] sm:$0xff] }
  0xef   :  { %2154 = vmatprep.subr.mxu1 %v1040_v26  ;;  %2086 = vmatpush2.msra.mxu0 %v907_v27  ;;  %v1035_v33 = vld [vmem:[%s8441_s1 + $0x1f80] sm:$0xff]  ;;  %v900_v34 = vld [vmem:[%s8441_s1 + $0x1b48] sm:$0xff]  ;;  %v5280_v27 = vrot.slane %v1546_v14, %v4008_v48 }
  0xf0   :  { %2155 = vmatpush2.msra.mxu1 %v1039_v28  ;;  %2087 = vmatprep.subr.mxu0 %v904_v29  ;;  %v1032_v35 = vld [vmem:[%s8441_s1 + $0x1f68] sm:$0xff]  ;;  %v899_v36 = vld [vmem:[%s8441_s1 + $0x1b40] sm:$0xff] }
  0xf1   :  { %2156 = vmatprep.subr.mxu1 %v1036_v31  ;;  %2088 = vmatpush2.msra.mxu0 %v903_v32  ;;  %v1031_v37 = vld [vmem:[%s8441_s1 + $0x1f60] sm:$0xff]  ;;  %v896_v39 = vld [vmem:[%s8441_s1 + $0x1b28] sm:$0xff]  ;;  %v5290_v31 = vcombine.high %v5259_v18, %v5259_v18 }
  0xf2   :  { %2157 = vmatpush2.msra.mxu1 %v1035_v33  ;;  %2089 = vmatprep.subr.mxu0 %v900_v34  ;;  %v1028_v40 = vld [vmem:[%s8441_s1 + $0x1f48] sm:$0xff]  ;;  %v895_v41 = vld [vmem:[%s8441_s1 + $0x1b20] sm:$0xff] }
  0xf3   :  { %2158 = vmatprep.subr.mxu1 %v1032_v35  ;;  %2090 = vmatpush2.msra.mxu0 %v899_v36  ;;  %v1027_v43 = vld [vmem:[%s8441_s1 + $0x1f40] sm:$0xff]  ;;  %v892_v44 = vld [vmem:[%s8441_s1 + $0x1b08] sm:$0xff]  ;;  %v5306_v36 = vcombine.high %v5280_v27, %v5280_v27 }
  0xf4   :  { %2159 = vmatpush2.msra.mxu1 %v1031_v37  ;;  %2091 = vmatprep.subr.mxu0 %v896_v39  ;;  %v1024_v45 = vld [vmem:[%s8441_s1 + $0x1f28] sm:$0xff]  ;;  %v891_v46 = vld [vmem:[%s8441_s1 + $0x1b00] sm:$0xff] }
  0xf5   :  { %2160 = vmatprep.subr.mxu1 %v1028_v40  ;;  %2092 = vmatpush2.msra.mxu0 %v895_v41  ;;  %v1023_v47 = vld [vmem:[%s8441_s1 + $0x1f20] sm:$0xff]  ;;  %v888_v49 = vld [vmem:[%s8441_s1 + $0x1ae8] sm:$0xff] }
  0xf6   :  { %2161 = vmatpush2.msra.mxu1 %v1027_v43  ;;  %2093 = vmatprep.subr.mxu0 %v892_v44  ;;  %v1020_v51 = vld [vmem:[%s8441_s1 + $0x1f08] sm:$0xff]  ;;  %v887_v52 = vld [vmem:[%s8441_s1 + $0x1ae0] sm:$0xff] }
  0xf7   :  { %2162 = vmatprep.subr.mxu1 %v1024_v45  ;;  %2094 = vmatpush2.msra.mxu0 %v891_v46  ;;  %v1019_v54 = vld [vmem:[%s8441_s1 + $0x1f00] sm:$0xff]  ;;  %v884_v55 = vld [vmem:[%s8441_s1 + $0x1ac8] sm:$0xff] }
  0xf8   :  { %2163 = vmatpush2.msra.mxu1 %v1023_v47  ;;  %2095 = vmatprep.subr.mxu0 %v888_v49  ;;  %v1016_v56 = vld [vmem:[%s8441_s1 + $0x1ee8] sm:$0xff]  ;;  %v883_v57 = vld [vmem:[%s8441_s1 + $0x1ac0] sm:$0xff] }
  0xf9   :  { %2164 = vmatprep.subr.mxu1 %v1020_v51  ;;  %2096 = vmatpush2.msra.mxu0 %v887_v52  ;;  %v1015_v60 = vld [vmem:[%s8441_s1 + $0x1ee0] sm:$0xff]  ;;  %v880_v61 = vld [vmem:[%s8441_s1 + $0x1aa8] sm:$0xff] }
  0xfa   :  { %2165 = vmatpush2.msra.mxu1 %v1019_v54  ;;  %2097 = vmatprep.subr.mxu0 %v884_v55  ;;  %v1012_v62 = vld [vmem:[%s8441_s1 + $0x1ec8] sm:$0xff]  ;;  %v879_v63 = vld [vmem:[%s8441_s1 + $0x1aa0] sm:$0xff] }
  0xfb   :  { %2166 = vmatprep.subr.mxu1 %v1016_v56  ;;  %2098 = vmatpush2.msra.mxu0 %v883_v57  ;;  %v1011_v0 = vld [vmem:[%s8441_s1 + $0x1ec0] sm:$0xff]  ;;  %v876_v1 = vld [vmem:[%s8441_s1 + $0x1a88] sm:$0xff] }
  0xfc   :  { %2167 = vmatpush2.msra.mxu1 %v1015_v60  ;;  %2099 = vmatprep.subr.mxu0 %v880_v61  ;;  %v1008_v2 = vld [vmem:[%s8441_s1 + $0x1ea8] sm:$0xff]  ;;  %v875_v3 = vld [vmem:[%s8441_s1 + $0x1a80] sm:$0xff] }
  0xfd   :  { %2168 = vmatprep.subr.mxu1 %v1012_v62  ;;  %2100 = vmatpush2.msra.mxu0 %v879_v63  ;;  %v1007_v7 = vld [vmem:[%s8441_s1 + $0x1ea0] sm:$0xff]  ;;  %v872_v8 = vld [vmem:[%s8441_s1 + $0x1a68] sm:$0xff] }
  0xfe   :  { %2169 = vmatpush2.msra.mxu1 %v1011_v0  ;;  %2101 = vmatprep.subr.mxu0 %v876_v1  ;;  %v1004_v9 = vld [vmem:[%s8441_s1 + $0x1e88] sm:$0xff]  ;;  %v871_v10 = vld [vmem:[%s8441_s1 + $0x1a60] sm:$0xff] }
  0xff   :  { %2170 = vmatprep.subr.mxu1 %v1008_v2  ;;  %2102 = vmatpush2.msra.mxu0 %v875_v3  ;;  %v1003_v11 = vld [vmem:[%s8441_s1 + $0x1e80] sm:$0xff]  ;;  %v868_v13 = vld [vmem:[%s8441_s1 + $0x1a48] sm:$0xff] }
 0x100   :  { %2171 = vmatpush2.msra.mxu1 %v1007_v7  ;;  %2103 = vmatprep.subr.mxu0 %v872_v8  ;;  %v1000_v16 = vld [vmem:[%s8441_s1 + $0x1e68] sm:$0xff]  ;;  %v867_v17 = vld [vmem:[%s8441_s1 + $0x1a40] sm:$0xff] }
 0x101   :  { %2172 = vmatprep.subr.mxu1 %v1004_v9  ;;  %2104 = vmatpush2.msra.mxu0 %v871_v10  ;;  %v999_v19 = vld [vmem:[%s8441_s1 + $0x1e60] sm:$0xff]  ;;  %v864_v20 = vld [vmem:[%s8441_s1 + $0x1a28] sm:$0xff] }
 0x102   :  { %2173 = vmatpush2.msra.mxu1 %v1003_v11  ;;  %2105 = vmatprep.subr.mxu0 %v868_v13  ;;  %v996_v21 = vld [vmem:[%s8441_s1 + $0x1e48] sm:$0xff]  ;;  %v863_v23 = vld [vmem:[%s8441_s1 + $0x1a20] sm:$0xff] }
 0x103   :  { %2174 = vmatprep.subr.mxu1 %v1000_v16  ;;  %2106 = vmatpush2.msra.mxu0 %v867_v17  ;;  %v995_v24 = vld [vmem:[%s8441_s1 + $0x1e40] sm:$0xff]  ;;  %v860_v26 = vld [vmem:[%s8441_s1 + $0x1a08] sm:$0xff] }
 0x104   :  { %2175 = vmatpush2.msra.mxu1 %v999_v19  ;;  %2107 = vmatprep.subr.mxu0 %v864_v20  ;;  %v992_v28 = vld [vmem:[%s8441_s1 + $0x1e28] sm:$0xff]  ;;  %v859_v29 = vld [vmem:[%s8441_s1 + $0x1a00] sm:$0xff] }
 0x105   :  { %2176 = vmatprep.subr.mxu1 %v996_v21  ;;  %2108 = vmatpush2.msra.mxu0 %v863_v23  ;;  %v991_v32 = vld [vmem:[%s8441_s1 + $0x1e20] sm:$0xff]  ;;  %v988_v33 = vld [vmem:[%s8441_s1 + $0x1e08] sm:$0xff] }
 0x106   :  { %2177 = vmatpush2.msra.mxu1 %v995_v24  ;;  %2109 = vmatprep.subr.mxu0 %v860_v26  ;;  %v1112_v34 = vld [vmem:[%s8441_s1 + $0x21e8] sm:$0xff]  ;;  %v987_v35 = vld [vmem:[%s8441_s1 + $0x1e00] sm:$0xff] }
 0x107   :  { %2178 = vmatprep.subr.mxu1 %v992_v28  ;;  %2110 = vmatpush2.msra.mxu0 %v859_v29  ;;  %v1111_v37 = vld [vmem:[%s8441_s1 + $0x21e0] sm:$0xff]  ;;  %v1108_v39 = vld [vmem:[%s8441_s1 + $0x21c8] sm:$0xff] }
 0x108   :  { %2111 = vmatprep.mubr.f32.mxu0 %v5290_v31  ;;  %2179 = vmatpush2.msra.mxu1 %v991_v32  ;;  %v1240_v40 = vld [vmem:[%s8441_s1 + $0x25e8] sm:$0xff]  ;;  %v1107_v41 = vld [vmem:[%s8441_s1 + $0x21c0] sm:$0xff] }
 0x109   :  { %2112 = vmatmul.mubr.f32.vlgmr.msra.gmra.mxu0 %v5259_v18  ;;  %2180 = vmatprep.subr.mxu1 %v988_v33  ;;  %v1239_v43 = vld [vmem:[%s8441_s1 + $0x25e0] sm:$0xff]  ;;  %v1104_v44 = vld [vmem:[%s8441_s1 + $0x21a8] sm:$0xff] }
 0x10a   :  { %2189 = vmatprep.subr.mxu0 %v1112_v34  ;;  %2181 = vmatpush2.msra.mxu1 %v987_v35  ;;  %v1236_v45 = vld [vmem:[%s8441_s1 + $0x25c8] sm:$0xff]  ;;  %v1103_v46 = vld [vmem:[%s8441_s1 + $0x21a0] sm:$0xff] }
 0x10b   :  { %2182 = vmatprep.mubr.f32.mxu1 %v5306_v36  ;;  %2190 = vmatpush1.msra.mxu0 %v1111_v37  ;;  %v1235_v47 = vld [vmem:[%s8441_s1 + $0x25c0] sm:$0xff]  ;;  %v1100_v49 = vld [vmem:[%s8441_s1 + $0x2188] sm:$0xff] }
 0x10c   :  { %2183 = vmatmul.mubr.f32.vlgmr.msra.gmra.mxu1 %v5280_v27  ;;  %2191 = vmatprep.subr.mxu0 %v1108_v39  ;;  %v1232_v51 = vld [vmem:[%s8441_s1 + $0x25a8] sm:$0xff]  ;;  %v1099_v52 = vld [vmem:[%s8441_s1 + $0x2180] sm:$0xff] }
 0x10d   :  { %2260 = vmatprep.subr.mxu1 %v1240_v40  ;;  %2192 = vmatpush1.msra.mxu0 %v1107_v41  ;;  %v1231_v54 = vld [vmem:[%s8441_s1 + $0x25a0] sm:$0xff]  ;;  %v1096_v55 = vld [vmem:[%s8441_s1 + $0x2168] sm:$0xff] }
 0x10e   :  { %2261 = vmatpush1.msra.mxu1 %v1239_v43  ;;  %2193 = vmatprep.subr.mxu0 %v1104_v44  ;;  %v1228_v56 = vld [vmem:[%s8441_s1 + $0x2588] sm:$0xff]  ;;  %v1095_v57 = vld [vmem:[%s8441_s1 + $0x2160] sm:$0xff] }
 0x10f   :  { %2262 = vmatprep.subr.mxu1 %v1236_v45  ;;  %2194 = vmatpush1.msra.mxu0 %v1103_v46  ;;  %v1227_v60 = vld [vmem:[%s8441_s1 + $0x2580] sm:$0xff]  ;;  %v1092_v61 = vld [vmem:[%s8441_s1 + $0x2148] sm:$0xff] }
 0x110   :  { %2263 = vmatpush1.msra.mxu1 %v1235_v47  ;;  %2195 = vmatprep.subr.mxu0 %v1100_v49  ;;  %v1224_v62 = vld [vmem:[%s8441_s1 + $0x2568] sm:$0xff]  ;;  %v1091_v63 = vld [vmem:[%s8441_s1 + $0x2140] sm:$0xff] }
 0x111   :  { %2264 = vmatprep.subr.mxu1 %v1232_v51  ;;  %2196 = vmatpush1.msra.mxu0 %v1099_v52  ;;  %v1223_v0 = vld [vmem:[%s8441_s1 + $0x2560] sm:$0xff]  ;;  %v1088_v1 = vld [vmem:[%s8441_s1 + $0x2128] sm:$0xff] }
 0x112   :  { %2265 = vmatpush1.msra.mxu1 %v1231_v54  ;;  %2197 = vmatprep.subr.mxu0 %v1096_v55  ;;  %v1220_v2 = vld [vmem:[%s8441_s1 + $0x2548] sm:$0xff]  ;;  %v1087_v3 = vld [vmem:[%s8441_s1 + $0x2120] sm:$0xff] }
 0x113   :  { %2266 = vmatprep.subr.mxu1 %v1228_v56  ;;  %2198 = vmatpush1.msra.mxu0 %v1095_v57  ;;  %v1219_v6 = vld [vmem:[%s8441_s1 + $0x2540] sm:$0xff]  ;;  %v1084_v7 = vld [vmem:[%s8441_s1 + $0x2108] sm:$0xff] }
 0x114   :  { %2267 = vmatpush1.msra.mxu1 %v1227_v60  ;;  %2199 = vmatprep.subr.mxu0 %v1092_v61  ;;  %v1216_v8 = vld [vmem:[%s8441_s1 + $0x2528] sm:$0xff]  ;;  %v1083_v9 = vld [vmem:[%s8441_s1 + $0x2100] sm:$0xff] }
 0x115   :  { %2268 = vmatprep.subr.mxu1 %v1224_v62  ;;  %2200 = vmatpush1.msra.mxu0 %v1091_v63  ;;  %v1215_v10 = vld [vmem:[%s8441_s1 + $0x2520] sm:$0xff]  ;;  %v1080_v11 = vld [vmem:[%s8441_s1 + $0x20e8] sm:$0xff] }
 0x116   :  { %2269 = vmatpush1.msra.mxu1 %v1223_v0  ;;  %2201 = vmatprep.subr.mxu0 %v1088_v1  ;;  %v1212_v13 = vld [vmem:[%s8441_s1 + $0x2508] sm:$0xff]  ;;  %v1079_v14 = vld [vmem:[%s8441_s1 + $0x20e0] sm:$0xff] }
 0x117   :  { %2270 = vmatprep.subr.mxu1 %v1220_v2  ;;  %2202 = vmatpush1.msra.mxu0 %v1087_v3  ;;  %v1211_v16 = vld [vmem:[%s8441_s1 + $0x2500] sm:$0xff]  ;;  %v1076_v17 = vld [vmem:[%s8441_s1 + $0x20c8] sm:$0xff] }
 0x118   :  { %2271 = vmatpush1.msra.mxu1 %v1219_v6  ;;  %2203 = vmatprep.subr.mxu0 %v1084_v7  ;;  %v1208_v19 = vld [vmem:[%s8441_s1 + $0x24e8] sm:$0xff]  ;;  %v1075_v20 = vld [vmem:[%s8441_s1 + $0x20c0] sm:$0xff] }
 0x119   :  { %2272 = vmatprep.subr.mxu1 %v1216_v8  ;;  %2204 = vmatpush1.msra.mxu0 %v1083_v9  ;;  %v1207_v21 = vld [vmem:[%s8441_s1 + $0x24e0] sm:$0xff]  ;;  %v1072_v23 = vld [vmem:[%s8441_s1 + $0x20a8] sm:$0xff] }
 0x11a   :  { %2273 = vmatpush1.msra.mxu1 %v1215_v10  ;;  %2205 = vmatprep.subr.mxu0 %v1080_v11  ;;  %v1204_v24 = vld [vmem:[%s8441_s1 + $0x24c8] sm:$0xff]  ;;  %v1071_v26 = vld [vmem:[%s8441_s1 + $0x20a0] sm:$0xff] }
 0x11b   :  { %2274 = vmatprep.subr.mxu1 %v1212_v13  ;;  %2206 = vmatpush1.msra.mxu0 %v1079_v14  ;;  %v1203_v28 = vld [vmem:[%s8441_s1 + $0x24c0] sm:$0xff]  ;;  %v1068_v29 = vld [vmem:[%s8441_s1 + $0x2088] sm:$0xff] }
 0x11c   :  { %2275 = vmatpush1.msra.mxu1 %v1211_v16  ;;  %2207 = vmatprep.subr.mxu0 %v1076_v17  ;;  %v1200_v32 = vld [vmem:[%s8441_s1 + $0x24a8] sm:$0xff]  ;;  %v1067_v33 = vld [vmem:[%s8441_s1 + $0x2080] sm:$0xff] }
 0x11d   :  { %2276 = vmatprep.subr.mxu1 %v1208_v19  ;;  %2208 = vmatpush1.msra.mxu0 %v1075_v20  ;;  %v1199_v34 = vld [vmem:[%s8441_s1 + $0x24a0] sm:$0xff]  ;;  %v1064_v35 = vld [vmem:[%s8441_s1 + $0x2068] sm:$0xff] }
 0x11e   :  { %2277 = vmatpush1.msra.mxu1 %v1207_v21  ;;  %2209 = vmatprep.subr.mxu0 %v1072_v23  ;;  %v1196_v37 = vld [vmem:[%s8441_s1 + $0x2488] sm:$0xff]  ;;  %v1063_v39 = vld [vmem:[%s8441_s1 + $0x2060] sm:$0xff] }
 0x11f   :  { %2278 = vmatprep.subr.mxu1 %v1204_v24  ;;  %2210 = vmatpush1.msra.mxu0 %v1071_v26  ;;  %v1195_v40 = vld [vmem:[%s8441_s1 + $0x2480] sm:$0xff]  ;;  %v1060_v41 = vld [vmem:[%s8441_s1 + $0x2048] sm:$0xff] }
 0x120   :  { %2279 = vmatpush1.msra.mxu1 %v1203_v28  ;;  %2211 = vmatprep.subr.mxu0 %v1068_v29  ;;  %v1192_v43 = vld [vmem:[%s8441_s1 + $0x2468] sm:$0xff]  ;;  %v1059_v44 = vld [vmem:[%s8441_s1 + $0x2040] sm:$0xff] }
 0x121   :  { %2280 = vmatprep.subr.mxu1 %v1200_v32  ;;  %2212 = vmatpush1.msra.mxu0 %v1067_v33  ;;  %v1191_v45 = vld [vmem:[%s8441_s1 + $0x2460] sm:$0xff]  ;;  %v1056_v46 = vld [vmem:[%s8441_s1 + $0x2028] sm:$0xff] }
 0x122   :  { %2281 = vmatpush1.msra.mxu1 %v1199_v34  ;;  %2213 = vmatprep.subr.mxu0 %v1064_v35  ;;  %v1188_v47 = vld [vmem:[%s8441_s1 + $0x2448] sm:$0xff]  ;;  %v1055_v49 = vld [vmem:[%s8441_s1 + $0x2020] sm:$0xff] }
 0x123   :  { %2282 = vmatprep.subr.mxu1 %v1196_v37  ;;  %2214 = vmatpush1.msra.mxu0 %v1063_v39  ;;  %v1187_v51 = vld [vmem:[%s8441_s1 + $0x2440] sm:$0xff]  ;;  %v1052_v52 = vld [vmem:[%s8441_s1 + $0x2008] sm:$0xff] }
 0x124   :  { %2283 = vmatpush1.msra.mxu1 %v1195_v40  ;;  %2215 = vmatprep.subr.mxu0 %v1060_v41  ;;  %v1184_v54 = vld [vmem:[%s8441_s1 + $0x2428] sm:$0xff]  ;;  %v1051_v55 = vld [vmem:[%s8441_s1 + $0x2000] sm:$0xff] }
 0x125   :  { %2284 = vmatprep.subr.mxu1 %v1192_v43  ;;  %2216 = vmatpush1.msra.mxu0 %v1059_v44  ;;  %v1183_v56 = vld [vmem:[%s8441_s1 + $0x2420] sm:$0xff]  ;;  %v1176_v57 = vld [vmem:[%s8441_s1 + $0x23e8] sm:$0xff] }
 0x126   :  { %2285 = vmatpush1.msra.mxu1 %v1191_v45  ;;  %2217 = vmatprep.subr.mxu0 %v1056_v46  ;;  %v1180_v60 = vld [vmem:[%s8441_s1 + $0x2408] sm:$0xff]  ;;  %v1175_v61 = vld [vmem:[%s8441_s1 + $0x23e0] sm:$0xff] }
 0x127   :  { %2286 = vmatprep.subr.mxu1 %v1188_v47  ;;  %2218 = vmatpush1.msra.mxu0 %v1055_v49  ;;  %v1179_v62 = vld [vmem:[%s8441_s1 + $0x2400] sm:$0xff]  ;;  %v1172_v63 = vld [vmem:[%s8441_s1 + $0x23c8] sm:$0xff] }
 0x128   :  { %2287 = vmatpush1.msra.mxu1 %v1187_v51  ;;  %2219 = vmatprep.subr.mxu0 %v1052_v52  ;;  %v1304_v0 = vld [vmem:[%s8441_s1 + $0x27e8] sm:$0xff]  ;;  %v1171_v1 = vld [vmem:[%s8441_s1 + $0x23c0] sm:$0xff] }
 0x129   :  { %2288 = vmatprep.subr.mxu1 %v1184_v54  ;;  %2220 = vmatpush1.msra.mxu0 %v1051_v55  ;;  %v1303_v2 = vld [vmem:[%s8441_s1 + $0x27e0] sm:$0xff]  ;;  %v1168_v3 = vld [vmem:[%s8441_s1 + $0x23a8] sm:$0xff] }
 0x12a   :  { %2289 = vmatpush1.msra.mxu1 %v1183_v56  ;;  %2221 = vmatprep.subr.mxu0 %v1176_v57  ;;  %v1300_v6 = vld [vmem:[%s8441_s1 + $0x27c8] sm:$0xff]  ;;  %v1167_v7 = vld [vmem:[%s8441_s1 + $0x23a0] sm:$0xff] }
 0x12b   :  { %2290 = vmatprep.subr.mxu1 %v1180_v60  ;;  %2222 = vmatpush2.msra.mxu0 %v1175_v61  ;;  %v1299_v8 = vld [vmem:[%s8441_s1 + $0x27c0] sm:$0xff]  ;;  %v1164_v9 = vld [vmem:[%s8441_s1 + $0x2388] sm:$0xff] }
 0x12c   :  { %2291 = vmatpush1.msra.mxu1 %v1179_v62  ;;  %2223 = vmatprep.subr.mxu0 %v1172_v63  ;;  %v1296_v10 = vld [vmem:[%s8441_s1 + $0x27a8] sm:$0xff]  ;;  %v1163_v11 = vld [vmem:[%s8441_s1 + $0x2380] sm:$0xff] }
 0x12d   :  { %2292 = vmatprep.subr.mxu1 %v1304_v0  ;;  %2224 = vmatpush2.msra.mxu0 %v1171_v1  ;;  %v1295_v13 = vld [vmem:[%s8441_s1 + $0x27a0] sm:$0xff]  ;;  %v1160_v14 = vld [vmem:[%s8441_s1 + $0x2368] sm:$0xff] }
 0x12e   :  { %2293 = vmatpush2.msra.mxu1 %v1303_v2  ;;  %2225 = vmatprep.subr.mxu0 %v1168_v3  ;;  %v1292_v16 = vld [vmem:[%s8441_s1 + $0x2788] sm:$0xff]  ;;  %v1159_v17 = vld [vmem:[%s8441_s1 + $0x2360] sm:$0xff] }
 0x12f   :  { %2294 = vmatprep.subr.mxu1 %v1300_v6  ;;  %2226 = vmatpush2.msra.mxu0 %v1167_v7  ;;  %v1291_v19 = vld [vmem:[%s8441_s1 + $0x2780] sm:$0xff]  ;;  %v1156_v20 = vld [vmem:[%s8441_s1 + $0x2348] sm:$0xff] }
 0x130   :  { %2295 = vmatpush2.msra.mxu1 %v1299_v8  ;;  %2227 = vmatprep.subr.mxu0 %v1164_v9  ;;  %v1288_v21 = vld [vmem:[%s8441_s1 + $0x2768] sm:$0xff]  ;;  %v1155_v23 = vld [vmem:[%s8441_s1 + $0x2340] sm:$0xff] }
 0x131   :  { %2296 = vmatprep.subr.mxu1 %v1296_v10  ;;  %2228 = vmatpush2.msra.mxu0 %v1163_v11  ;;  %v1287_v24 = vld [vmem:[%s8441_s1 + $0x2760] sm:$0xff]  ;;  %v1152_v26 = vld [vmem:[%s8441_s1 + $0x2328] sm:$0xff] }
 0x132   :  { %2297 = vmatpush2.msra.mxu1 %v1295_v13  ;;  %2229 = vmatprep.subr.mxu0 %v1160_v14  ;;  %v1284_v28 = vld [vmem:[%s8441_s1 + $0x2748] sm:$0xff]  ;;  %v1151_v29 = vld [vmem:[%s8441_s1 + $0x2320] sm:$0xff] }
 0x133   :  { %2298 = vmatprep.subr.mxu1 %v1292_v16  ;;  %2230 = vmatpush2.msra.mxu0 %v1159_v17  ;;  %v1283_v32 = vld [vmem:[%s8441_s1 + $0x2740] sm:$0xff]  ;;  %v1148_v33 = vld [vmem:[%s8441_s1 + $0x2308] sm:$0xff] }
 0x134   :  { %2299 = vmatpush2.msra.mxu1 %v1291_v19  ;;  %2231 = vmatprep.subr.mxu0 %v1156_v20  ;;  %v1280_v34 = vld [vmem:[%s8441_s1 + $0x2728] sm:$0xff]  ;;  %v1147_v35 = vld [vmem:[%s8441_s1 + $0x2300] sm:$0xff] }
 0x135   :  { %2300 = vmatprep.subr.mxu1 %v1288_v21  ;;  %2232 = vmatpush2.msra.mxu0 %v1155_v23  ;;  %v1279_v37 = vld [vmem:[%s8441_s1 + $0x2720] sm:$0xff]  ;;  %v1144_v39 = vld [vmem:[%s8441_s1 + $0x22e8] sm:$0xff] }
 0x136   :  { %2301 = vmatpush2.msra.mxu1 %v1287_v24  ;;  %2233 = vmatprep.subr.mxu0 %v1152_v26  ;;  %v1276_v40 = vld [vmem:[%s8441_s1 + $0x2708] sm:$0xff]  ;;  %v1143_v41 = vld [vmem:[%s8441_s1 + $0x22e0] sm:$0xff] }
 0x137   :  { %2302 = vmatprep.subr.mxu1 %v1284_v28  ;;  %2234 = vmatpush2.msra.mxu0 %v1151_v29  ;;  %v1275_v43 = vld [vmem:[%s8441_s1 + $0x2700] sm:$0xff]  ;;  %v1140_v44 = vld [vmem:[%s8441_s1 + $0x22c8] sm:$0xff] }
 0x138   :  { %2303 = vmatpush2.msra.mxu1 %v1283_v32  ;;  %2235 = vmatprep.subr.mxu0 %v1148_v33  ;;  %v1272_v45 = vld [vmem:[%s8441_s1 + $0x26e8] sm:$0xff]  ;;  %v1139_v46 = vld [vmem:[%s8441_s1 + $0x22c0] sm:$0xff] }
 0x139   :  { %2304 = vmatprep.subr.mxu1 %v1280_v34  ;;  %2236 = vmatpush2.msra.mxu0 %v1147_v35  ;;  %v1271_v47 = vld [vmem:[%s8441_s1 + $0x26e0] sm:$0xff]  ;;  %v1136_v49 = vld [vmem:[%s8441_s1 + $0x22a8] sm:$0xff]  ;;  %v90_v35 = vld [vmem:[%s8441_s1 + $0x1f8] sm:$0xff] }
 0x13a   :  { %2305 = vmatpush2.msra.mxu1 %v1279_v37  ;;  %2237 = vmatprep.subr.mxu0 %v1144_v39  ;;  %v1268_v51 = vld [vmem:[%s8441_s1 + $0x26c8] sm:$0xff]  ;;  %v1135_v52 = vld [vmem:[%s8441_s1 + $0x22a0] sm:$0xff]  ;;  %v89_v39 = vld [vmem:[%s8441_s1 + $0x1f0] sm:$0xff] }
 0x13b   :  { %2306 = vmatprep.subr.mxu1 %v1276_v40  ;;  %2238 = vmatpush2.msra.mxu0 %v1143_v41  ;;  %v1267_v54 = vld [vmem:[%s8441_s1 + $0x26c0] sm:$0xff]  ;;  %v1132_v55 = vld [vmem:[%s8441_s1 + $0x2288] sm:$0xff]  ;;  %v86_v41 = vld [vmem:[%s8441_s1 + $0x1d8] sm:$0xff] }
 0x13c   :  { %2307 = vmatpush2.msra.mxu1 %v1275_v43  ;;  %2239 = vmatprep.subr.mxu0 %v1140_v44  ;;  %v1264_v56 = vld [vmem:[%s8441_s1 + $0x26a8] sm:$0xff]  ;;  %v1131_v57 = vld [vmem:[%s8441_s1 + $0x2280] sm:$0xff]  ;;  %v85_v44 = vld [vmem:[%s8441_s1 + $0x1d0] sm:$0xff] }
 0x13d   :  { %2308 = vmatprep.subr.mxu1 %v1272_v45  ;;  %2240 = vmatpush2.msra.mxu0 %v1139_v46  ;;  %v25_v60 = vld [vmem:[%s8440_s0 + $0x20] sm:$0xff]  ;;  %v1128_v62 = vld [vmem:[%s8441_s1 + $0x2268] sm:$0xff]  ;;  %v82_v46 = vld [vmem:[%s8441_s1 + $0x1b8] sm:$0xff] }
 0x13e   :  { %2309 = vmatpush2.msra.mxu1 %v1271_v47  ;;  %2241 = vmatprep.subr.mxu0 %v1136_v49  ;;  %v1263_v61 = vld [vmem:[%s8441_s1 + $0x26a0] sm:$0xff]  ;;  %v1260_v63 = vld [vmem:[%s8441_s1 + $0x2688] sm:$0xff]  ;;  %v1563_v3 = vcombine.high %v25_v60, %v25_v60  ;;  %v5664_v8 = vrot.slane %v25_v60, %v4008_v48  ;;  %v81_v49 = vld [vmem:[%s8441_s1 + $0x1b0] sm:$0xff] }
 0x13f   :  { %2310 = vmatprep.subr.mxu1 %v1268_v51  ;;  %2242 = vmatpush2.msra.mxu0 %v1135_v52  ;;  %v1127_v0 = vld [vmem:[%s8441_s1 + $0x2260] sm:$0xff]  ;;  %v1124_v2 = vld [vmem:[%s8441_s1 + $0x2248] sm:$0xff]  ;;  %v78_v52 = vld [vmem:[%s8441_s1 + $0x198] sm:$0xff] }
 0x140   :  { %2311 = vmatpush2.msra.mxu1 %v1267_v54  ;;  %2243 = vmatprep.subr.mxu0 %v1132_v55  ;;  %v1259_v1 = vld [vmem:[%s8441_s1 + $0x2680] sm:$0xff]  ;;  %v1256_v6 = vld [vmem:[%s8441_s1 + $0x2668] sm:$0xff]  ;;  %v5685_v17 = vrot.slane %v1563_v3, %v4008_v48  ;;  %v5695_v21 = vcombine.high %v5664_v8, %v5664_v8  ;;  %v77_v55 = vld [vmem:[%s8441_s1 + $0x190] sm:$0xff] }
 0x141   :  { %2312 = vmatprep.subr.mxu1 %v1264_v56  ;;  %2244 = vmatpush2.msra.mxu0 %v1131_v57  ;;  %v1123_v7 = vld [vmem:[%s8441_s1 + $0x2240] sm:$0xff]  ;;  %v1120_v10 = vld [vmem:[%s8441_s1 + $0x2228] sm:$0xff]  ;;  %v74_v57 = vld [vmem:[%s8441_s1 + $0x178] sm:$0xff] }
 0x142   :  { %2313 = vmatpush2.msra.mxu1 %v1263_v61  ;;  %2245 = vmatprep.subr.mxu0 %v1128_v62  ;;  %v1255_v9 = vld [vmem:[%s8441_s1 + $0x2660] sm:$0xff]  ;;  %v1252_v11 = vld [vmem:[%s8441_s1 + $0x2648] sm:$0xff]  ;;  %v5711_v29 = vcombine.high %v5685_v17, %v5685_v17  ;;  %v73_v61 = vld [vmem:[%s8441_s1 + $0x170] sm:$0xff] }
 0x143   :  { %2314 = vmatprep.subr.mxu1 %v1260_v63  ;;  %2246 = vmatpush2.msra.mxu0 %v1127_v0  ;;  %v1119_v13 = vld [vmem:[%s8441_s1 + $0x2220] sm:$0xff]  ;;  %v1116_v16 = vld [vmem:[%s8441_s1 + $0x2208] sm:$0xff]  ;;  %v70_v63 = vld [vmem:[%s8441_s1 + $0x158] sm:$0xff] }
 0x144   :  { %2315 = vmatpush2.msra.mxu1 %v1259_v1  ;;  %2247 = vmatprep.subr.mxu0 %v1124_v2  ;;  %v1251_v14 = vld [vmem:[%s8441_s1 + $0x2640] sm:$0xff]  ;;  %v1248_v19 = vld [vmem:[%s8441_s1 + $0x2628] sm:$0xff]  ;;  %v69_v1 = vld [vmem:[%s8441_s1 + $0x150] sm:$0xff] }
 0x145   :  { %2316 = vmatprep.subr.mxu1 %v1256_v6  ;;  %2248 = vmatpush2.msra.mxu0 %v1123_v7  ;;  %v1115_v20 = vld [vmem:[%s8441_s1 + $0x2200] sm:$0xff]  ;;  %v1244_v24 = vld [vmem:[%s8441_s1 + $0x2608] sm:$0xff]  ;;  %v66_v3 = vld [vmem:[%s8441_s1 + $0x138] sm:$0xff] }
 0x146   :  { %2317 = vmatpush2.msra.mxu1 %v1255_v9  ;;  %2249 = vmatprep.subr.mxu0 %v1120_v10  ;;  %v1247_v23 = vld [vmem:[%s8441_s1 + $0x2620] sm:$0xff]  ;;  %v1368_v26 = vld [vmem:[%s8441_s1 + $0x29e8] sm:$0xff]  ;;  %v65_v7 = vld [vmem:[%s8441_s1 + $0x130] sm:$0xff] }
 0x147   :  { %2318 = vmatprep.subr.mxu1 %v1252_v11  ;;  %2250 = vmatpush2.msra.mxu0 %v1119_v13  ;;  %v1243_v28 = vld [vmem:[%s8441_s1 + $0x2600] sm:$0xff]  ;;  %v1364_v33 = vld [vmem:[%s8441_s1 + $0x29c8] sm:$0xff]  ;;  %v62_v10 = vld [vmem:[%s8441_s1 + $0x118] sm:$0xff] }
 0x148   :  { %2319 = vmatpush2.msra.mxu1 %v1251_v14  ;;  %2251 = vmatprep.subr.mxu0 %v1116_v16  ;;  %v1367_v32 = vld [vmem:[%s8441_s1 + $0x29e0] sm:$0xff]  ;;  %v1360_v37 = vld [vmem:[%s8441_s1 + $0x29a8] sm:$0xff]  ;;  %v61_v13 = vld [vmem:[%s8441_s1 + $0x110] sm:$0xff] }
 0x149   :  { %2320 = vmatprep.subr.mxu1 %v1248_v19  ;;  %2252 = vmatpush2.msra.mxu0 %v1115_v20  ;;  %v1363_v34 = vld [vmem:[%s8441_s1 + $0x29c0] sm:$0xff]  ;;  %v1356_v43 = vld [vmem:[%s8441_s1 + $0x2988] sm:$0xff]  ;;  %v58_v16 = vld [vmem:[%s8441_s1 + $0xf8] sm:$0xff] }
 0x14a   :  { %2253 = vmatprep.mubr.f32.mxu0 %v5695_v21  ;;  %2321 = vmatpush2.msra.mxu1 %v1247_v23  ;;  %v1359_v40 = vld [vmem:[%s8441_s1 + $0x29a0] sm:$0xff]  ;;  %v1352_v47 = vld [vmem:[%s8441_s1 + $0x2968] sm:$0xff]  ;;  %v57_v20 = vld [vmem:[%s8441_s1 + $0xf0] sm:$0xff] }
 0x14b   :  { %2254 = vmatmul.mubr.f32.vlgmr.msra.gmra.mxu0 %v5664_v8  ;;  %2322 = vmatprep.subr.mxu1 %v1244_v24  ;;  %v1355_v45 = vld [vmem:[%s8441_s1 + $0x2980] sm:$0xff]  ;;  %v1348_v54 = vld [vmem:[%s8441_s1 + $0x2948] sm:$0xff]  ;;  %v54_v24 = vld [vmem:[%s8441_s1 + $0xd8] sm:$0xff] }
 0x14c   :  { %2331 = vmatprep.subr.mxu0 %v1368_v26  ;;  %2323 = vmatpush2.msra.mxu1 %v1243_v28  ;;  %v1351_v51 = vld [vmem:[%s8441_s1 + $0x2960] sm:$0xff]  ;;  %v1344_v60 = vld [vmem:[%s8441_s1 + $0x2928] sm:$0xff]  ;;  %v53_v28 = vld [vmem:[%s8441_s1 + $0xd0] sm:$0xff] }
 0x14d   :  { %2324 = vmatprep.mubr.f32.mxu1 %v5711_v29  ;;  %2332 = vmatpush1.msra.mxu0 %v1367_v32  ;;  %v1347_v56 = vld [vmem:[%s8441_s1 + $0x2940] sm:$0xff]  ;;  %v1340_v0 = vld [vmem:[%s8441_s1 + $0x2908] sm:$0xff] }
 0x14e   :  { %2325 = vmatmul.mubr.f32.vlgmr.msra.gmra.mxu1 %v5685_v17  ;;  %2333 = vmatprep.subr.mxu0 %v1364_v33  ;;  %v1343_v62 = vld [vmem:[%s8441_s1 + $0x2920] sm:$0xff]  ;;  %v1336_v6 = vld [vmem:[%s8441_s1 + $0x28e8] sm:$0xff]  ;;  %v50_v33 = vld [vmem:[%s8441_s1 + $0xb8] sm:$0xff] }
 0x14f   :  { %2334 = vmatpush1.msra.mxu0 %v1363_v34  ;;  %2473 = vmatprep.subr.mxu1 %v90_v35  ;;  %v1339_v2 = vld [vmem:[%s8441_s1 + $0x2900] sm:$0xff]  ;;  %v1332_v11 = vld [vmem:[%s8441_s1 + $0x28c8] sm:$0xff]  ;;  %v49_v35 = vld [vmem:[%s8441_s1 + $0xb0] sm:$0xff] }
 0x150   :  { %2335 = vmatprep.subr.mxu0 %v1360_v37  ;;  %2474 = vmatpush1.msra.mxu1 %v89_v39  ;;  %v1335_v9 = vld [vmem:[%s8441_s1 + $0x28e0] sm:$0xff]  ;;  %v1328_v19 = vld [vmem:[%s8441_s1 + $0x28a8] sm:$0xff]  ;;  %v46_v39 = vld [vmem:[%s8441_s1 + $0x98] sm:$0xff] }
 0x151   :  { %2336 = vmatpush1.msra.mxu0 %v1359_v40  ;;  %2475 = vmatprep.subr.mxu1 %v86_v41  ;;  %v1331_v14 = vld [vmem:[%s8441_s1 + $0x28c0] sm:$0xff]  ;;  %v1324_v26 = vld [vmem:[%s8441_s1 + $0x2888] sm:$0xff]  ;;  %v45_v41 = vld [vmem:[%s8441_s1 + $0x90] sm:$0xff] }
 0x152   :  { %2337 = vmatprep.subr.mxu0 %v1356_v43  ;;  %2476 = vmatpush1.msra.mxu1 %v85_v44  ;;  %v1327_v23 = vld [vmem:[%s8441_s1 + $0x28a0] sm:$0xff]  ;;  %v1320_v34 = vld [vmem:[%s8441_s1 + $0x2868] sm:$0xff]  ;;  %v42_v44 = vld [vmem:[%s8441_s1 + $0x78] sm:$0xff] }
 0x153   :  { %2338 = vmatpush1.msra.mxu0 %v1355_v45  ;;  %2477 = vmatprep.subr.mxu1 %v82_v46  ;;  %v1323_v32 = vld [vmem:[%s8441_s1 + $0x2880] sm:$0xff]  ;;  %v1316_v40 = vld [vmem:[%s8441_s1 + $0x2848] sm:$0xff]  ;;  %v41_v46 = vld [vmem:[%s8441_s1 + $0x70] sm:$0xff] }
 0x154   :  { %2339 = vmatprep.subr.mxu0 %v1352_v47  ;;  %2478 = vmatpush1.msra.mxu1 %v81_v49  ;;  %v1319_v37 = vld [vmem:[%s8441_s1 + $0x2860] sm:$0xff]  ;;  %v1312_v45 = vld [vmem:[%s8441_s1 + $0x2828] sm:$0xff]  ;;  %v38_v49 = vld [vmem:[%s8441_s1 + $0x58] sm:$0xff] }
 0x155   :  { %2340 = vmatpush1.msra.mxu0 %v1351_v51  ;;  %2479 = vmatprep.subr.mxu1 %v78_v52  ;;  %v1315_v43 = vld [vmem:[%s8441_s1 + $0x2840] sm:$0xff]  ;;  %v1308_v51 = vld [vmem:[%s8441_s1 + $0x2808] sm:$0xff]  ;;  %v37_v52 = vld [vmem:[%s8441_s1 + $0x50] sm:$0xff] }
 0x156   :  { %2341 = vmatprep.subr.mxu0 %v1348_v54  ;;  %2480 = vmatpush1.msra.mxu1 %v77_v55  ;;  %v1311_v47 = vld [vmem:[%s8441_s1 + $0x2820] sm:$0xff]  ;;  %v34_v55 = vld [vmem:[%s8441_s1 + $0x38] sm:$0xff] }
 0x157   :  { %2342 = vmatpush1.msra.mxu0 %v1347_v56  ;;  %2481 = vmatprep.subr.mxu1 %v74_v57  ;;  %v1307_v54 = vld [vmem:[%s8441_s1 + $0x2800] sm:$0xff]  ;;  %v1432_v56 = vld [vmem:[%s8441_s1 + $0x2be8] sm:$0xff]  ;;  %v33_v57 = vld [vmem:[%s8441_s1 + $0x30] sm:$0xff] }
 0x158   :  { %2343 = vmatprep.subr.mxu0 %v1344_v60  ;;  %2482 = vmatpush1.msra.mxu1 %v73_v61  ;;  %v1431_v60 = vld [vmem:[%s8441_s1 + $0x2be0] sm:$0xff]  ;;  %v30_v61 = vld [vmem:[%s8441_s1 + $0x18] sm:$0xff] }
 0x159   :  { %2344 = vmatpush1.msra.mxu0 %v1343_v62  ;;  %2483 = vmatprep.subr.mxu1 %v70_v63  ;;  %v1428_v62 = vld [vmem:[%s8441_s1 + $0x2bc8] sm:$0xff]  ;;  %v29_v63 = vld [vmem:[%s8441_s1 + $0x10] sm:$0xff] }
 0x15a   :  { %2345 = vmatprep.subr.mxu0 %v1340_v0  ;;  %2484 = vmatpush1.msra.mxu1 %v69_v1  ;;  %v1427_v0 = vld [vmem:[%s8441_s1 + $0x2bc0] sm:$0xff]  ;;  %v154_v1 = vld [vmem:[%s8441_s1 + $0x3f8] sm:$0xff] }
 0x15b   :  { %2346 = vmatpush1.msra.mxu0 %v1339_v2  ;;  %2485 = vmatprep.subr.mxu1 %v66_v3  ;;  %v1424_v2 = vld [vmem:[%s8441_s1 + $0x2ba8] sm:$0xff]  ;;  %v153_v3 = vld [vmem:[%s8441_s1 + $0x3f0] sm:$0xff] }
 0x15c   :  { %2347 = vmatprep.subr.mxu0 %v1336_v6  ;;  %2486 = vmatpush1.msra.mxu1 %v65_v7  ;;  %v1423_v6 = vld [vmem:[%s8441_s1 + $0x2ba0] sm:$0xff]  ;;  %v150_v7 = vld [vmem:[%s8441_s1 + $0x3d8] sm:$0xff] }
 0x15d   :  { %2348 = vmatpush1.msra.mxu0 %v1335_v9  ;;  %2487 = vmatprep.subr.mxu1 %v62_v10  ;;  %v1420_v9 = vld [vmem:[%s8441_s1 + $0x2b88] sm:$0xff]  ;;  %v149_v10 = vld [vmem:[%s8441_s1 + $0x3d0] sm:$0xff] }
 0x15e   :  { %2349 = vmatprep.subr.mxu0 %v1332_v11  ;;  %2488 = vmatpush1.msra.mxu1 %v61_v13  ;;  %v1419_v11 = vld [vmem:[%s8441_s1 + $0x2b80] sm:$0xff]  ;;  %v146_v13 = vld [vmem:[%s8441_s1 + $0x3b8] sm:$0xff] }
 0x15f   :  { %2350 = vmatpush1.msra.mxu0 %v1331_v14  ;;  %2489 = vmatprep.subr.mxu1 %v58_v16  ;;  %v1416_v14 = vld [vmem:[%s8441_s1 + $0x2b68] sm:$0xff]  ;;  %v145_v16 = vld [vmem:[%s8441_s1 + $0x3b0] sm:$0xff] }
 0x160   :  { %2351 = vmatprep.subr.mxu0 %v1328_v19  ;;  %2490 = vmatpush1.msra.mxu1 %v57_v20  ;;  %v5954_v19 = vld [vmem:[%s8440_s0 + $0x28] sm:$0x3f]  ;;  %v1415_v20 = vld [vmem:[%s8441_s1 + $0x2b60] sm:$0xff] }
 0x161   :  { %2352 = vmatpush1.msra.mxu0 %v1327_v23  ;;  %2491 = vmatprep.subr.mxu1 %v54_v24  ;;  %v142_v23 = vld [vmem:[%s8441_s1 + $0x398] sm:$0xff]  ;;  %v1412_v24 = vld [vmem:[%s8441_s1 + $0x2b48] sm:$0xff] }
 0x162   :  { %2353 = vmatprep.subr.mxu0 %v1324_v26  ;;  %2492 = vmatpush1.msra.mxu1 %v53_v28  ;;  %v141_v26 = vld [vmem:[%s8441_s1 + $0x390] sm:$0xff]  ;;  %v1411_v28 = vld [vmem:[%s8441_s1 + $0x2b40] sm:$0xff] }
 0x163   :  { %2354 = vmatpush1.msra.mxu0 %v1323_v32  ;;  %2493 = vmatprep.subr.mxu1 %v50_v33  ;;  %v138_v32 = vld [vmem:[%s8441_s1 + $0x378] sm:$0xff]  ;;  %v5976_v33 = vrot.slane %v5954_v19, %v4008_v48 }
 0x164   :  { %2355 = vmatprep.subr.mxu0 %v1320_v34  ;;  %2494 = vmatpush1.msra.mxu1 %v49_v35  ;;  %v1408_v34 = vld [vmem:[%s8441_s1 + $0x2b28] sm:$0xff]  ;;  %v137_v35 = vld [vmem:[%s8441_s1 + $0x370] sm:$0xff] }
 0x165   :  { %2356 = vmatpush1.msra.mxu0 %v1319_v37  ;;  %2495 = vmatprep.subr.mxu1 %v46_v39  ;;  %v1407_v37 = vld [vmem:[%s8441_s1 + $0x2b20] sm:$0xff]  ;;  %v134_v39 = vld [vmem:[%s8441_s1 + $0x358] sm:$0xff] }
 0x166   :  { %2357 = vmatprep.subr.mxu0 %v1316_v40  ;;  %2496 = vmatpush1.msra.mxu1 %v45_v41  ;;  %v1404_v40 = vld [vmem:[%s8441_s1 + $0x2b08] sm:$0xff]  ;;  %v133_v41 = vld [vmem:[%s8441_s1 + $0x350] sm:$0xff] }
 0x167   :  { %2358 = vmatpush1.msra.mxu0 %v1315_v43  ;;  %2497 = vmatprep.subr.mxu1 %v42_v44  ;;  %v1403_v43 = vld [vmem:[%s8441_s1 + $0x2b00] sm:$0xff]  ;;  %v130_v44 = vld [vmem:[%s8441_s1 + $0x338] sm:$0xff] }
 0x168   :  { %2359 = vmatprep.subr.mxu0 %v1312_v45  ;;  %2498 = vmatpush1.msra.mxu1 %v41_v46  ;;  %v6004_v45 = vcombine.high %v5976_v33, %v5976_v33  ;;  %v1400_v46 = vld [vmem:[%s8441_s1 + $0x2ae8] sm:$0xff] }
 0x169   :  { %2360 = vmatpush1.msra.mxu0 %v1311_v47  ;;  %2499 = vmatprep.subr.mxu1 %v38_v49  ;;  %v1399_v47 = vld [vmem:[%s8441_s1 + $0x2ae0] sm:$0xff]  ;;  %v129_v49 = vld [vmem:[%s8441_s1 + $0x330] sm:$0xff] }
 0x16a   :  { %2361 = vmatprep.subr.mxu0 %v1308_v51  ;;  %2500 = vmatpush1.msra.mxu1 %v37_v52  ;;  %v1396_v51 = vld [vmem:[%s8441_s1 + $0x2ac8] sm:$0xff]  ;;  %v126_v52 = vld [vmem:[%s8441_s1 + $0x318] sm:$0xff] }
 0x16b   :  { %2362 = vmatpush1.msra.mxu0 %v1307_v54  ;;  %2501 = vmatprep.subr.mxu1 %v34_v55  ;;  %v1395_v54 = vld [vmem:[%s8441_s1 + $0x2ac0] sm:$0xff]  ;;  %v125_v55 = vld [vmem:[%s8441_s1 + $0x310] sm:$0xff] }
 0x16c   :  { %2363 = vmatprep.subr.mxu0 %v1432_v56  ;;  %2502 = vmatpush1.msra.mxu1 %v33_v57  ;;  %v1392_v56 = vld [vmem:[%s8441_s1 + $0x2aa8] sm:$0xff]  ;;  %v122_v57 = vld [vmem:[%s8441_s1 + $0x2f8] sm:$0xff] }
 0x16d   :  { %2364 = vmatpush2.msra.mxu0 %v1431_v60  ;;  %2503 = vmatprep.subr.mxu1 %v30_v61  ;;  %v1391_v60 = vld [vmem:[%s8441_s1 + $0x2aa0] sm:$0xff]  ;;  %v121_v61 = vld [vmem:[%s8441_s1 + $0x2f0] sm:$0xff] }
 0x16e   :  { %2365 = vmatprep.subr.mxu0 %v1428_v62  ;;  %2504 = vmatpush1.msra.mxu1 %v29_v63  ;;  %v1388_v62 = vld [vmem:[%s8441_s1 + $0x2a88] sm:$0xff]  ;;  %v118_v63 = vld [vmem:[%s8441_s1 + $0x2d8] sm:$0xff] }
 0x16f   :  { %2366 = vmatpush2.msra.mxu0 %v1427_v0  ;;  %2505 = vmatprep.subr.mxu1 %v154_v1  ;;  %v1387_v0 = vld [vmem:[%s8441_s1 + $0x2a80] sm:$0xff]  ;;  %v117_v1 = vld [vmem:[%s8441_s1 + $0x2d0] sm:$0xff] }
 0x170   :  { %2367 = vmatprep.subr.mxu0 %v1424_v2  ;;  %2506 = vmatpush2.msra.mxu1 %v153_v3  ;;  %v1384_v2 = vld [vmem:[%s8441_s1 + $0x2a68] sm:$0xff]  ;;  %v114_v3 = vld [vmem:[%s8441_s1 + $0x2b8] sm:$0xff] }
 0x171   :  { %2368 = vmatpush2.msra.mxu0 %v1423_v6  ;;  %2507 = vmatprep.subr.mxu1 %v150_v7  ;;  %v1383_v6 = vld [vmem:[%s8441_s1 + $0x2a60] sm:$0xff]  ;;  %v113_v7 = vld [vmem:[%s8441_s1 + $0x2b0] sm:$0xff] }
 0x172   :  { %2369 = vmatprep.subr.mxu0 %v1420_v9  ;;  %2508 = vmatpush2.msra.mxu1 %v149_v10  ;;  %v1380_v9 = vld [vmem:[%s8441_s1 + $0x2a48] sm:$0xff]  ;;  %v110_v10 = vld [vmem:[%s8441_s1 + $0x298] sm:$0xff] }
 0x173   :  { %2370 = vmatpush2.msra.mxu0 %v1419_v11  ;;  %2509 = vmatprep.subr.mxu1 %v146_v13  ;;  %v1379_v11 = vld [vmem:[%s8441_s1 + $0x2a40] sm:$0xff]  ;;  %v109_v13 = vld [vmem:[%s8441_s1 + $0x290] sm:$0xff] }
 0x174   :  { %2371 = vmatprep.subr.mxu0 %v1416_v14  ;;  %2510 = vmatpush2.msra.mxu1 %v145_v16  ;;  %v1376_v14 = vld [vmem:[%s8441_s1 + $0x2a28] sm:$0xff]  ;;  %v106_v16 = vld [vmem:[%s8441_s1 + $0x278] sm:$0xff] }
 0x175   :  { %2372 = vmatpush2.msra.mxu0 %v1415_v20  ;;  %2511 = vmatprep.subr.mxu1 %v142_v23  ;;  %v1375_v20 = vld [vmem:[%s8441_s1 + $0x2a20] sm:$0xff]  ;;  %v105_v23 = vld [vmem:[%s8441_s1 + $0x270] sm:$0xff] }
 0x176   :  { %2373 = vmatprep.subr.mxu0 %v1412_v24  ;;  %2512 = vmatpush2.msra.mxu1 %v141_v26  ;;  %v1372_v24 = vld [vmem:[%s8441_s1 + $0x2a08] sm:$0xff]  ;;  %v102_v26 = vld [vmem:[%s8441_s1 + $0x258] sm:$0xff] }
 0x177   :  { %2374 = vmatpush2.msra.mxu0 %v1411_v28  ;;  %2513 = vmatprep.subr.mxu1 %v138_v32  ;;  %v1371_v28 = vld [vmem:[%s8441_s1 + $0x2a00] sm:$0xff]  ;;  %v101_v32 = vld [vmem:[%s8441_s1 + $0x250] sm:$0xff] }
 0x178   :  { %2375 = vmatprep.subr.mxu0 %v1408_v34  ;;  %2514 = vmatpush2.msra.mxu1 %v137_v35  ;;  %v1464_v34 = vld [vmem:[%s8441_s1 + $0x2ce8] sm:$0xff]  ;;  %v1463_v35 = vld [vmem:[%s8441_s1 + $0x2ce0] sm:$0xff] }
 0x179   :  { %2376 = vmatpush2.msra.mxu0 %v1407_v37  ;;  %2515 = vmatprep.subr.mxu1 %v134_v39  ;;  %v98_v37 = vld [vmem:[%s8441_s1 + $0x238] sm:$0xff]  ;;  %v1460_v39 = vld [vmem:[%s8441_s1 + $0x2cc8] sm:$0xff] }
 0x17a   :  { %2377 = vmatprep.subr.mxu0 %v1404_v40  ;;  %2516 = vmatpush2.msra.mxu1 %v133_v41  ;;  %v1459_v40 = vld [vmem:[%s8441_s1 + $0x2cc0] sm:$0xff]  ;;  %v97_v41 = vld [vmem:[%s8441_s1 + $0x230] sm:$0xff] }
 0x17b   :  { %2378 = vmatpush2.msra.mxu0 %v1403_v43  ;;  %2517 = vmatprep.subr.mxu1 %v130_v44  ;;  %v1456_v43 = vld [vmem:[%s8441_s1 + $0x2ca8] sm:$0xff]  ;;  %v94_v44 = vld [vmem:[%s8441_s1 + $0x218] sm:$0xff] }
 0x17c   :  { %2379 = vmatprep.subr.mxu0 %v1400_v46  ;;  %2395 = vmatprep.mubr.f32.mxu0 %v6004_v45  ;;  %v1455_v46 = vld [vmem:[%s8441_s1 + $0x2ca0] sm:$0xff] }
 0x17d   :  { %2380 = vmatpush2.msra.mxu0 %v1399_v47  ;;  %2518 = vmatpush2.msra.mxu1 %v129_v49  ;;  %v3652_v47 = vmov 0.0   ;;  %v93_v49 = vld [vmem:[%s8441_s1 + $0x210] sm:$0xff] }
 0x17e   :  { %2381 = vmatprep.subr.mxu0 %v1396_v51  ;;  %2519 = vmatprep.subr.mxu1 %v126_v52  ;;  %v1452_v51 = vld [vmem:[%s8441_s1 + $0x2c88] sm:$0xff]  ;;  %v1451_v52 = vld [vmem:[%s8441_s1 + $0x2c80] sm:$0xff] }
 0x17f   :  { %2382 = vmatpush2.msra.mxu0 %v1395_v54  ;;  %2520 = vmatpush2.msra.mxu1 %v125_v55  ;;  %v346_v54 = vld [vmem:[%s8441_s1 + $0x9f8] sm:$0xff]  ;;  %v1448_v55 = vld [vmem:[%s8441_s1 + $0x2c68] sm:$0xff] }
 0x180   :  { %2383 = vmatprep.subr.mxu0 %v1392_v56  ;;  %2521 = vmatprep.subr.mxu1 %v122_v57  ;;  %v1447_v56 = vld [vmem:[%s8441_s1 + $0x2c60] sm:$0xff]  ;;  %v345_v57 = vld [vmem:[%s8441_s1 + $0x9f0] sm:$0xff] }
 0x181   :  { %2384 = vmatpush2.msra.mxu0 %v1391_v60  ;;  %2522 = vmatpush2.msra.mxu1 %v121_v61  ;;  %v1444_v60 = vld [vmem:[%s8441_s1 + $0x2c48] sm:$0xff]  ;;  %v342_v61 = vld [vmem:[%s8441_s1 + $0x9d8] sm:$0xff] }
 0x182   :  { %2385 = vmatprep.subr.mxu0 %v1388_v62  ;;  %2523 = vmatprep.subr.mxu1 %v118_v63  ;;  %v1580_v62 = vcombine.high %v5954_v19, %v5954_v19  ;;  %v341_v63 = vld [vmem:[%s8441_s1 + $0x9d0] sm:$0xff]  ;;  %v338_v19 = vld [vmem:[%s8441_s1 + $0x9b8] sm:$0xff] }
 0x183   :  { %2386 = vmatpush2.msra.mxu0 %v1387_v0  ;;  %2524 = vmatpush2.msra.mxu1 %v117_v1  ;;  %v1440_v0 = vld [vmem:[%s8441_s1 + $0x2c28] sm:$0xff]  ;;  %v1439_v1 = vld [vmem:[%s8441_s1 + $0x2c20] sm:$0xff] }
 0x184   :  { %2387 = vmatprep.subr.mxu0 %v1384_v2  ;;  %2525 = vmatprep.subr.mxu1 %v114_v3  ;;  %v1436_v2 = vld [vmem:[%s8441_s1 + $0x2c08] sm:$0xff]  ;;  %v334_v3 = vld [vmem:[%s8441_s1 + $0x998] sm:$0xff] }
 0x185   :  { %2388 = vmatpush2.msra.mxu0 %v1383_v6  ;;  %2526 = vmatpush2.msra.mxu1 %v113_v7  ;;  %v1435_v6 = vld [vmem:[%s8441_s1 + $0x2c00] sm:$0xff]  ;;  %v6188_v7 = vrot.slane %v1580_v62, %v4008_v48  ;;  %v330_v48 = vld [vmem:[%s8441_s1 + $0x978] sm:$0xff] }
 0x186   :  { %2389 = vmatprep.subr.mxu0 %v1380_v9  ;;  %2527 = vmatprep.subr.mxu1 %v110_v10  ;;  %v333_v9 = vld [vmem:[%s8441_s1 + $0x990] sm:$0xff]  ;;  %v218_v10 = vld [vmem:[%s8441_s1 + $0x5f8] sm:$0xff] }
 0x187   :  { %2390 = vmatpush2.msra.mxu0 %v1379_v11  ;;  %2528 = vmatpush2.msra.mxu1 %v109_v13  ;;  %v217_v11 = vld [vmem:[%s8441_s1 + $0x5f0] sm:$0xff]  ;;  %v214_v13 = vld [vmem:[%s8441_s1 + $0x5d8] sm:$0xff] }
 0x188   :  { %2391 = vmatprep.subr.mxu0 %v1376_v14  ;;  %2529 = vmatprep.subr.mxu1 %v106_v16  ;;  %v329_v14 = vld [vmem:[%s8441_s1 + $0x970] sm:$0xff]  ;;  %v302_v62 = vld [vmem:[%s8441_s1 + $0x898] sm:$0xff] }
 0x189   :  { %2392 = vmatpush2.msra.mxu0 %v1375_v20  ;;  %2530 = vmatpush2.msra.mxu1 %v105_v23  ;;  %v213_v16 = vld [vmem:[%s8441_s1 + $0x5d0] sm:$0xff]  ;;  %v326_v20 = vld [vmem:[%s8441_s1 + $0x958] sm:$0xff] }
 0x18a   :  { %2393 = vmatprep.subr.mxu0 %v1372_v24  ;;  %2531 = vmatprep.subr.mxu1 %v102_v26  ;;  %v210_v23 = vld [vmem:[%s8441_s1 + $0x5b8] sm:$0xff]  ;;  %v325_v24 = vld [vmem:[%s8441_s1 + $0x950] sm:$0xff] }
 0x18b   :  { %2394 = vmatpush2.msra.mxu0 %v1371_v28  ;;  %2532 = vmatpush2.msra.mxu1 %v101_v32  ;;  %v209_v26 = vld [vmem:[%s8441_s1 + $0x5b0] sm:$0xff]  ;;  %v322_v28 = vld [vmem:[%s8441_s1 + $0x938] sm:$0xff] }
 0x18c   :  { %2396 = vmatmul.mubr.f32.vlgmr.msra.gmra.mxu0 %v5976_v33  ;;  %2418 = vmatprep.subr.mxu0 %v1464_v34  ;;  %v206_v32 = vld [vmem:[%s8441_s1 + $0x598] sm:$0xff]  ;;  %v321_v34 = vld [vmem:[%s8441_s1 + $0x930] sm:$0xff] }
 0x18d   :  { %2419 = vmatpush1.msra.mxu0 %v1463_v35  ;;  %2533 = vmatprep.subr.mxu1 %v98_v37  ;;  %v205_v35 = vld [vmem:[%s8441_s1 + $0x590] sm:$0xff]  ;;  %v318_v37 = vld [vmem:[%s8441_s1 + $0x918] sm:$0xff] }
 0x18e   :  { %2420 = vmatprep.subr.mxu0 %v1460_v39  ;;  %2466 = vmatprep.mubr.f32.mxu0 %v3652_v47  ;;  %v202_v39 = vld [vmem:[%s8441_s1 + $0x578] sm:$0xff] }
 0x18f   :  { %2421 = vmatpush1.msra.mxu0 %v1459_v40  ;;  %2534 = vmatpush2.msra.mxu1 %v97_v41  ;;  %v317_v40 = vld [vmem:[%s8441_s1 + $0x910] sm:$0xff] }
 0x190   :  { %2422 = vmatprep.subr.mxu0 %v1456_v43  ;;  %2535 = vmatprep.subr.mxu1 %v94_v44  ;;  %v201_v41 = vld [vmem:[%s8441_s1 + $0x570] sm:$0xff]  ;;  %v314_v43 = vld [vmem:[%s8441_s1 + $0x8f8] sm:$0xff] }
 0x191   :  { %2423 = vmatpush1.msra.mxu0 %v1455_v46  ;;  %2536 = vmatpush2.msra.mxu1 %v93_v49  ;;  %v198_v44 = vld [vmem:[%s8441_s1 + $0x558] sm:$0xff]  ;;  %v313_v46 = vld [vmem:[%s8441_s1 + $0x8f0] sm:$0xff] }
 0x192   :  { %2424 = vmatprep.subr.mxu0 %v1452_v51  ;;  %2537 = vmatprep.mubr.f32.mxu1 %v4066_v4  ;;  %v1443_v4 = vld [vmem:[%s8441_s1 + $0x2c40] sm:$0xff]  ;;  %v197_v49 = vld [vmem:[%s8441_s1 + $0x550] sm:$0xff]  ;;  %v310_v51 = vld [vmem:[%s8441_s1 + $0x8d8] sm:$0xff] }
 0x193   :  { %2425 = vmatpush1.msra.mxu0 %v1451_v52  ;;  %2615 = vmatprep.subr.mxu1 %v346_v54  ;;  %v194_v52 = vld [vmem:[%s8441_s1 + $0x538] sm:$0xff]  ;;  %v309_v54 = vld [vmem:[%s8441_s1 + $0x8d0] sm:$0xff] }
 0x194   :  { %2426 = vmatprep.subr.mxu0 %v1448_v55  ;;  %2538 = vmatmul.mubr.f32.vlgmr.msra.gmra.mxu1 %v4038_v58  ;;  %v337_v58 = vld [vmem:[%s8441_s1 + $0x9b0] sm:$0xff] }
 0x195   :  { %2427 = vmatpush1.msra.mxu0 %v1447_v56  ;;  %2616 = vmatpush1.msra.mxu1 %v345_v57  ;;  %v193_v55 = vld [vmem:[%s8441_s1 + $0x530] sm:$0xff]  ;;  %v306_v56 = vld [vmem:[%s8441_s1 + $0x8b8] sm:$0xff] }
 0x196   :  { %2428 = vmatprep.subr.mxu0 %v1444_v60  ;;  %2617 = vmatprep.subr.mxu1 %v342_v61  ;;  %v190_v57 = vld [vmem:[%s8441_s1 + $0x518] sm:$0xff]  ;;  %v305_v60 = vld [vmem:[%s8441_s1 + $0x8b0] sm:$0xff] }
 0x197   :  { %2429 = vmatpush1.msra.mxu0 %v1443_v4  ;;  %2618 = vmatpush1.msra.mxu1 %v341_v63  ;;  %v189_v61 = vld [vmem:[%s8441_s1 + $0x510] sm:$0xff]  ;;  %v186_v4 = vld [vmem:[%s8441_s1 + $0x4f8] sm:$0xff] }
 0x198   :  { %2430 = vmatprep.subr.mxu0 %v1440_v0  ;;  %2619 = vmatprep.subr.mxu1 %v338_v19  ;;  %v301_v63 = vld [vmem:[%s8441_s1 + $0x890] sm:$0xff]  ;;  %v298_v19 = vld [vmem:[%s8441_s1 + $0x878] sm:$0xff] }
 0x199   :  { %2431 = vmatpush1.msra.mxu0 %v1439_v1  ;;  %2620 = vmatpush1.msra.mxu1 %v337_v58  ;;  %v185_v0 = vld [vmem:[%s8441_s1 + $0x4f0] sm:$0xff]  ;;  %v182_v1 = vld [vmem:[%s8441_s1 + $0x4d8] sm:$0xff] }
 0x19a   :  { %2432 = vmatprep.subr.mxu0 %v1436_v2  ;;  %2621 = vmatprep.subr.mxu1 %v334_v3  ;;  %v297_v58 = vld [vmem:[%s8441_s1 + $0x870] sm:$0xff]  ;;  %v294_v3 = vld [vmem:[%s8441_s1 + $0x858] sm:$0xff] }
 0x19b   :  { %2433 = vmatpush1.msra.mxu0 %v1435_v6  ;;  %2622 = vmatpush1.msra.mxu1 %v333_v9  ;;  %v181_v2 = vld [vmem:[%s8441_s1 + $0x4d0] sm:$0xff]  ;;  %v178_v6 = vld [vmem:[%s8441_s1 + $0x4b8] sm:$0xff] }
 0x19c   :  { %3576 = vmatmul.mubr.msk.f32.vlgmr.msra.gmra.mxu0 %vm1618_vm0, %v6188_v7  ;;  %2544 = vmatprep.subr.mxu0 %v218_v10  ;;  %v293_v9 = vld [vmem:[%s8441_s1 + $0x850] sm:$0xff] }
 0x19d   :  { %2545 = vmatpush1.msra.mxu0 %v217_v11  ;;  %2623 = vmatprep.subr.mxu1 %v330_v48  ;;  %v177_v10 = vld [vmem:[%s8441_s1 + $0x4b0] sm:$0xff]  ;;  %v290_v11 = vld [vmem:[%s8441_s1 + $0x838] sm:$0xff] }
 0x19e   :  { %2546 = vmatprep.subr.mxu0 %v214_v13  ;;  %2624 = vmatpush1.msra.mxu1 %v329_v14  ;;  %v174_v48 = vld [vmem:[%s8441_s1 + $0x498] sm:$0xff]  ;;  %v289_v13 = vld [vmem:[%s8441_s1 + $0x830] sm:$0xff] }
 0x19f   :  { %2547 = vmatpush1.msra.mxu0 %v213_v16  ;;  %2625 = vmatprep.subr.mxu1 %v326_v20  ;;  %v173_v14 = vld [vmem:[%s8441_s1 + $0x490] sm:$0xff]  ;;  %v286_v16 = vld [vmem:[%s8441_s1 + $0x818] sm:$0xff] }
 0x1a0   :  { %2548 = vmatprep.subr.mxu0 %v210_v23  ;;  %2626 = vmatpush1.msra.mxu1 %v325_v24  ;;  %v170_v20 = vld [vmem:[%s8441_s1 + $0x478] sm:$0xff]  ;;  %v285_v23 = vld [vmem:[%s8441_s1 + $0x810] sm:$0xff] }
 0x1a1   :  { %2549 = vmatpush1.msra.mxu0 %v209_v26  ;;  %2627 = vmatprep.subr.mxu1 %v322_v28  ;;  %v169_v24 = vld [vmem:[%s8441_s1 + $0x470] sm:$0xff]  ;;  %v410_v26 = vld [vmem:[%s8441_s1 + $0xbf8] sm:$0xff] }
 0x1a2   :  { %2550 = vmatprep.subr.mxu0 %v206_v32  ;;  %2628 = vmatpush1.msra.mxu1 %v321_v34  ;;  %v166_v28 = vld [vmem:[%s8441_s1 + $0x458] sm:$0xff]  ;;  %v409_v32 = vld [vmem:[%s8441_s1 + $0xbf0] sm:$0xff] }
 0x1a3   :  { %2551 = vmatpush1.msra.mxu0 %v205_v35  ;;  %2629 = vmatprep.subr.mxu1 %v318_v37  ;;  %v165_v34 = vld [vmem:[%s8441_s1 + $0x450] sm:$0xff]  ;;  %v406_v35 = vld [vmem:[%s8441_s1 + $0xbd8] sm:$0xff] }
 0x1a4   :  { %2552 = vmatprep.subr.mxu0 %v202_v39  ;;  %2630 = vmatpush1.msra.mxu1 %v317_v40  ;;  %v162_v37 = vld [vmem:[%s8441_s1 + $0x438] sm:$0xff]  ;;  %v405_v39 = vld [vmem:[%s8441_s1 + $0xbd0] sm:$0xff] }
 0x1a5   :  { %2553 = vmatpush1.msra.mxu0 %v201_v41  ;;  %2631 = vmatprep.subr.mxu1 %v314_v43  ;;  %v161_v40 = vld [vmem:[%s8441_s1 + $0x430] sm:$0xff]  ;;  %v402_v41 = vld [vmem:[%s8441_s1 + $0xbb8] sm:$0xff] }
 0x1a6   :  { %2554 = vmatprep.subr.mxu0 %v198_v44  ;;  %2632 = vmatpush1.msra.mxu1 %v313_v46  ;;  %v158_v43 = vld [vmem:[%s8441_s1 + $0x418] sm:$0xff]  ;;  %v401_v44 = vld [vmem:[%s8441_s1 + $0xbb0] sm:$0xff] }
 0x1a7   :  { %2555 = vmatpush1.msra.mxu0 %v197_v49  ;;  %2633 = vmatprep.subr.mxu1 %v310_v51  ;;  %v157_v46 = vld [vmem:[%s8441_s1 + $0x410] sm:$0xff]  ;;  %v398_v49 = vld [vmem:[%s8441_s1 + $0xb98] sm:$0xff] }
 0x1a8   :  { %2556 = vmatprep.subr.mxu0 %v194_v52  ;;  %2634 = vmatpush1.msra.mxu1 %v309_v54  ;;  %v282_v51 = vld [vmem:[%s8441_s1 + $0x7f8] sm:$0xff]  ;;  %v397_v52 = vld [vmem:[%s8441_s1 + $0xb90] sm:$0xff] }
 0x1a9   :  { %2557 = vmatpush1.msra.mxu0 %v193_v55  ;;  %2635 = vmatprep.subr.mxu1 %v306_v56  ;;  %v281_v54 = vld [vmem:[%s8441_s1 + $0x7f0] sm:$0xff]  ;;  %v394_v55 = vld [vmem:[%s8441_s1 + $0xb78] sm:$0xff] }
 0x1aa   :  { %2558 = vmatprep.subr.mxu0 %v190_v57  ;;  %2636 = vmatpush1.msra.mxu1 %v305_v60  ;;  %v278_v56 = vld [vmem:[%s8441_s1 + $0x7d8] sm:$0xff]  ;;  %v393_v57 = vld [vmem:[%s8441_s1 + $0xb70] sm:$0xff] }
 0x1ab   :  { %2559 = vmatpush1.msra.mxu0 %v189_v61  ;;  %2637 = vmatprep.subr.mxu1 %v302_v62  ;;  %v277_v60 = vld [vmem:[%s8441_s1 + $0x7d0] sm:$0xff]  ;;  %v390_v61 = vld [vmem:[%s8441_s1 + $0xb58] sm:$0xff] }
 0x1ac   :  { %2560 = vmatprep.subr.mxu0 %v186_v4  ;;  %2638 = vmatpush1.msra.mxu1 %v301_v63  ;;  %v274_v62 = vld [vmem:[%s8441_s1 + $0x7b8] sm:$0xff]  ;;  %v389_v4 = vld [vmem:[%s8441_s1 + $0xb50] sm:$0xff] }
 0x1ad   :  { %2561 = vmatpush1.msra.mxu0 %v185_v0  ;;  %2639 = vmatprep.subr.mxu1 %v298_v19  ;;  %v273_v63 = vld [vmem:[%s8441_s1 + $0x7b0] sm:$0xff]  ;;  %v386_v0 = vld [vmem:[%s8441_s1 + $0xb38] sm:$0xff] }
 0x1ae   :  { %2562 = vmatprep.subr.mxu0 %v182_v1  ;;  %2640 = vmatpush1.msra.mxu1 %v297_v58  ;;  %v270_v19 = vld [vmem:[%s8441_s1 + $0x798] sm:$0xff]  ;;  %v385_v1 = vld [vmem:[%s8441_s1 + $0xb30] sm:$0xff] }
 0x1af   :  { %2563 = vmatpush1.msra.mxu0 %v181_v2  ;;  %2641 = vmatprep.subr.mxu1 %v294_v3  ;;  %v269_v58 = vld [vmem:[%s8441_s1 + $0x790] sm:$0xff]  ;;  %v382_v2 = vld [vmem:[%s8441_s1 + $0xb18] sm:$0xff] }
 0x1b0   :  { %2564 = vmatprep.subr.mxu0 %v178_v6  ;;  %2642 = vmatpush1.msra.mxu1 %v293_v9  ;;  %v266_v3 = vld [vmem:[%s8441_s1 + $0x778] sm:$0xff]  ;;  %v381_v6 = vld [vmem:[%s8441_s1 + $0xb10] sm:$0xff] }
 0x1b1   :  { %2565 = vmatpush1.msra.mxu0 %v177_v10  ;;  %2643 = vmatprep.subr.mxu1 %v290_v11  ;;  %v265_v9 = vld [vmem:[%s8441_s1 + $0x770] sm:$0xff]  ;;  %v378_v10 = vld [vmem:[%s8441_s1 + $0xaf8] sm:$0xff] }
 0x1b2   :  { %2566 = vmatprep.subr.mxu0 %v174_v48  ;;  %2644 = vmatpush1.msra.mxu1 %v289_v13  ;;  %v262_v11 = vld [vmem:[%s8441_s1 + $0x758] sm:$0xff]  ;;  %v377_v48 = vld [vmem:[%s8441_s1 + $0xaf0] sm:$0xff] }
 0x1b3   :  { %2567 = vmatpush1.msra.mxu0 %v173_v14  ;;  %2645 = vmatprep.subr.mxu1 %v286_v16  ;;  %v261_v13 = vld [vmem:[%s8441_s1 + $0x750] sm:$0xff]  ;;  %v374_v14 = vld [vmem:[%s8441_s1 + $0xad8] sm:$0xff] }
 0x1b4   :  { %2568 = vmatprep.subr.mxu0 %v170_v20  ;;  %2646 = vmatpush1.msra.mxu1 %v285_v23  ;;  %v258_v16 = vld [vmem:[%s8441_s1 + $0x738] sm:$0xff]  ;;  %v373_v20 = vld [vmem:[%s8441_s1 + $0xad0] sm:$0xff] }
 0x1b5   :  { %2569 = vmatpush1.msra.mxu0 %v169_v24  ;;  %2647 = vmatprep.subr.mxu1 %v410_v26  ;;  %v257_v23 = vld [vmem:[%s8441_s1 + $0x730] sm:$0xff]  ;;  %v370_v24 = vld [vmem:[%s8441_s1 + $0xab8] sm:$0xff] }
 0x1b6   :  { %2570 = vmatprep.subr.mxu0 %v166_v28  ;;  %2648 = vmatpush2.msra.mxu1 %v409_v32  ;;  %v254_v26 = vld [vmem:[%s8441_s1 + $0x718] sm:$0xff]  ;;  %v369_v28 = vld [vmem:[%s8441_s1 + $0xab0] sm:$0xff] }
 0x1b7   :  { %2571 = vmatpush1.msra.mxu0 %v165_v34  ;;  %2649 = vmatprep.subr.mxu1 %v406_v35  ;;  %v253_v32 = vld [vmem:[%s8441_s1 + $0x710] sm:$0xff]  ;;  %v366_v34 = vld [vmem:[%s8441_s1 + $0xa98] sm:$0xff] }
 0x1b8   :  { %2572 = vmatprep.subr.mxu0 %v162_v37  ;;  %2650 = vmatpush2.msra.mxu1 %v405_v39  ;;  %v250_v35 = vld [vmem:[%s8441_s1 + $0x6f8] sm:$0xff]  ;;  %v365_v37 = vld [vmem:[%s8441_s1 + $0xa90] sm:$0xff] }
 0x1b9   :  { %2573 = vmatpush1.msra.mxu0 %v161_v40  ;;  %2651 = vmatprep.subr.mxu1 %v402_v41  ;;  %v249_v39 = vld [vmem:[%s8441_s1 + $0x6f0] sm:$0xff]  ;;  %v362_v40 = vld [vmem:[%s8441_s1 + $0xa78] sm:$0xff] }
 0x1ba   :  { %2574 = vmatprep.subr.mxu0 %v158_v43  ;;  %2652 = vmatpush2.msra.mxu1 %v401_v44  ;;  %v246_v41 = vld [vmem:[%s8441_s1 + $0x6d8] sm:$0xff]  ;;  %v361_v43 = vld [vmem:[%s8441_s1 + $0xa70] sm:$0xff] }
 0x1bb   :  { %2575 = vmatpush1.msra.mxu0 %v157_v46  ;;  %2653 = vmatprep.subr.mxu1 %v398_v49  ;;  %v245_v44 = vld [vmem:[%s8441_s1 + $0x6d0] sm:$0xff]  ;;  %v358_v46 = vld [vmem:[%s8441_s1 + $0xa58] sm:$0xff] }
 0x1bc   :  { %2576 = vmatprep.subr.mxu0 %v282_v51  ;;  %2654 = vmatpush2.msra.mxu1 %v397_v52  ;;  %v242_v49 = vld [vmem:[%s8441_s1 + $0x6b8] sm:$0xff]  ;;  %v357_v51 = vld [vmem:[%s8441_s1 + $0xa50] sm:$0xff] }
 0x1bd   :  { %2577 = vmatpush2.msra.mxu0 %v281_v54  ;;  %2655 = vmatprep.subr.mxu1 %v394_v55  ;;  %v241_v52 = vld [vmem:[%s8441_s1 + $0x6b0] sm:$0xff]  ;;  %v354_v54 = vld [vmem:[%s8441_s1 + $0xa38] sm:$0xff] }
 0x1be   :  { %2578 = vmatprep.subr.mxu0 %v278_v56  ;;  %2656 = vmatpush2.msra.mxu1 %v393_v57  ;;  %v238_v55 = vld [vmem:[%s8441_s1 + $0x698] sm:$0xff]  ;;  %v237_v56 = vld [vmem:[%s8441_s1 + $0x690] sm:$0xff] }
 0x1bf   :  { %2579 = vmatpush2.msra.mxu0 %v277_v60  ;;  %2657 = vmatprep.subr.mxu1 %v390_v61  ;;  %v353_v57 = vld [vmem:[%s8441_s1 + $0xa30] sm:$0xff]  ;;  %v234_v60 = vld [vmem:[%s8441_s1 + $0x678] sm:$0xff] }
 0x1c0   :  { %2580 = vmatprep.subr.mxu0 %v274_v62  ;;  %2658 = vmatpush2.msra.mxu1 %v389_v4  ;;  %v350_v61 = vld [vmem:[%s8441_s1 + $0xa18] sm:$0xff]  ;;  %v233_v62 = vld [vmem:[%s8441_s1 + $0x670] sm:$0xff] }
 0x1c1   :  { %2581 = vmatpush2.msra.mxu0 %v273_v63  ;;  %2659 = vmatprep.subr.mxu1 %v386_v0  ;;  %v349_v4 = vld [vmem:[%s8441_s1 + $0xa10] sm:$0xff]  ;;  %v230_v63 = vld [vmem:[%s8441_s1 + $0x658] sm:$0xff] }
 0x1c2   :  { %2582 = vmatprep.subr.mxu0 %v270_v19  ;;  %2660 = vmatpush2.msra.mxu1 %v385_v1  ;;  %v229_v0 = vld [vmem:[%s8441_s1 + $0x650] sm:$0xff]  ;;  %v602_v19 = vld [vmem:[%s8441_s1 + $0x11f8] sm:$0xff] }
 0x1c3   :  { %2583 = vmatpush2.msra.mxu0 %v269_v58  ;;  %2661 = vmatprep.subr.mxu1 %v382_v2  ;;  %v225_v1 = vld [vmem:[%s8441_s1 + $0x630] sm:$0xff]  ;;  %v222_v2 = vld [vmem:[%s8441_s1 + $0x618] sm:$0xff] }
 0x1c4   :  { %2584 = vmatprep.subr.mxu0 %v266_v3  ;;  %2662 = vmatpush2.msra.mxu1 %v381_v6  ;;  %v601_v58 = vld [vmem:[%s8441_s1 + $0x11f0] sm:$0xff]  ;;  %v598_v3 = vld [vmem:[%s8441_s1 + $0x11d8] sm:$0xff] }
 0x1c5   :  { %2585 = vmatpush2.msra.mxu0 %v265_v9  ;;  %2663 = vmatprep.subr.mxu1 %v378_v10  ;;  %v597_v6 = vld [vmem:[%s8441_s1 + $0x11d0] sm:$0xff]  ;;  %v474_v9 = vld [vmem:[%s8441_s1 + $0xdf8] sm:$0xff] }
 0x1c6   :  { %2586 = vmatprep.subr.mxu0 %v262_v11  ;;  %2664 = vmatpush2.msra.mxu1 %v377_v48  ;;  %v594_v10 = vld [vmem:[%s8441_s1 + $0x11b8] sm:$0xff]  ;;  %v593_v48 = vld [vmem:[%s8441_s1 + $0x11b0] sm:$0xff] }
 0x1c7   :  { %2587 = vmatpush2.msra.mxu0 %v261_v13  ;;  %2665 = vmatprep.subr.mxu1 %v374_v14  ;;  %v470_v11 = vld [vmem:[%s8441_s1 + $0xdd8] sm:$0xff]  ;;  %v469_v13 = vld [vmem:[%s8441_s1 + $0xdd0] sm:$0xff] }
 0x1c8   :  { %2588 = vmatprep.subr.mxu0 %v258_v16  ;;  %2666 = vmatpush2.msra.mxu1 %v373_v20  ;;  %v590_v14 = vld [vmem:[%s8441_s1 + $0x1198] sm:$0xff]  ;;  %v589_v20 = vld [vmem:[%s8441_s1 + $0x1190] sm:$0xff] }
 0x1c9   :  { %2589 = vmatpush2.msra.mxu0 %v257_v23  ;;  %2667 = vmatprep.subr.mxu1 %v370_v24  ;;  %v466_v16 = vld [vmem:[%s8441_s1 + $0xdb8] sm:$0xff] }
 0x1ca   :  { %2590 = vmatprep.subr.mxu0 %v254_v26  ;;  %2668 = vmatpush2.msra.mxu1 %v369_v28  ;;  %v586_v23 = vld [vmem:[%s8441_s1 + $0x1178] sm:$0xff]  ;;  %v585_v26 = vld [vmem:[%s8441_s1 + $0x1170] sm:$0xff] }
 0x1cb   :  { %2591 = vmatpush2.msra.mxu0 %v253_v32  ;;  %2669 = vmatprep.subr.mxu1 %v366_v34  ;;  %v462_v24 = vld [vmem:[%s8441_s1 + $0xd98] sm:$0xff]  ;;  %v461_v28 = vld [vmem:[%s8441_s1 + $0xd90] sm:$0xff] }
 0x1cc   :  { %2592 = vmatprep.subr.mxu0 %v250_v35  ;;  %2670 = vmatpush2.msra.mxu1 %v365_v37  ;;  %v582_v32 = vld [vmem:[%s8441_s1 + $0x1158] sm:$0xff]  ;;  %v581_v35 = vld [vmem:[%s8441_s1 + $0x1150] sm:$0xff] }
 0x1cd   :  { %2593 = vmatpush2.msra.mxu0 %v249_v39  ;;  %2671 = vmatprep.subr.mxu1 %v362_v40  ;;  %v458_v34 = vld [vmem:[%s8441_s1 + $0xd78] sm:$0xff]  ;;  %v457_v37 = vld [vmem:[%s8441_s1 + $0xd70] sm:$0xff] }
 0x1ce   :  { %2594 = vmatprep.subr.mxu0 %v246_v41  ;;  %2672 = vmatpush2.msra.mxu1 %v361_v43  ;;  %v578_v39 = vld [vmem:[%s8441_s1 + $0x1138] sm:$0xff]  ;;  %v577_v41 = vld [vmem:[%s8441_s1 + $0x1130] sm:$0xff] }
 0x1cf   :  { %2595 = vmatpush2.msra.mxu0 %v245_v44  ;;  %2673 = vmatprep.subr.mxu1 %v358_v46  ;;  %v454_v40 = vld [vmem:[%s8441_s1 + $0xd58] sm:$0xff]  ;;  %v453_v43 = vld [vmem:[%s8441_s1 + $0xd50] sm:$0xff] }
 0x1d0   :  { %2596 = vmatprep.subr.mxu0 %v242_v49  ;;  %2674 = vmatpush2.msra.mxu1 %v357_v51  ;;  %v574_v44 = vld [vmem:[%s8441_s1 + $0x1118] sm:$0xff]  ;;  %v573_v49 = vld [vmem:[%s8441_s1 + $0x1110] sm:$0xff] }
 0x1d1   :  { %2597 = vmatpush2.msra.mxu0 %v241_v52  ;;  %2675 = vmatprep.subr.mxu1 %v354_v54  ;;  %v450_v46 = vld [vmem:[%s8441_s1 + $0xd38] sm:$0xff]  ;;  %v449_v51 = vld [vmem:[%s8441_s1 + $0xd30] sm:$0xff] }
 0x1d2   :  { %2598 = vmatprep.subr.mxu0 %v238_v55  ;;  %2608 = vmatprep.mubr.f32.mxu0 %v4092_v12  ;;  %v226_v12 = vld [vmem:[%s8441_s1 + $0x638] sm:$0xff]  ;;  %v569_v55 = vld [vmem:[%s8441_s1 + $0x10f0] sm:$0xff] }
 0x1d3   :  { %2599 = vmatpush2.msra.mxu0 %v237_v56  ;;  %2676 = vmatpush2.msra.mxu1 %v353_v57  ;;  %v570_v52 = vld [vmem:[%s8441_s1 + $0x10f8] sm:$0xff]  ;;  %v445_v56 = vld [vmem:[%s8441_s1 + $0xd10] sm:$0xff] }
 0x1d4   :  { %2600 = vmatprep.subr.mxu0 %v234_v60  ;;  %2677 = vmatprep.subr.mxu1 %v350_v61  ;;  %v446_v54 = vld [vmem:[%s8441_s1 + $0xd18] sm:$0xff]  ;;  %v565_v61 = vld [vmem:[%s8441_s1 + $0x10d0] sm:$0xff] }
 0x1d5   :  { %2601 = vmatpush2.msra.mxu0 %v233_v62  ;;  %2678 = vmatpush2.msra.mxu1 %v349_v4  ;;  %v566_v57 = vld [vmem:[%s8441_s1 + $0x10d8] sm:$0xff]  ;;  %v441_v62 = vld [vmem:[%s8441_s1 + $0xcf0] sm:$0xff] }
 0x1d6   :  { %2602 = vmatprep.subr.mxu0 %v230_v63  ;;  %2679 = vmatprep.mubr.f32.mxu1 %v4480_v25  ;;  %v221_v25 = vld [vmem:[%s8441_s1 + $0x610] sm:$0xff]  ;;  %v442_v60 = vld [vmem:[%s8441_s1 + $0xcf8] sm:$0xff] }
 0x1d7   :  { %2603 = vmatpush2.msra.mxu0 %v229_v0  ;;  %2680 = vmatmul.mubr.f32.vlgmr.msra.gmra.mxu1 %v4449_v15  ;;  %v473_v15 = vld [vmem:[%s8441_s1 + $0xdf0] sm:$0xff]  ;;  %v562_v4 = vld [vmem:[%s8441_s1 + $0x10b8] sm:$0xff] }
 0x1d8   :  { %2604 = vmatprep.subr.mxu0 %v226_v12  ;;  %2757 = vmatprep.subr.mxu1 %v602_v19  ;;  %v438_v63 = vld [vmem:[%s8441_s1 + $0xcd8] sm:$0xff]  ;;  %v561_v0 = vld [vmem:[%s8441_s1 + $0x10b0] sm:$0xff] }
 0x1d9   :  { %2605 = vmatpush2.msra.mxu0 %v225_v1  ;;  %2758 = vmatpush1.msra.mxu1 %v601_v58  ;;  %v437_v12 = vld [vmem:[%s8441_s1 + $0xcd0] sm:$0xff]  ;;  %v558_v19 = vld [vmem:[%s8441_s1 + $0x1098] sm:$0xff] }
 0x1da   :  { %2606 = vmatprep.subr.mxu0 %v222_v2  ;;  %2759 = vmatprep.subr.mxu1 %v598_v3  ;;  %v434_v1 = vld [vmem:[%s8441_s1 + $0xcb8] sm:$0xff]  ;;  %v557_v58 = vld [vmem:[%s8441_s1 + $0x1090] sm:$0xff] }
 0x1db   :  { %2607 = vmatpush2.msra.mxu0 %v221_v25  ;;  %2760 = vmatpush1.msra.mxu1 %v597_v6  ;;  %v433_v2 = vld [vmem:[%s8441_s1 + $0xcb0] sm:$0xff]  ;;  %v554_v3 = vld [vmem:[%s8441_s1 + $0x1078] sm:$0xff] }
 0x1dc   :  { %2609 = vmatmul.mubr.f32.vlgmr.msra.gmra.mxu0 %v4069_v5  ;;  %2686 = vmatprep.subr.mxu0 %v474_v9  ;;  %v465_v5 = vld [vmem:[%s8441_s1 + $0xdb0] sm:$0xff]  ;;  %v430_v25 = vld [vmem:[%s8441_s1 + $0xc98] sm:$0xff] }
 0x1dd   :  { %2687 = vmatpush1.msra.mxu0 %v473_v15  ;;  %2761 = vmatprep.subr.mxu1 %v594_v10  ;;  %v553_v6 = vld [vmem:[%s8441_s1 + $0x1070] sm:$0xff]  ;;  %v550_v15 = vld [vmem:[%s8441_s1 + $0x1058] sm:$0xff] }
 0x1de   :  { %2688 = vmatprep.subr.mxu0 %v470_v11  ;;  %2762 = vmatpush1.msra.mxu1 %v593_v48  ;;  %v429_v9 = vld [vmem:[%s8441_s1 + $0xc90] sm:$0xff]  ;;  %v426_v10 = vld [vmem:[%s8441_s1 + $0xc78] sm:$0xff] }
 0x1df   :  { %2689 = vmatpush1.msra.mxu0 %v469_v13  ;;  %2763 = vmatprep.subr.mxu1 %v590_v14  ;;  %v549_v11 = vld [vmem:[%s8441_s1 + $0x1050] sm:$0xff]  ;;  %v546_v13 = vld [vmem:[%s8441_s1 + $0x1038] sm:$0xff] }
 0x1e0   :  { %2690 = vmatprep.subr.mxu0 %v466_v16  ;;  %2764 = vmatpush1.msra.mxu1 %v589_v20  ;;  %v425_v48 = vld [vmem:[%s8441_s1 + $0xc70] sm:$0xff]  ;;  %v422_v14 = vld [vmem:[%s8441_s1 + $0xc58] sm:$0xff] }
 0x1e1   :  { %2691 = vmatpush1.msra.mxu0 %v465_v5  ;;  %2765 = vmatprep.subr.mxu1 %v586_v23  ;;  %v545_v16 = vld [vmem:[%s8441_s1 + $0x1030] sm:$0xff]  ;;  %v542_v5 = vld [vmem:[%s8441_s1 + $0x1018] sm:$0xff] }
 0x1e2   :  { %2692 = vmatprep.subr.mxu0 %v462_v24  ;;  %2766 = vmatpush1.msra.mxu1 %v585_v26  ;;  %v421_v20 = vld [vmem:[%s8441_s1 + $0xc50] sm:$0xff]  ;;  %v418_v23 = vld [vmem:[%s8441_s1 + $0xc38] sm:$0xff] }
 0x1e3   :  { %2693 = vmatpush1.msra.mxu0 %v461_v28  ;;  %2767 = vmatprep.subr.mxu1 %v582_v32  ;;  %v541_v24 = vld [vmem:[%s8441_s1 + $0x1010] sm:$0xff]  ;;  %v666_v28 = vld [vmem:[%s8441_s1 + $0x13f8] sm:$0xff] }
 0x1e4   :  { %2694 = vmatprep.subr.mxu0 %v458_v34  ;;  %2768 = vmatpush1.msra.mxu1 %v581_v35  ;;  %v417_v26 = vld [vmem:[%s8441_s1 + $0xc30] sm:$0xff]  ;;  %v414_v32 = vld [vmem:[%s8441_s1 + $0xc18] sm:$0xff] }
 0x1e5   :  { %2695 = vmatpush1.msra.mxu0 %v457_v37  ;;  %2769 = vmatprep.subr.mxu1 %v578_v39  ;;  %v665_v34 = vld [vmem:[%s8441_s1 + $0x13f0] sm:$0xff]  ;;  %v662_v37 = vld [vmem:[%s8441_s1 + $0x13d8] sm:$0xff] }
 0x1e6   :  { %2696 = vmatprep.subr.mxu0 %v454_v40  ;;  %2770 = vmatpush1.msra.mxu1 %v577_v41  ;;  %v413_v35 = vld [vmem:[%s8441_s1 + $0xc10] sm:$0xff]  ;;  %v538_v39 = vld [vmem:[%s8441_s1 + $0xff8] sm:$0xff] }
 0x1e7   :  { %2697 = vmatpush1.msra.mxu0 %v453_v43  ;;  %2771 = vmatprep.subr.mxu1 %v574_v44  ;;  %v661_v40 = vld [vmem:[%s8441_s1 + $0x13d0] sm:$0xff]  ;;  %v658_v43 = vld [vmem:[%s8441_s1 + $0x13b8] sm:$0xff] }
 0x1e8   :  { %2698 = vmatprep.subr.mxu0 %v450_v46  ;;  %2772 = vmatpush1.msra.mxu1 %v573_v49  ;;  %v537_v41 = vld [vmem:[%s8441_s1 + $0xff0] sm:$0xff]  ;;  %v534_v44 = vld [vmem:[%s8441_s1 + $0xfd8] sm:$0xff] }
 0x1e9   :  { %2699 = vmatpush1.msra.mxu0 %v449_v51  ;;  %2773 = vmatprep.subr.mxu1 %v570_v52  ;;  %v657_v46 = vld [vmem:[%s8441_s1 + $0x13b0] sm:$0xff]  ;;  %v654_v51 = vld [vmem:[%s8441_s1 + $0x1398] sm:$0xff] }
 0x1ea   :  { %2700 = vmatprep.subr.mxu0 %v446_v54  ;;  %2774 = vmatpush1.msra.mxu1 %v569_v55  ;;  %v533_v49 = vld [vmem:[%s8441_s1 + $0xfd0] sm:$0xff]  ;;  %v530_v52 = vld [vmem:[%s8441_s1 + $0xfb8] sm:$0xff] }
 0x1eb   :  { %2701 = vmatpush1.msra.mxu0 %v445_v56  ;;  %2775 = vmatprep.subr.mxu1 %v566_v57  ;;  %v653_v54 = vld [vmem:[%s8441_s1 + $0x1390] sm:$0xff]  ;;  %v650_v56 = vld [vmem:[%s8441_s1 + $0x1378] sm:$0xff] }
 0x1ec   :  { %2702 = vmatprep.subr.mxu0 %v442_v60  ;;  %2776 = vmatpush1.msra.mxu1 %v565_v61  ;;  %v529_v55 = vld [vmem:[%s8441_s1 + $0xfb0] sm:$0xff]  ;;  %v526_v57 = vld [vmem:[%s8441_s1 + $0xf98] sm:$0xff] }
 0x1ed   :  { %2703 = vmatpush1.msra.mxu0 %v441_v62  ;;  %2777 = vmatprep.subr.mxu1 %v562_v4  ;;  %v649_v60 = vld [vmem:[%s8441_s1 + $0x1370] sm:$0xff]  ;;  %v646_v62 = vld [vmem:[%s8441_s1 + $0x1358] sm:$0xff] }
 0x1ee   :  { %2704 = vmatprep.subr.mxu0 %v438_v63  ;;  %2778 = vmatpush1.msra.mxu1 %v561_v0  ;;  %v525_v61 = vld [vmem:[%s8441_s1 + $0xf90] sm:$0xff]  ;;  %v522_v4 = vld [vmem:[%s8441_s1 + $0xf78] sm:$0xff] }
 0x1ef   :  { %2705 = vmatpush1.msra.mxu0 %v437_v12  ;;  %2779 = vmatprep.subr.mxu1 %v558_v19  ;;  %v645_v63 = vld [vmem:[%s8441_s1 + $0x1350] sm:$0xff]  ;;  %v642_v12 = vld [vmem:[%s8441_s1 + $0x1338] sm:$0xff] }
 0x1f0   :  { %2706 = vmatprep.subr.mxu0 %v434_v1  ;;  %2780 = vmatpush1.msra.mxu1 %v557_v58  ;;  %v521_v0 = vld [vmem:[%s8441_s1 + $0xf70] sm:$0xff]  ;;  %v518_v19 = vld [vmem:[%s8441_s1 + $0xf58] sm:$0xff] }
 0x1f1   :  { %2707 = vmatpush1.msra.mxu0 %v433_v2  ;;  %2781 = vmatprep.subr.mxu1 %v554_v3  ;;  %v641_v1 = vld [vmem:[%s8441_s1 + $0x1330] sm:$0xff]  ;;  %v638_v2 = vld [vmem:[%s8441_s1 + $0x1318] sm:$0xff] }
 0x1f2   :  { %2708 = vmatprep.subr.mxu0 %v430_v25  ;;  %2782 = vmatpush1.msra.mxu1 %v553_v6  ;;  %v517_v58 = vld [vmem:[%s8441_s1 + $0xf50] sm:$0xff]  ;;  %v514_v3 = vld [vmem:[%s8441_s1 + $0xf38] sm:$0xff] }
 0x1f3   :  { %2709 = vmatpush1.msra.mxu0 %v429_v9  ;;  %2783 = vmatprep.subr.mxu1 %v550_v15  ;;  %v637_v25 = vld [vmem:[%s8441_s1 + $0x1310] sm:$0xff]  ;;  %v634_v9 = vld [vmem:[%s8441_s1 + $0x12f8] sm:$0xff] }
 0x1f4   :  { %2710 = vmatprep.subr.mxu0 %v426_v10  ;;  %2784 = vmatpush1.msra.mxu1 %v549_v11  ;;  %v513_v6 = vld [vmem:[%s8441_s1 + $0xf30] sm:$0xff]  ;;  %v510_v15 = vld [vmem:[%s8441_s1 + $0xf18] sm:$0xff] }
 0x1f5   :  { %2711 = vmatpush1.msra.mxu0 %v425_v48  ;;  %2785 = vmatprep.subr.mxu1 %v546_v13  ;;  %v633_v10 = vld [vmem:[%s8441_s1 + $0x12f0] sm:$0xff]  ;;  %v630_v48 = vld [vmem:[%s8441_s1 + $0x12d8] sm:$0xff] }
 0x1f6   :  { %2712 = vmatprep.subr.mxu0 %v422_v14  ;;  %2786 = vmatpush1.msra.mxu1 %v545_v16  ;;  %v509_v11 = vld [vmem:[%s8441_s1 + $0xf10] sm:$0xff]  ;;  %v506_v13 = vld [vmem:[%s8441_s1 + $0xef8] sm:$0xff] }
 0x1f7   :  { %2713 = vmatpush1.msra.mxu0 %v421_v20  ;;  %2787 = vmatprep.subr.mxu1 %v542_v5  ;;  %v629_v14 = vld [vmem:[%s8441_s1 + $0x12d0] sm:$0xff]  ;;  %v626_v20 = vld [vmem:[%s8441_s1 + $0x12b8] sm:$0xff] }
 0x1f8   :  { %2714 = vmatprep.subr.mxu0 %v418_v23  ;;  %2788 = vmatpush1.msra.mxu1 %v541_v24  ;;  %v505_v16 = vld [vmem:[%s8441_s1 + $0xef0] sm:$0xff]  ;;  %v502_v5 = vld [vmem:[%s8441_s1 + $0xed8] sm:$0xff] }
 0x1f9   :  { %2715 = vmatpush1.msra.mxu0 %v417_v26  ;;  %2789 = vmatprep.subr.mxu1 %v666_v28  ;;  %v625_v23 = vld [vmem:[%s8441_s1 + $0x12b0] sm:$0xff]  ;;  %v622_v26 = vld [vmem:[%s8441_s1 + $0x1298] sm:$0xff] }
 0x1fa   :  { %2716 = vmatprep.subr.mxu0 %v414_v32  ;;  %2790 = vmatpush2.msra.mxu1 %v665_v34  ;;  %v501_v24 = vld [vmem:[%s8441_s1 + $0xed0] sm:$0xff]  ;;  %v498_v28 = vld [vmem:[%s8441_s1 + $0xeb8] sm:$0xff] }
 0x1fb   :  { %2717 = vmatpush1.msra.mxu0 %v413_v35  ;;  %2791 = vmatprep.subr.mxu1 %v662_v37  ;;  %v621_v32 = vld [vmem:[%s8441_s1 + $0x1290] sm:$0xff]  ;;  %v618_v35 = vld [vmem:[%s8441_s1 + $0x1278] sm:$0xff] }
 0x1fc   :  { %2718 = vmatprep.subr.mxu0 %v538_v39  ;;  %2792 = vmatpush2.msra.mxu1 %v661_v40  ;;  %v497_v34 = vld [vmem:[%s8441_s1 + $0xeb0] sm:$0xff]  ;;  %v494_v37 = vld [vmem:[%s8441_s1 + $0xe98] sm:$0xff] }
 0x1fd   :  { %2719 = vmatpush2.msra.mxu0 %v537_v41  ;;  %2793 = vmatprep.subr.mxu1 %v658_v43  ;;  %v617_v39 = vld [vmem:[%s8441_s1 + $0x1270] sm:$0xff]  ;;  %v614_v41 = vld [vmem:[%s8441_s1 + $0x1258] sm:$0xff] }
 0x1fe   :  { %2720 = vmatprep.subr.mxu0 %v534_v44  ;;  %2794 = vmatpush2.msra.mxu1 %v657_v46  ;;  %v493_v40 = vld [vmem:[%s8441_s1 + $0xe90] sm:$0xff]  ;;  %v490_v43 = vld [vmem:[%s8441_s1 + $0xe78] sm:$0xff] }
 0x1ff   :  { %2721 = vmatpush2.msra.mxu0 %v533_v49  ;;  %2795 = vmatprep.subr.mxu1 %v654_v51  ;;  %v613_v44 = vld [vmem:[%s8441_s1 + $0x1250] sm:$0xff]  ;;  %v610_v49 = vld [vmem:[%s8441_s1 + $0x1238] sm:$0xff] }
 0x200   :  { %2722 = vmatprep.subr.mxu0 %v530_v52  ;;  %2796 = vmatpush2.msra.mxu1 %v653_v54  ;;  %v489_v46 = vld [vmem:[%s8441_s1 + $0xe70] sm:$0xff]  ;;  %v486_v51 = vld [vmem:[%s8441_s1 + $0xe58] sm:$0xff] }
 0x201   :  { %2723 = vmatpush2.msra.mxu0 %v529_v55  ;;  %2797 = vmatprep.subr.mxu1 %v650_v56  ;;  %v485_v52 = vld [vmem:[%s8441_s1 + $0xe50] sm:$0xff]  ;;  %v482_v55 = vld [vmem:[%s8441_s1 + $0xe38] sm:$0xff] }
 0x202   :  { %2724 = vmatprep.subr.mxu0 %v526_v57  ;;  %2798 = vmatpush2.msra.mxu1 %v649_v60  ;;  %v609_v54 = vld [vmem:[%s8441_s1 + $0x1230] sm:$0xff]  ;;  %v606_v56 = vld [vmem:[%s8441_s1 + $0x1218] sm:$0xff] }
 0x203   :  { %2725 = vmatpush2.msra.mxu0 %v525_v61  ;;  %2799 = vmatprep.subr.mxu1 %v646_v62  ;;  %v481_v57 = vld [vmem:[%s8441_s1 + $0xe30] sm:$0xff]  ;;  %v478_v61 = vld [vmem:[%s8441_s1 + $0xe18] sm:$0xff] }
 0x204   :  { %2726 = vmatprep.subr.mxu0 %v522_v4  ;;  %2800 = vmatpush2.msra.mxu1 %v645_v63  ;;  %v605_v60 = vld [vmem:[%s8441_s1 + $0x1210] sm:$0xff]  ;;  %v858_v63 = vld [vmem:[%s8441_s1 + $0x19f8] sm:$0xff] }
 0x205   :  { %2727 = vmatpush2.msra.mxu0 %v521_v0  ;;  %2801 = vmatprep.subr.mxu1 %v642_v12  ;;  %v477_v62 = vld [vmem:[%s8441_s1 + $0xe10] sm:$0xff]  ;;  %v726_v0 = vld [vmem:[%s8441_s1 + $0x15d8] sm:$0xff] }
 0x206   :  { %2728 = vmatprep.subr.mxu0 %v518_v19  ;;  %2802 = vmatpush2.msra.mxu1 %v641_v1  ;;  %v729_v4 = vld [vmem:[%s8441_s1 + $0x15f0] sm:$0xff]  ;;  %v854_v19 = vld [vmem:[%s8441_s1 + $0x19d8] sm:$0xff] }
 0x207   :  { %2729 = vmatpush2.msra.mxu0 %v517_v58  ;;  %2803 = vmatprep.subr.mxu1 %v638_v2  ;;  %v857_v12 = vld [vmem:[%s8441_s1 + $0x19f0] sm:$0xff]  ;;  %v850_v58 = vld [vmem:[%s8441_s1 + $0x19b8] sm:$0xff] }
 0x208   :  { %2730 = vmatprep.subr.mxu0 %v514_v3  ;;  %2804 = vmatpush2.msra.mxu1 %v637_v25  ;;  %v853_v1 = vld [vmem:[%s8441_s1 + $0x19d0] sm:$0xff]  ;;  %v718_v2 = vld [vmem:[%s8441_s1 + $0x1598] sm:$0xff] }
 0x209   :  { %2731 = vmatpush2.msra.mxu0 %v513_v6  ;;  %2805 = vmatprep.subr.mxu1 %v634_v9  ;;  %v849_v3 = vld [vmem:[%s8441_s1 + $0x19b0] sm:$0xff]  ;;  %v846_v6 = vld [vmem:[%s8441_s1 + $0x1998] sm:$0xff] }
 0x20a   :  { %2732 = vmatprep.subr.mxu0 %v510_v15  ;;  %2806 = vmatpush2.msra.mxu1 %v633_v10  ;;  %v717_v25 = vld [vmem:[%s8441_s1 + $0x1590] sm:$0xff]  ;;  %v714_v9 = vld [vmem:[%s8441_s1 + $0x1578] sm:$0xff] }
 0x20b   :  { %2733 = vmatpush2.msra.mxu0 %v509_v11  ;;  %2807 = vmatprep.subr.mxu1 %v630_v48  ;;  %v845_v15 = vld [vmem:[%s8441_s1 + $0x1990] sm:$0xff]  ;;  %v842_v11 = vld [vmem:[%s8441_s1 + $0x1978] sm:$0xff] }
 0x20c   :  { %2734 = vmatprep.subr.mxu0 %v506_v13  ;;  %2808 = vmatpush2.msra.mxu1 %v629_v14  ;;  %v713_v10 = vld [vmem:[%s8441_s1 + $0x1570] sm:$0xff]  ;;  %v710_v48 = vld [vmem:[%s8441_s1 + $0x1558] sm:$0xff] }
 0x20d   :  { %2735 = vmatpush2.msra.mxu0 %v505_v16  ;;  %2809 = vmatprep.subr.mxu1 %v626_v20  ;;  %v841_v13 = vld [vmem:[%s8441_s1 + $0x1970] sm:$0xff]  ;;  %v838_v16 = vld [vmem:[%s8441_s1 + $0x1958] sm:$0xff] }
 0x20e   :  { %2736 = vmatprep.subr.mxu0 %v502_v5  ;;  %2810 = vmatpush2.msra.mxu1 %v625_v23  ;;  %v709_v14 = vld [vmem:[%s8441_s1 + $0x1550] sm:$0xff]  ;;  %v706_v20 = vld [vmem:[%s8441_s1 + $0x1538] sm:$0xff] }
 0x20f   :  { %2737 = vmatpush2.msra.mxu0 %v501_v24  ;;  %2811 = vmatprep.subr.mxu1 %v622_v26  ;;  %v837_v5 = vld [vmem:[%s8441_s1 + $0x1950] sm:$0xff]  ;;  %v834_v24 = vld [vmem:[%s8441_s1 + $0x1938] sm:$0xff] }
 0x210   :  { %2738 = vmatprep.subr.mxu0 %v498_v28  ;;  %2812 = vmatpush2.msra.mxu1 %v621_v32  ;;  %v705_v23 = vld [vmem:[%s8441_s1 + $0x1530] sm:$0xff]  ;;  %v702_v26 = vld [vmem:[%s8441_s1 + $0x1518] sm:$0xff] }
 0x211   :  { %2739 = vmatpush2.msra.mxu0 %v497_v34  ;;  %2813 = vmatprep.subr.mxu1 %v618_v35  ;;  %v833_v28 = vld [vmem:[%s8441_s1 + $0x1930] sm:$0xff]  ;;  %v830_v34 = vld [vmem:[%s8441_s1 + $0x1918] sm:$0xff] }
 0x212   :  { %2740 = vmatprep.subr.mxu0 %v494_v37  ;;  %2814 = vmatpush2.msra.mxu1 %v617_v39  ;;  %v701_v32 = vld [vmem:[%s8441_s1 + $0x1510] sm:$0xff]  ;;  %v698_v35 = vld [vmem:[%s8441_s1 + $0x14f8] sm:$0xff] }
 0x213   :  { %2741 = vmatpush2.msra.mxu0 %v493_v40  ;;  %2815 = vmatprep.subr.mxu1 %v614_v41  ;;  %v829_v37 = vld [vmem:[%s8441_s1 + $0x1910] sm:$0xff]  ;;  %v826_v40 = vld [vmem:[%s8441_s1 + $0x18f8] sm:$0xff] }
 0x214   :  { %2742 = vmatprep.subr.mxu0 %v490_v43  ;;  %2816 = vmatpush2.msra.mxu1 %v613_v44  ;;  %v697_v39 = vld [vmem:[%s8441_s1 + $0x14f0] sm:$0xff]  ;;  %v694_v41 = vld [vmem:[%s8441_s1 + $0x14d8] sm:$0xff] }
 0x215   :  { %2743 = vmatpush2.msra.mxu0 %v489_v46  ;;  %2817 = vmatprep.subr.mxu1 %v610_v49  ;;  %v825_v43 = vld [vmem:[%s8441_s1 + $0x18f0] sm:$0xff]  ;;  %v822_v46 = vld [vmem:[%s8441_s1 + $0x18d8] sm:$0xff] }
 0x216   :  { %2744 = vmatprep.subr.mxu0 %v486_v51  ;;  %2750 = vmatprep.mubr.f32.mxu0 %v4496_v30  ;;  %v730_v30 = vld [vmem:[%s8441_s1 + $0x15f8] sm:$0xff]  ;;  %v693_v44 = vld [vmem:[%s8441_s1 + $0x14d0] sm:$0xff] }
 0x217   :  { %2745 = vmatpush2.msra.mxu0 %v485_v52  ;;  %2818 = vmatpush2.msra.mxu1 %v609_v54  ;;  %v690_v49 = vld [vmem:[%s8441_s1 + $0x14b8] sm:$0xff]  ;;  %v821_v51 = vld [vmem:[%s8441_s1 + $0x18d0] sm:$0xff] }
 0x218   :  { %2746 = vmatprep.subr.mxu0 %v482_v55  ;;  %2819 = vmatprep.subr.mxu1 %v606_v56  ;;  %v689_v52 = vld [vmem:[%s8441_s1 + $0x14b0] sm:$0xff]  ;;  %v818_v54 = vld [vmem:[%s8441_s1 + $0x18b8] sm:$0xff] }
 0x219   :  { %2747 = vmatpush2.msra.mxu0 %v481_v57  ;;  %2820 = vmatpush2.msra.mxu1 %v605_v60  ;;  %v686_v55 = vld [vmem:[%s8441_s1 + $0x1498] sm:$0xff]  ;;  %v817_v56 = vld [vmem:[%s8441_s1 + $0x18b0] sm:$0xff] }
 0x21a   :  { %2748 = vmatprep.subr.mxu0 %v478_v61  ;;  %2821 = vmatprep.mubr.f32.mxu1 %v4885_v53  ;;  %v725_v53 = vld [vmem:[%s8441_s1 + $0x15d0] sm:$0xff]  ;;  %v814_v60 = vld [vmem:[%s8441_s1 + $0x1898] sm:$0xff] }
 0x21b   :  { %2749 = vmatpush2.msra.mxu0 %v477_v62  ;;  %2822 = vmatmul.mubr.f32.vlgmr.msra.gmra.mxu1 %v4854_v42  ;;  %v722_v42 = vld [vmem:[%s8441_s1 + $0x15b8] sm:$0xff]  ;;  %v685_v57 = vld [vmem:[%s8441_s1 + $0x1490] sm:$0xff] }
 0x21c   :  { %2751 = vmatmul.mubr.f32.vlgmr.msra.gmra.mxu0 %v4470_v22  ;;  %2828 = vmatprep.subr.mxu0 %v730_v30  ;;  %v721_v22 = vld [vmem:[%s8441_s1 + $0x15b0] sm:$0xff]  ;;  %v682_v61 = vld [vmem:[%s8441_s1 + $0x1478] sm:$0xff] }
 0x21d   :  { %2829 = vmatpush1.msra.mxu0 %v729_v4  ;;  %2899 = vmatprep.subr.mxu1 %v858_v63  ;;  %v813_v62 = vld [vmem:[%s8441_s1 + $0x1890] sm:$0xff]  ;;  %v810_v4 = vld [vmem:[%s8441_s1 + $0x1878] sm:$0xff] }
 0x21e   :  { %2830 = vmatprep.subr.mxu0 %v726_v0  ;;  %2900 = vmatpush1.msra.mxu1 %v857_v12  ;;  %v681_v30 = vld [vmem:[%s8441_s1 + $0x1470] sm:$0xff]  ;;  %v678_v63 = vld [vmem:[%s8441_s1 + $0x1458] sm:$0xff] }
 0x21f   :  { %2831 = vmatpush1.msra.mxu0 %v725_v53  ;;  %2901 = vmatprep.subr.mxu1 %v854_v19  ;;  %v809_v0 = vld [vmem:[%s8441_s1 + $0x1870] sm:$0xff]  ;;  %v806_v53 = vld [vmem:[%s8441_s1 + $0x1858] sm:$0xff] }
 0x220   :  { %2832 = vmatprep.subr.mxu0 %v722_v42  ;;  %2902 = vmatpush1.msra.mxu1 %v853_v1  ;;  %v677_v12 = vld [vmem:[%s8441_s1 + $0x1450] sm:$0xff]  ;;  %v674_v19 = vld [vmem:[%s8441_s1 + $0x1438] sm:$0xff] }
 0x221   :  { %2833 = vmatpush1.msra.mxu0 %v721_v22  ;;  %2903 = vmatprep.subr.mxu1 %v850_v58  ;;  %v805_v42 = vld [vmem:[%s8441_s1 + $0x1850] sm:$0xff]  ;;  %v802_v22 = vld [vmem:[%s8441_s1 + $0x1838] sm:$0xff] }
 0x222   :  { %2834 = vmatprep.subr.mxu0 %v718_v2  ;;  %2904 = vmatpush1.msra.mxu1 %v849_v3  ;;  %v673_v1 = vld [vmem:[%s8441_s1 + $0x1430] sm:$0xff]  ;;  %v670_v58 = vld [vmem:[%s8441_s1 + $0x1418] sm:$0xff] }
 0x223   :  { %2835 = vmatpush1.msra.mxu0 %v717_v25  ;;  %2905 = vmatprep.subr.mxu1 %v846_v6  ;;  %v801_v2 = vld [vmem:[%s8441_s1 + $0x1830] sm:$0xff]  ;;  %v798_v25 = vld [vmem:[%s8441_s1 + $0x1818] sm:$0xff] }
 0x224   :  { %2836 = vmatprep.subr.mxu0 %v714_v9  ;;  %2906 = vmatpush1.msra.mxu1 %v845_v15  ;;  %v669_v3 = vld [vmem:[%s8441_s1 + $0x1410] sm:$0xff]  ;;  %v794_v6 = vld [vmem:[%s8441_s1 + $0x17f8] sm:$0xff] }
 0x225   :  { %2837 = vmatpush1.msra.mxu0 %v713_v10  ;;  %2907 = vmatprep.subr.mxu1 %v842_v11  ;;  %v797_v9 = vld [vmem:[%s8441_s1 + $0x1810] sm:$0xff]  ;;  %v922_v10 = vld [vmem:[%s8441_s1 + $0x1bf8] sm:$0xff] }
 0x226   :  { %2838 = vmatprep.subr.mxu0 %v710_v48  ;;  %2908 = vmatpush1.msra.mxu1 %v841_v13  ;;  %v793_v15 = vld [vmem:[%s8441_s1 + $0x17f0] sm:$0xff]  ;;  %v790_v11 = vld [vmem:[%s8441_s1 + $0x17d8] sm:$0xff] }
 0x227   :  { %2839 = vmatpush1.msra.mxu0 %v709_v14  ;;  %2909 = vmatprep.subr.mxu1 %v838_v16  ;;  %v921_v48 = vld [vmem:[%s8441_s1 + $0x1bf0] sm:$0xff]  ;;  %v918_v14 = vld [vmem:[%s8441_s1 + $0x1bd8] sm:$0xff] }
 0x228   :  { %2840 = vmatprep.subr.mxu0 %v706_v20  ;;  %2910 = vmatpush1.msra.mxu1 %v837_v5  ;;  %v789_v13 = vld [vmem:[%s8441_s1 + $0x17d0] sm:$0xff]  ;;  %v786_v16 = vld [vmem:[%s8441_s1 + $0x17b8] sm:$0xff] }
 0x229   :  { %2841 = vmatpush1.msra.mxu0 %v705_v23  ;;  %2911 = vmatprep.subr.mxu1 %v834_v24  ;;  %v917_v20 = vld [vmem:[%s8441_s1 + $0x1bd0] sm:$0xff]  ;;  %v914_v23 = vld [vmem:[%s8441_s1 + $0x1bb8] sm:$0xff] }
 0x22a   :  { %2842 = vmatprep.subr.mxu0 %v702_v26  ;;  %2912 = vmatpush1.msra.mxu1 %v833_v28  ;;  %v785_v5 = vld [vmem:[%s8441_s1 + $0x17b0] sm:$0xff]  ;;  %v782_v24 = vld [vmem:[%s8441_s1 + $0x1798] sm:$0xff] }
 0x22b   :  { %2843 = vmatpush1.msra.mxu0 %v701_v32  ;;  %2913 = vmatprep.subr.mxu1 %v830_v34  ;;  %v913_v26 = vld [vmem:[%s8441_s1 + $0x1bb0] sm:$0xff]  ;;  %v910_v32 = vld [vmem:[%s8441_s1 + $0x1b98] sm:$0xff] }
 0x22c   :  { %2844 = vmatprep.subr.mxu0 %v698_v35  ;;  %2914 = vmatpush1.msra.mxu1 %v829_v37  ;;  %v781_v28 = vld [vmem:[%s8441_s1 + $0x1790] sm:$0xff]  ;;  %v778_v34 = vld [vmem:[%s8441_s1 + $0x1778] sm:$0xff] }
 0x22d   :  { %2845 = vmatpush1.msra.mxu0 %v697_v39  ;;  %2915 = vmatprep.subr.mxu1 %v826_v40  ;;  %v909_v35 = vld [vmem:[%s8441_s1 + $0x1b90] sm:$0xff]  ;;  %v906_v39 = vld [vmem:[%s8441_s1 + $0x1b78] sm:$0xff] }
 0x22e   :  { %2846 = vmatprep.subr.mxu0 %v694_v41  ;;  %2916 = vmatpush1.msra.mxu1 %v825_v43  ;;  %v777_v37 = vld [vmem:[%s8441_s1 + $0x1770] sm:$0xff]  ;;  %v774_v40 = vld [vmem:[%s8441_s1 + $0x1758] sm:$0xff] }
 0x22f   :  { %2847 = vmatpush1.msra.mxu0 %v693_v44  ;;  %2917 = vmatprep.subr.mxu1 %v822_v46  ;;  %v905_v41 = vld [vmem:[%s8441_s1 + $0x1b70] sm:$0xff]  ;;  %v902_v44 = vld [vmem:[%s8441_s1 + $0x1b58] sm:$0xff] }
 0x230   :  { %2848 = vmatprep.subr.mxu0 %v690_v49  ;;  %2918 = vmatpush1.msra.mxu1 %v821_v51  ;;  %v773_v43 = vld [vmem:[%s8441_s1 + $0x1750] sm:$0xff]  ;;  %v770_v46 = vld [vmem:[%s8441_s1 + $0x1738] sm:$0xff] }
 0x231   :  { %2849 = vmatpush1.msra.mxu0 %v689_v52  ;;  %2919 = vmatprep.subr.mxu1 %v818_v54  ;;  %v901_v49 = vld [vmem:[%s8441_s1 + $0x1b50] sm:$0xff]  ;;  %v898_v52 = vld [vmem:[%s8441_s1 + $0x1b38] sm:$0xff] }
 0x232   :  { %2850 = vmatprep.subr.mxu0 %v686_v55  ;;  %2920 = vmatpush1.msra.mxu1 %v817_v56  ;;  %v769_v51 = vld [vmem:[%s8441_s1 + $0x1730] sm:$0xff]  ;;  %v766_v54 = vld [vmem:[%s8441_s1 + $0x1718] sm:$0xff] }
 0x233   :  { %2851 = vmatpush1.msra.mxu0 %v685_v57  ;;  %2921 = vmatprep.subr.mxu1 %v814_v60  ;;  %v897_v55 = vld [vmem:[%s8441_s1 + $0x1b30] sm:$0xff]  ;;  %v894_v57 = vld [vmem:[%s8441_s1 + $0x1b18] sm:$0xff] }
 0x234   :  { %2852 = vmatprep.subr.mxu0 %v682_v61  ;;  %2922 = vmatpush1.msra.mxu1 %v813_v62  ;;  %v765_v56 = vld [vmem:[%s8441_s1 + $0x1710] sm:$0xff]  ;;  %v762_v60 = vld [vmem:[%s8441_s1 + $0x16f8] sm:$0xff] }
 0x235   :  { %2853 = vmatpush1.msra.mxu0 %v681_v30  ;;  %2923 = vmatprep.subr.mxu1 %v810_v4  ;;  %v893_v61 = vld [vmem:[%s8441_s1 + $0x1b10] sm:$0xff]  ;;  %v890_v30 = vld [vmem:[%s8441_s1 + $0x1af8] sm:$0xff] }
 0x236   :  { %2854 = vmatprep.subr.mxu0 %v678_v63  ;;  %2924 = vmatpush1.msra.mxu1 %v809_v0  ;;  %v761_v62 = vld [vmem:[%s8441_s1 + $0x16f0] sm:$0xff]  ;;  %v758_v4 = vld [vmem:[%s8441_s1 + $0x16d8] sm:$0xff] }
 0x237   :  { %2855 = vmatpush1.msra.mxu0 %v677_v12  ;;  %2925 = vmatprep.subr.mxu1 %v806_v53  ;;  %v889_v63 = vld [vmem:[%s8441_s1 + $0x1af0] sm:$0xff]  ;;  %v886_v12 = vld [vmem:[%s8441_s1 + $0x1ad8] sm:$0xff] }
 0x238   :  { %2856 = vmatprep.subr.mxu0 %v674_v19  ;;  %2926 = vmatpush1.msra.mxu1 %v805_v42  ;;  %v757_v0 = vld [vmem:[%s8441_s1 + $0x16d0] sm:$0xff]  ;;  %v754_v53 = vld [vmem:[%s8441_s1 + $0x16b8] sm:$0xff] }
 0x239   :  { %2857 = vmatpush1.msra.mxu0 %v673_v1  ;;  %2927 = vmatprep.subr.mxu1 %v802_v22  ;;  %v885_v19 = vld [vmem:[%s8441_s1 + $0x1ad0] sm:$0xff]  ;;  %v882_v1 = vld [vmem:[%s8441_s1 + $0x1ab8] sm:$0xff] }
 0x23a   :  { %2858 = vmatprep.subr.mxu0 %v670_v58  ;;  %2928 = vmatpush1.msra.mxu1 %v801_v2  ;;  %v753_v42 = vld [vmem:[%s8441_s1 + $0x16b0] sm:$0xff]  ;;  %v750_v22 = vld [vmem:[%s8441_s1 + $0x1698] sm:$0xff] }
 0x23b   :  { %2859 = vmatpush1.msra.mxu0 %v669_v3  ;;  %2929 = vmatprep.subr.mxu1 %v798_v25  ;;  %v881_v58 = vld [vmem:[%s8441_s1 + $0x1ab0] sm:$0xff]  ;;  %v878_v3 = vld [vmem:[%s8441_s1 + $0x1a98] sm:$0xff] }
 0x23c   :  { %2860 = vmatprep.subr.mxu0 %v794_v6  ;;  %2930 = vmatpush1.msra.mxu1 %v797_v9  ;;  %v749_v2 = vld [vmem:[%s8441_s1 + $0x1690] sm:$0xff]  ;;  %v746_v25 = vld [vmem:[%s8441_s1 + $0x1678] sm:$0xff] }
 0x23d   :  { %2861 = vmatpush2.msra.mxu0 %v793_v15  ;;  %2931 = vmatprep.subr.mxu1 %v922_v10  ;;  %v877_v6 = vld [vmem:[%s8441_s1 + $0x1a90] sm:$0xff]  ;;  %v874_v15 = vld [vmem:[%s8441_s1 + $0x1a78] sm:$0xff] }
 0x23e   :  { %2862 = vmatprep.subr.mxu0 %v790_v11  ;;  %2932 = vmatpush2.msra.mxu1 %v921_v48  ;;  %v745_v9 = vld [vmem:[%s8441_s1 + $0x1670] sm:$0xff]  ;;  %v742_v10 = vld [vmem:[%s8441_s1 + $0x1658] sm:$0xff] }
 0x23f   :  { %2863 = vmatpush2.msra.mxu0 %v789_v13  ;;  %2933 = vmatprep.subr.mxu1 %v918_v14  ;;  %v873_v11 = vld [vmem:[%s8441_s1 + $0x1a70] sm:$0xff]  ;;  %v870_v13 = vld [vmem:[%s8441_s1 + $0x1a58] sm:$0xff] }
 0x240   :  { %2864 = vmatprep.subr.mxu0 %v786_v16  ;;  %2934 = vmatpush2.msra.mxu1 %v917_v20  ;;  %v741_v48 = vld [vmem:[%s8441_s1 + $0x1650] sm:$0xff]  ;;  %v738_v14 = vld [vmem:[%s8441_s1 + $0x1638] sm:$0xff] }
 0x241   :  { %2865 = vmatpush2.msra.mxu0 %v785_v5  ;;  %2935 = vmatprep.subr.mxu1 %v914_v23  ;;  %v869_v16 = vld [vmem:[%s8441_s1 + $0x1a50] sm:$0xff]  ;;  %v866_v5 = vld [vmem:[%s8441_s1 + $0x1a38] sm:$0xff] }
 0x242   :  { %2866 = vmatprep.subr.mxu0 %v782_v24  ;;  %2936 = vmatpush2.msra.mxu1 %v913_v26  ;;  %v737_v20 = vld [vmem:[%s8441_s1 + $0x1630] sm:$0xff]  ;;  %v734_v23 = vld [vmem:[%s8441_s1 + $0x1618] sm:$0xff] }
 0x243   :  { %2867 = vmatpush2.msra.mxu0 %v781_v28  ;;  %2937 = vmatprep.subr.mxu1 %v910_v32  ;;  %v733_v24 = vld [vmem:[%s8441_s1 + $0x1610] sm:$0xff]  ;;  %v862_v28 = vld [vmem:[%s8441_s1 + $0x1a18] sm:$0xff] }
 0x244   :  { %2868 = vmatprep.subr.mxu0 %v778_v34  ;;  %2938 = vmatpush2.msra.mxu1 %v909_v35  ;;  %v865_v26 = vld [vmem:[%s8441_s1 + $0x1a30] sm:$0xff]  ;;  %v986_v32 = vld [vmem:[%s8441_s1 + $0x1df8] sm:$0xff] }
 0x245   :  { %2869 = vmatpush2.msra.mxu0 %v777_v37  ;;  %2939 = vmatprep.subr.mxu1 %v906_v39  ;;  %v861_v34 = vld [vmem:[%s8441_s1 + $0x1a10] sm:$0xff]  ;;  %v1114_v37 = vld [vmem:[%s8441_s1 + $0x21f8] sm:$0xff] }
 0x246   :  { %2870 = vmatprep.subr.mxu0 %v774_v40  ;;  %2940 = vmatpush2.msra.mxu1 %v905_v41  ;;  %v985_v35 = vld [vmem:[%s8441_s1 + $0x1df0] sm:$0xff]  ;;  %v978_v40 = vld [vmem:[%s8441_s1 + $0x1db8] sm:$0xff] }
 0x247   :  { %2871 = vmatpush2.msra.mxu0 %v773_v43  ;;  %2941 = vmatprep.subr.mxu1 %v902_v44  ;;  %v981_v39 = vld [vmem:[%s8441_s1 + $0x1dd0] sm:$0xff]  ;;  %v1110_v41 = vld [vmem:[%s8441_s1 + $0x21d8] sm:$0xff] }
 0x248   :  { %2872 = vmatprep.subr.mxu0 %v770_v46  ;;  %2942 = vmatpush2.msra.mxu1 %v901_v49  ;;  %v1109_v43 = vld [vmem:[%s8441_s1 + $0x21d0] sm:$0xff]  ;;  %v974_v44 = vld [vmem:[%s8441_s1 + $0x1d98] sm:$0xff] }
 0x249   :  { %2873 = vmatpush2.msra.mxu0 %v769_v51  ;;  %2943 = vmatprep.subr.mxu1 %v898_v52  ;;  %v973_v46 = vld [vmem:[%s8441_s1 + $0x1d90] sm:$0xff]  ;;  %v970_v51 = vld [vmem:[%s8441_s1 + $0x1d78] sm:$0xff] }
 0x24a   :  { %2874 = vmatprep.subr.mxu0 %v766_v54  ;;  %2944 = vmatpush2.msra.mxu1 %v897_v55  ;;  %v1105_v49 = vld [vmem:[%s8441_s1 + $0x21b0] sm:$0xff]  ;;  %v1102_v52 = vld [vmem:[%s8441_s1 + $0x2198] sm:$0xff] }
 0x24b   :  { %2875 = vmatpush2.msra.mxu0 %v765_v56  ;;  %2945 = vmatprep.subr.mxu1 %v894_v57  ;;  %v969_v54 = vld [vmem:[%s8441_s1 + $0x1d70] sm:$0xff]  ;;  %v966_v56 = vld [vmem:[%s8441_s1 + $0x1d58] sm:$0xff] }
 0x24c   :  { %2876 = vmatprep.subr.mxu0 %v762_v60  ;;  %2946 = vmatpush2.msra.mxu1 %v893_v61  ;;  %v1101_v55 = vld [vmem:[%s8441_s1 + $0x2190] sm:$0xff]  ;;  %v1098_v57 = vld [vmem:[%s8441_s1 + $0x2178] sm:$0xff] }
 0x24d   :  { %2877 = vmatpush2.msra.mxu0 %v761_v62  ;;  %2947 = vmatprep.subr.mxu1 %v890_v30  ;;  %v965_v60 = vld [vmem:[%s8441_s1 + $0x1d50] sm:$0xff]  ;;  %v962_v62 = vld [vmem:[%s8441_s1 + $0x1d38] sm:$0xff] }
 0x24e   :  { %2878 = vmatprep.subr.mxu0 %v758_v4  ;;  %2948 = vmatpush2.msra.mxu1 %v889_v63  ;;  %v1097_v61 = vld [vmem:[%s8441_s1 + $0x2170] sm:$0xff]  ;;  %v1094_v30 = vld [vmem:[%s8441_s1 + $0x2158] sm:$0xff] }
 0x24f   :  { %2879 = vmatpush2.msra.mxu0 %v757_v0  ;;  %2949 = vmatprep.subr.mxu1 %v886_v12  ;;  %v961_v4 = vld [vmem:[%s8441_s1 + $0x1d30] sm:$0xff]  ;;  %v958_v0 = vld [vmem:[%s8441_s1 + $0x1d18] sm:$0xff] }
 0x250   :  { %2880 = vmatprep.subr.mxu0 %v754_v53  ;;  %2950 = vmatpush2.msra.mxu1 %v885_v19  ;;  %v1093_v63 = vld [vmem:[%s8441_s1 + $0x2150] sm:$0xff]  ;;  %v1090_v12 = vld [vmem:[%s8441_s1 + $0x2138] sm:$0xff] }
 0x251   :  { %2881 = vmatpush2.msra.mxu0 %v753_v42  ;;  %2951 = vmatprep.subr.mxu1 %v882_v1  ;;  %v957_v53 = vld [vmem:[%s8441_s1 + $0x1d10] sm:$0xff]  ;;  %v954_v42 = vld [vmem:[%s8441_s1 + $0x1cf8] sm:$0xff] }
 0x252   :  { %2882 = vmatprep.subr.mxu0 %v750_v22  ;;  %2952 = vmatpush2.msra.mxu1 %v881_v58  ;;  %v1089_v19 = vld [vmem:[%s8441_s1 + $0x2130] sm:$0xff]  ;;  %v1086_v1 = vld [vmem:[%s8441_s1 + $0x2118] sm:$0xff] }
 0x253   :  { %2883 = vmatpush2.msra.mxu0 %v749_v2  ;;  %2953 = vmatprep.subr.mxu1 %v878_v3  ;;  %v953_v22 = vld [vmem:[%s8441_s1 + $0x1cf0] sm:$0xff]  ;;  %v950_v2 = vld [vmem:[%s8441_s1 + $0x1cd8] sm:$0xff] }
 0x254   :  { %2884 = vmatprep.subr.mxu0 %v746_v25  ;;  %2954 = vmatpush2.msra.mxu1 %v877_v6  ;;  %v1085_v58 = vld [vmem:[%s8441_s1 + $0x2110] sm:$0xff]  ;;  %v1082_v3 = vld [vmem:[%s8441_s1 + $0x20f8] sm:$0xff] }
 0x255   :  { %2885 = vmatpush2.msra.mxu0 %v745_v9  ;;  %2955 = vmatprep.subr.mxu1 %v874_v15  ;;  %v949_v25 = vld [vmem:[%s8441_s1 + $0x1cd0] sm:$0xff]  ;;  %v946_v9 = vld [vmem:[%s8441_s1 + $0x1cb8] sm:$0xff] }
 0x256   :  { %2886 = vmatprep.subr.mxu0 %v742_v10  ;;  %2956 = vmatpush2.msra.mxu1 %v873_v11  ;;  %v1081_v6 = vld [vmem:[%s8441_s1 + $0x20f0] sm:$0xff]  ;;  %v1078_v15 = vld [vmem:[%s8441_s1 + $0x20d8] sm:$0xff] }
 0x257   :  { %2887 = vmatpush2.msra.mxu0 %v741_v48  ;;  %2957 = vmatprep.subr.mxu1 %v870_v13  ;;  %v945_v10 = vld [vmem:[%s8441_s1 + $0x1cb0] sm:$0xff]  ;;  %v942_v48 = vld [vmem:[%s8441_s1 + $0x1c98] sm:$0xff] }
 0x258   :  { %2888 = vmatprep.subr.mxu0 %v738_v14  ;;  %2958 = vmatpush2.msra.mxu1 %v869_v16  ;;  %v1077_v11 = vld [vmem:[%s8441_s1 + $0x20d0] sm:$0xff]  ;;  %v1074_v13 = vld [vmem:[%s8441_s1 + $0x20b8] sm:$0xff] }
 0x259   :  { %2889 = vmatpush2.msra.mxu0 %v737_v20  ;;  %2959 = vmatprep.subr.mxu1 %v866_v5  ;;  %v941_v14 = vld [vmem:[%s8441_s1 + $0x1c90] sm:$0xff]  ;;  %v938_v20 = vld [vmem:[%s8441_s1 + $0x1c78] sm:$0xff] }
 0x25a   :  { %2890 = vmatprep.subr.mxu0 %v734_v23  ;;  %2892 = vmatprep.mubr.f32.mxu0 %v4901_v59  ;;  %v982_v59 = vld [vmem:[%s8441_s1 + $0x1dd8] sm:$0xff]  ;;  %v1073_v16 = vld [vmem:[%s8441_s1 + $0x20b0] sm:$0xff] }
 0x25b   :  { %2891 = vmatpush2.msra.mxu0 %v733_v24  ;;  %2960 = vmatpush2.msra.mxu1 %v865_v26  ;;  %v1070_v5 = vld [vmem:[%s8441_s1 + $0x2098] sm:$0xff]  ;;  %v937_v23 = vld [vmem:[%s8441_s1 + $0x1c70] sm:$0xff] }
 0x25c   :  { %2893 = vmatmul.mubr.f32.vlgmr.msra.gmra.mxu0 %v4875_v50  ;;  %2961 = vmatprep.subr.mxu1 %v862_v28  ;;  %v1113_v50 = vld [vmem:[%s8441_s1 + $0x21f0] sm:$0xff]  ;;  %v934_v26 = vld [vmem:[%s8441_s1 + $0x1c58] sm:$0xff] }
 0x25d   :  { %2970 = vmatprep.subr.mxu0 %v986_v32  ;;  %2962 = vmatpush2.msra.mxu1 %v861_v34  ;;  %v1069_v24 = vld [vmem:[%s8441_s1 + $0x2090] sm:$0xff]  ;;  %v1066_v28 = vld [vmem:[%s8441_s1 + $0x2078] sm:$0xff] }
 0x25e   :  { %2963 = vmatprep.mubr.f32.mxu1 %v5290_v31  ;;  %2971 = vmatpush1.msra.mxu0 %v985_v35  ;;  %v977_v31 = vld [vmem:[%s8441_s1 + $0x1db0] sm:$0xff]  ;;  %v930_v35 = vld [vmem:[%s8441_s1 + $0x1c38] sm:$0xff] }
 0x25f   :  { %2964 = vmatmul.mubr.f32.vlgmr.msra.gmra.mxu1 %v5259_v18  ;;  %2972 = vmatprep.subr.mxu0 %v982_v59  ;;  %v1106_v18 = vld [vmem:[%s8441_s1 + $0x21b8] sm:$0xff]  ;;  %v933_v32 = vld [vmem:[%s8441_s1 + $0x1c50] sm:$0xff] }
 0x260   :  { %3041 = vmatprep.subr.mxu1 %v1114_v37  ;;  %2973 = vmatpush1.msra.mxu0 %v981_v39  ;;  %v1065_v34 = vld [vmem:[%s8441_s1 + $0x2070] sm:$0xff]  ;;  %v1062_v59 = vld [vmem:[%s8441_s1 + $0x2058] sm:$0xff] }
 0x261   :  { %3042 = vmatpush1.msra.mxu1 %v1113_v50  ;;  %2974 = vmatprep.subr.mxu0 %v978_v40  ;;  %v929_v37 = vld [vmem:[%s8441_s1 + $0x1c30] sm:$0xff]  ;;  %v926_v50 = vld [vmem:[%s8441_s1 + $0x1c18] sm:$0xff] }
 0x262   :  { %3043 = vmatprep.subr.mxu1 %v1110_v41  ;;  %2975 = vmatpush1.msra.mxu0 %v977_v31  ;;  %v1061_v39 = vld [vmem:[%s8441_s1 + $0x2050] sm:$0xff]  ;;  %v1058_v40 = vld [vmem:[%s8441_s1 + $0x2038] sm:$0xff] }
 0x263   :  { %3044 = vmatpush1.msra.mxu1 %v1109_v43  ;;  %2976 = vmatprep.subr.mxu0 %v974_v44  ;;  %v925_v41 = vld [vmem:[%s8441_s1 + $0x1c10] sm:$0xff]  ;;  %v1050_v43 = vld [vmem:[%s8441_s1 + $0x1ff8] sm:$0xff] }
 0x264   :  { %3045 = vmatprep.subr.mxu1 %v1106_v18  ;;  %2977 = vmatpush1.msra.mxu0 %v973_v46  ;;  %v1057_v31 = vld [vmem:[%s8441_s1 + $0x2030] sm:$0xff]  ;;  %v1054_v44 = vld [vmem:[%s8441_s1 + $0x2018] sm:$0xff] }
 0x265   :  { %3046 = vmatpush1.msra.mxu1 %v1105_v49  ;;  %2978 = vmatprep.subr.mxu0 %v970_v51  ;;  %v1049_v18 = vld [vmem:[%s8441_s1 + $0x1ff0] sm:$0xff]  ;;  %v1046_v49 = vld [vmem:[%s8441_s1 + $0x1fd8] sm:$0xff] }
 0x266   :  { %3047 = vmatprep.subr.mxu1 %v1102_v52  ;;  %2979 = vmatpush1.msra.mxu0 %v969_v54  ;;  %v1053_v46 = vld [vmem:[%s8441_s1 + $0x2010] sm:$0xff]  ;;  %v1178_v51 = vld [vmem:[%s8441_s1 + $0x23f8] sm:$0xff] }
 0x267   :  { %3048 = vmatpush1.msra.mxu1 %v1101_v55  ;;  %2980 = vmatprep.subr.mxu0 %v966_v56  ;;  %v1045_v52 = vld [vmem:[%s8441_s1 + $0x1fd0] sm:$0xff]  ;;  %v1042_v55 = vld [vmem:[%s8441_s1 + $0x1fb8] sm:$0xff] }
 0x268   :  { %3049 = vmatprep.subr.mxu1 %v1098_v57  ;;  %2981 = vmatpush1.msra.mxu0 %v965_v60  ;;  %v1177_v54 = vld [vmem:[%s8441_s1 + $0x23f0] sm:$0xff]  ;;  %v1174_v56 = vld [vmem:[%s8441_s1 + $0x23d8] sm:$0xff] }
 0x269   :  { %3050 = vmatpush1.msra.mxu1 %v1097_v61  ;;  %2982 = vmatprep.subr.mxu0 %v962_v62  ;;  %v1041_v57 = vld [vmem:[%s8441_s1 + $0x1fb0] sm:$0xff]  ;;  %v1038_v61 = vld [vmem:[%s8441_s1 + $0x1f98] sm:$0xff] }
 0x26a   :  { %3051 = vmatprep.subr.mxu1 %v1094_v30  ;;  %2983 = vmatpush1.msra.mxu0 %v961_v4  ;;  %v1173_v60 = vld [vmem:[%s8441_s1 + $0x23d0] sm:$0xff]  ;;  %v1170_v62 = vld [vmem:[%s8441_s1 + $0x23b8] sm:$0xff] }
 0x26b   :  { %3052 = vmatpush1.msra.mxu1 %v1093_v63  ;;  %2984 = vmatprep.subr.mxu0 %v958_v0  ;;  %v1037_v30 = vld [vmem:[%s8441_s1 + $0x1f90] sm:$0xff]  ;;  %v1034_v63 = vld [vmem:[%s8441_s1 + $0x1f78] sm:$0xff] }
 0x26c   :  { %3053 = vmatprep.subr.mxu1 %v1090_v12  ;;  %2985 = vmatpush1.msra.mxu0 %v957_v53  ;;  %v1169_v4 = vld [vmem:[%s8441_s1 + $0x23b0] sm:$0xff]  ;;  %v1166_v0 = vld [vmem:[%s8441_s1 + $0x2398] sm:$0xff] }
 0x26d   :  { %3054 = vmatpush1.msra.mxu1 %v1089_v19  ;;  %2986 = vmatprep.subr.mxu0 %v954_v42  ;;  %v1033_v12 = vld [vmem:[%s8441_s1 + $0x1f70] sm:$0xff]  ;;  %v1030_v19 = vld [vmem:[%s8441_s1 + $0x1f58] sm:$0xff] }
 0x26e   :  { %3055 = vmatprep.subr.mxu1 %v1086_v1  ;;  %2987 = vmatpush1.msra.mxu0 %v953_v22  ;;  %v1165_v53 = vld [vmem:[%s8441_s1 + $0x2390] sm:$0xff]  ;;  %v1162_v42 = vld [vmem:[%s8441_s1 + $0x2378] sm:$0xff] }
 0x26f   :  { %3056 = vmatpush1.msra.mxu1 %v1085_v58  ;;  %2988 = vmatprep.subr.mxu0 %v950_v2  ;;  %v1029_v1 = vld [vmem:[%s8441_s1 + $0x1f50] sm:$0xff]  ;;  %v1026_v58 = vld [vmem:[%s8441_s1 + $0x1f38] sm:$0xff] }
 0x270   :  { %3057 = vmatprep.subr.mxu1 %v1082_v3  ;;  %2989 = vmatpush1.msra.mxu0 %v949_v25  ;;  %v1161_v22 = vld [vmem:[%s8441_s1 + $0x2370] sm:$0xff]  ;;  %v1158_v2 = vld [vmem:[%s8441_s1 + $0x2358] sm:$0xff] }
 0x271   :  { %3058 = vmatpush1.msra.mxu1 %v1081_v6  ;;  %2990 = vmatprep.subr.mxu0 %v946_v9  ;;  %v1025_v3 = vld [vmem:[%s8441_s1 + $0x1f30] sm:$0xff]  ;;  %v1022_v6 = vld [vmem:[%s8441_s1 + $0x1f18] sm:$0xff] }
 0x272   :  { %3059 = vmatprep.subr.mxu1 %v1078_v15  ;;  %2991 = vmatpush1.msra.mxu0 %v945_v10  ;;  %v1157_v25 = vld [vmem:[%s8441_s1 + $0x2350] sm:$0xff]  ;;  %v1154_v9 = vld [vmem:[%s8441_s1 + $0x2338] sm:$0xff] }
 0x273   :  { %3060 = vmatpush1.msra.mxu1 %v1077_v11  ;;  %2992 = vmatprep.subr.mxu0 %v942_v48  ;;  %v1021_v15 = vld [vmem:[%s8441_s1 + $0x1f10] sm:$0xff]  ;;  %v1018_v11 = vld [vmem:[%s8441_s1 + $0x1ef8] sm:$0xff] }
 0x274   :  { %3061 = vmatprep.subr.mxu1 %v1074_v13  ;;  %2993 = vmatpush1.msra.mxu0 %v941_v14  ;;  %v1153_v10 = vld [vmem:[%s8441_s1 + $0x2330] sm:$0xff]  ;;  %v1150_v48 = vld [vmem:[%s8441_s1 + $0x2318] sm:$0xff] }
 0x275   :  { %3062 = vmatpush1.msra.mxu1 %v1073_v16  ;;  %2994 = vmatprep.subr.mxu0 %v938_v20  ;;  %v1017_v13 = vld [vmem:[%s8441_s1 + $0x1ef0] sm:$0xff]  ;;  %v1014_v16 = vld [vmem:[%s8441_s1 + $0x1ed8] sm:$0xff] }
 0x276   :  { %3063 = vmatprep.subr.mxu1 %v1070_v5  ;;  %2995 = vmatpush1.msra.mxu0 %v937_v23  ;;  %v1149_v14 = vld [vmem:[%s8441_s1 + $0x2310] sm:$0xff]  ;;  %v1146_v20 = vld [vmem:[%s8441_s1 + $0x22f8] sm:$0xff] }
 0x277   :  { %3064 = vmatpush1.msra.mxu1 %v1069_v24  ;;  %2996 = vmatprep.subr.mxu0 %v934_v26  ;;  %v1013_v5 = vld [vmem:[%s8441_s1 + $0x1ed0] sm:$0xff]  ;;  %v1010_v24 = vld [vmem:[%s8441_s1 + $0x1eb8] sm:$0xff] }
 0x278   :  { %3065 = vmatprep.subr.mxu1 %v1066_v28  ;;  %2997 = vmatpush1.msra.mxu0 %v933_v32  ;;  %v1145_v23 = vld [vmem:[%s8441_s1 + $0x22f0] sm:$0xff]  ;;  %v1142_v26 = vld [vmem:[%s8441_s1 + $0x22d8] sm:$0xff] }
 0x279   :  { %3066 = vmatpush1.msra.mxu1 %v1065_v34  ;;  %2998 = vmatprep.subr.mxu0 %v930_v35  ;;  %v1009_v28 = vld [vmem:[%s8441_s1 + $0x1eb0] sm:$0xff]  ;;  %v1006_v34 = vld [vmem:[%s8441_s1 + $0x1e98] sm:$0xff] }
 0x27a   :  { %3067 = vmatprep.subr.mxu1 %v1062_v59  ;;  %2999 = vmatpush1.msra.mxu0 %v929_v37  ;;  %v1141_v32 = vld [vmem:[%s8441_s1 + $0x22d0] sm:$0xff]  ;;  %v1138_v35 = vld [vmem:[%s8441_s1 + $0x22b8] sm:$0xff] }
 0x27b   :  { %3068 = vmatpush1.msra.mxu1 %v1061_v39  ;;  %3000 = vmatprep.subr.mxu0 %v926_v50  ;;  %v1005_v59 = vld [vmem:[%s8441_s1 + $0x1e90] sm:$0xff]  ;;  %v1002_v39 = vld [vmem:[%s8441_s1 + $0x1e78] sm:$0xff] }
 0x27c   :  { %3069 = vmatprep.subr.mxu1 %v1058_v40  ;;  %3001 = vmatpush1.msra.mxu0 %v925_v41  ;;  %v1137_v37 = vld [vmem:[%s8441_s1 + $0x22b0] sm:$0xff]  ;;  %v1134_v50 = vld [vmem:[%s8441_s1 + $0x2298] sm:$0xff] }
 0x27d   :  { %3070 = vmatpush1.msra.mxu1 %v1057_v31  ;;  %3002 = vmatprep.subr.mxu0 %v1050_v43  ;;  %v1001_v40 = vld [vmem:[%s8441_s1 + $0x1e70] sm:$0xff]  ;;  %v998_v31 = vld [vmem:[%s8441_s1 + $0x1e58] sm:$0xff] }
 0x27e   :  { %3071 = vmatprep.subr.mxu1 %v1054_v44  ;;  %3003 = vmatpush2.msra.mxu0 %v1049_v18  ;;  %v1133_v41 = vld [vmem:[%s8441_s1 + $0x2290] sm:$0xff]  ;;  %v1130_v43 = vld [vmem:[%s8441_s1 + $0x2278] sm:$0xff] }
 0x27f   :  { %3072 = vmatpush1.msra.mxu1 %v1053_v46  ;;  %3004 = vmatprep.subr.mxu0 %v1046_v49  ;;  %v997_v44 = vld [vmem:[%s8441_s1 + $0x1e50] sm:$0xff]  ;;  %v994_v46 = vld [vmem:[%s8441_s1 + $0x1e38] sm:$0xff] }
 0x280   :  { %3073 = vmatprep.subr.mxu1 %v1178_v51  ;;  %3005 = vmatpush2.msra.mxu0 %v1045_v52  ;;  %v1129_v18 = vld [vmem:[%s8441_s1 + $0x2270] sm:$0xff]  ;;  %v1126_v49 = vld [vmem:[%s8441_s1 + $0x2258] sm:$0xff] }
 0x281   :  { %3074 = vmatpush2.msra.mxu1 %v1177_v54  ;;  %3006 = vmatprep.subr.mxu0 %v1042_v55  ;;  %v993_v51 = vld [vmem:[%s8441_s1 + $0x1e30] sm:$0xff]  ;;  %v990_v54 = vld [vmem:[%s8441_s1 + $0x1e18] sm:$0xff] }
 0x282   :  { %3075 = vmatprep.subr.mxu1 %v1174_v56  ;;  %3007 = vmatpush2.msra.mxu0 %v1041_v57  ;;  %v1125_v52 = vld [vmem:[%s8441_s1 + $0x2250] sm:$0xff]  ;;  %v1122_v55 = vld [vmem:[%s8441_s1 + $0x2238] sm:$0xff] }
 0x283   :  { %3076 = vmatpush2.msra.mxu1 %v1173_v60  ;;  %3008 = vmatprep.subr.mxu0 %v1038_v61  ;;  %v989_v56 = vld [vmem:[%s8441_s1 + $0x1e10] sm:$0xff]  ;;  %v1118_v60 = vld [vmem:[%s8441_s1 + $0x2218] sm:$0xff] }
 0x284   :  { %3077 = vmatprep.subr.mxu1 %v1170_v62  ;;  %3009 = vmatpush2.msra.mxu0 %v1037_v30  ;;  %v1121_v57 = vld [vmem:[%s8441_s1 + $0x2230] sm:$0xff]  ;;  %v1242_v61 = vld [vmem:[%s8441_s1 + $0x25f8] sm:$0xff] }
 0x285   :  { %3078 = vmatpush2.msra.mxu1 %v1169_v4  ;;  %3010 = vmatprep.subr.mxu0 %v1034_v63  ;;  %v1117_v62 = vld [vmem:[%s8441_s1 + $0x2210] sm:$0xff]  ;;  %v1238_v4 = vld [vmem:[%s8441_s1 + $0x25d8] sm:$0xff] }
 0x286   :  { %3079 = vmatprep.subr.mxu1 %v1166_v0  ;;  %3011 = vmatpush2.msra.mxu0 %v1033_v12  ;;  %v1241_v30 = vld [vmem:[%s8441_s1 + $0x25f0] sm:$0xff]  ;;  %v1370_v63 = vld [vmem:[%s8441_s1 + $0x29f8] sm:$0xff] }
 0x287   :  { %3080 = vmatpush2.msra.mxu1 %v1165_v53  ;;  %3012 = vmatprep.subr.mxu0 %v1030_v19  ;;  %v1234_v0 = vld [vmem:[%s8441_s1 + $0x25b8] sm:$0xff]  ;;  %v1365_v53 = vld [vmem:[%s8441_s1 + $0x29d0] sm:$0xff] }
 0x288   :  { %3081 = vmatprep.subr.mxu1 %v1162_v42  ;;  %3013 = vmatpush2.msra.mxu0 %v1029_v1  ;;  %v1366_v12 = vld [vmem:[%s8441_s1 + $0x29d8] sm:$0xff]  ;;  %v1229_v42 = vld [vmem:[%s8441_s1 + $0x2590] sm:$0xff] }
 0x289   :  { %3082 = vmatpush2.msra.mxu1 %v1161_v22  ;;  %3014 = vmatprep.subr.mxu0 %v1026_v58  ;;  %v1230_v19 = vld [vmem:[%s8441_s1 + $0x2598] sm:$0xff]  ;;  %v1361_v1 = vld [vmem:[%s8441_s1 + $0x29b0] sm:$0xff] }
 0x28a   :  { %3083 = vmatprep.subr.mxu1 %v1158_v2  ;;  %3015 = vmatpush2.msra.mxu0 %v1025_v3  ;;  %v1226_v22 = vld [vmem:[%s8441_s1 + $0x2578] sm:$0xff]  ;;  %v1225_v2 = vld [vmem:[%s8441_s1 + $0x2570] sm:$0xff] }
 0x28b   :  { %3084 = vmatpush2.msra.mxu1 %v1157_v25  ;;  %3016 = vmatprep.subr.mxu0 %v1022_v6  ;;  %v1358_v58 = vld [vmem:[%s8441_s1 + $0x2998] sm:$0xff]  ;;  %v1357_v3 = vld [vmem:[%s8441_s1 + $0x2990] sm:$0xff] }
 0x28c   :  { %3085 = vmatprep.subr.mxu1 %v1154_v9  ;;  %3017 = vmatpush2.msra.mxu0 %v1021_v15  ;;  %v1222_v25 = vld [vmem:[%s8441_s1 + $0x2558] sm:$0xff]  ;;  %v1221_v9 = vld [vmem:[%s8441_s1 + $0x2550] sm:$0xff] }
 0x28d   :  { %3086 = vmatpush2.msra.mxu1 %v1153_v10  ;;  %3018 = vmatprep.subr.mxu0 %v1018_v11  ;;  %v1354_v6 = vld [vmem:[%s8441_s1 + $0x2978] sm:$0xff]  ;;  %v1353_v15 = vld [vmem:[%s8441_s1 + $0x2970] sm:$0xff] }
 0x28e   :  { %3087 = vmatprep.subr.mxu1 %v1150_v48  ;;  %3019 = vmatpush2.msra.mxu0 %v1017_v13  ;;  %v1218_v10 = vld [vmem:[%s8441_s1 + $0x2538] sm:$0xff]  ;;  %v1217_v48 = vld [vmem:[%s8441_s1 + $0x2530] sm:$0xff] }
 0x28f   :  { %3088 = vmatpush2.msra.mxu1 %v1149_v14  ;;  %3020 = vmatprep.subr.mxu0 %v1014_v16  ;;  %v1350_v11 = vld [vmem:[%s8441_s1 + $0x2958] sm:$0xff]  ;;  %v1349_v13 = vld [vmem:[%s8441_s1 + $0x2950] sm:$0xff] }
 0x290   :  { %3089 = vmatprep.subr.mxu1 %v1146_v20  ;;  %3021 = vmatpush2.msra.mxu0 %v1013_v5  ;;  %v1214_v14 = vld [vmem:[%s8441_s1 + $0x2518] sm:$0xff]  ;;  %v1213_v20 = vld [vmem:[%s8441_s1 + $0x2510] sm:$0xff] }
 0x291   :  { %3090 = vmatpush2.msra.mxu1 %v1145_v23  ;;  %3022 = vmatprep.subr.mxu0 %v1010_v24  ;;  %v1346_v16 = vld [vmem:[%s8441_s1 + $0x2938] sm:$0xff]  ;;  %v1345_v5 = vld [vmem:[%s8441_s1 + $0x2930] sm:$0xff] }
 0x292   :  { %3091 = vmatprep.subr.mxu1 %v1142_v26  ;;  %3023 = vmatpush2.msra.mxu0 %v1009_v28  ;;  %v1210_v23 = vld [vmem:[%s8441_s1 + $0x24f8] sm:$0xff]  ;;  %v1209_v26 = vld [vmem:[%s8441_s1 + $0x24f0] sm:$0xff] }
 0x293   :  { %3092 = vmatpush2.msra.mxu1 %v1141_v32  ;;  %3024 = vmatprep.subr.mxu0 %v1006_v34  ;;  %v1342_v24 = vld [vmem:[%s8441_s1 + $0x2918] sm:$0xff]  ;;  %v1341_v28 = vld [vmem:[%s8441_s1 + $0x2910] sm:$0xff] }
 0x294   :  { %3093 = vmatprep.subr.mxu1 %v1138_v35  ;;  %3025 = vmatpush2.msra.mxu0 %v1005_v59  ;;  %v1206_v32 = vld [vmem:[%s8441_s1 + $0x24d8] sm:$0xff]  ;;  %v1205_v35 = vld [vmem:[%s8441_s1 + $0x24d0] sm:$0xff] }
 0x295   :  { %3094 = vmatpush2.msra.mxu1 %v1137_v37  ;;  %3026 = vmatprep.subr.mxu0 %v1002_v39  ;;  %v1338_v34 = vld [vmem:[%s8441_s1 + $0x28f8] sm:$0xff]  ;;  %v1337_v59 = vld [vmem:[%s8441_s1 + $0x28f0] sm:$0xff] }
 0x296   :  { %3095 = vmatprep.subr.mxu1 %v1134_v50  ;;  %3027 = vmatpush2.msra.mxu0 %v1001_v40  ;;  %v1202_v37 = vld [vmem:[%s8441_s1 + $0x24b8] sm:$0xff]  ;;  %v1201_v50 = vld [vmem:[%s8441_s1 + $0x24b0] sm:$0xff] }
 0x297   :  { %3096 = vmatpush2.msra.mxu1 %v1133_v41  ;;  %3028 = vmatprep.subr.mxu0 %v998_v31  ;;  %v1334_v39 = vld [vmem:[%s8441_s1 + $0x28d8] sm:$0xff]  ;;  %v1333_v40 = vld [vmem:[%s8441_s1 + $0x28d0] sm:$0xff] }
 0x298   :  { %3097 = vmatprep.subr.mxu1 %v1130_v43  ;;  %3029 = vmatpush2.msra.mxu0 %v997_v44  ;;  %v1198_v41 = vld [vmem:[%s8441_s1 + $0x2498] sm:$0xff]  ;;  %v1197_v43 = vld [vmem:[%s8441_s1 + $0x2490] sm:$0xff] }
 0x299   :  { %3098 = vmatpush2.msra.mxu1 %v1129_v18  ;;  %3030 = vmatprep.subr.mxu0 %v994_v46  ;;  %v1330_v31 = vld [vmem:[%s8441_s1 + $0x28b8] sm:$0xff]  ;;  %v1329_v44 = vld [vmem:[%s8441_s1 + $0x28b0] sm:$0xff] }
 0x29a   :  { %3099 = vmatprep.subr.mxu1 %v1126_v49  ;;  %3031 = vmatpush2.msra.mxu0 %v993_v51  ;;  %v1194_v18 = vld [vmem:[%s8441_s1 + $0x2478] sm:$0xff]  ;;  %v1193_v49 = vld [vmem:[%s8441_s1 + $0x2470] sm:$0xff] }
 0x29b   :  { %3100 = vmatpush2.msra.mxu1 %v1125_v52  ;;  %3032 = vmatprep.subr.mxu0 %v990_v54  ;;  %v1326_v46 = vld [vmem:[%s8441_s1 + $0x2898] sm:$0xff]  ;;  %v1325_v51 = vld [vmem:[%s8441_s1 + $0x2890] sm:$0xff] }
 0x29c   :  { %3101 = vmatprep.subr.mxu1 %v1122_v55  ;;  %3033 = vmatpush2.msra.mxu0 %v989_v56  ;;  %v1190_v52 = vld [vmem:[%s8441_s1 + $0x2458] sm:$0xff]  ;;  %v1189_v55 = vld [vmem:[%s8441_s1 + $0x2450] sm:$0xff] }
 0x29d   :  { %3034 = vmatprep.mubr.f32.mxu0 %v5306_v36  ;;  %3102 = vmatpush2.msra.mxu1 %v1121_v57  ;;  %v1237_v36 = vld [vmem:[%s8441_s1 + $0x25d0] sm:$0xff]  ;;  %v1322_v54 = vld [vmem:[%s8441_s1 + $0x2878] sm:$0xff] }
 0x29e   :  { %3035 = vmatmul.mubr.f32.vlgmr.msra.gmra.mxu0 %v5280_v27  ;;  %3103 = vmatprep.subr.mxu1 %v1118_v60  ;;  %v1369_v27 = vld [vmem:[%s8441_s1 + $0x29f0] sm:$0xff]  ;;  %v1186_v57 = vld [vmem:[%s8441_s1 + $0x2438] sm:$0xff] }
 0x29f   :  { %3112 = vmatprep.subr.mxu0 %v1242_v61  ;;  %3104 = vmatpush2.msra.mxu1 %v1117_v62  ;;  %v1321_v56 = vld [vmem:[%s8441_s1 + $0x2870] sm:$0xff]  ;;  %v1318_v60 = vld [vmem:[%s8441_s1 + $0x2858] sm:$0xff] }
 0x2a0   :  { %3105 = vmatprep.mubr.f32.mxu1 %v5695_v21  ;;  %3113 = vmatpush1.msra.mxu0 %v1241_v30  ;;  %v1233_v21 = vld [vmem:[%s8441_s1 + $0x25b0] sm:$0xff]  ;;  %v1182_v30 = vld [vmem:[%s8441_s1 + $0x2418] sm:$0xff] }
 0x2a1   :  { %3106 = vmatmul.mubr.f32.vlgmr.msra.gmra.mxu1 %v5664_v8  ;;  %3114 = vmatprep.subr.mxu0 %v1238_v4  ;;  %v1362_v8 = vld [vmem:[%s8441_s1 + $0x29b8] sm:$0xff]  ;;  %v1185_v61 = vld [vmem:[%s8441_s1 + $0x2430] sm:$0xff] }
 0x2a2   :  { %3183 = vmatprep.subr.mxu1 %v1370_v63  ;;  %3115 = vmatpush1.msra.mxu0 %v1237_v36  ;;  %v1317_v62 = vld [vmem:[%s8441_s1 + $0x2850] sm:$0xff]  ;;  %v1314_v4 = vld [vmem:[%s8441_s1 + $0x2838] sm:$0xff] }
 0x2a3   :  { %3184 = vmatpush1.msra.mxu1 %v1369_v27  ;;  %3116 = vmatprep.subr.mxu0 %v1234_v0  ;;  %v1181_v63 = vld [vmem:[%s8441_s1 + $0x2410] sm:$0xff]  ;;  %v1306_v27 = vld [vmem:[%s8441_s1 + $0x27f8] sm:$0xff] }
 0x2a4   :  { %3185 = vmatprep.subr.mxu1 %v1366_v12  ;;  %3117 = vmatpush1.msra.mxu0 %v1233_v21  ;;  %v1313_v36 = vld [vmem:[%s8441_s1 + $0x2830] sm:$0xff]  ;;  %v1310_v0 = vld [vmem:[%s8441_s1 + $0x2818] sm:$0xff] }
 0x2a5   :  { %3186 = vmatpush1.msra.mxu1 %v1365_v53  ;;  %3118 = vmatprep.subr.mxu0 %v1230_v19  ;;  %v1305_v12 = vld [vmem:[%s8441_s1 + $0x27f0] sm:$0xff]  ;;  %v1302_v53 = vld [vmem:[%s8441_s1 + $0x27d8] sm:$0xff] }
 0x2a6   :  { %3187 = vmatprep.subr.mxu1 %v1362_v8  ;;  %3119 = vmatpush1.msra.mxu0 %v1229_v42  ;;  %v1309_v21 = vld [vmem:[%s8441_s1 + $0x2810] sm:$0xff]  ;;  %v1434_v19 = vld [vmem:[%s8441_s1 + $0x2bf8] sm:$0xff] }
 0x2a7   :  { %3188 = vmatpush1.msra.mxu1 %v1361_v1  ;;  %3120 = vmatprep.subr.mxu0 %v1226_v22  ;;  %v1301_v8 = vld [vmem:[%s8441_s1 + $0x27d0] sm:$0xff]  ;;  %v1298_v1 = vld [vmem:[%s8441_s1 + $0x27b8] sm:$0xff]  ;;  %v7936_v22 = vpop.f32.mrf.mxu0 }
 0x2a8   :  { %3189 = vmatprep.subr.mxu1 %v1358_v58  ;;  %3121 = vmatpush1.msra.mxu0 %v1225_v2  ;;  %v1433_v42 = vld [vmem:[%s8441_s1 + $0x2bf0] sm:$0xff]  ;;  %v1430_v58 = vld [vmem:[%s8441_s1 + $0x2bd8] sm:$0xff] }
 0x2a9   :  { %3190 = vmatpush1.msra.mxu1 %v1357_v3  ;;  %3122 = vmatprep.subr.mxu0 %v1222_v25  ;;  %v1297_v2 = vld [vmem:[%s8441_s1 + $0x27b0] sm:$0xff]  ;;  %v1294_v25 = vld [vmem:[%s8441_s1 + $0x2798] sm:$0xff] }
 0x2aa   :  { %3191 = vmatprep.subr.mxu1 %v1354_v6  ;;  %3123 = vmatpush1.msra.mxu0 %v1221_v9  ;;  %v1429_v3 = vld [vmem:[%s8441_s1 + $0x2bd0] sm:$0xff]  ;;  %v1426_v6 = vld [vmem:[%s8441_s1 + $0x2bb8] sm:$0xff] }
 0x2ab   :  { %3192 = vmatpush1.msra.mxu1 %v1353_v15  ;;  %3124 = vmatprep.subr.mxu0 %v1218_v10  ;;  %v1293_v9 = vld [vmem:[%s8441_s1 + $0x2790] sm:$0xff]  ;;  %v1475_v15 = vsub.s32 1, %v3981_v38 }
 0x2ac   :  { %3193 = vmatprep.subr.mxu1 %v1350_v11  ;;  %3125 = vmatpush1.msra.mxu0 %v1217_v48  ;;  %v1425_v10 = vld [vmem:[%s8441_s1 + $0x2bb0] sm:$0xff]  ;;  %v1290_v11 = vld [vmem:[%s8441_s1 + $0x2778] sm:$0xff]  ;;  %v7966_v48 = vld [vmem:[%s8442_s2] sm:$0xf] }
 0x2ad   :  { %3194 = vmatpush1.msra.mxu1 %v1349_v13  ;;  %3126 = vmatprep.subr.mxu0 %v1214_v14  ;;  %v1689_v13 = vpop.f32.mrf.mxu0  ;;  %v1422_v14 = vld [vmem:[%s8441_s1 + $0x2b98] sm:$0xff] }
 0x2ae   :  { %3195 = vmatprep.subr.mxu1 %v1346_v16  ;;  %3127 = vmatpush1.msra.mxu0 %v1213_v20  ;;  %v1289_v16 = vld [vmem:[%s8441_s1 + $0x2770] sm:$0xff] }
 0x2af   :  { %3196 = vmatpush1.msra.mxu1 %v1345_v5  ;;  %3128 = vmatprep.subr.mxu0 %v1210_v23  ;;  %v1421_v20 = vld [vmem:[%s8441_s1 + $0x2b90] sm:$0xff]  ;;  %v1286_v5 = vld [vmem:[%s8441_s1 + $0x2758] sm:$0xff]  ;;  %v7980_v23 = vpop.f32.mrf.mxu0 }
 0x2b0   :  { %3197 = vmatprep.subr.mxu1 %v1342_v24  ;;  %3129 = vmatpush1.msra.mxu0 %v1209_v26  ;;  %v1418_v24 = vld [vmem:[%s8441_s1 + $0x2b78] sm:$0xff]  ;;  %v1285_v26 = vld [vmem:[%s8441_s1 + $0x2750] sm:$0xff] }
 0x2b1   :  { %3198 = vmatpush1.msra.mxu1 %v1341_v28  ;;  %3130 = vmatprep.subr.mxu0 %v1206_v32  ;;  %v1476_v28 = vrot.slane %v7966_v48, %v1475_v15  ;;  %v1417_v32 = vld [vmem:[%s8441_s1 + $0x2b70] sm:$0xff] }
 0x2b2   :  { %3199 = vmatprep.subr.mxu1 %v1338_v34  ;;  %3131 = vmatpush1.msra.mxu0 %v1205_v35  ;;  %v1282_v34 = vld [vmem:[%s8441_s1 + $0x2738] sm:$0xff]  ;;  %v7995_v35 = vpop.f32.mrf.mxu1 }
 0x2b3   :  { %3200 = vmatpush1.msra.mxu1 %v1337_v59  ;;  %3132 = vmatprep.subr.mxu0 %v1202_v37  ;;  %v1414_v59 = vld [vmem:[%s8441_s1 + $0x2b58] sm:$0xff]  ;;  %v1281_v37 = vld [vmem:[%s8441_s1 + $0x2730] sm:$0xff] }
 0x2b4   :  { %3201 = vmatprep.subr.mxu1 %v1334_v39  ;;  %3133 = vmatpush1.msra.mxu0 %v1201_v50  ;;  %v1413_v39 = vld [vmem:[%s8441_s1 + $0x2b50] sm:$0xff]  ;;  %v1278_v50 = vld [vmem:[%s8441_s1 + $0x2718] sm:$0xff] }
 0x2b5   :  { %3202 = vmatpush1.msra.mxu1 %v1333_v40  ;;  %3134 = vmatprep.subr.mxu0 %v1198_v41  ;;  %v1831_v40 = vpop.f32.mrf.mxu0  ;;  %v1410_v41 = vld [vmem:[%s8441_s1 + $0x2b38] sm:$0xff] }
 0x2b6   :  { %3203 = vmatprep.subr.mxu1 %v1330_v31  ;;  %3135 = vmatpush1.msra.mxu0 %v1197_v43  ;;  %v1277_v31 = vld [vmem:[%s8441_s1 + $0x2710] sm:$0xff]  ;;  %v1690_v43 = vadd.f32 %v1689_v13, %v1476_v28 }
 0x2b7   :  { %3204 = vmatpush1.msra.mxu1 %v1329_v44  ;;  %3136 = vmatprep.subr.mxu0 %v1194_v18  ;;  %v1409_v44 = vld [vmem:[%s8441_s1 + $0x2b30] sm:$0xff]  ;;  %v1274_v18 = vld [vmem:[%s8441_s1 + $0x26f8] sm:$0xff] }
 0x2b8   :  { %3205 = vmatprep.subr.mxu1 %v1326_v46  ;;  %3137 = vmatpush1.msra.mxu0 %v1193_v49  ;;  %v1760_v46 = vpop.f32.mrf.mxu1  ;;  %v8021_v49 = vpop.f32.mrf.mxu0  ;;  %v1381_v28 = vld [vmem:[%s8441_s1 + $0x2a50] sm:$0xff] }
 0x2b9   :  { %3206 = vmatpush1.msra.mxu1 %v1325_v51  ;;  %3138 = vmatprep.subr.mxu0 %v1190_v52  ;;  %v1406_v51 = vld [vmem:[%s8441_s1 + $0x2b18] sm:$0xff]  ;;  %v1273_v52 = vld [vmem:[%s8441_s1 + $0x26f0] sm:$0xff] }
 0x2ba   :  { %3207 = vmatprep.subr.mxu1 %v1322_v54  ;;  %3139 = vmatpush1.msra.mxu0 %v1189_v55  ;;  %v1405_v54 = vld [vmem:[%s8441_s1 + $0x2b10] sm:$0xff]  ;;  %v1270_v55 = vld [vmem:[%s8441_s1 + $0x26d8] sm:$0xff] }
 0x2bb   :  { %3208 = vmatpush1.msra.mxu1 %v1321_v56  ;;  %3140 = vmatprep.subr.mxu0 %v1186_v57  ;;  %v8035_v56 = vpop.f32.mrf.mxu1  ;;  %v1402_v57 = vld [vmem:[%s8441_s1 + $0x2af8] sm:$0xff] }
 0x2bc   :  { %3209 = vmatprep.subr.mxu1 %v1318_v60  ;;  %3141 = vmatpush1.msra.mxu0 %v1185_v61  ;;  %v1269_v60 = vld [vmem:[%s8441_s1 + $0x26d0] sm:$0xff]  ;;  %v1761_v61 = vadd.f32 %v1760_v46, %v1690_v43  ;;  %v1466_v43 = vld [vmem:[%s8441_s1 + $0x2cf8] sm:$0xff] }
 0x2bd   :  { %3210 = vmatpush1.msra.mxu1 %v1317_v62  ;;  %3142 = vmatprep.subr.mxu0 %v1182_v30  ;;  %v1401_v62 = vld [vmem:[%s8441_s1 + $0x2af0] sm:$0xff]  ;;  %v1266_v30 = vld [vmem:[%s8441_s1 + $0x26b8] sm:$0xff] }
 0x2be   :  { %3211 = vmatprep.subr.mxu1 %v1314_v4  ;;  %3143 = vmatpush1.msra.mxu0 %v1181_v63  ;;  %v1973_v4 = vpop.f32.mrf.mxu0  ;;  %v1398_v63 = vld [vmem:[%s8441_s1 + $0x2ad8] sm:$0xff] }
 0x2bf   :  { %3212 = vmatpush1.msra.mxu1 %v1313_v36  ;;  %3144 = vmatprep.subr.mxu0 %v1306_v27  ;;  %v1265_v36 = vld [vmem:[%s8441_s1 + $0x26b0] sm:$0xff]  ;;  %v1832_v27 = vadd.f32 %v1831_v40, %v1761_v61 }
 0x2c0   :  { %3213 = vmatprep.subr.mxu1 %v1310_v0  ;;  %3145 = vmatpush2.msra.mxu0 %v1305_v12  ;;  %v1397_v0 = vld [vmem:[%s8441_s1 + $0x2ad0] sm:$0xff]  ;;  %v1262_v12 = vld [vmem:[%s8441_s1 + $0x2698] sm:$0xff] }
 0x2c1   :  { %3214 = vmatpush1.msra.mxu1 %v1309_v21  ;;  %3146 = vmatprep.subr.mxu0 %v1302_v53  ;;  %v1902_v21 = vpop.f32.mrf.mxu1  ;;  %v8061_v53 = vpop.f32.mrf.mxu0  ;;  %v1457_v61 = vld [vmem:[%s8441_s1 + $0x2cb0] sm:$0xff] }
 0x2c2   :  { %3215 = vmatprep.subr.mxu1 %v1434_v19  ;;  %3147 = vmatpush2.msra.mxu0 %v1301_v8  ;;  %v1394_v19 = vld [vmem:[%s8441_s1 + $0x2ab8] sm:$0xff]  ;;  %v1261_v8 = vld [vmem:[%s8441_s1 + $0x2690] sm:$0xff] }
 0x2c3   :  { %3216 = vmatpush2.msra.mxu1 %v1433_v42  ;;  %3148 = vmatprep.subr.mxu0 %v1298_v1  ;;  %v1393_v42 = vld [vmem:[%s8441_s1 + $0x2ab0] sm:$0xff]  ;;  %v1258_v1 = vld [vmem:[%s8441_s1 + $0x2678] sm:$0xff]  ;;  %v2115_v15 = vpop.f32.mrf.mxu0 }
 0x2c4   :  { %3217 = vmatprep.subr.mxu1 %v1430_v58  ;;  %3149 = vmatpush2.msra.mxu0 %v1297_v2  ;;  %v8075_v58 = vpop.f32.mrf.mxu1  ;;  %v1390_v2 = vld [vmem:[%s8441_s1 + $0x2a98] sm:$0xff] }
 0x2c5   :  { %3218 = vmatpush2.msra.mxu1 %v1429_v3  ;;  %3150 = vmatprep.subr.mxu0 %v1294_v25  ;;  %v1257_v3 = vld [vmem:[%s8441_s1 + $0x2670] sm:$0xff]  ;;  %v1903_v25 = vadd.f32 %v1902_v21, %v1832_v27  ;;  %v1450_v27 = vld [vmem:[%s8441_s1 + $0x2c78] sm:$0xff]  ;;  %v3374_v21 = vld [vmem:[%s8443_s3 + $0x168] sm:$0xff] }
 0x2c6   :  { %3219 = vmatprep.subr.mxu1 %v1426_v6  ;;  %3151 = vmatpush2.msra.mxu0 %v1293_v9  ;;  %v1389_v6 = vld [vmem:[%s8441_s1 + $0x2a90] sm:$0xff]  ;;  %v1254_v9 = vld [vmem:[%s8441_s1 + $0x2658] sm:$0xff] }
 0x2c7   :  { %3220 = vmatpush2.msra.mxu1 %v1425_v10  ;;  %3152 = vmatprep.subr.mxu0 %v1290_v11  ;;  %v1386_v10 = vld [vmem:[%s8441_s1 + $0x2a78] sm:$0xff]  ;;  %v1253_v11 = vld [vmem:[%s8441_s1 + $0x2650] sm:$0xff]  ;;  %v1974_v13 = vadd.f32 %v1973_v4, %v1903_v25 }
 0x2c8   :  { %3221 = vmatprep.subr.mxu1 %v1422_v14  ;;  %3153 = vmatpush2.msra.mxu0 %v1289_v16  ;;  %v1385_v14 = vld [vmem:[%s8441_s1 + $0x2a70] sm:$0xff]  ;;  %v1250_v16 = vld [vmem:[%s8441_s1 + $0x2638] sm:$0xff] }
 0x2c9   :  { %3222 = vmatpush2.msra.mxu1 %v1421_v20  ;;  %3154 = vmatprep.subr.mxu0 %v1286_v5  ;;  %v2044_v20 = vpop.f32.mrf.mxu1  ;;  %v8101_v5 = vpop.f32.mrf.mxu0  ;;  %v1442_v25 = vld [vmem:[%s8441_s1 + $0x2c38] sm:$0xff] }
 0x2ca   :  { %3223 = vmatprep.subr.mxu1 %v1418_v24  ;;  %3155 = vmatpush2.msra.mxu0 %v1285_v26  ;;  %v1382_v24 = vld [vmem:[%s8441_s1 + $0x2a58] sm:$0xff]  ;;  %v1249_v26 = vld [vmem:[%s8441_s1 + $0x2630] sm:$0xff] }
 0x2cb   :  { %3224 = vmatpush2.msra.mxu1 %v1417_v32  ;;  %3156 = vmatprep.subr.mxu0 %v1282_v34  ;;  %v1246_v32 = vld [vmem:[%s8441_s1 + $0x2618] sm:$0xff]  ;;  %v8115_v34 = vpop.f32.mrf.mxu1  ;;  %v2257_v40 = vpop.f32.mrf.mxu0 }
 0x2cc   :  { %3225 = vmatprep.subr.mxu1 %v1414_v59  ;;  %3157 = vmatpush2.msra.mxu0 %v1281_v37  ;;  %v1378_v59 = vld [vmem:[%s8441_s1 + $0x2a38] sm:$0xff]  ;;  %v1245_v37 = vld [vmem:[%s8441_s1 + $0x2610] sm:$0xff] }
 0x2cd   :  { %3226 = vmatpush2.msra.mxu1 %v1413_v39  ;;  %3158 = vmatprep.subr.mxu0 %v1278_v50  ;;  %v2045_v39 = vadd.f32 %v2044_v20, %v1974_v13  ;;  %v1377_v50 = vld [vmem:[%s8441_s1 + $0x2a30] sm:$0xff]  ;;  %v8135_v46 = vpop.f32.mrf.mxu0  ;;  %v3344_v20 = vld [vmem:[%s8443_s3 + $0x78] sm:$0xff] }
 0x2ce   :  { %3227 = vmatprep.subr.mxu1 %v1410_v41  ;;  %3159 = vmatpush2.msra.mxu0 %v1277_v31  ;;  %v1374_v41 = vld [vmem:[%s8441_s1 + $0x2a18] sm:$0xff]  ;;  %v3371_v13 = vld [vmem:[%s8443_s3 + $0x150] sm:$0xff] }
 0x2cf   :  { %3228 = vmatpush2.msra.mxu1 %v1409_v44  ;;  %3160 = vmatprep.subr.mxu0 %v1274_v18  ;;  %v2116_v31 = vadd.f32 %v2115_v15, %v2045_v39  ;;  %v1373_v44 = vld [vmem:[%s8441_s1 + $0x2a10] sm:$0xff]  ;;  %v2186_v18 = vpop.f32.mrf.mxu1  ;;  %v3372_v15 = vld [vmem:[%s8443_s3 + $0x158] sm:$0xff] }
 0x2d0   :  { %3229 = vmatprep.subr.mxu1 %v1406_v51  ;;  %3161 = vmatpush2.msra.mxu0 %v1273_v52  ;;  %v1465_v51 = vld [vmem:[%s8441_s1 + $0x2cf0] sm:$0xff]  ;;  %v1462_v52 = vld [vmem:[%s8441_s1 + $0x2cd8] sm:$0xff] }
 0x2d1   :  { %3230 = vmatpush2.msra.mxu1 %v1405_v54  ;;  %3162 = vmatprep.subr.mxu0 %v1270_v55  ;;  %v8145_v54 = vpop.f32.mrf.mxu1  ;;  %v2187_v55 = vadd.f32 %v2186_v18, %v2116_v31  ;;  %v3366_v18 = vld [vmem:[%s8443_s3 + $0x128] sm:$0xff] }
 0x2d2   :  { %3231 = vmatprep.subr.mxu1 %v1402_v57  ;;  %3163 = vmatpush2.msra.mxu0 %v1269_v60  ;;  %v1471_v57 = vsub.s32 0, %v3981_v38  ;;  %v2399_v60 = vpop.f32.mrf.mxu0 }
 0x2d3   :  { %3232 = vmatpush2.msra.mxu1 %v1401_v62  ;;  %3164 = vmatprep.subr.mxu0 %v1266_v30  ;;  %v2258_v62 = vadd.f32 %v2257_v40, %v2187_v55  ;;  %v3376_v30 = vld [vmem:[%s8443_s3 + $0x178] sm:$0xff]  ;;  %v2328_v4 = vpop.f32.mrf.mxu1  ;;  %v3365_v55 = vld [vmem:[%s8443_s3 + $0x120] sm:$0xff] }
 0x2d4   :  { %3233 = vmatprep.subr.mxu1 %v1398_v63  ;;  %3165 = vmatpush2.msra.mxu0 %v1265_v36  ;;  %v8166_v63 = vpop.f32.mrf.mxu0  ;;  %v3375_v36 = vld [vmem:[%s8443_s3 + $0x170] sm:$0xff]  ;;  %v3368_v40 = vld [vmem:[%s8443_s3 + $0x138] sm:$0xff] }
 0x2d5   :  { %3234 = vmatpush2.msra.mxu1 %v1397_v0  ;;  %3166 = vmatprep.subr.mxu0 %v1262_v12  ;;  %v1472_v0 = vrot.slane %v7966_v48, %v1471_v57  ;;  %v1449_v12 = vld [vmem:[%s8441_s1 + $0x2c70] sm:$0xff] }
 0x2d6   :  { %3235 = vmatprep.subr.mxu1 %v1394_v19  ;;  %3167 = vmatpush2.msra.mxu0 %v1261_v8  ;;  %v2329_v19 = vadd.f32 %v2328_v4, %v2258_v62  ;;  %v1446_v8 = vld [vmem:[%s8441_s1 + $0x2c58] sm:$0xff]  ;;  %v3363_v62 = vld [vmem:[%s8443_s3 + $0x110] sm:$0xff] }
 0x2d7   :  { %3236 = vmatpush2.msra.mxu1 %v1393_v42  ;;  %3168 = vmatprep.subr.mxu0 %v1258_v1  ;;  %v2470_v42 = vpop.f32.mrf.mxu0  ;;  %v1445_v1 = vld [vmem:[%s8441_s1 + $0x2c50] sm:$0xff] }
 0x2d8   :  { %3237 = vmatprep.subr.mxu1 %v1390_v2  ;;  %3169 = vmatpush2.msra.mxu0 %v1257_v3  ;;  %v3373_v2 = vld [vmem:[%s8443_s3 + $0x160] sm:$0xff]  ;;  %v2400_v3 = vadd.f32 %v2399_v60, %v2329_v19  ;;  %v3364_v60 = vld [vmem:[%s8443_s3 + $0x118] sm:$0xff]  ;;  %v3335_v4 = vld [vmem:[%s8443_s3 + $0x30] sm:$0xff] }
 0x2d9   :  { %3238 = vmatpush2.msra.mxu1 %v1389_v6  ;;  %3170 = vmatprep.subr.mxu0 %v1254_v9  ;;  %v1688_v6 = vadd.f32 %v7936_v22, %v1472_v0  ;;  %v1441_v9 = vld [vmem:[%s8441_s1 + $0x2c30] sm:$0xff]  ;;  %v3361_v0 = vld [vmem:[%s8443_s3 + $0x100] sm:$0xff]  ;;  %v3348_v19 = vld [vmem:[%s8443_s3 + $0x98] sm:$0xff] }
 0x2da   :  { %3239 = vmatprep.subr.mxu1 %v1386_v10  ;;  %3171 = vmatpush2.msra.mxu0 %v1253_v11  ;;  %v2471_v10 = vadd.f32 %v2470_v42, %v2400_v3  ;;  %v1438_v11 = vld [vmem:[%s8441_s1 + $0x2c18] sm:$0xff]  ;;  %v1437_v22 = vld [vmem:[%s8441_s1 + $0x2c10] sm:$0xff] }
 0x2db   :  { %3240 = vmatpush2.msra.mxu1 %v1385_v14  ;;  %3172 = vmatprep.subr.mxu0 %v1250_v16  ;;  %v3360_v14 = vld [vmem:[%s8443_s3 + $0xf8] sm:$0xff]  ;;  %v1759_v16 = vadd.f32 %v7995_v35, %v1688_v6  ;;  %v3343_v35 = vld [vmem:[%s8443_s3 + $0x70] sm:$0xff]  ;;  %v3346_v6 = vld [vmem:[%s8443_s3 + $0x88] sm:$0xff] }
 0x2dc   :  { %3241 = vmatprep.subr.mxu1 %v1382_v24  ;;  %3173 = vmatpush2.msra.mxu0 %v1249_v26  ;;  %v3326_v24 = vmax.f32 %v2471_v10, 0.0  ;;  %v3359_v26 = vld [vmem:[%s8443_s3 + $0xf0] sm:$0xff]  ;;  %v3332_v42 = vld [vmem:[%s8443_s3 + $0x18] sm:$0xff]  ;;  %v3329_v10 = vld [vmem:[%s8443_s3] sm:$0xff] }
 0x2dd   :  { %3242 = vmatpush2.msra.mxu1 %v1381_v28  ;;  %3174 = vmatprep.subr.mxu0 %v1246_v32  ;;  %v1830_v28 = vadd.f32 %v7980_v23, %v1759_v16  ;;  %v3370_v32 = vld [vmem:[%s8443_s3 + $0x148] sm:$0xff]  ;;  %v3369_v23 = vld [vmem:[%s8443_s3 + $0x140] sm:$0xff]  ;;  %v3384_v16 = vld [vmem:[%s8443_s3 + $0x1b8] sm:$0xff] }
 0x2de   :  { %3243 = vmatprep.subr.mxu1 %v1378_v59  ;;  %3175 = vmatpush2.msra.mxu0 %v1245_v37  ;;  %v3358_v59 = vld [vmem:[%s8443_s3 + $0xe8] sm:$0xff]  ;;  %v3357_v37 = vld [vmem:[%s8443_s3 + $0xe0] sm:$0xff] }
 0x2df   :  { %3176 = vmatprep.mubr.f32.mxu0 %v5711_v29  ;;  %3244 = vmatpush2.msra.mxu1 %v1377_v50  ;;  %v1461_v29 = vld [vmem:[%s8441_s1 + $0x2cd0] sm:$0xff]  ;;  %v1901_v39 = vadd.f32 %v8035_v56, %v1830_v28  ;;  %v3341_v50 = vld [vmem:[%s8443_s3 + $0x60] sm:$0xff]  ;;  %v3340_v56 = vld [vmem:[%s8443_s3 + $0x58] sm:$0xff] }
 0x2e0   :  { %3177 = vmatmul.mubr.f32.vlgmr.msra.gmra.mxu0 %v5685_v17  ;;  %3245 = vmatprep.subr.mxu1 %v1374_v41  ;;  %v1458_v17 = vld [vmem:[%s8441_s1 + $0x2cb8] sm:$0xff] }
 0x2e1   :  { %3270 = vmatprep.subr.mxu0 %v1466_v43  ;;  %3246 = vmatpush2.msra.mxu1 %v1373_v44  ;;  %v3356_v41 = vld [vmem:[%s8443_s3 + $0xd8] sm:$0xff]  ;;  %v1972_v31 = vadd.f32 %v8021_v49, %v1901_v39  ;;  %v3367_v43 = vld [vmem:[%s8443_s3 + $0x130] sm:$0xff] }
 0x2e2   :  { %3247 = vmatprep.mubr.f32.mxu1 %v6004_v45  ;;  %3271 = vmatpush1.msra.mxu0 %v1465_v51  ;;  %v1454_v45 = vld [vmem:[%s8441_s1 + $0x2c98] sm:$0xff]  ;;  %v3355_v44 = vld [vmem:[%s8443_s3 + $0xd0] sm:$0xff]  ;;  %v3354_v51 = vld [vmem:[%s8443_s3 + $0xc8] sm:$0xff] }
 0x2e3   :  { %3248 = vmatmul.mubr.f32.vlgmr.msra.gmra.mxu1 %v5976_v33  ;;  %3272 = vmatprep.subr.mxu0 %v1462_v52  ;;  %v1453_v33 = vld [vmem:[%s8441_s1 + $0x2c90] sm:$0xff]  ;;  %v2043_v52 = vadd.f32 %v8075_v58, %v1972_v31  ;;  %v3337_v58 = vld [vmem:[%s8443_s3 + $0x40] sm:$0xff]  ;;  %v3380_v28 = vld [vmem:[%s8443_s3 + $0x198] sm:$0xff] }
 0x2e4   :  { %3273 = vmatpush1.msra.mxu0 %v1461_v29  ;;  %3318 = vmatprep.mubr.f32.mxu0 %v3652_v47  ;;  %v3339_v49 = vld [vmem:[%s8443_s3 + $0x50] sm:$0xff]  ;;  %v3338_v29 = vld [vmem:[%s8443_s3 + $0x48] sm:$0xff] }
 0x2e5   :  { %3274 = vmatprep.subr.mxu0 %v1458_v17  ;;  %3477 = vmatprep.subr.mxu1 %v3652_v47  ;;  %v3353_v17 = vld [vmem:[%s8443_s3 + $0xc0] sm:$0xff]  ;;  %v2114_v57 = vadd.f32 %v8061_v53, %v2043_v52  ;;  %v3336_v53 = vld [vmem:[%s8443_s3 + $0x38] sm:$0xff] }
 0x2e6   :  { %3275 = vmatpush1.msra.mxu0 %v1457_v61  ;;  %3478 = vmatpush1.msra.mxu1 %v3376_v30  ;;  %v3352_v61 = vld [vmem:[%s8443_s3 + $0xb8] sm:$0xff] }
 0x2e7   :  { %3276 = vmatprep.subr.mxu0 %v1454_v45  ;;  %3479 = vmatprep.subr.mxu1 %v3652_v47  ;;  %v3351_v45 = vld [vmem:[%s8443_s3 + $0xb0] sm:$0xff]  ;;  %v2185_v30 = vadd.f32 %v8115_v34, %v2114_v57  ;;  %v3334_v34 = vld [vmem:[%s8443_s3 + $0x28] sm:$0xff] }
 0x2e8   :  { %3277 = vmatpush1.msra.mxu0 %v1453_v33  ;;  %3480 = vmatpush1.msra.mxu1 %v3375_v36  ;;  %v3362_v33 = vld [vmem:[%s8443_s3 + $0x108] sm:$0xff] }
 0x2e9   :  { %3278 = vmatprep.subr.mxu0 %v1450_v27  ;;  %3481 = vmatprep.subr.mxu1 %v3652_v47  ;;  %v3350_v36 = vld [vmem:[%s8443_s3 + $0xa8] sm:$0xff]  ;;  %v2256_v27 = vadd.f32 %v8101_v5, %v2185_v30  ;;  %v3333_v5 = vld [vmem:[%s8443_s3 + $0x20] sm:$0xff] }
 0x2ea   :  { %3279 = vmatpush1.msra.mxu0 %v1449_v12  ;;  %3482 = vmatpush1.msra.mxu1 %v3374_v21  ;;  %v3349_v12 = vld [vmem:[%s8443_s3 + $0xa0] sm:$0xff]  ;;  %v3391_v21 = vld [vmem:[%s8443_s3 + $0x1f0] sm:$0xf] }
 0x2eb   :  { %3280 = vmatprep.subr.mxu0 %v1446_v8  ;;  %3483 = vmatprep.subr.mxu1 %v3652_v47  ;;  %v2327_v8 = vadd.f32 %v8145_v54, %v2256_v27  ;;  %v3331_v54 = vld [vmem:[%s8443_s3 + $0x10] sm:$0xff] }
 0x2ec   :  { %3281 = vmatpush1.msra.mxu0 %v1445_v1  ;;  %3484 = vmatpush1.msra.mxu1 %v3373_v2  ;;  %v3390_v1 = vld [vmem:[%s8443_s3 + $0x1e8] sm:$0xff]  ;;  %v3347_v2 = vld [vmem:[%s8443_s3 + $0x90] sm:$0xff] }
 0x2ed   :  { %3282 = vmatprep.subr.mxu0 %v1442_v25  ;;  %3485 = vmatprep.subr.mxu1 %v3652_v47  ;;  %v2398_v3 = vadd.f32 %v8135_v46, %v2327_v8  ;;  %v3389_v25 = vld [vmem:[%s8443_s3 + $0x1e0] sm:$0xff]  ;;  %v3330_v46 = vld [vmem:[%s8443_s3 + $0x8] sm:$0xff] }
 0x2ee   :  { %3283 = vmatpush1.msra.mxu0 %v1441_v9  ;;  %3486 = vmatpush1.msra.mxu1 %v3372_v15  ;;  %v3345_v15 = vld [vmem:[%s8443_s3 + $0x80] sm:$0xff] }
 0x2ef   :  { %3284 = vmatprep.subr.mxu0 %v1438_v11  ;;  %3487 = vmatprep.subr.mxu1 %v3652_v47  ;;  %v2469_v9 = vadd.f32 %v8166_v63, %v2398_v3  ;;  %v3388_v11 = vld [vmem:[%s8443_s3 + $0x1d8] sm:$0xff] }
 0x2f0   :  { %3285 = vmatpush1.msra.mxu0 %v1437_v22  ;;  %3488 = vmatpush1.msra.mxu1 %v3371_v13  ;;  %v3387_v22 = vld [vmem:[%s8443_s3 + $0x1d0] sm:$0xff]  ;;  %v3386_v13 = vld [vmem:[%s8443_s3 + $0x1c8] sm:$0xff] }
 0x2f1   :  { %3577 = vmatmul.mubr.msk.f32.vlgmr.msra.gmra.mxu0 %vm1618_vm0, %v6188_v7  ;;  %3581 = vmatprep.subr.mxu0 %v3360_v14  ;;  %v3342_v7 = vld [vmem:[%s8443_s3 + $0x68] sm:$0xff]  ;;  %v3325_v63 = vmax.f32 %v2469_v9, 0.0  ;;  %v3385_v14 = vld [vmem:[%s8443_s3 + $0x1c0] sm:$0xff] }
 0x2f2   :  { %3582 = vmatpush3.msra.mxu0 %v3344_v20  ;;  %3471 = vmatprep.mubr.f32.mxu0 %v3326_v24  ;;  %v3383_v20 = vld [vmem:[%s8443_s3 + $0x1b0] sm:$0xff]  ;;  %v3382_v24 = vld [vmem:[%s8443_s3 + $0x1a8] sm:$0xff] }
 0x2f3   :  { %3583 = vmatprep.subr.mxu0 %v3359_v26  ;;  %3489 = vmatprep.subr.mxu1 %v3652_v47  ;;  %v3381_v26 = vld [vmem:[%s8443_s3 + $0x1a0] sm:$0xff] }
 0x2f4   :  { %3584 = vmatpush3.msra.mxu0 %v3343_v35  ;;  %3490 = vmatpush1.msra.mxu1 %v3370_v32  ;;  %v3379_v35 = vld [vmem:[%s8443_s3 + $0x190] sm:$0xff]  ;;  %v3378_v32 = vld [vmem:[%s8443_s3 + $0x188] sm:$0xff] }
 0x2f5   :  { %3585 = vmatprep.subr.mxu0 %v3358_v59  ;;  %3491 = vmatprep.subr.mxu1 %v3652_v47  ;;  %v3377_v59 = vld [vmem:[%s8443_s3 + $0x180] sm:$0xff] }
 0x2f6   :  { %3586 = vmatpush3.msra.mxu0 %v3342_v7  ;;  %3492 = vmatpush1.msra.mxu1 %v3369_v23  ;;  %v1479_v7 = vsub.s32 2, %v3981_v38  ;;  %v1483_v23 = vsub.s32 3, %v3981_v38 }
 0x2f7   :  { %3587 = vmatprep.subr.mxu0 %v3357_v37  ;;  %3493 = vmatprep.subr.mxu1 %v3652_v47  ;;  %v2539_v37 = vpop.f32.mrf.mxu1 }
 0x2f8   :  { %3588 = vmatpush3.msra.mxu0 %v3341_v50  ;;  %3494 = vmatpush1.msra.mxu1 %v3368_v40  ;;  %v1480_v39 = vrot.slane %v7966_v48, %v1479_v7  ;;  %v2610_v50 = vpop.f32.mrf.mxu0  ;;  %v1484_v40 = vrot.slane %v7966_v48, %v1483_v23 }
 0x2f9   :  { %3589 = vmatprep.subr.mxu0 %v3356_v41  ;;  %3495 = vmatprep.subr.mxu1 %v3652_v47  ;;  %v2541_v41 = vpop.f32.mrf.mxu1 }
 0x2fa   :  { %3590 = vmatpush3.msra.mxu0 %v3340_v56  ;;  %3496 = vmatpush1.msra.mxu1 %v3367_v43  ;;  %v2540_v31 = vadd.f32 %v2539_v37, %v1480_v39  ;;  %v2612_v56 = vpop.f32.mrf.mxu0 }
 0x2fb   :  { %3591 = vmatprep.subr.mxu0 %v3355_v44  ;;  %3497 = vmatprep.subr.mxu1 %v3652_v47  ;;  %v2681_v43 = vpop.f32.mrf.mxu1  ;;  %v2542_v44 = vadd.f32 %v2541_v41, %v1484_v40 }
 0x2fc   :  { %3592 = vmatpush3.msra.mxu0 %v3339_v49  ;;  %3498 = vmatpush1.msra.mxu1 %v3366_v18  ;;  %v2611_v49 = vadd.f32 %v2610_v50, %v2540_v31  ;;  %v2752_v18 = vpop.f32.mrf.mxu0 }
 0x2fd   :  { %3593 = vmatprep.subr.mxu0 %v3354_v51  ;;  %3499 = vmatprep.subr.mxu1 %v3652_v47  ;;  %v2613_v51 = vadd.f32 %v2612_v56, %v2542_v44 }
 0x2fe   :  { %3594 = vmatpush3.msra.mxu0 %v3338_v29  ;;  %3500 = vmatpush1.msra.mxu1 %v3365_v55  ;;  %v2682_v52 = vadd.f32 %v2681_v43, %v2611_v49  ;;  %v2754_v29 = vpop.f32.mrf.mxu0 }
 0x2ff   :  { %3595 = vmatprep.subr.mxu0 %v3353_v17  ;;  %3501 = vmatprep.subr.mxu1 %v3652_v47 }
 0x300   :  { %3596 = vmatpush3.msra.mxu0 %v3337_v58  ;;  %3502 = vmatpush1.msra.mxu1 %v3364_v60  ;;  %v2753_v38 = vadd.f32 %v2752_v18, %v2682_v52 }
 0x301   :  { %3597 = vmatprep.subr.mxu0 %v3352_v61  ;;  %3503 = vmatprep.subr.mxu1 %v3652_v47 }
 0x302   :  { %3598 = vmatpush3.msra.mxu0 %v3336_v53  ;;  %3504 = vmatpush1.msra.mxu1 %v3363_v62 }
 0x303   :  { %3599 = vmatprep.subr.mxu0 %v3351_v45  ;;  %3505 = vmatprep.subr.mxu1 %v3652_v47 }
 0x304   :  { %3600 = vmatpush3.msra.mxu0 %v3335_v4  ;;  %3506 = vmatpush1.msra.mxu1 %v3362_v33 }
 0x305   :  { %3601 = vmatprep.subr.mxu0 %v3350_v36  ;;  %3507 = vmatprep.subr.mxu1 %v3652_v47 }
 0x306   :  { %3602 = vmatpush3.msra.mxu0 %v3334_v34  ;;  %3508 = vmatpush1.msra.mxu1 %v3361_v0 }
 0x307   :  { %3603 = vmatprep.subr.mxu0 %v3349_v12  ;;  %3511 = vmatprep.subr.mxu1 %v3652_v47 }
 0x308   :  { %3604 = vmatpush3.msra.mxu0 %v3333_v5  ;;  %3579 = vmatpush2.msk.msra.mxu1 %vm3403_vm1, %v3391_v21 }
 0x309   :  { %3605 = vmatprep.subr.mxu0 %v3348_v19  ;;  %3513 = vmatprep.subr.mxu1 %v3652_v47 }
 0x30a   :  { %3606 = vmatpush3.msra.mxu0 %v3332_v42  ;;  %3514 = vmatpush2.msra.mxu1 %v3390_v1 }
 0x30b   :  { %3607 = vmatprep.subr.mxu0 %v3347_v2  ;;  %3515 = vmatprep.subr.mxu1 %v3652_v47 }
 0x30c   :  { %3608 = vmatpush3.msra.mxu0 %v3331_v54  ;;  %3516 = vmatpush2.msra.mxu1 %v3389_v25 }
 0x30d   :  { %3609 = vmatprep.subr.mxu0 %v3346_v6  ;;  %3517 = vmatprep.subr.mxu1 %v3652_v47 }
 0x30e   :  { %3610 = vmatpush3.msra.mxu0 %v3330_v46  ;;  %3518 = vmatpush2.msra.mxu1 %v3388_v11 }
 0x30f   :  { %3611 = vmatprep.subr.mxu0 %v3345_v15  ;;  %3519 = vmatprep.subr.mxu1 %v3652_v47 }
 0x310   :  { %3612 = vmatpush3.msra.mxu0 %v3329_v10  ;;  %3520 = vmatpush2.msra.mxu1 %v3387_v22 }
 0x311   :  { %3472 = vmatmul.mubr.f32.vlgmr.msra.gmra.mxu0 %v3325_v63  ;;  %3521 = vmatprep.subr.mxu1 %v3652_v47 }
 0x312   :  { %3522 = vmatpush2.msra.mxu1 %v3386_v13 }
 0x313   :  { %3523 = vmatprep.subr.mxu1 %v3652_v47 }
 0x314   :  { %3524 = vmatpush2.msra.mxu1 %v3385_v14 }
 0x315   :  { %3525 = vmatprep.subr.mxu1 %v3652_v47 }
 0x316   :  { %3526 = vmatpush2.msra.mxu1 %v3384_v16 }
 0x317   :  { %3527 = vmatprep.subr.mxu1 %v3652_v47 }
 0x318   :  { %3528 = vmatpush2.msra.mxu1 %v3383_v20  ;;  %v3578_v20 = vld [vmem:[%s8444_s4] ss:$0 sm:$0xff]  ;;  %s3653_s4 = smov [#allocation2]  }
 0x319   :  { %3529 = vmatprep.subr.mxu1 %v3652_v47  ;;  %s3568_s15 = sshll.u32 %s3653_s4, 4  ;;  %s3569_s15 = int_to_ptr.vmem [resolvable:$true] %s3568_s15 }
 0x31a   :  { %3530 = vmatpush2.msra.mxu1 %v3382_v24  ;;  %s3629_s1 = scalar_lea.vmem %s3569_s15, 32  ;;  %p3634_p1 = scmp.lt.s32.totalorder %s3569_s15, %s3569_s15 }
 0x31b   :  { %3531 = vmatprep.subr.mxu1 %v3652_v47  ;;  %p3630_p0 = scmp.ne.s32.totalorder %s3569_s15, %s3629_s1  ;;  %p3635_p2 = scmp.lt.s32.totalorder %s3629_s1, %s3629_s1 }
 0x31c   :  { %3532 = vmatpush2.msra.mxu1 %v3381_v26  ;;  %v2894_v57 = vpop.f32.mrf.mxu0 }
 0x31d   :  { %3533 = vmatprep.subr.mxu1 %v3652_v47  ;;  %p3636_p3 = por %p3635_p2, %p3634_p1 }
 0x31e   :  { %3534 = vmatpush2.msra.mxu1 %v3380_v28  ;;  %v2896_v53 = vpop.f32.mrf.mxu0 }
 0x31f   :  { %3535 = vmatprep.subr.mxu1 %v3652_v47  ;;  %p3637_p4 = pnand %p3636_p3, %p3630_p0 }
 0x320   :  { %3536 = vmatpush2.msra.mxu1 %v3379_v35 }
 0x321   :  { %3537 = vmatprep.subr.mxu1 %v3652_v47 }
 0x322   :  { %3538 = vmatpush2.msra.mxu1 %v3378_v32 }
 0x323   :  { %3539 = vmatprep.subr.mxu1 %v3652_v47  ;;  %v2683_v47 = vpop.f32.mrf.mxu1 }
 0x324   :  { %3540 = vmatpush2.msra.mxu1 %v3377_v59  ;;  %v2684_v17 = vadd.f32 %v2683_v47, %v2613_v51 }
 0x325   :  { %v2823_v55 = vpop.f32.mrf.mxu1 }
 0x326   :  { %v2755_v58 = vadd.f32 %v2754_v29, %v2684_v17  ;;  %v2824_v61 = vadd.f32 %v2823_v55, %v2753_v38 }
 0x327   :  { %v2825_v60 = vpop.f32.mrf.mxu1 }
 0x328   :  { %v2826_v62 = vadd.f32 %v2825_v60, %v2755_v58  ;;  %v2895_v45 = vadd.f32 %v2894_v57, %v2824_v61 }
 0x329   :  { %v2965_v48 = vpop.f32.mrf.mxu1 }
 0x32a   :  { %v2897_v4 = vadd.f32 %v2896_v53, %v2826_v62  ;;  %v2966_v36 = vadd.f32 %v2965_v48, %v2895_v45 }
 0x32b   :  { %v2967_v33 = vpop.f32.mrf.mxu1 }
 0x32c   :  { %v2968_v0 = vadd.f32 %v2967_v33, %v2897_v4 }
 0x35e   :  { %v3036_v30 = vpop.f32.mrf.mxu0 }
 0x35f   :  { %v3037_v12 = vadd.f32 %v3036_v30, %v2966_v36 }
 0x360   :  { %v3038_v27 = vpop.f32.mrf.mxu0 }
 0x361   :  { %v3107_v34 = vpop.f32.mrf.mxu1  ;;  %v3039_v21 = vadd.f32 %v3038_v27, %v2968_v0 }
 0x362   :  { %v3108_v8 = vadd.f32 %v3107_v34, %v3037_v12 }
 0x363   :  { %v3109_v19 = vpop.f32.mrf.mxu1 }
 0x364   :  { %v3110_v2 = vadd.f32 %v3109_v19, %v3039_v21 }
 0x3a0   :  { %v3178_v5 = vpop.f32.mrf.mxu0 }
 0x3a1   :  { %v3179_v3 = vadd.f32 %v3178_v5, %v3108_v8 }
 0x3a2   :  { %v3180_v42 = vpop.f32.mrf.mxu0 }
 0x3a3   :  { %v3249_v1 = vpop.f32.mrf.mxu1  ;;  %v3181_v54 = vadd.f32 %v3180_v42, %v3110_v2 }
 0x3a4   :  { %v3250_v6 = vadd.f32 %v3249_v1, %v3179_v3 }
 0x3a5   :  { %v3251_v25 = vpop.f32.mrf.mxu1 }
 0x3a6   :  { %v3252_v46 = vadd.f32 %v3251_v25, %v3181_v54 }
 0x3b1   :  { %v3320_v9 = vpop.f32.mrf.mxu0 }
 0x3b2   :  { %v3321_v15 = vadd.f32 %v3320_v9, %v3250_v6 }
 0x3b3   :  { %v3322_v10 = vpop.f32.mrf.mxu0 }
 0x3b4   :  { %v3323_v63 = vadd.f32 %v3322_v10, %v3252_v46  ;;  %v3327_v22 = vmax.f32 %v3321_v15, 0.0 }
 0x3b6   :  { %v3328_v11 = vmax.f32 %v3323_v63, 0.0 }
 0x3b8   :  { %3580 = vmatprep.mubr.msk.f32.mxu1 %vm3399_vm2, %v3328_v11 }
 0x3b9   :  { %3542 = vmatmul.mubr.f32.vlgmr.msra.gmra.mxu1 %v3327_v22 }
 0x3d1   :  { %v3613_v13 = vpop.f32.mrf.mxu0 }
 0x3d3   :  { %v3614_v14 = vpop.f32.mrf.mxu0 }
 0x3d4   :  { %v3615_v16 = vadd.f32 %v3614_v14, %v3613_v13 }
 0x3d6   :  { %v3474_v24 = vadd.f32 %v3615_v16, %v3578_v20 }
 0x479   :  { %v3543_v26 = vpop.f32.mrf.mxu1 }
 0x47a   :  { %v3544_v28 = vadd.f32 %v3543_v26, %v3474_v24 }
 0x47b   :  { %v3545_v35 = vpop.f32.mrf.mxu1 }
 0x47c   :  { %v3548_v32 = vsel %vm3547_vm3, %v3544_v28, -inf }
 0x47d   :  { %3549 = vmax.xlane.f32.xlu0 %v3548_v32 }
 0x506   :  { %v3550_v59 = vpop.xlane.xlu0 %3549 }
 0x507   :  { %v3551_v7 = vsub.f32 %v3544_v28, %v3550_v59 }
 0x509   :  { %v3552_v23 = vmul.f32 1.442695, %v3551_v7 }
 0x50b   :  { %3625 = vpow2.f32 %v3552_v23 }
 0x518   :  { %v3626_v37 = vpop.eup %3625 }
 0x519   :  { %v3554_v39 = vsel %vm3547_vm3, %v3626_v37, 0.0 }
 0x51a   :  { %3555 = vadd.xlane.f32.xlu0 %v3554_v39 }
 0x5a3   :  { %v3556_v50 = vpop.xlane.xlu0 %3555 }
 0x5a4   :  { %3627 = vlog2.f32 %v3556_v50 }
 0x5b1   :  { %v3628_v40 = vpop.eup %3627 }
 0x5b2   :  { %v3558_v41 = vmul.f32 0.6931472, %v3628_v40 }
 0x5b4   :  { %v3559_v31 = vadd.f32 %v3558_v41, %v3550_v59 }
 0x5b6   :  { %v3560_v56 = vsub.f32 %v3544_v28, %v3559_v31 }
 0x5b8   :  { %3561 = vst.msk [vmem:[#allocation2] sm:$0x3] %vm3547_vm3, %v3560_v56 }
 0x5b9   :  { %3640 = shalt.err (!%p3637_p4)
}
 0x5ba   :  { %3571 = dma.vmem_to_hbm [thread:$0]  %s3569_s15, 32, %s8445_s5, [#allocation3]  }
 0x5bb   :  { %3649 = dma.done.wait [#allocation3], 32  }
 0x5bc   :  { %3650 = vsyncadd [#allocation3], 4294967264 }
 0x5bd   :  { %3575 = vsyncpa [#allocation3], 1 }

</bundles_post_ra>
